<compile_context>
chip_gen: v7x
topology: tpu7x:2x2x1
jax: 0.10.0
libtpu: 0.0.40
codegen_flags: <defaults>
</compile_context>

<pallas_src>
import functools
import math

import jax
import jax.numpy as jnp
from jax import lax
from jax.experimental import pallas as pl
from jax.experimental.pallas import tpu as pltpu

LN_EPS = 1e-12            # BertLayerNorm eps
MASK_NEG = -10000.0       # HF additive attention-mask value
_SQRT1_2 = 1.0 / math.sqrt(2.0)


# --------------------------------------------------------------------------
# small helpers
# --------------------------------------------------------------------------
def _vmem_limit(block_bytes):
    # derive from actual per-step block bytes (double-buffered) + headroom,
    # clamped so the same config fits v7x (64 MiB/TC) as well as v5e/v6e.
    lim = 2 * int(block_bytes) + (8 << 20)
    return int(min(56 << 20, max(32 << 20, lim)))


def _cparams(semantics, block_bytes):
    return pltpu.CompilerParams(
        dimension_semantics=semantics,
        vmem_limit_bytes=_vmem_limit(block_bytes))


def _token_tile(T):
    # 256-row tiles (full MXU M-dim on v6e/v7x) when possible, else 128.
    for t in (256, 128):
        if T % t == 0:
            return t
    return T  # unreachable once the sequence is padded to a multiple of 128


def _heads_per_block(num_heads, head_dim):
    # pack adjacent heads so each attention block is 128 lanes wide.
    if head_dim >= 128 or 128 % head_dim != 0:
        return 1
    hpb = 128 // head_dim
    while hpb > 1 and num_heads % hpb != 0:
        hpb //= 2
    return max(1, min(hpb, num_heads))


def _gelu(x):
    # exact (erf) GELU, f32 math (no bf16 EUP on v5e)
    return 0.5 * x * (1.0 + lax.erf(x * _SQRT1_2))


# --------------------------------------------------------------------------
# Kernel 1: dense  y = x @ W + b   (QKV projection; emits bf16 activations)
# --------------------------------------------------------------------------
def _dense_kernel(x_ref, w_ref, b_ref, o_ref):
    x = x_ref[...]
    if x.dtype != jnp.bfloat16:
        x = x.astype(jnp.bfloat16)
    y = jnp.dot(x, w_ref[...], preferred_element_type=jnp.float32) + b_ref[...]
    o_ref[...] = y.astype(o_ref.dtype)


def dense(x, w, b, out_dtype=jnp.bfloat16):
    # x: (T, IN)   w: (IN, OUT) bf16   b: (OUT,) f32
    T, IN = x.shape
    OUT = w.shape[1]
    TT = _token_tile(T)
    blk = TT * IN * 4 + IN * OUT * 2 + OUT * 4 + TT * OUT * 4
    # TODO(synk): on v7x, single-buffer the resident weight/bias specs
    # (pipeline_mode=pl.Buffered(1)) to reclaim VMEM for larger token tiles.
    return pl.pallas_call(
        _dense_kernel,
        out_shape=jax.ShapeDtypeStruct((T, OUT), out_dtype),
        grid=(T // TT,),
        in_specs=[
            pl.BlockSpec((TT, IN), lambda i: (i, 0)),
            pl.BlockSpec((IN, OUT), lambda i: (0, 0)),      # weight resident
            pl.BlockSpec((1, OUT), lambda i: (0, 0)),
        ],
        out_specs=pl.BlockSpec((TT, OUT), lambda i: (i, 0)),
        compiler_params=_cparams(("parallel",), blk),
    )(x, w, b.reshape(1, -1))


# --------------------------------------------------------------------------
# Kernel 2: dense + residual-add + LayerNorm fused epilogue (attn out proj)
#   out = LayerNorm((x @ W + b) + residual) * gamma + beta      (f32 stream)
# --------------------------------------------------------------------------
def _dense_add_ln_kernel(x_ref, w_ref, b_ref, r_ref, g_ref, be_ref, o_ref):
    x = x_ref[...]
    if x.dtype != jnp.bfloat16:
        x = x.astype(jnp.bfloat16)
    y = jnp.dot(x, w_ref[...], preferred_element_type=jnp.float32) + b_ref[...]
    h = y + r_ref[...]
    mean = jnp.mean(h, axis=-1, keepdims=True)
    c = h - mean
    var = jnp.mean(c * c, axis=-1, keepdims=True)
    o_ref[...] = c * lax.rsqrt(var + LN_EPS) * g_ref[...] + be_ref[...]


def dense_add_ln(x, w, b, residual, gamma, beta):
    T, IN = x.shape
    OUT = w.shape[1]
    TT = _token_tile(T)
    blk = TT * IN * 2 + IN * OUT * 2 + OUT * 4 * 3 + 2 * TT * OUT * 4
    return pl.pallas_call(
        _dense_add_ln_kernel,
        out_shape=jax.ShapeDtypeStruct((T, OUT), jnp.float32),
        grid=(T // TT,),
        in_specs=[
            pl.BlockSpec((TT, IN), lambda i: (i, 0)),
            pl.BlockSpec((IN, OUT), lambda i: (0, 0)),      # weight resident
            pl.BlockSpec((1, OUT), lambda i: (0, 0)),
            pl.BlockSpec((TT, OUT), lambda i: (i, 0)),      # residual tile
            pl.BlockSpec((1, OUT), lambda i: (0, 0)),
            pl.BlockSpec((1, OUT), lambda i: (0, 0)),
        ],
        out_specs=pl.BlockSpec((TT, OUT), lambda i: (i, 0)),
        compiler_params=_cparams(("parallel",), blk),
    )(x, w, b.reshape(1, -1), residual, gamma.reshape(1, -1),
      beta.reshape(1, -1))


# --------------------------------------------------------------------------
# Kernel 3: fused FFN  out = LN(GELU(x@Wi+bi)@Wo2 + bo2 + x) * g + b
#   grid = (token-tile, intermediate-tile); f32 accumulator in VMEM scratch;
#   the (T, intermediate) activation never touches HBM.
# --------------------------------------------------------------------------
def _ffn_kernel(x_ref, wi_ref, bi_ref, wo2_ref, bo2_ref, g_ref, be_ref,
                o_ref, acc_ref):
    k = pl.program_id(1)

    @pl.when(k == 0)
    def _():
        acc_ref[...] = jnp.zeros_like(acc_ref)

    x = x_ref[...]                                           # f32 residual
    h = jnp.dot(x.astype(jnp.bfloat16), wi_ref[...],
                preferred_element_type=jnp.float32) + bi_ref[...]
    h = _gelu(h)
    acc_ref[...] += jnp.dot(h.astype(jnp.bfloat16), wo2_ref[...],
                            preferred_element_type=jnp.float32)

    @pl.when(k == pl.num_programs(1) - 1)
    def _():
        y = acc_ref[...] + bo2_ref[...] + x_ref[...]
        mean = jnp.mean(y, axis=-1, keepdims=True)
        c = y - mean
        var = jnp.mean(c * c, axis=-1, keepdims=True)
        o_ref[...] = c * lax.rsqrt(var + LN_EPS) * g_ref[...] + be_ref[...]


def ffn_fused(x, wi, bi, wo2, bo2, gamma, beta):
    T, H = x.shape
    I = wi.shape[1]
    TT = _token_tile(T)
    TKI = next((t for t in (2048, 1024, 512, 256, 128) if I % t == 0), I)
    blk = (TT * H * 4 + H * TKI * 2 + TKI * 4 + TKI * H * 2
           + 3 * H * 4 + 2 * TT * H * 4)
    return pl.pallas_call(
        _ffn_kernel,
        out_shape=jax.ShapeDtypeStruct((T, H), jnp.float32),
        grid=(T // TT, I // TKI),
        in_specs=[
            pl.BlockSpec((TT, H), lambda i, k: (i, 0)),      # x / residual
            pl.BlockSpec((H, TKI), lambda i, k: (0, k)),     # Wi tile
            pl.BlockSpec((1, TKI), lambda i, k: (0, k)),
            pl.BlockSpec((TKI, H), lambda i, k: (k, 0)),     # Wo2 tile
            pl.BlockSpec((1, H), lambda i, k: (0, 0)),
            pl.BlockSpec((1, H), lambda i, k: (0, 0)),
            pl.BlockSpec((1, H), lambda i, k: (0, 0)),
        ],
        out_specs=pl.BlockSpec((TT, H), lambda i, k: (i, 0)),
        scratch_shapes=[pltpu.VMEM((TT, H), jnp.float32)],
        compiler_params=_cparams(("parallel", "arbitrary"), blk),
    )(x, wi, bi.reshape(1, -1), wo2, bo2.reshape(1, -1),
      gamma.reshape(1, -1), beta.reshape(1, -1))


# --------------------------------------------------------------------------
# Kernel 4: plain LayerNorm (embeddings)
# --------------------------------------------------------------------------
def _ln_kernel(x_ref, g_ref, b_ref, o_ref):
    h = x_ref[...]
    mean = jnp.mean(h, axis=-1, keepdims=True)
    c = h - mean
    var = jnp.mean(c * c, axis=-1, keepdims=True)
    o_ref[...] = c * lax.rsqrt(var + LN_EPS) * g_ref[...] + b_ref[...]


def layernorm(x, gamma, beta):
    T, H = x.shape
    TT = _token_tile(T)
    blk = 2 * TT * H * 4 + 2 * H * 4
    return pl.pallas_call(
        _ln_kernel,
        out_shape=jax.ShapeDtypeStruct((T, H), jnp.float32),
        grid=(T // TT,),
        in_specs=[
            pl.BlockSpec((TT, H), lambda i: (i, 0)),
            pl.BlockSpec((1, H), lambda i: (0, 0)),
            pl.BlockSpec((1, H), lambda i: (0, 0)),
        ],
        out_specs=pl.BlockSpec((TT, H), lambda i: (i, 0)),
        compiler_params=_cparams(("parallel",), blk),
    )(x, gamma.reshape(1, -1), beta.reshape(1, -1))


# --------------------------------------------------------------------------
# Kernel 5: flash-style multi-head attention with additive mask.
#   grid = (batch, head-block, q-tile, kv-tile); online softmax with per-head
#   VMEM accumulators; adjacent heads packed so every block is 128 lanes wide;
#   reads q/k/v straight out of the fused bf16 (B, S, 3H) tensor; writes a
#   lane-dense bf16 context block in (B, S, H) layout.
# --------------------------------------------------------------------------
def _attn_kernel(q_ref, k_ref, v_ref, bias_ref, o_ref, m_sc, l_sc, acc_sc,
                 *, scale, hpb, head_dim):
    kv = pl.program_id(3)

    @pl.when(kv == 0)
    def _():
        m_sc[...] = jnp.full_like(m_sc, -jnp.inf)
        l_sc[...] = jnp.zeros_like(l_sc)
        acc_sc[...] = jnp.zeros_like(acc_sc)

    q_all = q_ref[0]            # (TQ, hpb*D) bf16
    k_all = k_ref[0]            # (TK, hpb*D) bf16
    v_all = v_ref[0]            # (TK, hpb*D) bf16
    bias = bias_ref[0]          # (1, TK) f32 additive mask

    for h in range(hpb):        # static unroll over packed heads
        lo, hi = h * head_dim, (h + 1) * head_dim
        q = q_all[:, lo:hi]
        k = k_all[:, lo:hi]
        v = v_all[:, lo:hi]
        # contract last dims directly (no explicit .T / XLU transpose)
        s = lax.dot_general(q, k, (((1,), (1,)), ((), ())),
                            preferred_element_type=jnp.float32)
        s = s * scale + bias
        m_prev = m_sc[h]
        m_new = jnp.maximum(m_prev, jnp.max(s, axis=-1, keepdims=True))
        alpha = jnp.exp(m_prev - m_new)
        p = jnp.exp(s - m_new)                       # f32 softmax math
        l_sc[h] = alpha * l_sc[h] + jnp.sum(p, axis=-1, keepdims=True)
        acc_sc[h] = alpha * acc_sc[h] + lax.dot_general(
            p.astype(jnp.bfloat16), v, (((1,), (0,)), ((), ())),
            preferred_element_type=jnp.float32)
        m_sc[h] = m_new

    @pl.when(kv == pl.num_programs(3) - 1)
    def _():
        outs = [acc_sc[h] * pl.reciprocal(l_sc[h], approx=True)
                for h in range(hpb)]
        o_ref[0] = jnp.concatenate(outs, axis=-1).astype(o_ref.dtype)


def attention(qkv, mask_bias, *, num_heads, head_dim):
    # qkv: (B, S, 3*hidden) bf16 (q|k|v concatenated); mask_bias: (B, 1, S) f32
    B, S, _ = qkv.shape
    hidden = num_heads * head_dim
    hpb = _heads_per_block(num_heads, head_dim)
    n_hblk = num_heads // hpb
    W = hpb * head_dim
    TQ = 128 if S % 128 == 0 else S
    TK = 128 if S % 128 == 0 else S
    blk = (TQ * W * 2 + 2 * TK * W * 2 + TK * 4 + TQ * W * 2
           + hpb * TQ * (head_dim + 2) * 4)
    return pl.pallas_call(
        functools.partial(_attn_kernel, scale=1.0 / math.sqrt(head_dim),
                          hpb=hpb, head_dim=head_dim),
        out_shape=jax.ShapeDtypeStruct((B, S, hidden), jnp.bfloat16),
        grid=(B, n_hblk, S // TQ, S // TK),
        in_specs=[
            pl.BlockSpec((1, TQ, W), lambda b, hb, qi, kv: (b, qi, hb)),
            pl.BlockSpec((1, TK, W), lambda b, hb, qi, kv: (b, kv, n_hblk + hb)),
            pl.BlockSpec((1, TK, W),
                         lambda b, hb, qi, kv: (b, kv, 2 * n_hblk + hb)),
            pl.BlockSpec((1, 1, TK), lambda b, hb, qi, kv: (b, 0, kv)),
        ],
        out_specs=pl.BlockSpec((1, TQ, W), lambda b, hb, qi, kv: (b, qi, hb)),
        scratch_shapes=[
            pltpu.VMEM((hpb, TQ, 1), jnp.float32),           # running max
            pltpu.VMEM((hpb, TQ, 1), jnp.float32),           # running denom
            pltpu.VMEM((hpb, TQ, head_dim), jnp.float32),    # context acc
        ],
        compiler_params=_cparams(
            ("parallel", "parallel", "arbitrary", "arbitrary"), blk),
    )(qkv, qkv, qkv, mask_bias)


# --------------------------------------------------------------------------
# Parameter init (deterministic, synthetic — stands in for BertModel weights)
# Matmul weights stored in bf16; LN params / biases / embeddings in f32.
# --------------------------------------------------------------------------
def init_bert_params(key, *, vocab, max_pos, hidden, num_layers, intermediate):
    std = 0.02
    keys = iter(jax.random.split(key, 4 + num_layers * 4))

    def w(shape, dtype=jnp.bfloat16):
        return (jax.random.normal(next(keys), shape, jnp.float32) * std
                ).astype(dtype)

    params = {
        "word_emb": w((vocab, hidden), jnp.float32),
        "pos_emb": w((max_pos, hidden), jnp.float32),
        "type_emb": w((2, hidden), jnp.float32),
        "emb_ln_g": jnp.ones((hidden,), jnp.float32),
        "emb_ln_b": jnp.zeros((hidden,), jnp.float32),
        "layers": [],
    }
    for _ in range(num_layers):
        params["layers"].append({
            "wqkv": w((hidden, 3 * hidden)),                 # fused q|k|v
            "bqkv": jnp.zeros((3 * hidden,), jnp.float32),
            "wo": w((hidden, hidden)),
            "bo": jnp.zeros((hidden,), jnp.float32),
            "ln1_g": jnp.ones((hidden,), jnp.float32),
            "ln1_b": jnp.zeros((hidden,), jnp.float32),
            "wi": w((hidden, intermediate)),
            "bi": jnp.zeros((intermediate,), jnp.float32),
            "wo2": w((intermediate, hidden)),
            "bo2": jnp.zeros((hidden,), jnp.float32),
            "ln2_g": jnp.ones((hidden,), jnp.float32),
            "ln2_b": jnp.zeros((hidden,), jnp.float32),
        })
    return params


# --------------------------------------------------------------------------
# Full forward (= VerbModelBert.forward): BERT encoder -> CLS hidden state
# --------------------------------------------------------------------------
def verb_model_bert_forward(params, input_ids, attention_mask, *, num_heads):
    B, S_in = input_ids.shape
    hidden = params["word_emb"].shape[1]
    head_dim = hidden // num_heads

    # pad the sequence to a multiple of 128 (keeps every kernel on the tiled
    # path); padded keys are masked out, padded query rows never reach CLS.
    S = ((S_in + 127) // 128) * 128
    if S != S_in:
        input_ids = jnp.pad(input_ids, ((0, 0), (0, S - S_in)))
        attention_mask = jnp.pad(attention_mask, ((0, 0), (0, S - S_in)))
    T = B * S

    # ---- embeddings (gather + adds are glue; LayerNorm runs in Pallas) ----
    emb = jnp.take(params["word_emb"], input_ids, axis=0)          # (B,S,H)
    emb = emb + params["pos_emb"][:S][None, :, :]
    emb = emb + params["type_emb"][0][None, None, :]               # type ids 0
    x = layernorm(emb.reshape(T, hidden),
                  params["emb_ln_g"], params["emb_ln_b"])          # f32 stream

    # additive attention mask, HF-style: (B, 1, S)
    mask_bias = ((1.0 - attention_mask.astype(jnp.float32)) * MASK_NEG
                 ).reshape(B, 1, S)

    # TODO(synk): dropout layers are identity in eval mode, omitted.
    for layer in params["layers"]:
        # ---- self-attention ----
        qkv = dense(x, layer["wqkv"], layer["bqkv"])               # (T,3H) bf16
        ctx = attention(qkv.reshape(B, S, 3 * hidden), mask_bias,
                        num_heads=num_heads, head_dim=head_dim)    # bf16
        x = dense_add_ln(ctx.reshape(T, hidden), layer["wo"], layer["bo"],
                         x, layer["ln1_g"], layer["ln1_b"])        # f32

        # ---- feed-forward (fully fused: wi + GELU + wo2 + residual + LN) ----
        x = ffn_fused(x, layer["wi"], layer["bi"], layer["wo2"], layer["bo2"],
                      layer["ln2_g"], layer["ln2_b"])              # f32

    last_hidden_state = x.reshape(B, S, hidden)
    cls_hidden_states = last_hidden_state[:, 0, :]                 # (B, H)
    return cls_hidden_states


# --------------------------------------------------------------------------
if __name__ == "__main__":
    # small synthetic BERT config (hidden / head_dim are multiples of 128 so
    # every MXU / vreg tile is fully populated; head packing kicks in
    # automatically for real head_dim=64 configs)
    B, S = 2, 128
    VOCAB, MAX_POS = 64, 128
    HIDDEN, NUM_HEADS, INTERMEDIATE, NUM_LAYERS = 256, 2, 512, 2

    root = jax.random.PRNGKey(0)
    k_params, k_ids = jax.random.split(root)

    params = init_bert_params(
        k_params, vocab=VOCAB, max_pos=MAX_POS, hidden=HIDDEN,
        num_layers=NUM_LAYERS, intermediate=INTERMEDIATE)

    input_ids = jax.random.randint(k_ids, (B, S), 0, VOCAB, dtype=jnp.int32)
    # second example has 16 padded positions
    attention_mask = jnp.concatenate(
        [jnp.ones((1, S), jnp.int32),
         jnp.concatenate([jnp.ones((1, S - 16), jnp.int32),
                          jnp.zeros((1, 16), jnp.int32)], axis=1)],
        axis=0)

    fwd = jax.jit(functools.partial(verb_model_bert_forward,
                                    num_heads=NUM_HEADS))
    cls = jax.block_until_ready(fwd(params, input_ids, attention_mask))
    assert cls.shape == (B, HIDDEN) and cls.dtype == jnp.float32
    assert bool(jnp.all(jnp.isfinite(cls)))
    print("KERNEL_OK")
</pallas_src>

<mosaic_0001>
module attributes {stable_mosaic.version = 11 : i64} {
  func.func @_ln_kernel(%arg0: i32, %arg1: memref<256x256xf32, #tpu.memory_space<vmem>>, %arg2: memref<1x256xf32, #tpu.memory_space<vmem>>, %arg3: memref<1x256xf32, #tpu.memory_space<vmem>>, %arg4: memref<256x256xf32, #tpu.memory_space<vmem>>) attributes {dimension_semantics = [#tpu.dimension_semantics<parallel>], iteration_bounds = array<i64: 1>, scalar_prefetch = 0 : i64, scratch_operands = 0 : i64, tpu.core_type = #tpu.core_type<tc>, window_params = [{transform_indices = @transform_0, window_bounds = array<i64: 256, 256>}, {pipeline_mode = #tpu.pipeline_mode<synchronous>, transform_indices = @transform_1, window_bounds = array<i64: 1, 256>}, {pipeline_mode = #tpu.pipeline_mode<synchronous>, transform_indices = @transform_2, window_bounds = array<i64: 1, 256>}, {transform_indices = @transform_3, window_bounds = array<i64: 256, 256>}]} {
    %c0 = arith.constant 0 : index
    %c0_0 = arith.constant 0 : index
    %0 = vector.load %arg1[%c0, %c0_0] : memref<256x256xf32, #tpu.memory_space<vmem>>, vector<256x256xf32>
    %cst = arith.constant dense<0.000000e+00> : vector<256xf32>
    %1 = vector.multi_reduction <add>, %0, %cst [1] : vector<256x256xf32> to vector<256xf32>
    %2 = vector.shape_cast %1 : vector<256xf32> to vector<256x1xf32>
    %cst_1 = arith.constant 2.560000e+02 : f32
    %3 = vector.broadcast %cst_1 : f32 to vector<256x1xf32>
    %4 = arith.divf %2, %3 : vector<256x1xf32>
    %5 = vector.broadcast %4 : vector<256x1xf32> to vector<256x256xf32>
    %6 = arith.subf %0, %5 : vector<256x256xf32>
    %7 = arith.mulf %6, %6 : vector<256x256xf32>
    %cst_2 = arith.constant dense<0.000000e+00> : vector<256xf32>
    %8 = vector.multi_reduction <add>, %7, %cst_2 [1] : vector<256x256xf32> to vector<256xf32>
    %9 = vector.shape_cast %8 : vector<256xf32> to vector<256x1xf32>
    %cst_3 = arith.constant 2.560000e+02 : f32
    %10 = vector.broadcast %cst_3 : f32 to vector<256x1xf32>
    %11 = arith.divf %9, %10 : vector<256x1xf32>
    %cst_4 = arith.constant 9.99999996E-13 : f32
    %12 = vector.broadcast %cst_4 : f32 to vector<256x1xf32>
    %13 = arith.addf %11, %12 : vector<256x1xf32>
    %14 = math.rsqrt %13 : vector<256x1xf32>
    %15 = vector.broadcast %14 : vector<256x1xf32> to vector<256x256xf32>
    %16 = arith.mulf %6, %15 : vector<256x256xf32>
    %c0_5 = arith.constant 0 : index
    %c0_6 = arith.constant 0 : index
    %17 = vector.load %arg2[%c0_5, %c0_6] : memref<1x256xf32, #tpu.memory_space<vmem>>, vector<1x256xf32>
    %18 = vector.broadcast %17 : vector<1x256xf32> to vector<256x256xf32>
    %19 = arith.mulf %16, %18 : vector<256x256xf32>
    %c0_7 = arith.constant 0 : index
    %c0_8 = arith.constant 0 : index
    %20 = vector.load %arg3[%c0_7, %c0_8] : memref<1x256xf32, #tpu.memory_space<vmem>>, vector<1x256xf32>
    %21 = vector.broadcast %20 : vector<1x256xf32> to vector<256x256xf32>
    %22 = arith.addf %19, %21 : vector<256x256xf32>
    %c0_9 = arith.constant 0 : index
    %c0_10 = arith.constant 0 : index
    %23 = vector.load %arg4[%c0_9, %c0_10] : memref<256x256xf32, #tpu.memory_space<vmem>>, vector<256x256xf32>
    tpu.vector_store %arg4[%c0_9, %c0_10], %22 {strides = array<i32>} : memref<256x256xf32, #tpu.memory_space<vmem>>, vector<256x256xf32>,
    return
  }
  func.func @transform_0(%arg0: i32) -> (i32, i32) {
    %c0_i32 = arith.constant 0 : i32
    %c0_i32_0 = arith.constant 0 : i32
    return %arg0, %c0_i32 : i32, i32
  }
  func.func @transform_1(%arg0: i32) -> (i32, i32) {
    %c0_i32 = arith.constant 0 : i32
    %c0_i32_0 = arith.constant 0 : i32
    %c0_i32_1 = arith.constant 0 : i32
    return %c0_i32, %c0_i32_0 : i32, i32
  }
  func.func @transform_2(%arg0: i32) -> (i32, i32) {
    %c0_i32 = arith.constant 0 : i32
    %c0_i32_0 = arith.constant 0 : i32
    %c0_i32_1 = arith.constant 0 : i32
    return %c0_i32, %c0_i32_0 : i32, i32
  }
  func.func @transform_3(%arg0: i32) -> (i32, i32) {
    %c0_i32 = arith.constant 0 : i32
    %c0_i32_0 = arith.constant 0 : i32
    return %arg0, %c0_i32 : i32, i32
  }
}

module attributes {stable_mosaic.version = 11 : i64} {
  func.func @_dense_kernel(%arg0: i32, %arg1: memref<256x256xf32, #tpu.memory_space<vmem>>, %arg2: memref<256x768xbf16, #tpu.memory_space<vmem>>, %arg3: memref<1x768xf32, #tpu.memory_space<vmem>>, %arg4: memref<256x768xbf16, #tpu.memory_space<vmem>>) attributes {dimension_semantics = [#tpu.dimension_semantics<parallel>], iteration_bounds = array<i64: 1>, scalar_prefetch = 0 : i64, scratch_operands = 0 : i64, tpu.core_type = #tpu.core_type<tc>, window_params = [{transform_indices = @transform_0, window_bounds = array<i64: 256, 256>}, {pipeline_mode = #tpu.pipeline_mode<synchronous>, transform_indices = @transform_1, window_bounds = array<i64: 256, 768>}, {pipeline_mode = #tpu.pipeline_mode<synchronous>, transform_indices = @transform_2, window_bounds = array<i64: 1, 768>}, {transform_indices = @transform_3, window_bounds = array<i64: 256, 768>}]} {
    %c0 = arith.constant 0 : index
    %c0_0 = arith.constant 0 : index
    %0 = vector.load %arg1[%c0, %c0_0] : memref<256x256xf32, #tpu.memory_space<vmem>>, vector<256x256xf32>
    %1 = arith.truncf %0 : vector<256x256xf32> to vector<256x256xbf16>
    %c0_1 = arith.constant 0 : index
    %c0_2 = arith.constant 0 : index
    %2 = vector.load %arg2[%c0_1, %c0_2] : memref<256x768xbf16, #tpu.memory_space<vmem>>, vector<256x768xbf16>
    %cst = arith.constant dense<0.000000e+00> : vector<256x768xf32>
    %3 = tpu.matmul %1, %2, %cst {dimension_numbers = #tpu.dot_dimension_numbers<[1], [0], [0], [1], [0, 0, 1, 1], [], []>} : vector<256x256xbf16>, vector<256x768xbf16>, vector<256x768xf32> -> vector<256x768xf32>
    %c0_3 = arith.constant 0 : index
    %c0_4 = arith.constant 0 : index
    %4 = vector.load %arg3[%c0_3, %c0_4] : memref<1x768xf32, #tpu.memory_space<vmem>>, vector<1x768xf32>
    %5 = vector.broadcast %4 : vector<1x768xf32> to vector<256x768xf32>
    %6 = arith.addf %3, %5 : vector<256x768xf32>
    %7 = arith.truncf %6 : vector<256x768xf32> to vector<256x768xbf16>
    %c0_5 = arith.constant 0 : index
    %c0_6 = arith.constant 0 : index
    %8 = vector.load %arg4[%c0_5, %c0_6] : memref<256x768xbf16, #tpu.memory_space<vmem>>, vector<256x768xbf16>
    tpu.vector_store %arg4[%c0_5, %c0_6], %7 {strides = array<i32>} : memref<256x768xbf16, #tpu.memory_space<vmem>>, vector<256x768xbf16>,
    return
  }
  func.func @transform_0(%arg0: i32) -> (i32, i32) {
    %c0_i32 = arith.constant 0 : i32
    %c0_i32_0 = arith.constant 0 : i32
    return %arg0, %c0_i32 : i32, i32
  }
  func.func @transform_1(%arg0: i32) -> (i32, i32) {
    %c0_i32 = arith.constant 0 : i32
    %c0_i32_0 = arith.constant 0 : i32
    %c0_i32_1 = arith.constant 0 : i32
    return %c0_i32, %c0_i32_0 : i32, i32
  }
  func.func @transform_2(%arg0: i32) -> (i32, i32) {
    %c0_i32 = arith.constant 0 : i32
    %c0_i32_0 = arith.constant 0 : i32
    %c0_i32_1 = arith.constant 0 : i32
    return %c0_i32, %c0_i32_0 : i32, i32
  }
  func.func @transform_3(%arg0: i32) -> (i32, i32) {
    %c0_i32 = arith.constant 0 : i32
    %c0_i32_0 = arith.constant 0 : i32
    return %arg0, %c0_i32 : i32, i32
  }
}

module attributes {stable_mosaic.version = 11 : i64} {
  func.func @_attn_kernel(%arg0: i32, %arg1: i32, %arg2: i32, %arg3: i32, %arg4: memref<1x128x128xbf16, #tpu.memory_space<vmem>>, %arg5: memref<1x128x128xbf16, #tpu.memory_space<vmem>>, %arg6: memref<1x128x128xbf16, #tpu.memory_space<vmem>>, %arg7: memref<1x1x128xf32, #tpu.memory_space<vmem>>, %arg8: memref<1x128x128xbf16, #tpu.memory_space<vmem>>, %arg9: memref<1x128x1xf32, #tpu.memory_space<vmem>>, %arg10: memref<1x128x1xf32, #tpu.memory_space<vmem>>, %arg11: memref<1x128x128xf32, #tpu.memory_space<vmem>>) attributes {dimension_semantics = [#tpu.dimension_semantics<parallel>, #tpu.dimension_semantics<parallel>, #tpu.dimension_semantics<arbitrary>, #tpu.dimension_semantics<arbitrary>], iteration_bounds = array<i64: 2, 2, 1, 1>, scalar_prefetch = 0 : i64, scratch_operands = 3 : i64, tpu.core_type = #tpu.core_type<tc>, window_params = [{transform_indices = @transform_0, window_bounds = array<i64: 1, 128, 128>}, {transform_indices = @transform_1, window_bounds = array<i64: 1, 128, 128>}, {transform_indices = @transform_2, window_bounds = array<i64: 1, 128, 128>}, {transform_indices = @transform_3, window_bounds = array<i64: 1, 1, 128>}, {transform_indices = @transform_4, window_bounds = array<i64: 1, 128, 128>}]} {
    %c0_i32 = arith.constant 0 : i32
    %0 = arith.cmpi eq, %arg3, %c0_i32 : i32
    %1 = arith.extui %0 : i1 to i32
    %c0_i32_0 = arith.constant 0 : i32
    %2 = arith.cmpi ne, %1, %c0_i32_0 : i32
    scf.if %2 {
      %cst_36 = arith.constant 0xFF800000 : f32
      %51 = vector.broadcast %cst_36 : f32 to vector<1x128x1xf32>
      %c0_37 = arith.constant 0 : index
      %c0_38 = arith.constant 0 : index
      %c0_39 = arith.constant 0 : index
      %52 = vector.load %arg9[%c0_37, %c0_38, %c0_39] : memref<1x128x1xf32, #tpu.memory_space<vmem>>, vector<1x128x1xf32>
      tpu.vector_store %arg9[%c0_37, %c0_38, %c0_39], %51 {strides = array<i32>} : memref<1x128x1xf32, #tpu.memory_space<vmem>>, vector<1x128x1xf32>,
      %cst_40 = arith.constant 0.000000e+00 : f32
      %53 = vector.broadcast %cst_40 : f32 to vector<1x128x1xf32>
      %c0_41 = arith.constant 0 : index
      %c0_42 = arith.constant 0 : index
      %c0_43 = arith.constant 0 : index
      %54 = vector.load %arg10[%c0_41, %c0_42, %c0_43] : memref<1x128x1xf32, #tpu.memory_space<vmem>>, vector<1x128x1xf32>
      tpu.vector_store %arg10[%c0_41, %c0_42, %c0_43], %53 {strides = array<i32>} : memref<1x128x1xf32, #tpu.memory_space<vmem>>, vector<1x128x1xf32>,
      %cst_44 = arith.constant 0.000000e+00 : f32
      %55 = vector.broadcast %cst_44 : f32 to vector<1x128x128xf32>
      %c0_45 = arith.constant 0 : index
      %c0_46 = arith.constant 0 : index
      %c0_47 = arith.constant 0 : index
      %56 = vector.load %arg11[%c0_45, %c0_46, %c0_47] : memref<1x128x128xf32, #tpu.memory_space<vmem>>, vector<1x128x128xf32>
      tpu.vector_store %arg11[%c0_45, %c0_46, %c0_47], %55 {strides = array<i32>} : memref<1x128x128xf32, #tpu.memory_space<vmem>>, vector<1x128x128xf32>,
    } else {
    }
    %c0 = arith.constant 0 : index
    %c0_1 = arith.constant 0 : index
    %c0_2 = arith.constant 0 : index
    %3 = vector.load %arg4[%c0, %c0_1, %c0_2] : memref<1x128x128xbf16, #tpu.memory_space<vmem>>, vector<1x128x128xbf16>
    %4 = vector.shape_cast %3 : vector<1x128x128xbf16> to vector<128x128xbf16>
    %c0_3 = arith.constant 0 : index
    %c0_4 = arith.constant 0 : index
    %c0_5 = arith.constant 0 : index
    %5 = vector.load %arg5[%c0_3, %c0_4, %c0_5] : memref<1x128x128xbf16, #tpu.memory_space<vmem>>, vector<1x128x128xbf16>
    %6 = vector.shape_cast %5 : vector<1x128x128xbf16> to vector<128x128xbf16>
    %c0_6 = arith.constant 0 : index
    %c0_7 = arith.constant 0 : index
    %c0_8 = arith.constant 0 : index
    %7 = vector.load %arg6[%c0_6, %c0_7, %c0_8] : memref<1x128x128xbf16, #tpu.memory_space<vmem>>, vector<1x128x128xbf16>
    %8 = vector.shape_cast %7 : vector<1x128x128xbf16> to vector<128x128xbf16>
    %c0_9 = arith.constant 0 : index
    %c0_10 = arith.constant 0 : index
    %c0_11 = arith.constant 0 : index
    %9 = vector.load %arg7[%c0_9, %c0_10, %c0_11] : memref<1x1x128xf32, #tpu.memory_space<vmem>>, vector<1x1x128xf32>
    %10 = vector.shape_cast %9 : vector<1x1x128xf32> to vector<1x128xf32>
    %cst = arith.constant dense<0.000000e+00> : vector<128x128xf32>
    %11 = tpu.matmul %4, %6, %cst {dimension_numbers = #tpu.dot_dimension_numbers<[1], [1], [0], [0], [0, 0, 1, 0], [], []>} : vector<128x128xbf16>, vector<128x128xbf16>, vector<128x128xf32> -> vector<128x128xf32>
    %cst_12 = arith.constant 0.0883883461 : f32
    %12 = vector.broadcast %cst_12 : f32 to vector<128x128xf32>
    %13 = arith.mulf %11, %12 : vector<128x128xf32>
    %14 = vector.broadcast %10 : vector<1x128xf32> to vector<128x128xf32>
    %15 = arith.addf %13, %14 : vector<128x128xf32>
    %c0_13 = arith.constant 0 : index
    %c0_14 = arith.constant 0 : index
    %c0_15 = arith.constant 0 : index
    %16 = vector.load %arg9[%c0_13, %c0_14, %c0_15] : memref<1x128x1xf32, #tpu.memory_space<vmem>>, vector<1x128x1xf32>
    %17 = vector.shape_cast %16 : vector<1x128x1xf32> to vector<128x1xf32>
    %cst_16 = arith.constant dense<0xFF800000> : vector<128xf32>
    %18 = vector.multi_reduction <maximumf>, %15, %cst_16 [1] : vector<128x128xf32> to vector<128xf32>
    %19 = vector.shape_cast %18 : vector<128xf32> to vector<128x1xf32>
    %20 = arith.maximumf %17, %19 : vector<128x1xf32>
    %21 = arith.subf %17, %20 : vector<128x1xf32>
    %22 = math.exp %21 : vector<128x1xf32>
    %23 = vector.broadcast %20 : vector<128x1xf32> to vector<128x128xf32>
    %24 = arith.subf %15, %23 : vector<128x128xf32>
    %25 = math.exp %24 : vector<128x128xf32>
    %c0_17 = arith.constant 0 : index
    %c0_18 = arith.constant 0 : index
    %c0_19 = arith.constant 0 : index
    %26 = vector.load %arg10[%c0_17, %c0_18, %c0_19] : memref<1x128x1xf32, #tpu.memory_space<vmem>>, vector<1x128x1xf32>
    %27 = vector.shape_cast %26 : vector<1x128x1xf32> to vector<128x1xf32>
    %28 = arith.mulf %22, %27 : vector<128x1xf32>
    %cst_20 = arith.constant dense<0.000000e+00> : vector<128xf32>
    %29 = vector.multi_reduction <add>, %25, %cst_20 [1] : vector<128x128xf32> to vector<128xf32>
    %30 = vector.shape_cast %29 : vector<128xf32> to vector<128x1xf32>
    %31 = arith.addf %28, %30 : vector<128x1xf32>
    %c0_21 = arith.constant 0 : index
    %c0_22 = arith.constant 0 : index
    %c0_23 = arith.constant 0 : index
    %32 = vector.load %arg10[%c0_21, %c0_22, %c0_23] : memref<1x128x1xf32, #tpu.memory_space<vmem>>, vector<1x128x1xf32>
    %33 = vector.shape_cast %32 : vector<1x128x1xf32> to vector<128x1xf32>
    %34 = vector.shape_cast %31 : vector<128x1xf32> to vector<1x128x1xf32>
    tpu.vector_store %arg10[%c0_21, %c0_22, %c0_23], %34 {strides = array<i32>} : memref<1x128x1xf32, #tpu.memory_space<vmem>>, vector<1x128x1xf32>,
    %c0_24 = arith.constant 0 : index
    %c0_25 = arith.constant 0 : index
    %c0_26 = arith.constant 0 : index
    %35 = vector.load %arg11[%c0_24, %c0_25, %c0_26] : memref<1x128x128xf32, #tpu.memory_space<vmem>>, vector<1x128x128xf32>
    %36 = vector.shape_cast %35 : vector<1x128x128xf32> to vector<128x128xf32>
    %37 = vector.broadcast %22 : vector<128x1xf32> to vector<128x128xf32>
    %38 = arith.mulf %37, %36 : vector<128x128xf32>
    %39 = arith.truncf %25 : vector<128x128xf32> to vector<128x128xbf16>
    %cst_27 = arith.constant dense<0.000000e+00> : vector<128x128xf32>
    %40 = tpu.matmul %39, %8, %cst_27 {dimension_numbers = #tpu.dot_dimension_numbers<[1], [0], [0], [1], [0, 0, 1, 1], [], []>} : vector<128x128xbf16>, vector<128x128xbf16>, vector<128x128xf32> -> vector<128x128xf32>
    %41 = arith.addf %38, %40 : vector<128x128xf32>
    %c0_28 = arith.constant 0 : index
    %c0_29 = arith.constant 0 : index
    %c0_30 = arith.constant 0 : index
    %42 = vector.load %arg11[%c0_28, %c0_29, %c0_30] : memref<1x128x128xf32, #tpu.memory_space<vmem>>, vector<1x128x128xf32>
    %43 = vector.shape_cast %42 : vector<1x128x128xf32> to vector<128x128xf32>
    %44 = vector.shape_cast %41 : vector<128x128xf32> to vector<1x128x128xf32>
    tpu.vector_store %arg11[%c0_28, %c0_29, %c0_30], %44 {strides = array<i32>} : memref<1x128x128xf32, #tpu.memory_space<vmem>>, vector<1x128x128xf32>,
    %c0_31 = arith.constant 0 : index
    %c0_32 = arith.constant 0 : index
    %c0_33 = arith.constant 0 : index
    %45 = vector.load %arg9[%c0_31, %c0_32, %c0_33] : memref<1x128x1xf32, #tpu.memory_space<vmem>>, vector<1x128x1xf32>
    %46 = vector.shape_cast %45 : vector<1x128x1xf32> to vector<128x1xf32>
    %47 = vector.shape_cast %20 : vector<128x1xf32> to vector<1x128x1xf32>
    tpu.vector_store %arg9[%c0_31, %c0_32, %c0_33], %47 {strides = array<i32>} : memref<1x128x1xf32, #tpu.memory_space<vmem>>, vector<1x128x1xf32>,
    %c0_i32_34 = arith.constant 0 : i32
    %48 = arith.cmpi eq, %arg3, %c0_i32_34 : i32
    %49 = arith.extui %48 : i1 to i32
    %c0_i32_35 = arith.constant 0 : i32
    %50 = arith.cmpi ne, %49, %c0_i32_35 : i32
    scf.if %50 {
      %c0_36 = arith.constant 0 : index
      %c0_37 = arith.constant 0 : index
      %c0_38 = arith.constant 0 : index
      %51 = vector.load %arg11[%c0_36, %c0_37, %c0_38] : memref<1x128x128xf32, #tpu.memory_space<vmem>>, vector<1x128x128xf32>
      %52 = vector.shape_cast %51 : vector<1x128x128xf32> to vector<128x128xf32>
      %c0_39 = arith.constant 0 : index
      %c0_40 = arith.constant 0 : index
      %c0_41 = arith.constant 0 : index
      %53 = vector.load %arg10[%c0_39, %c0_40, %c0_41] : memref<1x128x1xf32, #tpu.memory_space<vmem>>, vector<1x128x1xf32>
      %54 = vector.shape_cast %53 : vector<1x128x1xf32> to vector<128x1xf32>
      %55 = tpu.reciprocal %54 {approx = true} : vector<128x1xf32> -> vector<128x1xf32>
      %56 = vector.broadcast %55 : vector<128x1xf32> to vector<128x128xf32>
      %57 = arith.mulf %52, %56 : vector<128x128xf32>
      %58 = arith.truncf %57 : vector<128x128xf32> to vector<128x128xbf16>
      %c0_42 = arith.constant 0 : index
      %c0_43 = arith.constant 0 : index
      %c0_44 = arith.constant 0 : index
      %59 = vector.load %arg8[%c0_42, %c0_43, %c0_44] : memref<1x128x128xbf16, #tpu.memory_space<vmem>>, vector<1x128x128xbf16>
      %60 = vector.shape_cast %59 : vector<1x128x128xbf16> to vector<128x128xbf16>
      %61 = vector.shape_cast %58 : vector<128x128xbf16> to vector<1x128x128xbf16>
      tpu.vector_store %arg8[%c0_42, %c0_43, %c0_44], %61 {strides = array<i32>} : memref<1x128x128xbf16, #tpu.memory_space<vmem>>, vector<1x128x128xbf16>,
    } else {
    }
    return
  }
  func.func @transform_0(%arg0: i32, %arg1: i32, %arg2: i32, %arg3: i32) -> (i32, i32, i32) {
    %c0_i32 = arith.constant 0 : i32
    return %arg0, %arg2, %arg1 : i32, i32, i32
  }
  func.func @transform_1(%arg0: i32, %arg1: i32, %arg2: i32, %arg3: i32) -> (i32, i32, i32) {
    %c2_i32 = arith.constant 2 : i32
    %0 = arith.addi %c2_i32, %arg1 : i32
    %c0_i32 = arith.constant 0 : i32
    return %arg0, %arg3, %0 : i32, i32, i32
  }
  func.func @transform_2(%arg0: i32, %arg1: i32, %arg2: i32, %arg3: i32) -> (i32, i32, i32) {
    %c4_i32 = arith.constant 4 : i32
    %0 = arith.addi %c4_i32, %arg1 : i32
    %c0_i32 = arith.constant 0 : i32
    return %arg0, %arg3, %0 : i32, i32, i32
  }
  func.func @transform_3(%arg0: i32, %arg1: i32, %arg2: i32, %arg3: i32) -> (i32, i32, i32) {
    %c0_i32 = arith.constant 0 : i32
    %c0_i32_0 = arith.constant 0 : i32
    return %arg0, %c0_i32, %arg3 : i32, i32, i32
  }
  func.func @transform_4(%arg0: i32, %arg1: i32, %arg2: i32, %arg3: i32) -> (i32, i32, i32) {
    %c0_i32 = arith.constant 0 : i32
    return %arg0, %arg2, %arg1 : i32, i32, i32
  }
}

module attributes {stable_mosaic.version = 11 : i64} {
  func.func @_dense_add_ln_kernel(%arg0: i32, %arg1: memref<256x256xbf16, #tpu.memory_space<vmem>>, %arg2: memref<256x256xbf16, #tpu.memory_space<vmem>>, %arg3: memref<1x256xf32, #tpu.memory_space<vmem>>, %arg4: memref<256x256xf32, #tpu.memory_space<vmem>>, %arg5: memref<1x256xf32, #tpu.memory_space<vmem>>, %arg6: memref<1x256xf32, #tpu.memory_space<vmem>>, %arg7: memref<256x256xf32, #tpu.memory_space<vmem>>) attributes {dimension_semantics = [#tpu.dimension_semantics<parallel>], iteration_bounds = array<i64: 1>, scalar_prefetch = 0 : i64, scratch_operands = 0 : i64, tpu.core_type = #tpu.core_type<tc>, window_params = [{transform_indices = @transform_0, window_bounds = array<i64: 256, 256>}, {pipeline_mode = #tpu.pipeline_mode<synchronous>, transform_indices = @transform_1, window_bounds = array<i64: 256, 256>}, {pipeline_mode = #tpu.pipeline_mode<synchronous>, transform_indices = @transform_2, window_bounds = array<i64: 1, 256>}, {transform_indices = @transform_3, window_bounds = array<i64: 256, 256>}, {pipeline_mode = #tpu.pipeline_mode<synchronous>, transform_indices = @transform_4, window_bounds = array<i64: 1, 256>}, {pipeline_mode = #tpu.pipeline_mode<synchronous>, transform_indices = @transform_5, window_bounds = array<i64: 1, 256>}, {transform_indices = @transform_6, window_bounds = array<i64: 256, 256>}]} {
    %c0 = arith.constant 0 : index
    %c0_0 = arith.constant 0 : index
    %0 = vector.load %arg1[%c0, %c0_0] : memref<256x256xbf16, #tpu.memory_space<vmem>>, vector<256x256xbf16>
    %c0_1 = arith.constant 0 : index
    %c0_2 = arith.constant 0 : index
    %1 = vector.load %arg2[%c0_1, %c0_2] : memref<256x256xbf16, #tpu.memory_space<vmem>>, vector<256x256xbf16>
    %cst = arith.constant dense<0.000000e+00> : vector<256x256xf32>
    %2 = tpu.matmul %0, %1, %cst {dimension_numbers = #tpu.dot_dimension_numbers<[1], [0], [0], [1], [0, 0, 1, 1], [], []>} : vector<256x256xbf16>, vector<256x256xbf16>, vector<256x256xf32> -> vector<256x256xf32>
    %c0_3 = arith.constant 0 : index
    %c0_4 = arith.constant 0 : index
    %3 = vector.load %arg3[%c0_3, %c0_4] : memref<1x256xf32, #tpu.memory_space<vmem>>, vector<1x256xf32>
    %4 = vector.broadcast %3 : vector<1x256xf32> to vector<256x256xf32>
    %5 = arith.addf %2, %4 : vector<256x256xf32>
    %c0_5 = arith.constant 0 : index
    %c0_6 = arith.constant 0 : index
    %6 = vector.load %arg4[%c0_5, %c0_6] : memref<256x256xf32, #tpu.memory_space<vmem>>, vector<256x256xf32>
    %7 = arith.addf %5, %6 : vector<256x256xf32>
    %cst_7 = arith.constant dense<0.000000e+00> : vector<256xf32>
    %8 = vector.multi_reduction <add>, %7, %cst_7 [1] : vector<256x256xf32> to vector<256xf32>
    %9 = vector.shape_cast %8 : vector<256xf32> to vector<256x1xf32>
    %cst_8 = arith.constant 2.560000e+02 : f32
    %10 = vector.broadcast %cst_8 : f32 to vector<256x1xf32>
    %11 = arith.divf %9, %10 : vector<256x1xf32>
    %12 = vector.broadcast %11 : vector<256x1xf32> to vector<256x256xf32>
    %13 = arith.subf %7, %12 : vector<256x256xf32>
    %14 = arith.mulf %13, %13 : vector<256x256xf32>
    %cst_9 = arith.constant dense<0.000000e+00> : vector<256xf32>
    %15 = vector.multi_reduction <add>, %14, %cst_9 [1] : vector<256x256xf32> to vector<256xf32>
    %16 = vector.shape_cast %15 : vector<256xf32> to vector<256x1xf32>
    %cst_10 = arith.constant 2.560000e+02 : f32
    %17 = vector.broadcast %cst_10 : f32 to vector<256x1xf32>
    %18 = arith.divf %16, %17 : vector<256x1xf32>
    %cst_11 = arith.constant 9.99999996E-13 : f32
    %19 = vector.broadcast %cst_11 : f32 to vector<256x1xf32>
    %20 = arith.addf %18, %19 : vector<256x1xf32>
    %21 = math.rsqrt %20 : vector<256x1xf32>
    %22 = vector.broadcast %21 : vector<256x1xf32> to vector<256x256xf32>
    %23 = arith.mulf %13, %22 : vector<256x256xf32>
    %c0_12 = arith.constant 0 : index
    %c0_13 = arith.constant 0 : index
    %24 = vector.load %arg5[%c0_12, %c0_13] : memref<1x256xf32, #tpu.memory_space<vmem>>, vector<1x256xf32>
    %25 = vector.broadcast %24 : vector<1x256xf32> to vector<256x256xf32>
    %26 = arith.mulf %23, %25 : vector<256x256xf32>
    %c0_14 = arith.constant 0 : index
    %c0_15 = arith.constant 0 : index
    %27 = vector.load %arg6[%c0_14, %c0_15] : memref<1x256xf32, #tpu.memory_space<vmem>>, vector<1x256xf32>
    %28 = vector.broadcast %27 : vector<1x256xf32> to vector<256x256xf32>
    %29 = arith.addf %26, %28 : vector<256x256xf32>
    %c0_16 = arith.constant 0 : index
    %c0_17 = arith.constant 0 : index
    %30 = vector.load %arg7[%c0_16, %c0_17] : memref<256x256xf32, #tpu.memory_space<vmem>>, vector<256x256xf32>
    tpu.vector_store %arg7[%c0_16, %c0_17], %29 {strides = array<i32>} : memref<256x256xf32, #tpu.memory_space<vmem>>, vector<256x256xf32>,
    return
  }
  func.func @transform_0(%arg0: i32) -> (i32, i32) {
    %c0_i32 = arith.constant 0 : i32
    %c0_i32_0 = arith.constant 0 : i32
    return %arg0, %c0_i32 : i32, i32
  }
  func.func @transform_1(%arg0: i32) -> (i32, i32) {
    %c0_i32 = arith.constant 0 : i32
    %c0_i32_0 = arith.constant 0 : i32
    %c0_i32_1 = arith.constant 0 : i32
    return %c0_i32, %c0_i32_0 : i32, i32
  }
  func.func @transform_2(%arg0: i32) -> (i32, i32) {
    %c0_i32 = arith.constant 0 : i32
    %c0_i32_0 = arith.constant 0 : i32
    %c0_i32_1 = arith.constant 0 : i32
    return %c0_i32, %c0_i32_0 : i32, i32
  }
  func.func @transform_3(%arg0: i32) -> (i32, i32) {
    %c0_i32 = arith.constant 0 : i32
    %c0_i32_0 = arith.constant 0 : i32
    return %arg0, %c0_i32 : i32, i32
  }
  func.func @transform_4(%arg0: i32) -> (i32, i32) {
    %c0_i32 = arith.constant 0 : i32
    %c0_i32_0 = arith.constant 0 : i32
    %c0_i32_1 = arith.constant 0 : i32
    return %c0_i32, %c0_i32_0 : i32, i32
  }
  func.func @transform_5(%arg0: i32) -> (i32, i32) {
    %c0_i32 = arith.constant 0 : i32
    %c0_i32_0 = arith.constant 0 : i32
    %c0_i32_1 = arith.constant 0 : i32
    return %c0_i32, %c0_i32_0 : i32, i32
  }
  func.func @transform_6(%arg0: i32) -> (i32, i32) {
    %c0_i32 = arith.constant 0 : i32
    %c0_i32_0 = arith.constant 0 : i32
    return %arg0, %c0_i32 : i32, i32
  }
}

module attributes {stable_mosaic.version = 11 : i64} {
  func.func @_ffn_kernel(%arg0: i32, %arg1: i32, %arg2: memref<256x256xf32, #tpu.memory_space<vmem>>, %arg3: memref<256x512xbf16, #tpu.memory_space<vmem>>, %arg4: memref<1x512xf32, #tpu.memory_space<vmem>>, %arg5: memref<512x256xbf16, #tpu.memory_space<vmem>>, %arg6: memref<1x256xf32, #tpu.memory_space<vmem>>, %arg7: memref<1x256xf32, #tpu.memory_space<vmem>>, %arg8: memref<1x256xf32, #tpu.memory_space<vmem>>, %arg9: memref<256x256xf32, #tpu.memory_space<vmem>>, %arg10: memref<256x256xf32, #tpu.memory_space<vmem>>) attributes {dimension_semantics = [#tpu.dimension_semantics<parallel>, #tpu.dimension_semantics<arbitrary>], iteration_bounds = array<i64: 1, 1>, scalar_prefetch = 0 : i64, scratch_operands = 1 : i64, tpu.core_type = #tpu.core_type<tc>, window_params = [{transform_indices = @transform_0, window_bounds = array<i64: 256, 256>}, {transform_indices = @transform_1, window_bounds = array<i64: 256, 512>}, {transform_indices = @transform_2, window_bounds = array<i64: 1, 512>}, {transform_indices = @transform_3, window_bounds = array<i64: 512, 256>}, {pipeline_mode = #tpu.pipeline_mode<synchronous>, transform_indices = @transform_4, window_bounds = array<i64: 1, 256>}, {pipeline_mode = #tpu.pipeline_mode<synchronous>, transform_indices = @transform_5, window_bounds = array<i64: 1, 256>}, {pipeline_mode = #tpu.pipeline_mode<synchronous>, transform_indices = @transform_6, window_bounds = array<i64: 1, 256>}, {transform_indices = @transform_7, window_bounds = array<i64: 256, 256>}]} {
    %c0_i32 = arith.constant 0 : i32
    %0 = arith.cmpi eq, %arg1, %c0_i32 : i32
    %1 = arith.extui %0 : i1 to i32
    %c0_i32_0 = arith.constant 0 : i32
    %2 = arith.cmpi ne, %1, %c0_i32_0 : i32
    scf.if %2 {
      %cst_18 = arith.constant 0.000000e+00 : f32
      %27 = vector.broadcast %cst_18 : f32 to vector<256x256xf32>
      %c0_19 = arith.constant 0 : index
      %c0_20 = arith.constant 0 : index
      %28 = vector.load %arg10[%c0_19, %c0_20] : memref<256x256xf32, #tpu.memory_space<vmem>>, vector<256x256xf32>
      tpu.vector_store %arg10[%c0_19, %c0_20], %27 {strides = array<i32>} : memref<256x256xf32, #tpu.memory_space<vmem>>, vector<256x256xf32>,
    } else {
    }
    %c0 = arith.constant 0 : index
    %c0_1 = arith.constant 0 : index
    %3 = vector.load %arg2[%c0, %c0_1] : memref<256x256xf32, #tpu.memory_space<vmem>>, vector<256x256xf32>
    %4 = arith.truncf %3 : vector<256x256xf32> to vector<256x256xbf16>
    %c0_2 = arith.constant 0 : index
    %c0_3 = arith.constant 0 : index
    %5 = vector.load %arg3[%c0_2, %c0_3] : memref<256x512xbf16, #tpu.memory_space<vmem>>, vector<256x512xbf16>
    %cst = arith.constant dense<0.000000e+00> : vector<256x512xf32>
    %6 = tpu.matmul %4, %5, %cst {dimension_numbers = #tpu.dot_dimension_numbers<[1], [0], [0], [1], [0, 0, 1, 1], [], []>} : vector<256x256xbf16>, vector<256x512xbf16>, vector<256x512xf32> -> vector<256x512xf32>
    %c0_4 = arith.constant 0 : index
    %c0_5 = arith.constant 0 : index
    %7 = vector.load %arg4[%c0_4, %c0_5] : memref<1x512xf32, #tpu.memory_space<vmem>>, vector<1x512xf32>
    %8 = vector.broadcast %7 : vector<1x512xf32> to vector<256x512xf32>
    %9 = arith.addf %6, %8 : vector<256x512xf32>
    %cst_6 = arith.constant 5.000000e-01 : f32
    %10 = vector.broadcast %cst_6 : f32 to vector<256x512xf32>
    %11 = arith.mulf %10, %9 : vector<256x512xf32>
    %cst_7 = arith.constant 0.707106769 : f32
    %12 = vector.broadcast %cst_7 : f32 to vector<256x512xf32>
    %13 = arith.mulf %9, %12 : vector<256x512xf32>
    %14 = math.erf %13 : vector<256x512xf32>
    %cst_8 = arith.constant 1.000000e+00 : f32
    %15 = vector.broadcast %cst_8 : f32 to vector<256x512xf32>
    %16 = arith.addf %15, %14 : vector<256x512xf32>
    %17 = arith.mulf %11, %16 : vector<256x512xf32>
    %c0_9 = arith.constant 0 : index
    %c0_10 = arith.constant 0 : index
    %18 = vector.load %arg10[%c0_9, %c0_10] : memref<256x256xf32, #tpu.memory_space<vmem>>, vector<256x256xf32>
    %19 = arith.truncf %17 : vector<256x512xf32> to vector<256x512xbf16>
    %c0_11 = arith.constant 0 : index
    %c0_12 = arith.constant 0 : index
    %20 = vector.load %arg5[%c0_11, %c0_12] : memref<512x256xbf16, #tpu.memory_space<vmem>>, vector<512x256xbf16>
    %cst_13 = arith.constant dense<0.000000e+00> : vector<256x256xf32>
    %21 = tpu.matmul %19, %20, %cst_13 {dimension_numbers = #tpu.dot_dimension_numbers<[1], [0], [0], [1], [0, 0, 1, 1], [], []>} : vector<256x512xbf16>, vector<512x256xbf16>, vector<256x256xf32> -> vector<256x256xf32>
    %22 = arith.addf %18, %21 : vector<256x256xf32>
    %c0_14 = arith.constant 0 : index
    %c0_15 = arith.constant 0 : index
    %23 = vector.load %arg10[%c0_14, %c0_15] : memref<256x256xf32, #tpu.memory_space<vmem>>, vector<256x256xf32>
    tpu.vector_store %arg10[%c0_14, %c0_15], %22 {strides = array<i32>} : memref<256x256xf32, #tpu.memory_space<vmem>>, vector<256x256xf32>,
    %c0_i32_16 = arith.constant 0 : i32
    %24 = arith.cmpi eq, %arg1, %c0_i32_16 : i32
    %25 = arith.extui %24 : i1 to i32
    %c0_i32_17 = arith.constant 0 : i32
    %26 = arith.cmpi ne, %25, %c0_i32_17 : i32
    scf.if %26 {
      %c0_18 = arith.constant 0 : index
      %c0_19 = arith.constant 0 : index
      %27 = vector.load %arg10[%c0_18, %c0_19] : memref<256x256xf32, #tpu.memory_space<vmem>>, vector<256x256xf32>
      %c0_20 = arith.constant 0 : index
      %c0_21 = arith.constant 0 : index
      %28 = vector.load %arg6[%c0_20, %c0_21] : memref<1x256xf32, #tpu.memory_space<vmem>>, vector<1x256xf32>
      %29 = vector.broadcast %28 : vector<1x256xf32> to vector<256x256xf32>
      %30 = arith.addf %27, %29 : vector<256x256xf32>
      %c0_22 = arith.constant 0 : index
      %c0_23 = arith.constant 0 : index
      %31 = vector.load %arg2[%c0_22, %c0_23] : memref<256x256xf32, #tpu.memory_space<vmem>>, vector<256x256xf32>
      %32 = arith.addf %30, %31 : vector<256x256xf32>
      %cst_24 = arith.constant dense<0.000000e+00> : vector<256xf32>
      %33 = vector.multi_reduction <add>, %32, %cst_24 [1] : vector<256x256xf32> to vector<256xf32>
      %34 = vector.shape_cast %33 : vector<256xf32> to vector<256x1xf32>
      %cst_25 = arith.constant 2.560000e+02 : f32
      %35 = vector.broadcast %cst_25 : f32 to vector<256x1xf32>
      %36 = arith.divf %34, %35 : vector<256x1xf32>
      %37 = vector.broadcast %36 : vector<256x1xf32> to vector<256x256xf32>
      %38 = arith.subf %32, %37 : vector<256x256xf32>
      %39 = arith.mulf %38, %38 : vector<256x256xf32>
      %cst_26 = arith.constant dense<0.000000e+00> : vector<256xf32>
      %40 = vector.multi_reduction <add>, %39, %cst_26 [1] : vector<256x256xf32> to vector<256xf32>
      %41 = vector.shape_cast %40 : vector<256xf32> to vector<256x1xf32>
      %cst_27 = arith.constant 2.560000e+02 : f32
      %42 = vector.broadcast %cst_27 : f32 to vector<256x1xf32>
      %43 = arith.divf %41, %42 : vector<256x1xf32>
      %cst_28 = arith.constant 9.99999996E-13 : f32
      %44 = vector.broadcast %cst_28 : f32 to vector<256x1xf32>
      %45 = arith.addf %43, %44 : vector<256x1xf32>
      %46 = math.rsqrt %45 : vector<256x1xf32>
      %47 = vector.broadcast %46 : vector<256x1xf32> to vector<256x256xf32>
      %48 = arith.mulf %38, %47 : vector<256x256xf32>
      %c0_29 = arith.constant 0 : index
      %c0_30 = arith.constant 0 : index
      %49 = vector.load %arg7[%c0_29, %c0_30] : memref<1x256xf32, #tpu.memory_space<vmem>>, vector<1x256xf32>
      %50 = vector.broadcast %49 : vector<1x256xf32> to vector<256x256xf32>
      %51 = arith.mulf %48, %50 : vector<256x256xf32>
      %c0_31 = arith.constant 0 : index
      %c0_32 = arith.constant 0 : index
      %52 = vector.load %arg8[%c0_31, %c0_32] : memref<1x256xf32, #tpu.memory_space<vmem>>, vector<1x256xf32>
      %53 = vector.broadcast %52 : vector<1x256xf32> to vector<256x256xf32>
      %54 = arith.addf %51, %53 : vector<256x256xf32>
      %c0_33 = arith.constant 0 : index
      %c0_34 = arith.constant 0 : index
      %55 = vector.load %arg9[%c0_33, %c0_34] : memref<256x256xf32, #tpu.memory_space<vmem>>, vector<256x256xf32>
      tpu.vector_store %arg9[%c0_33, %c0_34], %54 {strides = array<i32>} : memref<256x256xf32, #tpu.memory_space<vmem>>, vector<256x256xf32>,
    } else {
    }
    return
  }
  func.func @transform_0(%arg0: i32, %arg1: i32) -> (i32, i32) {
    %c0_i32 = arith.constant 0 : i32
    %c0_i32_0 = arith.constant 0 : i32
    return %arg0, %c0_i32 : i32, i32
  }
  func.func @transform_1(%arg0: i32, %arg1: i32) -> (i32, i32) {
    %c0_i32 = arith.constant 0 : i32
    %c0_i32_0 = arith.constant 0 : i32
    return %c0_i32, %arg1 : i32, i32
  }
  func.func @transform_2(%arg0: i32, %arg1: i32) -> (i32, i32) {
    %c0_i32 = arith.constant 0 : i32
    %c0_i32_0 = arith.constant 0 : i32
    return %c0_i32, %arg1 : i32, i32
  }
  func.func @transform_3(%arg0: i32, %arg1: i32) -> (i32, i32) {
    %c0_i32 = arith.constant 0 : i32
    %c0_i32_0 = arith.constant 0 : i32
    return %arg1, %c0_i32 : i32, i32
  }
  func.func @transform_4(%arg0: i32, %arg1: i32) -> (i32, i32) {
    %c0_i32 = arith.constant 0 : i32
    %c0_i32_0 = arith.constant 0 : i32
    %c0_i32_1 = arith.constant 0 : i32
    return %c0_i32, %c0_i32_0 : i32, i32
  }
  func.func @transform_5(%arg0: i32, %arg1: i32) -> (i32, i32) {
    %c0_i32 = arith.constant 0 : i32
    %c0_i32_0 = arith.constant 0 : i32
    %c0_i32_1 = arith.constant 0 : i32
    return %c0_i32, %c0_i32_0 : i32, i32
  }
  func.func @transform_6(%arg0: i32, %arg1: i32) -> (i32, i32) {
    %c0_i32 = arith.constant 0 : i32
    %c0_i32_0 = arith.constant 0 : i32
    %c0_i32_1 = arith.constant 0 : i32
    return %c0_i32, %c0_i32_0 : i32, i32
  }
  func.func @transform_7(%arg0: i32, %arg1: i32) -> (i32, i32) {
    %c0_i32 = arith.constant 0 : i32
    %c0_i32_0 = arith.constant 0 : i32
    return %arg0, %c0_i32 : i32, i32
  }
}

</mosaic_0001>

<bundles_post_ra>
// kernel: verb_model_bert_forward.9
= control target key start
LH: loop header
LB: loop body
LE: loop exit
PB: predicated region body
PF: predicated region fallthrough
CT: control target
= control target key end

     0   :  { %s1997_s0 = inlined_call_operand.vmem [shape: f32[256,256], index: 0, kind: input, shape index: {}]   ;;  %s1998_s1 = inlined_call_operand.vmem [shape: f32[1,256], index: 1, kind: input, shape index: {}]   ;;  %s1999_s2 = inlined_call_operand.vmem [shape: f32[1,256], index: 2, kind: input, shape index: {}]   ;;  %s2000_s3 = inlined_call_operand.vmem [shape: f32[256,256], index: 3, kind: output, shape index: {}]  }
   0x1   :  { %v898_v0 = vld [vmem:[%s1997_s0] sm:$0xff]  ;;  %v903_v1 = vld [vmem:[%s1997_s0 + $0x8] sm:$0xff]  ;;  %v920_v5 = vld [vmem:[%s1997_s0 + $0x10] sm:$0xff] }
   0x2   :  { %v908_v2 = vld [vmem:[%s1997_s0 + $0x20] sm:$0xff]  ;;  %v78_v3 = vadd.f32 %v903_v1, %v898_v0  ;;  %v915_v4 = vld [vmem:[%s1997_s0 + $0x28] sm:$0xff]  ;;  %v925_v6 = vld [vmem:[%s1997_s0 + $0x18] sm:$0xff] }
   0x3   :  { %v84_v7 = vadd.f32 %v915_v4, %v908_v2  ;;  %v932_v8 = vld [vmem:[%s1997_s0 + $0x30] sm:$0xff]  ;;  %v937_v9 = vld [vmem:[%s1997_s0 + $0x38] sm:$0xff]  ;;  %v81_v10 = vadd.f32 %v925_v6, %v920_v5  ;;  %v946_v12 = vld [vmem:[%s1997_s0 + $0x40] sm:$0xff] }
   0x4   :  { %79 = vadd.xlane.f32.xlu0 %v78_v3  ;;  %v87_v11 = vadd.f32 %v937_v9, %v932_v8  ;;  %v951_v13 = vld [vmem:[%s1997_s0 + $0x48] sm:$0xff]  ;;  %v956_v14 = vld [vmem:[%s1997_s0 + $0x50] sm:$0xff]  ;;  %v961_v15 = vld [vmem:[%s1997_s0 + $0x58] sm:$0xff] }
   0x5   :  { %85 = vadd.xlane.f32.xlu1 %v84_v7  ;;  %v90_v16 = vadd.f32 %v951_v13, %v946_v12  ;;  %v93_v17 = vadd.f32 %v961_v15, %v956_v14  ;;  %v970_v18 = vld [vmem:[%s1997_s0 + $0x60] sm:$0xff]  ;;  %v975_v19 = vld [vmem:[%s1997_s0 + $0x68] sm:$0xff]  ;;  %v980_v20 = vld [vmem:[%s1997_s0 + $0x70] sm:$0xff] }
   0x6   :  { %v985_v21 = vld [vmem:[%s1997_s0 + $0x78] sm:$0xff]  ;;  %v96_v22 = vadd.f32 %v975_v19, %v970_v18  ;;  %v994_v24 = vld [vmem:[%s1997_s0 + $0x80] sm:$0xff]  ;;  %v999_v25 = vld [vmem:[%s1997_s0 + $0x88] sm:$0xff] }
   0x7   :  { %v99_v23 = vadd.f32 %v985_v21, %v980_v20  ;;  %v1004_v26 = vld [vmem:[%s1997_s0 + $0x90] sm:$0xff]  ;;  %v1009_v27 = vld [vmem:[%s1997_s0 + $0x98] sm:$0xff]  ;;  %v102_v28 = vadd.f32 %v999_v25, %v994_v24  ;;  %v1018_v30 = vld [vmem:[%s1997_s0 + $0xa0] sm:$0xff] }
   0x8   :  { %82 = vadd.xlane.f32.xlu0 %v81_v10  ;;  %v105_v29 = vadd.f32 %v1009_v27, %v1004_v26  ;;  %v1023_v31 = vld [vmem:[%s1997_s0 + $0xa8] sm:$0xff]  ;;  %v1028_v32 = vld [vmem:[%s1997_s0 + $0xb0] sm:$0xff]  ;;  %v1033_v33 = vld [vmem:[%s1997_s0 + $0xb8] sm:$0xff] }
   0x9   :  { %88 = vadd.xlane.f32.xlu1 %v87_v11  ;;  %v108_v34 = vadd.f32 %v1023_v31, %v1018_v30  ;;  %v111_v35 = vadd.f32 %v1033_v33, %v1028_v32  ;;  %v1042_v36 = vld [vmem:[%s1997_s0 + $0xc0] sm:$0xff]  ;;  %v1047_v37 = vld [vmem:[%s1997_s0 + $0xc8] sm:$0xff]  ;;  %v1052_v38 = vld [vmem:[%s1997_s0 + $0xd0] sm:$0xff] }
   0xa   :  { %v1057_v39 = vld [vmem:[%s1997_s0 + $0xd8] sm:$0xff]  ;;  %v114_v40 = vadd.f32 %v1047_v37, %v1042_v36  ;;  %v1066_v42 = vld [vmem:[%s1997_s0 + $0xe0] sm:$0xff]  ;;  %v1071_v43 = vld [vmem:[%s1997_s0 + $0xe8] sm:$0xff] }
   0xb   :  { %v117_v41 = vadd.f32 %v1057_v39, %v1052_v38  ;;  %v1076_v44 = vld [vmem:[%s1997_s0 + $0xf0] sm:$0xff]  ;;  %v1081_v45 = vld [vmem:[%s1997_s0 + $0xf8] sm:$0xff]  ;;  %v120_v46 = vadd.f32 %v1071_v43, %v1066_v42  ;;  %v1090_v48 = vld [vmem:[%s1997_s0 + $0x100] sm:$0xff] }
   0xc   :  { %91 = vadd.xlane.f32.xlu0 %v90_v16  ;;  %v123_v47 = vadd.f32 %v1081_v45, %v1076_v44  ;;  %v1095_v49 = vld [vmem:[%s1997_s0 + $0x108] sm:$0xff]  ;;  %v1100_v50 = vld [vmem:[%s1997_s0 + $0x110] sm:$0xff]  ;;  %v1105_v51 = vld [vmem:[%s1997_s0 + $0x118] sm:$0xff] }
   0xd   :  { %94 = vadd.xlane.f32.xlu1 %v93_v17  ;;  %v126_v52 = vadd.f32 %v1095_v49, %v1090_v48  ;;  %v129_v53 = vadd.f32 %v1105_v51, %v1100_v50  ;;  %v1114_v54 = vld [vmem:[%s1997_s0 + $0x120] sm:$0xff]  ;;  %v1119_v55 = vld [vmem:[%s1997_s0 + $0x128] sm:$0xff]  ;;  %v1124_v56 = vld [vmem:[%s1997_s0 + $0x130] sm:$0xff] }
   0xe   :  { %v1129_v57 = vld [vmem:[%s1997_s0 + $0x138] sm:$0xff]  ;;  %v132_v58 = vadd.f32 %v1119_v55, %v1114_v54  ;;  %v1138_v60 = vld [vmem:[%s1997_s0 + $0x140] sm:$0xff]  ;;  %v1143_v61 = vld [vmem:[%s1997_s0 + $0x148] sm:$0xff] }
   0xf   :  { %v135_v59 = vadd.f32 %v1129_v57, %v1124_v56  ;;  %v1148_v62 = vld [vmem:[%s1997_s0 + $0x150] sm:$0xff]  ;;  %v1153_v63 = vld [vmem:[%s1997_s0 + $0x158] sm:$0xff]  ;;  %v138_v3 = vadd.f32 %v1143_v61, %v1138_v60  ;;  %v1162_v10 = vld [vmem:[%s1997_s0 + $0x160] sm:$0xff] }
  0x10   :  { %97 = vadd.xlane.f32.xlu0 %v96_v22  ;;  %v141_v7 = vadd.f32 %v1153_v63, %v1148_v62  ;;  %v1167_v11 = vld [vmem:[%s1997_s0 + $0x168] sm:$0xff]  ;;  %v1172_v16 = vld [vmem:[%s1997_s0 + $0x170] sm:$0xff]  ;;  %v1177_v17 = vld [vmem:[%s1997_s0 + $0x178] sm:$0xff] }
  0x11   :  { %100 = vadd.xlane.f32.xlu1 %v99_v23  ;;  %v144_v22 = vadd.f32 %v1167_v11, %v1162_v10  ;;  %v147_v23 = vadd.f32 %v1177_v17, %v1172_v16 }
  0x14   :  { %103 = vadd.xlane.f32.xlu0 %v102_v28  ;;  %v1186_v28 = vld [vmem:[%s1997_s0 + $0x180] sm:$0xff] }
  0x15   :  { %106 = vadd.xlane.f32.xlu1 %v105_v29  ;;  %v1191_v29 = vld [vmem:[%s1997_s0 + $0x188] sm:$0xff] }
  0x18   :  { %109 = vadd.xlane.f32.xlu0 %v108_v34  ;;  %v1196_v34 = vld [vmem:[%s1997_s0 + $0x190] sm:$0xff] }
  0x19   :  { %112 = vadd.xlane.f32.xlu1 %v111_v35  ;;  %2037 = vst [vmem:[#allocation2_spill] sm:$0xff] %v1196_v34  ;;  %v1201_v35 = vld [vmem:[%s1997_s0 + $0x198] sm:$0xff] }
  0x1a   :  { %2038 = vst [vmem:[#allocation3_spill] sm:$0xff] %v1201_v35 }
  0x1c   :  { %115 = vadd.xlane.f32.xlu0 %v114_v40  ;;  %v150_v40 = vadd.f32 %v1191_v29, %v1186_v28 }
  0x1d   :  { %118 = vadd.xlane.f32.xlu1 %v117_v41  ;;  %v153_v41 = vadd.f32 %v1201_v35, %v1196_v34 }
  0x20   :  { %121 = vadd.xlane.f32.xlu0 %v120_v46  ;;  %v1210_v46 = vld [vmem:[%s1997_s0 + $0x1a0] sm:$0xff] }
  0x21   :  { %124 = vadd.xlane.f32.xlu1 %v123_v47  ;;  %2039 = vst [vmem:[#allocation4_spill] sm:$0xff] %v1210_v46  ;;  %v1215_v47 = vld [vmem:[%s1997_s0 + $0x1a8] sm:$0xff] }
  0x22   :  { %2040 = vst [vmem:[#allocation5_spill] sm:$0xff] %v1215_v47 }
  0x24   :  { %127 = vadd.xlane.f32.xlu0 %v126_v52  ;;  %v1220_v52 = vld [vmem:[%s1997_s0 + $0x1b0] sm:$0xff] }
  0x25   :  { %130 = vadd.xlane.f32.xlu1 %v129_v53  ;;  %2041 = vst [vmem:[#allocation6_spill] sm:$0xff] %v1220_v52  ;;  %v1225_v53 = vld [vmem:[%s1997_s0 + $0x1b8] sm:$0xff] }
  0x26   :  { %2042 = vst [vmem:[#allocation7_spill] sm:$0xff] %v1225_v53 }
  0x28   :  { %133 = vadd.xlane.f32.xlu0 %v132_v58  ;;  %v156_v58 = vadd.f32 %v1215_v47, %v1210_v46 }
  0x29   :  { %136 = vadd.xlane.f32.xlu1 %v135_v59  ;;  %v159_v59 = vadd.f32 %v1225_v53, %v1220_v52  ;;  %v1258_v53 = vld [vmem:[%s1997_s0 + $0x1e0] sm:$0xff]  ;;  %v1263_v52 = vld [vmem:[%s1997_s0 + $0x1e8] sm:$0xff] }
  0x2a   :  { %2047 = vst [vmem:[#allocation12_spill] sm:$0xff] %v1263_v52 }
  0x2c   :  { %139 = vadd.xlane.f32.xlu0 %v138_v3  ;;  %v1234_v3 = vld [vmem:[%s1997_s0 + $0x1c0] sm:$0xff] }
  0x2d   :  { %142 = vadd.xlane.f32.xlu1 %v141_v7  ;;  %2043 = vst [vmem:[#allocation8_spill] sm:$0xff] %v1234_v3  ;;  %v1239_v7 = vld [vmem:[%s1997_s0 + $0x1c8] sm:$0xff] }
  0x2e   :  { %2044 = vst [vmem:[#allocation9_spill] sm:$0xff] %v1239_v7 }
  0x30   :  { %145 = vadd.xlane.f32.xlu0 %v144_v22  ;;  %v1244_v22 = vld [vmem:[%s1997_s0 + $0x1d0] sm:$0xff] }
  0x31   :  { %148 = vadd.xlane.f32.xlu1 %v147_v23  ;;  %2045 = vst [vmem:[#allocation10_spill] sm:$0xff] %v1244_v22  ;;  %v1249_v23 = vld [vmem:[%s1997_s0 + $0x1d8] sm:$0xff] }
  0x32   :  { %2046 = vst [vmem:[#allocation11_spill] sm:$0xff] %v1249_v23 }
  0x34   :  { %151 = vadd.xlane.f32.xlu0 %v150_v40  ;;  %v162_v40 = vadd.f32 %v1239_v7, %v1234_v3 }
  0x35   :  { %154 = vadd.xlane.f32.xlu1 %v153_v41  ;;  %v165_v41 = vadd.f32 %v1249_v23, %v1244_v22  ;;  %v168_v23 = vadd.f32 %v1263_v52, %v1258_v53 }
  0x38   :  { %157 = vadd.xlane.f32.xlu0 %v156_v58  ;;  %v1268_v58 = vld [vmem:[%s1997_s0 + $0x1f0] sm:$0xff] }
  0x39   :  { %160 = vadd.xlane.f32.xlu1 %v159_v59  ;;  %v1273_v59 = vld [vmem:[%s1997_s0 + $0x1f8] sm:$0xff] }
  0x3a   :  { %2048 = vst [vmem:[#allocation13_spill] sm:$0xff] %v1273_v59  ;;  %v171_v22 = vadd.f32 %v1273_v59, %v1268_v58 }
  0x3c   :  { %163 = vadd.xlane.f32.xlu0 %v162_v40 }
  0x3d   :  { %166 = vadd.xlane.f32.xlu1 %v165_v41 }
  0x40   :  { %169 = vadd.xlane.f32.xlu0 %v168_v23 }
  0x41   :  { %172 = vadd.xlane.f32.xlu1 %v171_v22 }
  0x91   :  { %v80_v7 = vpop.xlane.xlu0 %79 }
  0x92   :  { %v175_v3 = vmul.f32 0.00390625, %v80_v7  ;;  %v86_v47 = vpop.xlane.xlu1 %85 }
  0x93   :  { %v177_v46 = vmul.f32 0.00390625, %v86_v47 }
  0x94   :  { %v1280_v35 = vsub.f32 %v898_v0, %v175_v3  ;;  %v1283_v34 = vsub.f32 %v903_v1, %v175_v3 }
  0x95   :  { %v1286_v40 = vsub.f32 %v908_v2, %v177_v46  ;;  %v1289_v41 = vsub.f32 %v915_v4, %v177_v46  ;;  %v83_v52 = vpop.xlane.xlu0 %82 }
  0x96   :  { %2049 = vst [vmem:[#allocation14_spill] sm:$0xff] %v1280_v35  ;;  %2050 = vst [vmem:[#allocation15_spill] sm:$0xff] %v1283_v34  ;;  %v176_v59 = vmul.f32 0.00390625, %v83_v52  ;;  %v89_v23 = vpop.xlane.xlu1 %88  ;;  %v271_v7 = vmul.f32 %v1280_v35, %v1280_v35  ;;  %v272_v47 = vmul.f32 %v1283_v34, %v1283_v34 }
  0x97   :  { %2051 = vst [vmem:[#allocation16_spill] sm:$0xff] %v1286_v40  ;;  %2052 = vst [vmem:[#allocation17_spill] sm:$0xff] %v1289_v41  ;;  %v178_v0 = vmul.f32 0.00390625, %v89_v23  ;;  %v275_v1 = vmul.f32 %v1286_v40, %v1286_v40  ;;  %v276_v2 = vmul.f32 %v1289_v41, %v1289_v41 }
  0x98   :  { %v1300_v3 = vsub.f32 %v920_v5, %v176_v59  ;;  %v1303_v4 = vsub.f32 %v925_v6, %v176_v59  ;;  %v335_v46 = vadd.f32 %v272_v47, %v271_v7 }
  0x99   :  { %v1306_v52 = vsub.f32 %v932_v8, %v178_v0  ;;  %v1309_v22 = vsub.f32 %v937_v9, %v178_v0  ;;  %v92_v23 = vpop.xlane.xlu0 %91  ;;  %v341_v35 = vadd.f32 %v276_v2, %v275_v1 }
  0x9a   :  { %v179_v34 = vmul.f32 0.00390625, %v92_v23  ;;  %336 = vadd.xlane.f32.xlu0 %v335_v46  ;;  %v95_v40 = vpop.xlane.xlu1 %94  ;;  %v273_v41 = vmul.f32 %v1300_v3, %v1300_v3  ;;  %v274_v5 = vmul.f32 %v1303_v4, %v1303_v4 }
  0x9b   :  { %v180_v6 = vmul.f32 0.00390625, %v95_v40  ;;  %v277_v59 = vmul.f32 %v1306_v52, %v1306_v52  ;;  %v278_v8 = vmul.f32 %v1309_v22, %v1309_v22 }
  0x9c   :  { %v1320_v9 = vsub.f32 %v946_v12, %v179_v34  ;;  %v1323_v7 = vsub.f32 %v951_v13, %v179_v34  ;;  %v338_v47 = vadd.f32 %v274_v5, %v273_v41 }
  0x9d   :  { %v1326_v0 = vsub.f32 %v956_v14, %v180_v6  ;;  %v1329_v1 = vsub.f32 %v961_v15, %v180_v6  ;;  %v98_v40 = vpop.xlane.xlu0 %97  ;;  %v344_v23 = vadd.f32 %v278_v8, %v277_v59 }
  0x9e   :  { %v181_v2 = vmul.f32 0.00390625, %v98_v40  ;;  %342 = vadd.xlane.f32.xlu0 %v341_v35  ;;  %339 = vadd.xlane.f32.xlu1 %v338_v47  ;;  %v101_v46 = vpop.xlane.xlu1 %100  ;;  %v279_v12 = vmul.f32 %v1320_v9, %v1320_v9  ;;  %v280_v13 = vmul.f32 %v1323_v7, %v1323_v7 }
  0x9f   :  { %v182_v34 = vmul.f32 0.00390625, %v101_v46  ;;  %v281_v14 = vmul.f32 %v1326_v0, %v1326_v0  ;;  %v282_v15 = vmul.f32 %v1329_v1, %v1329_v1 }
  0xa0   :  { %v1340_v41 = vsub.f32 %v970_v18, %v181_v2  ;;  %v1343_v35 = vsub.f32 %v975_v19, %v181_v2  ;;  %v347_v5 = vadd.f32 %v280_v13, %v279_v12 }
  0xa1   :  { %v1346_v6 = vsub.f32 %v980_v20, %v182_v34  ;;  %v1349_v59 = vsub.f32 %v985_v21, %v182_v34  ;;  %v104_v8 = vpop.xlane.xlu0 %103  ;;  %v350_v46 = vadd.f32 %v282_v15, %v281_v14 }
  0xa2   :  { %v183_v47 = vmul.f32 0.00390625, %v104_v8  ;;  %345 = vadd.xlane.f32.xlu1 %v344_v23  ;;  %348 = vadd.xlane.f32.xlu0 %v347_v5  ;;  %v107_v40 = vpop.xlane.xlu1 %106  ;;  %v283_v18 = vmul.f32 %v1340_v41, %v1340_v41  ;;  %v284_v19 = vmul.f32 %v1343_v35, %v1343_v35 }
  0xa3   :  { %v184_v2 = vmul.f32 0.00390625, %v107_v40  ;;  %v285_v20 = vmul.f32 %v1346_v6, %v1346_v6  ;;  %v286_v21 = vmul.f32 %v1349_v59, %v1349_v59 }
  0xa4   :  { %v1360_v12 = vsub.f32 %v994_v24, %v183_v47  ;;  %v1363_v23 = vsub.f32 %v999_v25, %v183_v47  ;;  %v353_v13 = vadd.f32 %v284_v19, %v283_v18 }
  0xa5   :  { %v1366_v34 = vsub.f32 %v1004_v26, %v184_v2  ;;  %v1369_v14 = vsub.f32 %v1009_v27, %v184_v2  ;;  %v110_v15 = vpop.xlane.xlu0 %109  ;;  %v356_v40 = vadd.f32 %v286_v21, %v285_v20 }
  0xa6   :  { %v185_v5 = vmul.f32 0.00390625, %v110_v15  ;;  %351 = vadd.xlane.f32.xlu1 %v350_v46  ;;  %354 = vadd.xlane.f32.xlu0 %v353_v13  ;;  %v113_v8 = vpop.xlane.xlu1 %112  ;;  %v287_v24 = vmul.f32 %v1360_v12, %v1360_v12  ;;  %v288_v25 = vmul.f32 %v1363_v23, %v1363_v23 }
  0xa7   :  { %v186_v47 = vmul.f32 0.00390625, %v113_v8  ;;  %v289_v26 = vmul.f32 %v1366_v34, %v1366_v34  ;;  %v290_v27 = vmul.f32 %v1369_v14, %v1369_v14 }
  0xa8   :  { %v1380_v18 = vsub.f32 %v1018_v30, %v185_v5  ;;  %v1383_v46 = vsub.f32 %v1023_v31, %v185_v5  ;;  %v359_v19 = vadd.f32 %v288_v25, %v287_v24 }
  0xa9   :  { %v1386_v2 = vsub.f32 %v1028_v32, %v186_v47  ;;  %v1389_v20 = vsub.f32 %v1033_v33, %v186_v47  ;;  %v116_v21 = vpop.xlane.xlu0 %115  ;;  %v362_v8 = vadd.f32 %v290_v27, %v289_v26 }
  0xaa   :  { %v187_v13 = vmul.f32 0.00390625, %v116_v21  ;;  %357 = vadd.xlane.f32.xlu1 %v356_v40  ;;  %360 = vadd.xlane.f32.xlu0 %v359_v19  ;;  %v119_v15 = vpop.xlane.xlu1 %118  ;;  %v291_v30 = vmul.f32 %v1380_v18, %v1380_v18  ;;  %v292_v31 = vmul.f32 %v1383_v46, %v1383_v46 }
  0xab   :  { %v188_v5 = vmul.f32 0.00390625, %v119_v15  ;;  %v293_v32 = vmul.f32 %v1386_v2, %v1386_v2  ;;  %v294_v33 = vmul.f32 %v1389_v20, %v1389_v20 }
  0xac   :  { %v1400_v24 = vsub.f32 %v1042_v36, %v187_v13  ;;  %v1403_v40 = vsub.f32 %v1047_v37, %v187_v13  ;;  %v365_v25 = vadd.f32 %v292_v31, %v291_v30 }
  0xad   :  { %v1406_v47 = vsub.f32 %v1052_v38, %v188_v5  ;;  %v1409_v26 = vsub.f32 %v1057_v39, %v188_v5  ;;  %v122_v27 = vpop.xlane.xlu0 %121  ;;  %v368_v15 = vadd.f32 %v294_v33, %v293_v32 }
  0xae   :  { %v189_v19 = vmul.f32 0.00390625, %v122_v27  ;;  %363 = vadd.xlane.f32.xlu1 %v362_v8  ;;  %366 = vadd.xlane.f32.xlu0 %v365_v25  ;;  %v125_v21 = vpop.xlane.xlu1 %124  ;;  %v295_v36 = vmul.f32 %v1400_v24, %v1400_v24  ;;  %v296_v37 = vmul.f32 %v1403_v40, %v1403_v40 }
  0xaf   :  { %v190_v13 = vmul.f32 0.00390625, %v125_v21  ;;  %v297_v38 = vmul.f32 %v1406_v47, %v1406_v47  ;;  %v298_v39 = vmul.f32 %v1409_v26, %v1409_v26 }
  0xb0   :  { %v1420_v30 = vsub.f32 %v1066_v42, %v189_v19  ;;  %v1423_v8 = vsub.f32 %v1071_v43, %v189_v19  ;;  %v371_v31 = vadd.f32 %v296_v37, %v295_v36 }
  0xb1   :  { %v1426_v5 = vsub.f32 %v1076_v44, %v190_v13  ;;  %v1429_v32 = vsub.f32 %v1081_v45, %v190_v13  ;;  %v128_v33 = vpop.xlane.xlu0 %127  ;;  %v374_v21 = vadd.f32 %v298_v39, %v297_v38 }
  0xb2   :  { %v191_v25 = vmul.f32 0.00390625, %v128_v33  ;;  %369 = vadd.xlane.f32.xlu1 %v368_v15  ;;  %372 = vadd.xlane.f32.xlu0 %v371_v31  ;;  %v131_v27 = vpop.xlane.xlu1 %130  ;;  %v299_v42 = vmul.f32 %v1420_v30, %v1420_v30  ;;  %v300_v43 = vmul.f32 %v1423_v8, %v1423_v8 }
  0xb3   :  { %v192_v19 = vmul.f32 0.00390625, %v131_v27  ;;  %v301_v44 = vmul.f32 %v1426_v5, %v1426_v5  ;;  %v302_v45 = vmul.f32 %v1429_v32, %v1429_v32 }
  0xb4   :  { %v1440_v36 = vsub.f32 %v1090_v48, %v191_v25  ;;  %v1443_v15 = vsub.f32 %v1095_v49, %v191_v25  ;;  %v377_v37 = vadd.f32 %v300_v43, %v299_v42 }
  0xb5   :  { %v1446_v13 = vsub.f32 %v1100_v50, %v192_v19  ;;  %v1449_v38 = vsub.f32 %v1105_v51, %v192_v19  ;;  %v134_v39 = vpop.xlane.xlu0 %133  ;;  %v380_v27 = vadd.f32 %v302_v45, %v301_v44 }
  0xb6   :  { %v193_v31 = vmul.f32 0.00390625, %v134_v39  ;;  %375 = vadd.xlane.f32.xlu1 %v374_v21  ;;  %378 = vadd.xlane.f32.xlu0 %v377_v37  ;;  %v137_v33 = vpop.xlane.xlu1 %136  ;;  %v303_v48 = vmul.f32 %v1440_v36, %v1440_v36  ;;  %v304_v49 = vmul.f32 %v1443_v15, %v1443_v15 }
  0xb7   :  { %v194_v25 = vmul.f32 0.00390625, %v137_v33  ;;  %v305_v50 = vmul.f32 %v1446_v13, %v1446_v13  ;;  %v306_v51 = vmul.f32 %v1449_v38, %v1449_v38 }
  0xb8   :  { %v1460_v42 = vsub.f32 %v1114_v54, %v193_v31  ;;  %v1463_v21 = vsub.f32 %v1119_v55, %v193_v31  ;;  %v383_v43 = vadd.f32 %v304_v49, %v303_v48 }
  0xb9   :  { %v1466_v19 = vsub.f32 %v1124_v56, %v194_v25  ;;  %v1469_v44 = vsub.f32 %v1129_v57, %v194_v25  ;;  %v140_v45 = vpop.xlane.xlu0 %139  ;;  %v386_v33 = vadd.f32 %v306_v51, %v305_v50 }
  0xba   :  { %v195_v37 = vmul.f32 0.00390625, %v140_v45  ;;  %381 = vadd.xlane.f32.xlu1 %v380_v27  ;;  %384 = vadd.xlane.f32.xlu0 %v383_v43  ;;  %v143_v39 = vpop.xlane.xlu1 %142  ;;  %v307_v54 = vmul.f32 %v1460_v42, %v1460_v42  ;;  %v308_v55 = vmul.f32 %v1463_v21, %v1463_v21 }
  0xbb   :  { %v196_v31 = vmul.f32 0.00390625, %v143_v39  ;;  %v309_v56 = vmul.f32 %v1466_v19, %v1466_v19  ;;  %v310_v57 = vmul.f32 %v1469_v44, %v1469_v44 }
  0xbc   :  { %v1480_v48 = vsub.f32 %v1138_v60, %v195_v37  ;;  %v1483_v27 = vsub.f32 %v1143_v61, %v195_v37  ;;  %v389_v49 = vadd.f32 %v308_v55, %v307_v54 }
  0xbd   :  { %v1486_v25 = vsub.f32 %v1148_v62, %v196_v31  ;;  %v1489_v50 = vsub.f32 %v1153_v63, %v196_v31  ;;  %v146_v51 = vpop.xlane.xlu0 %145  ;;  %v392_v39 = vadd.f32 %v310_v57, %v309_v56 }
  0xbe   :  { %v197_v43 = vmul.f32 0.00390625, %v146_v51  ;;  %387 = vadd.xlane.f32.xlu1 %v386_v33  ;;  %390 = vadd.xlane.f32.xlu0 %v389_v49  ;;  %v149_v45 = vpop.xlane.xlu1 %148  ;;  %v311_v60 = vmul.f32 %v1480_v48, %v1480_v48  ;;  %v312_v61 = vmul.f32 %v1483_v27, %v1483_v27 }
  0xbf   :  { %v198_v37 = vmul.f32 0.00390625, %v149_v45  ;;  %v313_v62 = vmul.f32 %v1486_v25, %v1486_v25  ;;  %v314_v63 = vmul.f32 %v1489_v50, %v1489_v50 }
  0xc0   :  { %v1500_v54 = vsub.f32 %v1162_v10, %v197_v43  ;;  %v1503_v33 = vsub.f32 %v1167_v11, %v197_v43  ;;  %v395_v55 = vadd.f32 %v312_v61, %v311_v60 }
  0xc1   :  { %v1506_v31 = vsub.f32 %v1172_v16, %v198_v37  ;;  %v1509_v56 = vsub.f32 %v1177_v17, %v198_v37  ;;  %v152_v57 = vpop.xlane.xlu0 %151  ;;  %v398_v45 = vadd.f32 %v314_v63, %v313_v62  ;;  %v2059_v37 = vld [vmem:[#allocation2_spill] sm:$0xff]  ;;  %v2061_v63 = vld [vmem:[#allocation3_spill] sm:$0xff] }
  0xc2   :  { %2053 = vst [vmem:[#allocation18_spill] sm:$0xff] %v1500_v54  ;;  %2054 = vst [vmem:[#allocation19_spill] sm:$0xff] %v1503_v33  ;;  %v199_v49 = vmul.f32 0.00390625, %v152_v57  ;;  %393 = vadd.xlane.f32.xlu1 %v392_v39  ;;  %396 = vadd.xlane.f32.xlu0 %v395_v55  ;;  %v155_v51 = vpop.xlane.xlu1 %154  ;;  %v315_v10 = vmul.f32 %v1500_v54, %v1500_v54  ;;  %v316_v11 = vmul.f32 %v1503_v33, %v1503_v33 }
  0xc3   :  { %2055 = vst [vmem:[#allocation20_spill] sm:$0xff] %v1506_v31  ;;  %2056 = vst [vmem:[#allocation21_spill] sm:$0xff] %v1509_v56  ;;  %v200_v43 = vmul.f32 0.00390625, %v155_v51  ;;  %v317_v16 = vmul.f32 %v1506_v31, %v1506_v31  ;;  %v318_v17 = vmul.f32 %v1509_v56, %v1509_v56 }
  0xc4   :  { %v1520_v60 = vsub.f32 %v1186_v28, %v199_v49  ;;  %v1523_v39 = vsub.f32 %v1191_v29, %v199_v49  ;;  %v401_v61 = vadd.f32 %v316_v11, %v315_v10 }
  0xc5   :  { %v1526_v62 = vsub.f32 %v2059_v37, %v200_v43  ;;  %v1529_v55 = vsub.f32 %v2061_v63, %v200_v43  ;;  %v158_v57 = vpop.xlane.xlu0 %157  ;;  %v404_v33 = vadd.f32 %v318_v17, %v317_v16  ;;  %v2063_v43 = vld [vmem:[#allocation4_spill] sm:$0xff]  ;;  %v2067_v17 = vld [vmem:[#allocation6_spill] sm:$0xff] }
  0xc6   :  { %2057 = vst [vmem:[#allocation22_spill] sm:$0xff] %v1520_v60  ;;  %2058 = vst [vmem:[#allocation23_spill] sm:$0xff] %v1523_v39  ;;  %v201_v51 = vmul.f32 0.00390625, %v158_v57  ;;  %399 = vadd.xlane.f32.xlu1 %v398_v45  ;;  %402 = vadd.xlane.f32.xlu0 %v401_v61  ;;  %v161_v31 = vpop.xlane.xlu1 %160  ;;  %v319_v28 = vmul.f32 %v1520_v60, %v1520_v60  ;;  %v320_v29 = vmul.f32 %v1523_v39, %v1523_v39  ;;  %v2065_v45 = vld [vmem:[#allocation5_spill] sm:$0xff]  ;;  %v2069_v57 = vld [vmem:[#allocation7_spill] sm:$0xff] }
  0xc7   :  { %2060 = vst [vmem:[#allocation2_spill] sm:$0xff] %v1526_v62  ;;  %2062 = vst [vmem:[#allocation3_spill] sm:$0xff] %v1529_v55  ;;  %v202_v49 = vmul.f32 0.00390625, %v161_v31  ;;  %v321_v10 = vmul.f32 %v1526_v62, %v1526_v62  ;;  %v322_v11 = vmul.f32 %v1529_v55, %v1529_v55 }
  0xc8   :  { %v1540_v37 = vsub.f32 %v2063_v43, %v201_v51  ;;  %v1543_v61 = vsub.f32 %v2065_v45, %v201_v51  ;;  %v407_v16 = vadd.f32 %v320_v29, %v319_v28 }
  0xc9   :  { %v1546_v63 = vsub.f32 %v2067_v17, %v202_v49  ;;  %v1549_v60 = vsub.f32 %v2069_v57, %v202_v49  ;;  %v164_v31 = vpop.xlane.xlu0 %163  ;;  %v410_v56 = vadd.f32 %v322_v11, %v321_v10  ;;  %v2071_v49 = vld [vmem:[#allocation8_spill] sm:$0xff]  ;;  %v2075_v11 = vld [vmem:[#allocation10_spill] sm:$0xff] }
  0xca   :  { %2064 = vst [vmem:[#allocation4_spill] sm:$0xff] %v1540_v37  ;;  %2066 = vst [vmem:[#allocation5_spill] sm:$0xff] %v1543_v61  ;;  %v203_v39 = vmul.f32 0.00390625, %v164_v31  ;;  %405 = vadd.xlane.f32.xlu1 %v404_v33  ;;  %408 = vadd.xlane.f32.xlu0 %v407_v16  ;;  %v167_v62 = vpop.xlane.xlu1 %166  ;;  %v323_v43 = vmul.f32 %v1540_v37, %v1540_v37  ;;  %v324_v51 = vmul.f32 %v1543_v61, %v1543_v61  ;;  %v2073_v33 = vld [vmem:[#allocation9_spill] sm:$0xff]  ;;  %v2077_v31 = vld [vmem:[#allocation11_spill] sm:$0xff] }
  0xcb   :  { %2068 = vst [vmem:[#allocation6_spill] sm:$0xff] %v1546_v63  ;;  %2070 = vst [vmem:[#allocation7_spill] sm:$0xff] %v1549_v60  ;;  %v204_v45 = vmul.f32 0.00390625, %v167_v62  ;;  %v325_v28 = vmul.f32 %v1546_v63, %v1546_v63  ;;  %v326_v29 = vmul.f32 %v1549_v60, %v1549_v60 }
  0xcc   :  { %v1560_v17 = vsub.f32 %v2071_v49, %v203_v39  ;;  %v1563_v16 = vsub.f32 %v2073_v33, %v203_v39  ;;  %v413_v10 = vadd.f32 %v324_v51, %v323_v43 }
  0xcd   :  { %v1566_v57 = vsub.f32 %v2075_v11, %v204_v45  ;;  %v1569_v37 = vsub.f32 %v2077_v31, %v204_v45  ;;  %v170_v62 = vpop.xlane.xlu0 %169  ;;  %v416_v55 = vadd.f32 %v326_v29, %v325_v28  ;;  %v2083_v11 = vld [vmem:[#allocation13_spill] sm:$0xff] }
  0xce   :  { %2072 = vst [vmem:[#allocation8_spill] sm:$0xff] %v1560_v17  ;;  %2074 = vst [vmem:[#allocation9_spill] sm:$0xff] %v1563_v16  ;;  %v205_v61 = vmul.f32 0.00390625, %v170_v62  ;;  %411 = vadd.xlane.f32.xlu1 %v410_v56  ;;  %414 = vadd.xlane.f32.xlu0 %v413_v10  ;;  %v173_v63 = vpop.xlane.xlu1 %172  ;;  %v327_v49 = vmul.f32 %v1560_v17, %v1560_v17  ;;  %v328_v39 = vmul.f32 %v1563_v16, %v1563_v16  ;;  %v2080_v56 = vld [vmem:[#allocation12_spill] sm:$0xff] }
  0xcf   :  { %2076 = vst [vmem:[#allocation10_spill] sm:$0xff] %v1566_v57  ;;  %2078 = vst [vmem:[#allocation11_spill] sm:$0xff] %v1569_v37  ;;  %v206_v33 = vmul.f32 0.00390625, %v173_v63  ;;  %v329_v43 = vmul.f32 %v1566_v57, %v1566_v57  ;;  %v330_v51 = vmul.f32 %v1569_v37, %v1569_v37 }
  0xd0   :  { %v1580_v45 = vsub.f32 %v1258_v53, %v205_v61  ;;  %v1583_v10 = vsub.f32 %v2080_v56, %v205_v61  ;;  %v419_v28 = vadd.f32 %v328_v39, %v327_v49 }
  0xd1   :  { %v1586_v29 = vsub.f32 %v1268_v58, %v206_v33  ;;  %v1589_v31 = vsub.f32 %v2083_v11, %v206_v33  ;;  %v422_v63 = vadd.f32 %v330_v51, %v329_v43  ;;  %v593_v43 = vlaneseq }
  0xd2   :  { %2079 = vst [vmem:[#allocation24_spill] sm:$0xff] %v1580_v45  ;;  %2081 = vst [vmem:[#allocation12_spill] sm:$0xff] %v1583_v10  ;;  %417 = vadd.xlane.f32.xlu1 %v416_v55  ;;  %420 = vadd.xlane.f32.xlu0 %v419_v28  ;;  %v331_v62 = vmul.f32 %v1580_v45, %v1580_v45  ;;  %v332_v53 = vmul.f32 %v1583_v10, %v1583_v10 }
  0xd3   :  { %2082 = vst [vmem:[#allocation25_spill] sm:$0xff] %v1586_v29  ;;  %2084 = vst [vmem:[#allocation13_spill] sm:$0xff] %v1589_v31  ;;  %v333_v61 = vmul.f32 %v1586_v29, %v1586_v29  ;;  %v334_v49 = vmul.f32 %v1589_v31, %v1589_v31  ;;  %v594_v45 = vshrl.u32 %v593_v43, 7 }
  0xd4   :  { %v425_v58 = vadd.f32 %v332_v53, %v331_v62 }
  0xd5   :  { %v428_v39 = vadd.f32 %v334_v49, %v333_v61  ;;  %v595_v53 = vsub.s32 0, %v594_v45  ;;  %v599_v61 = vsub.s32 1, %v594_v45  ;;  %v591_v49 = vld [vmem:[%s1998_s1] sm:$0x3] }
  0xd6   :  { %423 = vadd.xlane.f32.xlu1 %v422_v63  ;;  %426 = vadd.xlane.f32.xlu0 %v425_v58 }
  0xda   :  { %429 = vadd.xlane.f32.xlu1 %v428_v39 }
 0x127   :  { %v337_v55 = vpop.xlane.xlu0 %336 }
 0x128   :  { %v431_v33 = vmul.f32 0.00390625, %v337_v55 }
 0x12a   :  { %v463_v51 = vadd.f32 1e-12, %v431_v33 }
 0x12b   :  { %v340_v56 = vpop.xlane.xlu1 %339  ;;  %v343_v28 = vpop.xlane.xlu0 %342 }
 0x12c   :  { %811 = vrsqrt.f32 %v463_v51  ;;  %v432_v11 = vmul.f32 0.00390625, %v340_v56  ;;  %v433_v10 = vmul.f32 0.00390625, %v343_v28 }
 0x12e   :  { %v464_v37 = vadd.f32 1e-12, %v432_v11  ;;  %v465_v29 = vadd.f32 1e-12, %v433_v10  ;;  %v667_v10 = vld [vmem:[%s1999_s2] sm:$0x3] }
 0x12f   :  { %v346_v57 = vpop.xlane.xlu1 %345  ;;  %v349_v16 = vpop.xlane.xlu0 %348  ;;  %v1609_v56 = vrot.slane %v667_v10, %v595_v53  ;;  %v1611_v28 = vrot.slane %v667_v10, %v599_v61  ;;  %v2085_v11 = vld [vmem:[#allocation14_spill] sm:$0xff] }
 0x130   :  { %813 = vrsqrt.f32 %v464_v37  ;;  %v434_v62 = vmul.f32 0.00390625, %v346_v57  ;;  %v435_v63 = vmul.f32 0.00390625, %v349_v16  ;;  %v1605_v57 = vrot.slane %v591_v49, %v595_v53 }
 0x131   :  { %815 = vrsqrt.f32 %v465_v29  ;;  %v1607_v16 = vrot.slane %v591_v49, %v599_v61 }
 0x132   :  { %v466_v58 = vadd.f32 1e-12, %v434_v62  ;;  %v467_v39 = vadd.f32 1e-12, %v435_v63  ;;  %v2086_v63 = vld [vmem:[#allocation15_spill] sm:$0xff] }
 0x133   :  { %v352_v55 = vpop.xlane.xlu1 %351  ;;  %v355_v33 = vpop.xlane.xlu0 %354 }
 0x134   :  { %817 = vrsqrt.f32 %v466_v58  ;;  %v436_v43 = vmul.f32 0.00390625, %v352_v55  ;;  %v437_v37 = vmul.f32 0.00390625, %v355_v33 }
 0x135   :  { %819 = vrsqrt.f32 %v467_v39 }
 0x136   :  { %v812_v45 = vpop.eup %811  ;;  %v468_v29 = vadd.f32 1e-12, %v436_v43  ;;  %v469_v51 = vadd.f32 1e-12, %v437_v37 }
 0x137   :  { %v527_v62 = vmul.f32 %v812_v45, %v2085_v11  ;;  %v528_v31 = vmul.f32 %v812_v45, %v2086_v63  ;;  %v358_v17 = vpop.xlane.xlu1 %357  ;;  %v361_v58 = vpop.xlane.xlu0 %360  ;;  %v2087_v63 = vld [vmem:[#allocation16_spill] sm:$0xff] }
 0x138   :  { %821 = vrsqrt.f32 %v468_v29  ;;  %v438_v55 = vmul.f32 0.00390625, %v358_v17  ;;  %v439_v33 = vmul.f32 0.00390625, %v361_v58 }
 0x139   :  { %v603_v49 = vmul.f32 %v1605_v57, %v527_v62  ;;  %v604_v39 = vmul.f32 %v1607_v16, %v528_v31  ;;  %823 = vrsqrt.f32 %v469_v51  ;;  %v2088_v62 = vld [vmem:[#allocation17_spill] sm:$0xff] }
 0x13a   :  { %v814_v43 = vpop.eup %813  ;;  %v470_v37 = vadd.f32 1e-12, %v438_v55  ;;  %v471_v53 = vadd.f32 1e-12, %v439_v33 }
 0x13b   :  { %v816_v60 = vpop.eup %815  ;;  %v679_v61 = vadd.f32 %v1609_v56, %v603_v49  ;;  %v680_v10 = vadd.f32 %v1611_v28, %v604_v39  ;;  %v529_v45 = vmul.f32 %v814_v43, %v1300_v3  ;;  %v530_v11 = vmul.f32 %v814_v43, %v1303_v4  ;;  %v364_v29 = vpop.xlane.xlu1 %363 }
 0x13c   :  { %v367_v17 = vpop.xlane.xlu0 %366  ;;  %v531_v58 = vmul.f32 %v816_v60, %v2087_v63  ;;  %v532_v54 = vmul.f32 %v816_v60, %v2088_v62  ;;  %825 = vrsqrt.f32 %v470_v37  ;;  %v440_v31 = vmul.f32 0.00390625, %v364_v29 }
 0x13d   :  { %743 = vst [vmem:[%s2000_s3] sm:$0xff] %v679_v61  ;;  %744 = vst [vmem:[%s2000_s3 + $0x8] sm:$0xff] %v680_v10  ;;  %v605_v3 = vmul.f32 %v1605_v57, %v529_v45  ;;  %v606_v4 = vmul.f32 %v1607_v16, %v530_v11  ;;  %827 = vrsqrt.f32 %v471_v53  ;;  %v441_v51 = vmul.f32 0.00390625, %v367_v17 }
 0x13e   :  { %v818_v55 = vpop.eup %817  ;;  %v607_v33 = vmul.f32 %v1605_v57, %v531_v58  ;;  %v608_v60 = vmul.f32 %v1607_v16, %v532_v54  ;;  %v472_v49 = vadd.f32 1e-12, %v440_v31 }
 0x13f   :  { %v820_v39 = vpop.eup %819  ;;  %v681_v43 = vadd.f32 %v1609_v56, %v605_v3  ;;  %v682_v37 = vadd.f32 %v1611_v28, %v606_v4  ;;  %v533_v61 = vmul.f32 %v818_v55, %v1306_v52  ;;  %v534_v10 = vmul.f32 %v818_v55, %v1309_v22  ;;  %v370_v45 = vpop.xlane.xlu1 %369 }
 0x140   :  { %v373_v29 = vpop.xlane.xlu0 %372  ;;  %v683_v53 = vadd.f32 %v1609_v56, %v607_v33  ;;  %v684_v11 = vadd.f32 %v1611_v28, %v608_v60  ;;  %v535_v17 = vmul.f32 %v820_v39, %v1320_v9  ;;  %v536_v54 = vmul.f32 %v820_v39, %v1323_v7 }
 0x141   :  { %745 = vst [vmem:[%s2000_s3 + $0x10] sm:$0xff] %v681_v43  ;;  %746 = vst [vmem:[%s2000_s3 + $0x18] sm:$0xff] %v682_v37  ;;  %v609_v52 = vmul.f32 %v1605_v57, %v533_v61  ;;  %v610_v22 = vmul.f32 %v1607_v16, %v534_v10  ;;  %829 = vrsqrt.f32 %v472_v49  ;;  %v473_v63 = vadd.f32 1e-12, %v441_v51 }
 0x142   :  { %v822_v58 = vpop.eup %821  ;;  %747 = vst [vmem:[%s2000_s3 + $0x20] sm:$0xff] %v683_v53  ;;  %748 = vst [vmem:[%s2000_s3 + $0x28] sm:$0xff] %v684_v11  ;;  %v611_v9 = vmul.f32 %v1605_v57, %v535_v17  ;;  %v612_v7 = vmul.f32 %v1607_v16, %v536_v54  ;;  %v442_v62 = vmul.f32 0.00390625, %v370_v45  ;;  %v443_v31 = vmul.f32 0.00390625, %v373_v29 }
 0x143   :  { %v824_v3 = vpop.eup %823  ;;  %v685_v4 = vadd.f32 %v1609_v56, %v609_v52  ;;  %v686_v51 = vadd.f32 %v1611_v28, %v610_v22  ;;  %v537_v55 = vmul.f32 %v822_v58, %v1326_v0  ;;  %v538_v33 = vmul.f32 %v822_v58, %v1329_v1  ;;  %v376_v60 = vpop.xlane.xlu1 %375 }
 0x144   :  { %v379_v49 = vpop.xlane.xlu0 %378  ;;  %v687_v39 = vadd.f32 %v1609_v56, %v611_v9  ;;  %v688_v43 = vadd.f32 %v1611_v28, %v612_v7  ;;  %v539_v37 = vmul.f32 %v824_v3, %v1340_v41  ;;  %v540_v61 = vmul.f32 %v824_v3, %v1343_v35 }
 0x145   :  { %749 = vst [vmem:[%s2000_s3 + $0x30] sm:$0xff] %v685_v4  ;;  %750 = vst [vmem:[%s2000_s3 + $0x38] sm:$0xff] %v686_v51  ;;  %v613_v0 = vmul.f32 %v1605_v57, %v537_v55  ;;  %v614_v1 = vmul.f32 %v1607_v16, %v538_v33  ;;  %831 = vrsqrt.f32 %v473_v63  ;;  %v474_v10 = vadd.f32 1e-12, %v442_v62 }
 0x146   :  { %v826_v45 = vpop.eup %825  ;;  %751 = vst [vmem:[%s2000_s3 + $0x40] sm:$0xff] %v687_v39  ;;  %752 = vst [vmem:[%s2000_s3 + $0x48] sm:$0xff] %v688_v43  ;;  %v615_v41 = vmul.f32 %v1605_v57, %v539_v37  ;;  %v616_v35 = vmul.f32 %v1607_v16, %v540_v61  ;;  %v475_v29 = vadd.f32 1e-12, %v443_v31  ;;  %v444_v53 = vmul.f32 0.00390625, %v376_v60 }
 0x147   :  { %v828_v11 = vpop.eup %827  ;;  %v689_v17 = vadd.f32 %v1609_v56, %v613_v0  ;;  %v690_v54 = vadd.f32 %v1611_v28, %v614_v1  ;;  %v541_v52 = vmul.f32 %v826_v45, %v1346_v6  ;;  %v542_v22 = vmul.f32 %v826_v45, %v1349_v59  ;;  %v382_v63 = vpop.xlane.xlu1 %381 }
 0x148   :  { %v385_v58 = vpop.xlane.xlu0 %384  ;;  %v691_v9 = vadd.f32 %v1609_v56, %v615_v41  ;;  %v692_v7 = vadd.f32 %v1611_v28, %v616_v35  ;;  %v543_v62 = vmul.f32 %v828_v11, %v1360_v12  ;;  %v544_v31 = vmul.f32 %v828_v11, %v1363_v23 }
 0x149   :  { %753 = vst [vmem:[%s2000_s3 + $0x50] sm:$0xff] %v689_v17  ;;  %754 = vst [vmem:[%s2000_s3 + $0x58] sm:$0xff] %v690_v54  ;;  %v617_v6 = vmul.f32 %v1605_v57, %v541_v52  ;;  %v618_v59 = vmul.f32 %v1607_v16, %v542_v22  ;;  %833 = vrsqrt.f32 %v474_v10  ;;  %v476_v3 = vadd.f32 1e-12, %v444_v53 }
 0x14a   :  { %755 = vst [vmem:[%s2000_s3 + $0x60] sm:$0xff] %v691_v9  ;;  %756 = vst [vmem:[%s2000_s3 + $0x68] sm:$0xff] %v692_v7  ;;  %v619_v12 = vmul.f32 %v1605_v57, %v543_v62  ;;  %v620_v23 = vmul.f32 %v1607_v16, %v544_v31  ;;  %835 = vrsqrt.f32 %v475_v29  ;;  %v445_v4 = vmul.f32 0.00390625, %v379_v49 }
 0x14b   :  { %v830_v51 = vpop.eup %829  ;;  %v693_v55 = vadd.f32 %v1609_v56, %v617_v6  ;;  %v694_v33 = vadd.f32 %v1611_v28, %v618_v59  ;;  %837 = vrsqrt.f32 %v476_v3  ;;  %v446_v60 = vmul.f32 0.00390625, %v382_v63  ;;  %v388_v39 = vpop.xlane.xlu1 %387 }
 0x14c   :  { %v391_v43 = vpop.xlane.xlu0 %390  ;;  %v695_v37 = vadd.f32 %v1609_v56, %v619_v12  ;;  %v696_v61 = vadd.f32 %v1611_v28, %v620_v23  ;;  %v545_v0 = vmul.f32 %v830_v51, %v1366_v34  ;;  %v546_v1 = vmul.f32 %v830_v51, %v1369_v14 }
 0x14d   :  { %757 = vst [vmem:[%s2000_s3 + $0x70] sm:$0xff] %v693_v55  ;;  %758 = vst [vmem:[%s2000_s3 + $0x78] sm:$0xff] %v694_v33  ;;  %v477_v49 = vadd.f32 1e-12, %v445_v4  ;;  %v478_v10 = vadd.f32 1e-12, %v446_v60 }
 0x14e   :  { %v447_v45 = vmul.f32 0.00390625, %v385_v58  ;;  %v448_v41 = vmul.f32 0.00390625, %v388_v39  ;;  %759 = vst [vmem:[%s2000_s3 + $0x80] sm:$0xff] %v695_v37  ;;  %760 = vst [vmem:[%s2000_s3 + $0x88] sm:$0xff] %v696_v61  ;;  %v621_v34 = vmul.f32 %v1605_v57, %v545_v0  ;;  %v622_v14 = vmul.f32 %v1607_v16, %v546_v1 }
 0x14f   :  { %v449_v35 = vmul.f32 0.00390625, %v391_v43  ;;  %v832_v29 = vpop.eup %831  ;;  %839 = vrsqrt.f32 %v477_v49  ;;  %v394_v17 = vpop.xlane.xlu1 %393 }
 0x150   :  { %v479_v53 = vadd.f32 1e-12, %v447_v45  ;;  %v480_v11 = vadd.f32 1e-12, %v448_v41  ;;  %v397_v54 = vpop.xlane.xlu0 %396  ;;  %v697_v52 = vadd.f32 %v1609_v56, %v621_v34  ;;  %v698_v22 = vadd.f32 %v1611_v28, %v622_v14 }
 0x151   :  { %v547_v63 = vmul.f32 %v832_v29, %v1380_v18  ;;  %v548_v58 = vmul.f32 %v832_v29, %v1383_v46  ;;  %841 = vrsqrt.f32 %v478_v10  ;;  %v481_v9 = vadd.f32 1e-12, %v449_v35 }
 0x152   :  { %v450_v7 = vmul.f32 0.00390625, %v394_v17  ;;  %v451_v62 = vmul.f32 0.00390625, %v397_v54  ;;  %761 = vst [vmem:[%s2000_s3 + $0x90] sm:$0xff] %v697_v52  ;;  %762 = vst [vmem:[%s2000_s3 + $0x98] sm:$0xff] %v698_v22  ;;  %843 = vrsqrt.f32 %v479_v53 }
 0x153   :  { %v623_v31 = vmul.f32 %v1605_v57, %v547_v63  ;;  %v624_v6 = vmul.f32 %v1607_v16, %v548_v58  ;;  %v834_v18 = vpop.eup %833  ;;  %845 = vrsqrt.f32 %v480_v11  ;;  %v400_v3 = vpop.xlane.xlu1 %399 }
 0x154   :  { %v482_v46 = vadd.f32 1e-12, %v450_v7  ;;  %v483_v59 = vadd.f32 1e-12, %v451_v62  ;;  %v403_v12 = vpop.xlane.xlu0 %402  ;;  %v836_v23 = vpop.eup %835  ;;  %v549_v55 = vmul.f32 %v834_v18, %v1386_v2  ;;  %v550_v33 = vmul.f32 %v834_v18, %v1389_v20 }
 0x155   :  { %v699_v4 = vadd.f32 %v1609_v56, %v623_v31  ;;  %v700_v51 = vadd.f32 %v1611_v28, %v624_v6  ;;  %v838_v60 = vpop.eup %837  ;;  %v551_v39 = vmul.f32 %v836_v23, %v1400_v24  ;;  %v552_v43 = vmul.f32 %v836_v23, %v1403_v40 }
 0x156   :  { %847 = vrsqrt.f32 %v481_v9  ;;  %v452_v37 = vmul.f32 0.00390625, %v400_v3  ;;  %v625_v61 = vmul.f32 %v1605_v57, %v549_v55  ;;  %v626_v2 = vmul.f32 %v1607_v16, %v550_v33 }
 0x157   :  { %763 = vst [vmem:[%s2000_s3 + $0xa0] sm:$0xff] %v699_v4  ;;  %764 = vst [vmem:[%s2000_s3 + $0xa8] sm:$0xff] %v700_v51  ;;  %v553_v20 = vmul.f32 %v838_v60, %v1406_v47  ;;  %v554_v24 = vmul.f32 %v838_v60, %v1409_v26  ;;  %v627_v40 = vmul.f32 %v1605_v57, %v551_v39  ;;  %849 = vrsqrt.f32 %v482_v46  ;;  %v406_v49 = vpop.xlane.xlu1 %405 }
 0x158   :  { %v628_v0 = vmul.f32 %v1607_v16, %v552_v43  ;;  %v484_v1 = vadd.f32 1e-12, %v452_v37  ;;  %v701_v10 = vadd.f32 %v1609_v56, %v625_v61  ;;  %v702_v45 = vadd.f32 %v1611_v28, %v626_v2  ;;  %v409_v14 = vpop.xlane.xlu0 %408 }
 0x159   :  { %v629_v41 = vmul.f32 %v1605_v57, %v553_v20  ;;  %v630_v34 = vmul.f32 %v1607_v16, %v554_v24  ;;  %v840_v35 = vpop.eup %839  ;;  %v703_v47 = vadd.f32 %v1609_v56, %v627_v40  ;;  %851 = vrsqrt.f32 %v483_v59 }
 0x15a   :  { %v704_v26 = vadd.f32 %v1611_v28, %v628_v0  ;;  %v453_v29 = vmul.f32 0.00390625, %v403_v12  ;;  %765 = vst [vmem:[%s2000_s3 + $0xb0] sm:$0xff] %v701_v10  ;;  %766 = vst [vmem:[%s2000_s3 + $0xb8] sm:$0xff] %v702_v45  ;;  %v555_v17 = vmul.f32 %v840_v35, %v1420_v30  ;;  %v556_v54 = vmul.f32 %v840_v35, %v1423_v8 }
 0x15b   :  { %v705_v53 = vadd.f32 %v1609_v56, %v629_v41  ;;  %v706_v11 = vadd.f32 %v1611_v28, %v630_v34  ;;  %v842_v52 = vpop.eup %841  ;;  %767 = vst [vmem:[%s2000_s3 + $0xc0] sm:$0xff] %v703_v47  ;;  %853 = vrsqrt.f32 %v484_v1  ;;  %v454_v63 = vmul.f32 0.00390625, %v406_v49  ;;  %v412_v9 = vpop.xlane.xlu1 %411 }
 0x15c   :  { %768 = vst [vmem:[%s2000_s3 + $0xc8] sm:$0xff] %v704_v26  ;;  %v485_v22 = vadd.f32 1e-12, %v453_v29  ;;  %v455_v58 = vmul.f32 0.00390625, %v409_v14  ;;  %v844_v7 = vpop.eup %843  ;;  %v631_v30 = vmul.f32 %v1605_v57, %v555_v17  ;;  %v632_v8 = vmul.f32 %v1607_v16, %v556_v54  ;;  %v415_v51 = vpop.xlane.xlu0 %414 }
 0x15d   :  { %769 = vst [vmem:[%s2000_s3 + $0xd0] sm:$0xff] %v705_v53  ;;  %770 = vst [vmem:[%s2000_s3 + $0xd8] sm:$0xff] %v706_v11  ;;  %v557_v62 = vmul.f32 %v842_v52, %v1426_v5  ;;  %v558_v31 = vmul.f32 %v842_v52, %v1429_v32  ;;  %v846_v6 = vpop.eup %845  ;;  %v559_v18 = vmul.f32 %v844_v7, %v1440_v36  ;;  %v486_v59 = vadd.f32 1e-12, %v454_v63 }
 0x15e   :  { %v560_v46 = vmul.f32 %v844_v7, %v1443_v15  ;;  %855 = vrsqrt.f32 %v485_v22  ;;  %v707_v3 = vadd.f32 %v1609_v56, %v631_v30  ;;  %v708_v12 = vadd.f32 %v1611_v28, %v632_v8  ;;  %v2090_v7 = vld [vmem:[#allocation19_spill] sm:$0xff] }
 0x15f   :  { %v633_v23 = vmul.f32 %v1605_v57, %v557_v62  ;;  %v634_v4 = vmul.f32 %v1607_v16, %v558_v31  ;;  %v635_v5 = vmul.f32 %v1605_v57, %v559_v18  ;;  %v561_v36 = vmul.f32 %v846_v6, %v1446_v13  ;;  %v418_v37 = vpop.xlane.xlu1 %417 }
 0x160   :  { %v848_v55 = vpop.eup %847  ;;  %v636_v32 = vmul.f32 %v1607_v16, %v560_v46  ;;  %v562_v15 = vmul.f32 %v846_v6, %v1449_v38  ;;  %771 = vst [vmem:[%s2000_s3 + $0xe0] sm:$0xff] %v707_v3  ;;  %772 = vst [vmem:[%s2000_s3 + $0xe8] sm:$0xff] %v708_v12  ;;  %857 = vrsqrt.f32 %v486_v59  ;;  %v487_v10 = vadd.f32 1e-12, %v455_v58  ;;  %v421_v34 = vpop.xlane.xlu0 %420  ;;  %v2089_v58 = vld [vmem:[#allocation18_spill] sm:$0xff] }
 0x161   :  { %v709_v33 = vadd.f32 %v1609_v56, %v633_v23  ;;  %v710_v60 = vadd.f32 %v1611_v28, %v634_v4  ;;  %v563_v39 = vmul.f32 %v848_v55, %v1460_v42  ;;  %v564_v43 = vmul.f32 %v848_v55, %v1463_v21  ;;  %v850_v13 = vpop.eup %849 }
 0x162   :  { %v711_v38 = vadd.f32 %v1609_v56, %v635_v5  ;;  %v712_v61 = vadd.f32 %v1611_v28, %v636_v32  ;;  %v637_v2 = vmul.f32 %v1605_v57, %v561_v36  ;;  %v638_v20 = vmul.f32 %v1607_v16, %v562_v15 }
 0x163   :  { %773 = vst [vmem:[%s2000_s3 + $0xf0] sm:$0xff] %v709_v33  ;;  %774 = vst [vmem:[%s2000_s3 + $0xf8] sm:$0xff] %v710_v60  ;;  %v639_v42 = vmul.f32 %v1605_v57, %v563_v39  ;;  %v640_v21 = vmul.f32 %v1607_v16, %v564_v43  ;;  %v565_v24 = vmul.f32 %v850_v13, %v1466_v19  ;;  %v852_v0 = vpop.eup %851  ;;  %859 = vrsqrt.f32 %v487_v10  ;;  %v424_v17 = vpop.xlane.xlu1 %423  ;;  %v2091_v60 = vld [vmem:[#allocation20_spill] sm:$0xff]  ;;  %v2092_v43 = vld [vmem:[#allocation21_spill] sm:$0xff] }
 0x164   :  { %v566_v40 = vmul.f32 %v850_v13, %v1469_v44  ;;  %775 = vst [vmem:[%s2000_s3 + $0x100] sm:$0xff] %v711_v38  ;;  %776 = vst [vmem:[%s2000_s3 + $0x108] sm:$0xff] %v712_v61  ;;  %v713_v1 = vadd.f32 %v1609_v56, %v637_v2  ;;  %v714_v49 = vadd.f32 %v1611_v28, %v638_v20  ;;  %v456_v26 = vmul.f32 0.00390625, %v412_v9  ;;  %v427_v3 = vpop.xlane.xlu0 %426 }
 0x165   :  { %v715_v45 = vadd.f32 %v1609_v56, %v639_v42  ;;  %v716_v19 = vadd.f32 %v1611_v28, %v640_v21  ;;  %v641_v44 = vmul.f32 %v1605_v57, %v565_v24  ;;  %v854_v14 = vpop.eup %853  ;;  %v567_v35 = vmul.f32 %v852_v0, %v1480_v48  ;;  %v2093_v42 = vld [vmem:[#allocation22_spill] sm:$0xff]  ;;  %v2094_v24 = vld [vmem:[#allocation23_spill] sm:$0xff] }
 0x166   :  { %v642_v41 = vmul.f32 %v1607_v16, %v566_v40  ;;  %777 = vst [vmem:[%s2000_s3 + $0x110] sm:$0xff] %v713_v1  ;;  %778 = vst [vmem:[%s2000_s3 + $0x118] sm:$0xff] %v714_v49  ;;  %v568_v47 = vmul.f32 %v852_v0, %v1483_v27  ;;  %v569_v11 = vmul.f32 %v854_v14, %v1486_v25  ;;  %v488_v22 = vadd.f32 1e-12, %v456_v26 }
 0x167   :  { %779 = vst [vmem:[%s2000_s3 + $0x120] sm:$0xff] %v715_v45  ;;  %780 = vst [vmem:[%s2000_s3 + $0x128] sm:$0xff] %v716_v19  ;;  %v717_v29 = vadd.f32 %v1609_v56, %v641_v44  ;;  %v570_v48 = vmul.f32 %v854_v14, %v1489_v50  ;;  %v643_v54 = vmul.f32 %v1605_v57, %v567_v35  ;;  %v457_v63 = vmul.f32 0.00390625, %v415_v51  ;;  %v430_v5 = vpop.xlane.xlu1 %429  ;;  %v2095_v14 = vld [vmem:[#allocation2_spill] sm:$0xff] }
 0x168   :  { %v718_v53 = vadd.f32 %v1611_v28, %v642_v41  ;;  %v856_v27 = vpop.eup %855  ;;  %v644_v52 = vmul.f32 %v1607_v16, %v568_v47  ;;  %v645_v25 = vmul.f32 %v1605_v57, %v569_v11  ;;  %861 = vrsqrt.f32 %v488_v22  ;;  %v2096_v47 = vld [vmem:[#allocation3_spill] sm:$0xff] }
 0x169   :  { %781 = vst [vmem:[%s2000_s3 + $0x130] sm:$0xff] %v717_v29  ;;  %v646_v50 = vmul.f32 %v1607_v16, %v570_v48  ;;  %v571_v9 = vmul.f32 %v856_v27, %v2089_v58  ;;  %v572_v30 = vmul.f32 %v856_v27, %v2090_v7  ;;  %v719_v8 = vadd.f32 %v1609_v56, %v643_v54  ;;  %v2097_v48 = vld [vmem:[#allocation4_spill] sm:$0xff]  ;;  %v2098_v27 = vld [vmem:[#allocation5_spill] sm:$0xff]  ;;  %v2099_v7 = vld [vmem:[#allocation6_spill] sm:$0xff] }
 0x16a   :  { %782 = vst [vmem:[%s2000_s3 + $0x138] sm:$0xff] %v718_v53  ;;  %v720_v62 = vadd.f32 %v1611_v28, %v644_v52  ;;  %v489_v31 = vadd.f32 1e-12, %v457_v63  ;;  %v721_v6 = vadd.f32 %v1609_v56, %v645_v25  ;;  %v458_v12 = vmul.f32 0.00390625, %v418_v37  ;;  %v858_v32 = vpop.eup %857 }
 0x16b   :  { %v722_v18 = vadd.f32 %v1611_v28, %v646_v50  ;;  %v647_v46 = vmul.f32 %v1605_v57, %v571_v9  ;;  %v648_v59 = vmul.f32 %v1607_v16, %v572_v30  ;;  %783 = vst [vmem:[%s2000_s3 + $0x140] sm:$0xff] %v719_v8  ;;  %v459_v23 = vmul.f32 0.00390625, %v421_v34  ;;  %v2100_v8 = vld [vmem:[#allocation7_spill] sm:$0xff] }
 0x16c   :  { %784 = vst [vmem:[%s2000_s3 + $0x148] sm:$0xff] %v720_v62  ;;  %863 = vrsqrt.f32 %v489_v31  ;;  %v460_v4 = vmul.f32 0.00390625, %v424_v17  ;;  %785 = vst [vmem:[%s2000_s3 + $0x150] sm:$0xff] %v721_v6  ;;  %v490_v36 = vadd.f32 1e-12, %v458_v12  ;;  %v461_v33 = vmul.f32 0.00390625, %v427_v3 }
 0x16d   :  { %786 = vst [vmem:[%s2000_s3 + $0x158] sm:$0xff] %v722_v18  ;;  %v723_v51 = vadd.f32 %v1609_v56, %v647_v46  ;;  %v724_v55 = vadd.f32 %v1611_v28, %v648_v59  ;;  %v491_v15 = vadd.f32 1e-12, %v459_v23  ;;  %v573_v39 = vmul.f32 %v858_v32, %v2091_v60  ;;  %v860_v13 = vpop.eup %859  ;;  %v2101_v46 = vld [vmem:[#allocation8_spill] sm:$0xff]  ;;  %v2102_v3 = vld [vmem:[#allocation9_spill] sm:$0xff] }
 0x16e   :  { %v574_v37 = vmul.f32 %v858_v32, %v2092_v43  ;;  %865 = vrsqrt.f32 %v490_v36  ;;  %v492_v38 = vadd.f32 1e-12, %v460_v4  ;;  %v462_v61 = vmul.f32 0.00390625, %v430_v5  ;;  %v2103_v36 = vld [vmem:[#allocation10_spill] sm:$0xff] }
 0x16f   :  { %787 = vst [vmem:[%s2000_s3 + $0x160] sm:$0xff] %v723_v51  ;;  %788 = vst [vmem:[%s2000_s3 + $0x168] sm:$0xff] %v724_v55  ;;  %v649_v2 = vmul.f32 %v1605_v57, %v573_v39  ;;  %v575_v21 = vmul.f32 %v860_v13, %v2093_v42  ;;  %v576_v40 = vmul.f32 %v860_v13, %v2094_v24  ;;  %867 = vrsqrt.f32 %v491_v15 }
 0x170   :  { %v650_v20 = vmul.f32 %v1607_v16, %v574_v37  ;;  %v493_v0 = vadd.f32 1e-12, %v461_v33  ;;  %869 = vrsqrt.f32 %v492_v38  ;;  %v494_v44 = vadd.f32 1e-12, %v462_v61  ;;  %v2104_v33 = vld [vmem:[#allocation11_spill] sm:$0xff]  ;;  %v2105_v37 = vld [vmem:[#allocation24_spill] sm:$0xff] }
 0x171   :  { %v725_v1 = vadd.f32 %v1609_v56, %v649_v2  ;;  %v651_v10 = vmul.f32 %v1605_v57, %v575_v21  ;;  %v652_v45 = vmul.f32 %v1607_v16, %v576_v40  ;;  %v2106_v38 = vld [vmem:[#allocation12_spill] sm:$0xff]  ;;  %v2107_v40 = vld [vmem:[#allocation25_spill] sm:$0xff] }
 0x172   :  { %v726_v49 = vadd.f32 %v1611_v28, %v650_v20  ;;  %v862_v19 = vpop.eup %861  ;;  %871 = vrsqrt.f32 %v493_v0 }
 0x173   :  { %789 = vst [vmem:[%s2000_s3 + $0x170] sm:$0xff] %v725_v1  ;;  %v727_v41 = vadd.f32 %v1609_v56, %v651_v10  ;;  %v728_v34 = vadd.f32 %v1611_v28, %v652_v45  ;;  %v577_v35 = vmul.f32 %v862_v19, %v2095_v14  ;;  %v578_v26 = vmul.f32 %v862_v19, %v2096_v47  ;;  %v2108_v1 = vld [vmem:[#allocation13_spill] sm:$0xff] }
 0x174   :  { %790 = vst [vmem:[%s2000_s3 + $0x178] sm:$0xff] %v726_v49  ;;  %873 = vrsqrt.f32 %v494_v44 }
 0x175   :  { %791 = vst [vmem:[%s2000_s3 + $0x180] sm:$0xff] %v727_v41  ;;  %792 = vst [vmem:[%s2000_s3 + $0x188] sm:$0xff] %v728_v34  ;;  %v653_v53 = vmul.f32 %v1605_v57, %v577_v35  ;;  %v654_v11 = vmul.f32 %v1607_v16, %v578_v26 }
 0x176   :  { %v864_v29 = vpop.eup %863 }
 0x177   :  { %v579_v17 = vmul.f32 %v864_v29, %v2097_v48  ;;  %v580_v54 = vmul.f32 %v864_v29, %v2098_v27  ;;  %v729_v52 = vadd.f32 %v1609_v56, %v653_v53  ;;  %v730_v22 = vadd.f32 %v1611_v28, %v654_v11 }
 0x178   :  { %v866_v50 = vpop.eup %865 }
 0x179   :  { %v655_v63 = vmul.f32 %v1605_v57, %v579_v17  ;;  %v656_v25 = vmul.f32 %v1607_v16, %v580_v54  ;;  %793 = vst [vmem:[%s2000_s3 + $0x190] sm:$0xff] %v729_v52  ;;  %794 = vst [vmem:[%s2000_s3 + $0x198] sm:$0xff] %v730_v22  ;;  %v581_v30 = vmul.f32 %v866_v50, %v2099_v7  ;;  %v868_v31 = vpop.eup %867 }
 0x17a   :  { %v582_v62 = vmul.f32 %v866_v50, %v2100_v8  ;;  %v583_v59 = vmul.f32 %v868_v31, %v2101_v46  ;;  %v584_v12 = vmul.f32 %v868_v31, %v2102_v3  ;;  %v870_v23 = vpop.eup %869 }
 0x17b   :  { %v731_v58 = vadd.f32 %v1609_v56, %v655_v63  ;;  %v732_v9 = vadd.f32 %v1611_v28, %v656_v25  ;;  %v657_v6 = vmul.f32 %v1605_v57, %v581_v30  ;;  %v585_v15 = vmul.f32 %v870_v23, %v2103_v36 }
 0x17c   :  { %v658_v18 = vmul.f32 %v1607_v16, %v582_v62  ;;  %v659_v55 = vmul.f32 %v1605_v57, %v583_v59  ;;  %v660_v5 = vmul.f32 %v1607_v16, %v584_v12  ;;  %v872_v32 = vpop.eup %871  ;;  %v586_v60 = vmul.f32 %v870_v23, %v2104_v33 }
 0x17d   :  { %795 = vst [vmem:[%s2000_s3 + $0x1a0] sm:$0xff] %v731_v58  ;;  %796 = vst [vmem:[%s2000_s3 + $0x1a8] sm:$0xff] %v732_v9  ;;  %v733_v4 = vadd.f32 %v1609_v56, %v657_v6  ;;  %v587_v13 = vmul.f32 %v872_v32, %v2105_v37  ;;  %v588_v61 = vmul.f32 %v872_v32, %v2106_v38 }
 0x17e   :  { %v734_v51 = vadd.f32 %v1611_v28, %v658_v18  ;;  %v735_v39 = vadd.f32 %v1609_v56, %v659_v55  ;;  %v736_v43 = vadd.f32 %v1611_v28, %v660_v5  ;;  %v874_v2 = vpop.eup %873  ;;  %v661_v20 = vmul.f32 %v1605_v57, %v585_v15 }
 0x17f   :  { %797 = vst [vmem:[%s2000_s3 + $0x1b0] sm:$0xff] %v733_v4  ;;  %v662_v42 = vmul.f32 %v1607_v16, %v586_v60  ;;  %v663_v21 = vmul.f32 %v1605_v57, %v587_v13  ;;  %v664_v24 = vmul.f32 %v1607_v16, %v588_v61  ;;  %v589_v0 = vmul.f32 %v874_v2, %v2107_v40 }
 0x180   :  { %798 = vst [vmem:[%s2000_s3 + $0x1b8] sm:$0xff] %v734_v51  ;;  %799 = vst [vmem:[%s2000_s3 + $0x1c0] sm:$0xff] %v735_v39  ;;  %v590_v49 = vmul.f32 %v874_v2, %v2108_v1  ;;  %v737_v10 = vadd.f32 %v1609_v56, %v661_v20 }
 0x181   :  { %800 = vst [vmem:[%s2000_s3 + $0x1c8] sm:$0xff] %v736_v43  ;;  %v738_v45 = vadd.f32 %v1611_v28, %v662_v42  ;;  %v739_v19 = vadd.f32 %v1609_v56, %v663_v21  ;;  %v740_v44 = vadd.f32 %v1611_v28, %v664_v24  ;;  %v665_v41 = vmul.f32 %v1605_v57, %v589_v0 }
 0x182   :  { %v666_v34 = vmul.f32 %v1607_v16, %v590_v49  ;;  %801 = vst [vmem:[%s2000_s3 + $0x1d0] sm:$0xff] %v737_v10 }
 0x183   :  { %802 = vst [vmem:[%s2000_s3 + $0x1d8] sm:$0xff] %v738_v45  ;;  %803 = vst [vmem:[%s2000_s3 + $0x1e0] sm:$0xff] %v739_v19  ;;  %v741_v57 = vadd.f32 %v1609_v56, %v665_v41 }
 0x184   :  { %804 = vst [vmem:[%s2000_s3 + $0x1e8] sm:$0xff] %v740_v44  ;;  %v742_v16 = vadd.f32 %v1611_v28, %v666_v34 }
 0x185   :  { %805 = vst [vmem:[%s2000_s3 + $0x1f0] sm:$0xff] %v741_v57 }
 0x186   :  { %806 = vst [vmem:[%s2000_s3 + $0x1f8] sm:$0xff] %v742_v16 }

// kernel: verb_model_bert_forward.11
= control target key start
LH: loop header
LB: loop body
LE: loop exit
PB: predicated region body
PF: predicated region fallthrough
CT: control target
= control target key end

     0   :  { %s3396_s0 = inlined_call_operand.vmem [shape: bf16[2,128,768], index: 0, kind: input, shape index: {}, may-alias: {0,1,2}]   ;;  %s3397_s1 = inlined_call_operand.vmem [shape: bf16[2,128,768], index: 1, kind: input, shape index: {}, may-alias: {0,1,2}]   ;;  %s3398_s2 = inlined_call_operand.vmem [shape: bf16[2,128,768], index: 2, kind: input, shape index: {}, may-alias: {0,1,2}]   ;;  %s3399_s3 = inlined_call_operand.vmem [shape: f32[2,1,128], index: 3, kind: input, shape index: {}]   ;;  %s3400_s4 = inlined_call_operand.vmem [shape: bf16[2,128,256], index: 4, kind: output, shape index: {}]  }
   0x1   :  { %3402 = sst [smem:[#allocation11_spill]] %s3400_s4 }
   0x2   :  { %s2675_s15 = smov 0   ;;  %s2677_s16 = smov 0  }
   0x3   :  { %s2679_s17 = smov 0   ;;  %s2681_s18 = smov 0  }
   0x4   :  { %s2683_s19 = smov 0   ;;  %s2685_s20 = smov 0  }
   0x5   :  { %s2687_s21 = smov 0   ;;  %s2689_s22 = smov 0  }
   0x6   :  { %s2691_s23 = smov 0   ;;  %s2693_s24 = smov 0  }
   0x7   :  { %s2695_s25 = smov 0  }
   0x8 LB: > { %3403 = sst [smem:[#allocation9_spill]] %s2629_s21  ;;  %s36_s27 = sadd.s32 1, %s2637_s23  ;;  %s2645_s25 = sphi %s2695_s25, %s14_s25   ;;  %s2641_s24 = sphi %s2693_s24, %s3436_s24   ;;  %s2637_s23 = sphi %s2691_s23, %s3435_s23   ;;  %s2633_s22 = sphi %s2689_s22, %s3434_s22   ;;  %s2629_s21 = sphi %s2687_s21, %s3433_s21   ;;  %s2625_s20 = sphi %s2685_s20, %s3432_s20   ;;  %s2621_s19 = sphi %s2683_s19, %s3431_s19   ;;  %s2617_s18 = sphi %s2681_s18, %s3430_s18   ;;  %s2613_s17 = sphi %s2679_s17, %s3429_s17   ;;  %s2609_s16 = sphi %s2677_s16, %s3428_s16   ;;  %s2605_s15 = sphi %s2675_s15, %s3427_s15  }
   0x9   : > { %p38_p0 = scmp.ge.s32.totalorder %s36_s27, 2  ;;  %s40_s28 = sadd.s32 1, %s2641_s24 }
   0xa   : > { %s51_s29 = sadd.s32 1, %s2625_s20  ;;  %p58_p1 = scmp.ne.s32.totalorder %s2625_s20, %s2621_s19 }
   0xb   : > { %s3438_s27 = smov (%p38_p0, %s36_s27), 0  ;;  %s3440_s28 = smov (!%p38_p0, %s40_s28), %s2641_s24 }
   0xc   : > { %s47_s30 = ssub.s32 %s2637_s23, %s3438_s27  ;;  %p59_p2 = scmp.eq.s32.totalorder %s2645_s25, 0 }
   0xd   : > { %p42_p3 = scmp.ge.s32.totalorder %s3440_s28, 2  ;;  %s74_s5 = sadd.s32 2, %s2637_s23 }
   0xe   : > { %p2748_p4 = por %p59_p2, %p58_p1  ;;  %s75_s7 = sadd.s32 2, %s3438_s27 }
   0xf   : > { %s3442_s28 = smov (%p42_p3, %s3440_s28), 0  ;;  %s79_s8 = ssub.s32 %s74_s5, %s75_s7 }
  0x10   : > { %3405 = sst [smem:[#allocation10_spill]] %s3442_s28  ;;  %s83_s9 = sadd.s32 1, %s2617_s18 }
  0x11   : > { %s44_s10 = ssub.s32 %s2641_s24, %s3442_s28  ;;  %p90_p5 = scmp.ne.s32.totalorder %s2617_s18, %s2613_s17 }
  0x12   : > { %s48_s11 = sor.u32 %s47_s30, %s44_s10  ;;  %s80_s12 = sor.u32 %s79_s8, %s44_s10 }
  0x13   : > { %p49_p6 = scmp.eq.s32.totalorder %s48_s11, 0  ;;  %p81_p7 = scmp.eq.s32.totalorder %s80_s12, 0 }
  0x14   : > { %p2762_p8 = por %p90_p5, %p59_p2  ;;  %s106_s14 = sadd.s32 4, %s2637_s23 }
  0x15   : > { %s2768_s26 = scalar_select %p49_p6, %s2625_s20, %s51_s29  }
  0x16   : > { %s2771_s5 = scalar_select %p81_p7, %s2617_s18, %s83_s9  }
  0x17   : > { %s107_s7 = sadd.s32 4, %s3438_s27  ;;  %s115_s28 = sadd.s32 1, %s2609_s16 }
  0x18   : > { %s111_s4 = ssub.s32 %s106_s14, %s107_s7  ;;  %p122_p9 = scmp.ne.s32.totalorder %s2609_s16, %s2605_s15 }
  0x19   : > { %s112_s30 = sor.u32 %s111_s4, %s44_s10  ;;  %s3407_s21 = sadd.s32 4294967295, %s2645_s25  }
  0x1a   : > { %p184_p10 = scmp.eq.s32.totalorder %s3407_s21, 3  ;;  %p113_p11 = scmp.eq.s32.totalorder %s112_s30, 0 }
  0x1b   : > { %p2781_p12 = por %p122_p9, %p59_p2  ;;  %p2096_p0 = scmp.ge.s32.totalorder %s2645_s25, 4 }
  0x1c   : > { %p2788_p13 = por %p184_p10, %p58_p1 }
  0x1d   : > { %s2793_s29 = scalar_select %p113_p11, %s2609_s16, %s115_s28  }
  0x1e   : > { %206 = sbr.rel (%p2096_p0) target bundleno = 88 (0x58), region = 16 }
  0x25   : > { %209 = sbr.rel (!%p2748_p4) target bundleno = 54 (0x36), region = 20  ;;  %s211_s4 = sand.u32 (%p2748_p4), 1, %s2625_s20  }
  0x26   : > { %s2345_s21 = smul.u32 (%p2748_p4), 96, %s2641_s24  ;;  %s2097_s9 = sshll.u32 (%p2748_p4), %s211_s4, 6 }
  0x27   : > { %s213_s28 = scalar_lea.vmem (%p2748_p4), [#allocation5], %s2097_s9 }
  0x28   : > { %s218_s10 = sadd.s32 (%p2748_p4), %s2637_s23, %s2345_s21 }
  0x29   : > { %s2098_s12 = sshll.u32 (%p2748_p4), %s218_s10, 2 }
  0x2a   : > { %s2804_s30 = scalar_lea.vmem (%p2748_p4), %s3396_s0, %s2098_s12 }
  0x2b   : > { %v236_v0 = vld [vmem:[%s2804_s30] sm:$0xf] (%p2748_p4)  ;;  %v238_v1 = vld [vmem:[%s2804_s30 + $0x18] sm:$0xf] (%p2748_p4)  ;;  %v240_v2 = vld [vmem:[%s2804_s30 + $0x30] sm:$0xf] (%p2748_p4) }
  0x2c   : > { %237 = vst [vmem:[%s213_s28] sm:$0xf] %v236_v0  ;;  %239 = vst [vmem:[%s213_s28 + $0x4] sm:$0xf] %v238_v1  ;;  %v242_v3 = vld [vmem:[%s2804_s30 + $0x48] sm:$0xf] }
  0x2d   : > { %241 = vst [vmem:[%s213_s28 + $0x8] sm:$0xf] %v240_v2  ;;  %v244_v4 = vld [vmem:[%s2804_s30 + $0x60] sm:$0xf]  ;;  %v246_v5 = vld [vmem:[%s2804_s30 + $0x78] sm:$0xf] }
  0x2e   : > { %243 = vst [vmem:[%s213_s28 + $0xc] sm:$0xf] %v242_v3  ;;  %245 = vst [vmem:[%s213_s28 + $0x10] sm:$0xf] %v244_v4  ;;  %v248_v6 = vld [vmem:[%s2804_s30 + $0x90] sm:$0xf] }
  0x2f   : > { %247 = vst [vmem:[%s213_s28 + $0x14] sm:$0xf] %v246_v5  ;;  %v250_v7 = vld [vmem:[%s2804_s30 + $0xa8] sm:$0xf]  ;;  %v252_v8 = vld [vmem:[%s2804_s30 + $0xc0] sm:$0xf] }
  0x30   : > { %249 = vst [vmem:[%s213_s28 + $0x18] sm:$0xf] %v248_v6  ;;  %251 = vst [vmem:[%s213_s28 + $0x1c] sm:$0xf] %v250_v7  ;;  %v254_v9 = vld [vmem:[%s2804_s30 + $0xd8] sm:$0xf] }
  0x31   : > { %253 = vst [vmem:[%s213_s28 + $0x20] sm:$0xf] %v252_v8  ;;  %v256_v10 = vld [vmem:[%s2804_s30 + $0xf0] sm:$0xf]  ;;  %v258_v11 = vld [vmem:[%s2804_s30 + $0x108] sm:$0xf] }
  0x32   : > { %255 = vst [vmem:[%s213_s28 + $0x24] sm:$0xf] %v254_v9  ;;  %257 = vst [vmem:[%s213_s28 + $0x28] sm:$0xf] %v256_v10  ;;  %v260_v12 = vld [vmem:[%s2804_s30 + $0x120] sm:$0xf] }
  0x33   : > { %259 = vst [vmem:[%s213_s28 + $0x2c] sm:$0xf] %v258_v11  ;;  %v262_v13 = vld [vmem:[%s2804_s30 + $0x138] sm:$0xf]  ;;  %v264_v14 = vld [vmem:[%s2804_s30 + $0x150] sm:$0xf] }
  0x34   : > { %261 = vst [vmem:[%s213_s28 + $0x30] sm:$0xf] %v260_v12  ;;  %263 = vst [vmem:[%s213_s28 + $0x34] sm:$0xf] %v262_v13  ;;  %v266_v15 = vld [vmem:[%s2804_s30 + $0x168] sm:$0xf] }
  0x35   : > { %265 = vst [vmem:[%s213_s28 + $0x38] sm:$0xf] %v264_v14  ;;  %267 = vst [vmem:[%s213_s28 + $0x3c] sm:$0xf] %v266_v15 }
  0x36 PF: > { %322 = sbr.rel (!%p2762_p8) target bundleno = 71 (0x47), region = 61  ;;  %s324_s6 = sand.u32 (%p2762_p8), 1, %s2617_s18  }
  0x37   : > { %s1977_s4 = smul.u32 (%p2762_p8), 96, %s2641_s24  ;;  %s2099_s21 = sshll.u32 (%p2762_p8), %s324_s6, 6 }
  0x38   : > { %s326_s13 = scalar_lea.vmem (%p2762_p8), [#allocation6], %s2099_s21 }
  0x39   : > { %s1978_s9 = sadd.s32 (%p2762_p8), %s2637_s23, %s1977_s4 }
  0x3a   : > { %s2100_s10 = sshll.u32 (%p2762_p8), %s1978_s9, 2 }
  0x3b   : > { %s2830_s7 = scalar_lea.vmem (%p2762_p8), %s3397_s1, %s2100_s10 }
  0x3c   : > { %v2101_v16 = vld [vmem:[%s2830_s7 + $0x8] sm:$0xf] (%p2762_p8)  ;;  %v2102_v17 = vld [vmem:[%s2830_s7 + $0x20] sm:$0xf] (%p2762_p8)  ;;  %v2103_v18 = vld [vmem:[%s2830_s7 + $0x38] sm:$0xf] (%p2762_p8) }
  0x3d   : > { %351 = vst [vmem:[%s326_s13] sm:$0xf] %v2101_v16  ;;  %353 = vst [vmem:[%s326_s13 + $0x4] sm:$0xf] %v2102_v17  ;;  %v2104_v19 = vld [vmem:[%s2830_s7 + $0x50] sm:$0xf] }
  0x3e   : > { %355 = vst [vmem:[%s326_s13 + $0x8] sm:$0xf] %v2103_v18  ;;  %v2105_v20 = vld [vmem:[%s2830_s7 + $0x68] sm:$0xf]  ;;  %v2106_v21 = vld [vmem:[%s2830_s7 + $0x80] sm:$0xf] }
  0x3f   : > { %357 = vst [vmem:[%s326_s13 + $0xc] sm:$0xf] %v2104_v19  ;;  %359 = vst [vmem:[%s326_s13 + $0x10] sm:$0xf] %v2105_v20  ;;  %v2107_v22 = vld [vmem:[%s2830_s7 + $0x98] sm:$0xf] }
  0x40   : > { %361 = vst [vmem:[%s326_s13 + $0x14] sm:$0xf] %v2106_v21  ;;  %v2108_v23 = vld [vmem:[%s2830_s7 + $0xb0] sm:$0xf]  ;;  %v2109_v24 = vld [vmem:[%s2830_s7 + $0xc8] sm:$0xf] }
  0x41   : > { %363 = vst [vmem:[%s326_s13 + $0x18] sm:$0xf] %v2107_v22  ;;  %365 = vst [vmem:[%s326_s13 + $0x1c] sm:$0xf] %v2108_v23  ;;  %v2110_v25 = vld [vmem:[%s2830_s7 + $0xe0] sm:$0xf] }
  0x42   : > { %367 = vst [vmem:[%s326_s13 + $0x20] sm:$0xf] %v2109_v24  ;;  %v2111_v26 = vld [vmem:[%s2830_s7 + $0xf8] sm:$0xf]  ;;  %v2112_v27 = vld [vmem:[%s2830_s7 + $0x110] sm:$0xf] }
  0x43   : > { %369 = vst [vmem:[%s326_s13 + $0x24] sm:$0xf] %v2110_v25  ;;  %371 = vst [vmem:[%s326_s13 + $0x28] sm:$0xf] %v2111_v26  ;;  %v2113_v28 = vld [vmem:[%s2830_s7 + $0x128] sm:$0xf] }
  0x44   : > { %373 = vst [vmem:[%s326_s13 + $0x2c] sm:$0xf] %v2112_v27  ;;  %v2114_v29 = vld [vmem:[%s2830_s7 + $0x140] sm:$0xf]  ;;  %v2115_v30 = vld [vmem:[%s2830_s7 + $0x158] sm:$0xf] }
  0x45   : > { %375 = vst [vmem:[%s326_s13 + $0x30] sm:$0xf] %v2113_v28  ;;  %377 = vst [vmem:[%s326_s13 + $0x34] sm:$0xf] %v2114_v29  ;;  %v2116_v31 = vld [vmem:[%s2830_s7 + $0x170] sm:$0xf] }
  0x46   : > { %379 = vst [vmem:[%s326_s13 + $0x38] sm:$0xf] %v2115_v30  ;;  %381 = vst [vmem:[%s326_s13 + $0x3c] sm:$0xf] %v2116_v31 }
  0x47 PF: > { %436 = sbr.rel (!%p2781_p12) target bundleno = 88 (0x58), region = 102  ;;  %s438_s30 = sand.u32 (%p2781_p12), 1, %s2609_s16  }
  0x48   : > { %s1986_s28 = smul.u32 (%p2781_p12), 96, %s2641_s24  ;;  %s2117_s6 = sshll.u32 (%p2781_p12), %s438_s30, 6 }
  0x49   : > { %s440_s8 = scalar_lea.vmem (%p2781_p12), [#allocation7], %s2117_s6 }
  0x4a   : > { %s1987_s4 = sadd.s32 (%p2781_p12), %s2637_s23, %s1986_s28 }
  0x4b   : > { %s2118_s21 = sshll.u32 (%p2781_p12), %s1987_s4, 2 }
  0x4c   : > { %s2856_s12 = scalar_lea.vmem (%p2781_p12), %s3398_s2, %s2118_s21 }
  0x4d   : > { %v2119_v32 = vld [vmem:[%s2856_s12 + $0x10] sm:$0xf] (%p2781_p12)  ;;  %v2120_v33 = vld [vmem:[%s2856_s12 + $0x28] sm:$0xf] (%p2781_p12)  ;;  %v2121_v34 = vld [vmem:[%s2856_s12 + $0x40] sm:$0xf] (%p2781_p12) }
  0x4e   : > { %465 = vst [vmem:[%s440_s8] sm:$0xf] %v2119_v32  ;;  %467 = vst [vmem:[%s440_s8 + $0x4] sm:$0xf] %v2120_v33  ;;  %v2122_v35 = vld [vmem:[%s2856_s12 + $0x58] sm:$0xf] }
  0x4f   : > { %469 = vst [vmem:[%s440_s8 + $0x8] sm:$0xf] %v2121_v34  ;;  %v2123_v36 = vld [vmem:[%s2856_s12 + $0x70] sm:$0xf]  ;;  %v2124_v37 = vld [vmem:[%s2856_s12 + $0x88] sm:$0xf] }
  0x50   : > { %471 = vst [vmem:[%s440_s8 + $0xc] sm:$0xf] %v2122_v35  ;;  %473 = vst [vmem:[%s440_s8 + $0x10] sm:$0xf] %v2123_v36  ;;  %v2125_v38 = vld [vmem:[%s2856_s12 + $0xa0] sm:$0xf] }
  0x51   : > { %475 = vst [vmem:[%s440_s8 + $0x14] sm:$0xf] %v2124_v37  ;;  %v2126_v39 = vld [vmem:[%s2856_s12 + $0xb8] sm:$0xf]  ;;  %v2127_v40 = vld [vmem:[%s2856_s12 + $0xd0] sm:$0xf] }
  0x52   : > { %477 = vst [vmem:[%s440_s8 + $0x18] sm:$0xf] %v2125_v38  ;;  %479 = vst [vmem:[%s440_s8 + $0x1c] sm:$0xf] %v2126_v39  ;;  %v2128_v41 = vld [vmem:[%s2856_s12 + $0xe8] sm:$0xf] }
  0x53   : > { %481 = vst [vmem:[%s440_s8 + $0x20] sm:$0xf] %v2127_v40  ;;  %v2129_v42 = vld [vmem:[%s2856_s12 + $0x100] sm:$0xf]  ;;  %v2130_v43 = vld [vmem:[%s2856_s12 + $0x118] sm:$0xf] }
  0x54   : > { %483 = vst [vmem:[%s440_s8 + $0x24] sm:$0xf] %v2128_v41  ;;  %485 = vst [vmem:[%s440_s8 + $0x28] sm:$0xf] %v2129_v42  ;;  %v2131_v44 = vld [vmem:[%s2856_s12 + $0x130] sm:$0xf] }
  0x55   : > { %487 = vst [vmem:[%s440_s8 + $0x2c] sm:$0xf] %v2130_v43  ;;  %v2132_v45 = vld [vmem:[%s2856_s12 + $0x148] sm:$0xf]  ;;  %v2133_v46 = vld [vmem:[%s2856_s12 + $0x160] sm:$0xf] }
  0x56   : > { %489 = vst [vmem:[%s440_s8 + $0x30] sm:$0xf] %v2131_v44  ;;  %491 = vst [vmem:[%s440_s8 + $0x34] sm:$0xf] %v2132_v45  ;;  %v2134_v47 = vld [vmem:[%s2856_s12 + $0x178] sm:$0xf] }
  0x57   : > { %493 = vst [vmem:[%s440_s8 + $0x38] sm:$0xf] %v2133_v46  ;;  %495 = vst [vmem:[%s440_s8 + $0x3c] sm:$0xf] %v2134_v47 }
  0x58 PF: > { %p2135_p1 = scmp.ge.s32.totalorder %s2645_s25, 1  ;;  %p558_p2 = scmp.lt.s32.totalorder %s2645_s25, 5 }
  0x5a   : > { %p559_p3 = pnand %p2135_p1, %p558_p2 }
  0x5b   : > { %s572_s14 = sand.u32 (!%p559_p3), 1, %s2613_s17   ;;  %s565_s13 = sand.u32 (!%p559_p3), 1, %s2621_s19   ;;  %vm634_vm0 = vcmask (!%p559_p3), 7168   ;;  %v2647_v0 = vmov (!%p559_p3), -inf   ;;  %v2648_v35 = vmov (!%p559_p3), 0  }
  0x5c   : > { %562 = sbr.rel (%p559_p3) target bundleno = 1016 (0x3f8), region = 147  ;;  %s2137_s7 = sshll.u32 (!%p559_p3), %s572_s14, 6  ;;  %637 = vst.msk [vmem:[#allocation2 + $0x10] sm:$0xff] (!%p559_p3), %vm634_vm0, %v2647_v0  ;;  %635 = vst.msk [vmem:[#allocation2] sm:$0xff] (!%p559_p3), %vm634_vm0, %v2647_v0  ;;  %2438 = vset.pattern.permute.xlu1 (!%p559_p3), %v2648_v35  ;;  %2437 = vset.pattern.permute.xlu0 (!%p559_p3), %v2648_v35 }
  0x5d   : > { %s574_s30 = scalar_lea.vmem (!%p559_p3), [#allocation6], %s2137_s7  ;;  %s2878_s28 = sshll.u32 (!%p559_p3), %s565_s13, 6  ;;  %636 = vst.msk [vmem:[#allocation2 + $0x8] sm:$0xff] (!%p559_p3), %vm634_vm0, %v2647_v0  ;;  %638 = vst.msk [vmem:[#allocation2 + $0x18] sm:$0xff] (!%p559_p3), %vm634_vm0, %v2647_v0 }
  0x5e   : > { %v2439_v48 = vld [vmem:[%s574_s30] sm:$0xff] (!%p559_p3)   ;;  %v2440_v49 = vld [vmem:[%s574_s30 + $0x8] sm:$0xff] (!%p559_p3)   ;;  %v2441_v50 = vld [vmem:[%s574_s30 + $0x10] sm:$0xff] (!%p559_p3)   ;;  %s2881_s6 = scalar_lea.vmem (!%p559_p3), [#allocation5], %s2878_s28  ;;  %639 = vst.msk [vmem:[#allocation2 + $0x20] sm:$0xff] (!%p559_p3), %vm634_vm0, %v2647_v0  ;;  %p622_p4 = scmp.lt.s32.totalorder (!%p559_p3), %s2633_s22, 1 }
  0x5f   : > { %2281 = vmatprep.subr.bf16.mxu0 (!%p559_p3), %v2439_v48  ;;  %v2447_v51 = vld [vmem:[%s2881_s6] sm:$0xff] (!%p559_p3)   ;;  %v2442_v52 = vld [vmem:[%s574_s30 + $0x18] sm:$0xff] (!%p559_p3)   ;;  %v2444_v54 = vld [vmem:[%s574_s30 + $0x28] sm:$0xff] (!%p559_p3)   ;;  %640 = vst.msk [vmem:[#allocation2 + $0x28] sm:$0xff] (!%p559_p3), %vm634_vm0, %v2647_v0  ;;  %s579_s9 = sand.u32 (!%p559_p3), 1, %s2605_s15   ;;  %s3318_s15 = scalar_lea.vmem (!%p559_p3), [#allocation8], %s2878_s28 }
  0x60   : > { %2282 = vmatpush3.bf16.xpose.msra.mxu0 (!%p559_p3), %v2439_v48  ;;  %2297 = vmatprep.mubr.bf16.mxu0 (!%p559_p3), %v2447_v51  ;;  %v2443_v53 = vld [vmem:[%s574_s30 + $0x20] sm:$0xff] (!%p559_p3)   ;;  %v2445_v55 = vld [vmem:[%s574_s30 + $0x30] sm:$0xff] (!%p559_p3)   ;;  %v2446_v56 = vld [vmem:[%s574_s30 + $0x38] sm:$0xff] (!%p559_p3)   ;;  %641 = vst.msk [vmem:[#allocation2 + $0x30] sm:$0xff] (!%p559_p3), %vm634_vm0, %v2647_v0  ;;  %v2649_v48 = vmov (!%p559_p3), 0.0   ;;  %s2138_s10 = sshll.u32 (!%p559_p3), %s579_s9, 6 }
  0x61   : > { %2283 = vmatprep.subr.bf16.mxu0 (!%p559_p3), %v2440_v49  ;;  %v2448_v57 = vld [vmem:[%s2881_s6 + $0x8] sm:$0xff] (!%p559_p3)   ;;  %v2449_v58 = vld [vmem:[%s2881_s6 + $0x10] sm:$0xff] (!%p559_p3)   ;;  %v2450_v59 = vld [vmem:[%s2881_s6 + $0x18] sm:$0xff] (!%p559_p3)   ;;  %642 = vst.msk [vmem:[#allocation2 + $0x38] sm:$0xff] (!%p559_p3), %vm634_vm0, %v2647_v0  ;;  %s2995_s12 = scalar_lea.vmem (!%p559_p3), [#allocation7], %s2138_s10 }
  0x62   : > { %v2451_v60 = vld [vmem:[%s2881_s6 + $0x20] sm:$0xff] (!%p559_p3)   ;;  %v2452_v61 = vld [vmem:[%s2881_s6 + $0x28] sm:$0xff] (!%p559_p3)   ;;  %v2453_v62 = vld [vmem:[%s2881_s6 + $0x30] sm:$0xff] (!%p559_p3)   ;;  %643 = vst.msk [vmem:[#allocation2 + $0x40] sm:$0xff] (!%p559_p3), %vm634_vm0, %v2647_v0 }
  0x63   : > { %v2454_v63 = vld [vmem:[%s2881_s6 + $0x38] sm:$0xff]   ;;  %644 = vst.msk [vmem:[#allocation2 + $0x48] sm:$0xff] %vm634_vm0, %v2647_v0  ;;  %645 = vst.msk [vmem:[#allocation2 + $0x50] sm:$0xff] %vm634_vm0, %v2647_v0  ;;  %s623_s17 = scalar_select %p622_p4, %s2633_s22, 1 }
  0x64   : > { %646 = vst.msk [vmem:[#allocation2 + $0x58] sm:$0xff] %vm634_vm0, %v2647_v0  ;;  %647 = vst.msk [vmem:[#allocation2 + $0x60] sm:$0xff] %vm634_vm0, %v2647_v0  ;;  %s3424_s8 = sld [smem:[#allocation9_spill]] (%p2788_p13)  ;;  %s2182_s14 = sshll.u32 (%p2788_p13), %s2633_s22, 5 }
  0x65   : > { %648 = vst.msk [vmem:[#allocation2 + $0x68] sm:$0xff] %vm634_vm0, %v2647_v0  ;;  %649 = vst.msk [vmem:[#allocation2 + $0x70] sm:$0xff] %vm634_vm0, %v2647_v0  ;;  %s627_s21 = scalar_lea.vmem %s3399_s3, %s623_s17  ;;  %s3425_s28 = sld [smem:[#allocation11_spill]] (%p2788_p13) }
  0x66   : > { %650 = vst.msk [vmem:[#allocation2 + $0x78] sm:$0xff] %vm634_vm0, %v2647_v0  ;;  %v2912_v2 = vld [vmem:[%s627_s21] ss:$0 sm:$0xff]  ;;  %653 = vst.msk [vmem:[#allocation3 + $0x10] sm:$0xff] %vm634_vm0, %v2649_v48 }
  0x67   : > { %651 = vst.msk [vmem:[#allocation3] sm:$0xff] %vm634_vm0, %v2649_v48  ;;  %652 = vst.msk [vmem:[#allocation3 + $0x8] sm:$0xff] %vm634_vm0, %v2649_v48 }
  0x68   : > { %2284 = vmatpush3.bf16.xpose.msra.mxu0 %v2440_v49  ;;  %654 = vst.msk [vmem:[#allocation3 + $0x18] sm:$0xff] %vm634_vm0, %v2649_v48  ;;  %655 = vst.msk [vmem:[#allocation3 + $0x20] sm:$0xff] %vm634_vm0, %v2649_v48 }
  0x69   : > { %2285 = vmatprep.subr.bf16.mxu0 %v2441_v50  ;;  %656 = vst.msk [vmem:[#allocation3 + $0x28] sm:$0xff] %vm634_vm0, %v2649_v48  ;;  %657 = vst.msk [vmem:[#allocation3 + $0x30] sm:$0xff] %vm634_vm0, %v2649_v48 }
  0x6a   : > { %658 = vst.msk [vmem:[#allocation3 + $0x38] sm:$0xff] %vm634_vm0, %v2649_v48  ;;  %659 = vst.msk [vmem:[#allocation3 + $0x40] sm:$0xff] %vm634_vm0, %v2649_v48  ;;  %s1851_s7 = sadd.s32 (%p2788_p13), %s3424_s8, %s2182_s14 }
  0x6b   : > { %660 = vst.msk [vmem:[#allocation3 + $0x48] sm:$0xff] %vm634_vm0, %v2649_v48  ;;  %661 = vst.msk [vmem:[#allocation3 + $0x50] sm:$0xff] %vm634_vm0, %v2649_v48  ;;  %v3078_v35 = vld [vmem:[#allocation2 + $0x58] sm:$0xff]  ;;  %s2183_s11 = sshll.u32 (%p2788_p13), %s1851_s7, 2 }
  0x6c   : > { %662 = vst.msk [vmem:[#allocation3 + $0x58] sm:$0xff] %vm634_vm0, %v2649_v48  ;;  %663 = vst.msk [vmem:[#allocation3 + $0x60] sm:$0xff] %vm634_vm0, %v2649_v48  ;;  %s1853_s6 = scalar_lea.vmem (%p2788_p13), %s3425_s28, %s2183_s11 }
  0x6d   : > { %664 = vst.msk [vmem:[#allocation3 + $0x68] sm:$0xff] %vm634_vm0, %v2649_v48  ;;  %665 = vst.msk [vmem:[#allocation3 + $0x70] sm:$0xff] %vm634_vm0, %v2649_v48 }
  0x6e   : > { %666 = vst.msk [vmem:[#allocation3 + $0x78] sm:$0xff] %vm634_vm0, %v2649_v48  ;;  %v3098_v48 = vld [vmem:[#allocation2 + $0x48] sm:$0xff] }
  0x70   : > { %2286 = vmatpush3.bf16.xpose.msra.mxu0 %v2441_v50 }
  0x71   : > { %2287 = vmatprep.subr.bf16.mxu0 %v2442_v52 }
  0x78   : > { %2288 = vmatpush3.bf16.xpose.msra.mxu0 %v2442_v52  ;;  %v2455_v52 = vld [vmem:[%s2995_s12] sm:$0xff]  }
  0x79   : > { %2289 = vmatprep.subr.bf16.mxu0 %v2443_v53  ;;  %2313 = vmatprep.subr.bf16.mxu1 %v2455_v52 }
  0x7a   : > { %2314 = vmatpush3.bf16.msra.mxu1 %v2455_v52 }
  0x80   : > { %2290 = vmatpush3.bf16.xpose.msra.mxu0 %v2443_v53  ;;  %v2456_v53 = vld [vmem:[%s2995_s12 + $0x8] sm:$0xff]  }
  0x81   : > { %2291 = vmatprep.subr.bf16.mxu0 %v2444_v54  ;;  %2315 = vmatprep.subr.bf16.mxu1 %v2456_v53 }
  0x82   : > { %2316 = vmatpush3.bf16.msra.mxu1 %v2456_v53 }
  0x88   : > { %2292 = vmatpush3.bf16.xpose.msra.mxu0 %v2444_v54  ;;  %v2999_v54 = vld [vmem:[#allocation2 + $0x10] sm:$0xff] }
  0x89   : > { %2293 = vmatprep.subr.bf16.mxu0 %v2445_v55 }
  0x90   : > { %2294 = vmatpush3.bf16.xpose.msra.mxu0 %v2445_v55  ;;  %v3001_v55 = vld [vmem:[#allocation2] sm:$0xff] }
  0x91   : > { %2295 = vmatprep.subr.bf16.mxu0 %v2446_v56 }
  0x98   : > { %2296 = vmatpush3.bf16.xpose.msra.mxu0 %v2446_v56 }
  0x9f   : > { %2298 = vmatmul.mubr.bf16.vlgmr.msra.gmra.mrb[0].mxu0 %v2448_v57 }
  0xa0   : > { %2301 = vmatprep.mubr.bf16.mxu0 %v2449_v58 }
  0xa7   : > { %2302 = vmatmul.mubr.bf16.gmra.mrb[4].mxu0 %v2450_v59 }
  0xa8   : > { %2305 = vmatprep.mubr.bf16.mxu0 %v2451_v60  ;;  %v3009_v60 = vld [vmem:[#allocation2 + $0x18] sm:$0xff] }
  0xaf   : > { %2306 = vmatmul.mubr.bf16.gmra.mrb[8].mxu0 %v2452_v61 }
  0xb0   : > { %2309 = vmatprep.mubr.bf16.mxu0 %v2453_v62  ;;  %v3016_v62 = vld [vmem:[#allocation2 + $0x8] sm:$0xff] }
  0xb7   : > { %2310 = vmatmul.mubr.bf16.gmra.mrb[12].mxu0 %v2454_v63  ;;  %v2457_v63 = vld [vmem:[%s2995_s12 + $0x10] sm:$0xff]  }
  0xb8   : > { %2317 = vmatprep.subr.bf16.mxu1 %v2457_v63 }
  0xb9   : > { %2318 = vmatpush3.bf16.msra.mxu1 %v2457_v63 }
 0x172   : > { %v2299_v1 = vpop.f32.mrb[0].mxu0 }
 0x173   : > { %v927_v3 = vmul.f32 0.088388346, %v2299_v1  ;;  %v862_v4 = vpop.f32.mrb[1].mxu0 }
 0x174   : > { %v925_v5 = vmul.f32 0.088388346, %v862_v4  ;;  %v2300_v6 = vpop.f32.mrb[2].mxu0 }
 0x175   : > { %v928_v7 = vmul.f32 0.088388346, %v2300_v6  ;;  %v865_v8 = vpop.f32.mrb[3].mxu0  ;;  %v2915_v9 = vadd.f32 %v2912_v2, %v927_v3  ;;  %v3035_v6 = vld [vmem:[#allocation2 + $0x20] sm:$0xff] }
 0x176   : > { %v926_v10 = vmul.f32 0.088388346, %v865_v8  ;;  %v2918_v11 = vadd.f32 %v2912_v2, %v925_v5 }
 0x177   : > { %983 = vmax.xlane.f32.xlu1 %v2915_v9  ;;  %v2923_v12 = vadd.f32 %v2912_v2, %v928_v7  ;;  %v2458_v7 = vld [vmem:[%s2995_s12 + $0x18] sm:$0xff]  }
 0x178   : > { %979 = vmax.xlane.f32.xlu0 %v2918_v11  ;;  %v2926_v14 = vadd.f32 %v2912_v2, %v926_v10  ;;  %v3042_v10 = vld [vmem:[#allocation2 + $0x38] sm:$0xff]  ;;  %2319 = vmatprep.subr.bf16.mxu1 %v2458_v7 }
 0x179   : > { %2320 = vmatpush3.bf16.msra.mxu1 %v2458_v7 }
 0x17a   : > { %v2303_v13 = vpop.f32.mrb[4].mxu0 }
 0x17b   : > { %985 = vmax.xlane.f32.xlu1 %v2923_v12  ;;  %v878_v15 = vpop.f32.mrb[5].mxu0  ;;  %v931_v20 = vmul.f32 0.088388346, %v2303_v13 }
 0x17c   : > { %v929_v16 = vmul.f32 0.088388346, %v878_v15  ;;  %981 = vmax.xlane.f32.xlu0 %v2926_v14  ;;  %v2304_v17 = vpop.f32.mrb[6].mxu0 }
 0x17d   : > { %v932_v18 = vmul.f32 0.088388346, %v2304_v17  ;;  %v881_v19 = vpop.f32.mrb[7].mxu0  ;;  %v2939_v25 = vadd.f32 %v2912_v2, %v931_v20 }
 0x17e   : > { %v2931_v21 = vadd.f32 %v2912_v2, %v929_v16  ;;  %v930_v22 = vmul.f32 0.088388346, %v881_v19  ;;  %v2459_v19 = vld [vmem:[%s2995_s12 + $0x20] sm:$0xff]  }
 0x17f   : > { %v2934_v23 = vadd.f32 %v2912_v2, %v932_v18  ;;  %v3051_v18 = vld [vmem:[#allocation2 + $0x30] sm:$0xff]  ;;  %2321 = vmatprep.subr.bf16.mxu1 %v2459_v19 }
 0x180   : > { %987 = vmax.xlane.f32.xlu0 %v2931_v21  ;;  %v2942_v27 = vadd.f32 %v2912_v2, %v930_v22  ;;  %v3058_v22 = vld [vmem:[#allocation2 + $0x28] sm:$0xff]  ;;  %2322 = vmatpush3.bf16.msra.mxu1 %v2459_v19 }
 0x181   : > { %993 = vmax.xlane.f32.xlu1 %v2934_v23 }
 0x182   : > { %v2307_v24 = vpop.f32.mrb[8].mxu0 }
 0x183   : > { %v894_v26 = vpop.f32.mrb[9].mxu0  ;;  %v935_v28 = vmul.f32 0.088388346, %v2307_v24 }
 0x184   : > { %v933_v29 = vmul.f32 0.088388346, %v894_v26  ;;  %991 = vmax.xlane.f32.xlu0 %v2939_v25  ;;  %v2308_v30 = vpop.f32.mrb[10].mxu0 }
 0x185   : > { %v936_v31 = vmul.f32 0.088388346, %v2308_v30  ;;  %989 = vmax.xlane.f32.xlu1 %v2942_v27  ;;  %v897_v32 = vpop.f32.mrb[11].mxu0  ;;  %v2954_v37 = vadd.f32 %v2912_v2, %v935_v28 }
 0x186   : > { %v934_v33 = vmul.f32 0.088388346, %v897_v32  ;;  %v2947_v34 = vadd.f32 %v2912_v2, %v933_v29  ;;  %v2460_v32 = vld [vmem:[%s2995_s12 + $0x28] sm:$0xff]  }
 0x187   : > { %v2950_v36 = vadd.f32 %v2912_v2, %v936_v31  ;;  %v3070_v31 = vld [vmem:[#allocation2 + $0x40] sm:$0xff]  ;;  %2323 = vmatprep.subr.bf16.mxu1 %v2460_v32 }
 0x188   : > { %995 = vmax.xlane.f32.xlu0 %v2947_v34  ;;  %v2958_v38 = vadd.f32 %v2912_v2, %v934_v33  ;;  %2324 = vmatpush3.bf16.msra.mxu1 %v2460_v32 }
 0x189   : > { %1001 = vmax.xlane.f32.xlu1 %v2950_v36 }
 0x18a   : > { %v2311_v39 = vpop.f32.mrb[12].mxu0 }
 0x18b   : > { %v910_v40 = vpop.f32.mrb[13].mxu0  ;;  %v939_v41 = vmul.f32 0.088388346, %v2311_v39 }
 0x18c   : > { %v937_v42 = vmul.f32 0.088388346, %v910_v40  ;;  %v2312_v43 = vpop.f32.mrb[14].mxu0  ;;  %999 = vmax.xlane.f32.xlu0 %v2954_v37 }
 0x18d   : > { %v940_v44 = vmul.f32 0.088388346, %v2312_v43  ;;  %997 = vmax.xlane.f32.xlu1 %v2958_v38  ;;  %v913_v45 = vpop.f32.mrb[15].mxu0  ;;  %v2986_v50 = vadd.f32 %v2912_v2, %v939_v41 }
 0x18e   : > { %v938_v46 = vmul.f32 0.088388346, %v913_v45  ;;  %v2963_v47 = vadd.f32 %v2912_v2, %v937_v42  ;;  %v2461_v45 = vld [vmem:[%s2995_s12 + $0x30] sm:$0xff]  }
 0x18f   : > { %v2982_v49 = vadd.f32 %v2912_v2, %v940_v44  ;;  %v3090_v44 = vld [vmem:[#allocation2 + $0x50] sm:$0xff]  ;;  %2325 = vmatprep.subr.bf16.mxu1 %v2461_v45 }
 0x190   : > { %1003 = vmax.xlane.f32.xlu0 %v2963_v47  ;;  %v2990_v51 = vadd.f32 %v2912_v2, %v938_v46  ;;  %2326 = vmatpush3.bf16.msra.mxu1 %v2461_v45  ;;  %v3138_v45 = vld [vmem:[#allocation2 + $0x68] sm:$0xff] }
 0x191   : > { %1009 = vmax.xlane.f32.xlu1 %v2982_v49 }
 0x194   : > { %1007 = vmax.xlane.f32.xlu0 %v2986_v50 }
 0x195   : > { %1005 = vmax.xlane.f32.xlu1 %v2990_v51 }
 0x204   : > { %v984_v56 = vpop.xlane.xlu1 %983 }
 0x205   : > { %v3004_v57 = vmax.f32 %v2999_v54, %v984_v56  ;;  %v980_v58 = vpop.xlane.xlu0 %979 }
 0x206   : > { %v3007_v59 = vmax.f32 %v3001_v55, %v980_v58 }
 0x207   : > { %v1029_v61 = vsub.f32 %v2999_v54, %v3004_v57  ;;  %1599 = vst.msk [vmem:[#allocation2 + $0x10] sm:$0xff] %vm634_vm0, %v3004_v57  ;;  %1087 = vperm.xlu1 %2438, %v3004_v57  }
 0x208   : > { %1597 = vst.msk [vmem:[#allocation2] sm:$0xff] %vm634_vm0, %v3007_v59  ;;  %v986_v1 = vpop.xlane.xlu1 %985  ;;  %1077 = vperm.xlu0 %2437, %v3007_v59  }
 0x209   : > { %v3025_v2 = vmax.f32 %v3009_v60, %v986_v1  ;;  %v982_v3 = vpop.xlane.xlu0 %981  ;;  %v3110_v1 = vld [vmem:[#allocation2 + $0x60] sm:$0xff] }
 0x20a   : > { %v3028_v4 = vmax.f32 %v3016_v62, %v982_v3  ;;  %v2462_v3 = vld [vmem:[%s2995_s12 + $0x38] sm:$0xff]  }
 0x20b   : > { %1600 = vst.msk [vmem:[#allocation2 + $0x18] sm:$0xff] %vm634_vm0, %v3025_v2  ;;  %1092 = vperm.xlu1 %2438, %v3025_v2   ;;  %2327 = vmatprep.subr.bf16.mxu1 %v2462_v3 }
 0x20c   : > { %v1028_v8 = vsub.f32 %v3016_v62, %v3028_v4  ;;  %1598 = vst.msk [vmem:[#allocation2 + $0x8] sm:$0xff] %vm634_vm0, %v3028_v4  ;;  %2328 = vmatpush3.bf16.msra.mxu1 %v2462_v3 }
 0x20d   : > { %v988_v13 = vpop.xlane.xlu0 %987 }
 0x20e   : > { %v3045_v15 = vmax.f32 %v3035_v6, %v988_v13  ;;  %v994_v16 = vpop.xlane.xlu1 %993  ;;  %v3118_v13 = vld [vmem:[#allocation2 + $0x78] sm:$0xff] }
 0x20f   : > { %v3048_v17 = vmax.f32 %v3042_v10, %v994_v16  ;;  %1082 = vperm.xlu1 %2438, %v3028_v4  }
 0x210   : > { %1601 = vst.msk [vmem:[#allocation2 + $0x20] sm:$0xff] %vm634_vm0, %v3045_v15 }
 0x211   : > { %1604 = vst.msk [vmem:[#allocation2 + $0x38] sm:$0xff] %vm634_vm0, %v3048_v17  ;;  %v992_v26 = vpop.xlane.xlu0 %991 }
 0x212   : > { %v3065_v28 = vmax.f32 %v3051_v18, %v992_v26  ;;  %v990_v29 = vpop.xlane.xlu1 %989 }
 0x213   : > { %v3068_v30 = vmax.f32 %v3058_v22, %v990_v29 }
 0x214   : > { %1603 = vst.msk [vmem:[#allocation2 + $0x30] sm:$0xff] %vm634_vm0, %v3065_v28  ;;  %1107 = vperm.xlu1 %2438, %v3065_v28   ;;  %v3413_v54 = vsub.f32 %v3051_v18, %v3065_v28 }
 0x215   : > { %1602 = vst.msk [vmem:[#allocation2 + $0x28] sm:$0xff] %vm634_vm0, %v3068_v30  ;;  %v996_v40 = vpop.xlane.xlu0 %995 }
 0x216   : > { %v1002_v41 = vpop.xlane.xlu1 %1001  ;;  %v3085_v42 = vmax.f32 %v3070_v31, %v996_v40  ;;  %v3131_v40 = vld [vmem:[#allocation2 + $0x70] sm:$0xff]  ;;  %v1055_v57 = vmul.f32 1.442695, %v3413_v54 }
 0x217   : > { %v3088_v43 = vmax.f32 %v3078_v35, %v1002_v41 }
 0x218   : > { %1605 = vst.msk [vmem:[#allocation2 + $0x40] sm:$0xff] %vm634_vm0, %v3085_v42  ;;  %1097 = vperm.xlu1 %2438, %v3045_v15   ;;  %v3415_v4 = vsub.f32 %v3070_v31, %v3085_v42 }
 0x219   : > { %1608 = vst.msk [vmem:[#allocation2 + $0x58] sm:$0xff] %vm634_vm0, %v3088_v43  ;;  %v1000_v53 = vpop.xlane.xlu0 %999 }
 0x21a   : > { %v998_v56 = vpop.xlane.xlu1 %997  ;;  %v3105_v58 = vmax.f32 %v3090_v44, %v1000_v53 }
 0x21b   : > { %v3108_v63 = vmax.f32 %v3098_v48, %v998_v56 }
 0x21c   : > { %1607 = vst.msk [vmem:[#allocation2 + $0x50] sm:$0xff] %vm634_vm0, %v3105_v58  ;;  %1102 = vperm.xlu1 %2438, %v3068_v30   ;;  %v3417_v18 = vsub.f32 %v3090_v44, %v3105_v58  ;;  %v3420_v44 = vsub.f32 %v3078_v35, %v3088_v43 }
 0x21d   : > { %1606 = vst.msk [vmem:[#allocation2 + $0x48] sm:$0xff] %vm634_vm0, %v3108_v63  ;;  %1122 = vperm.xlu0 %2437, %v3108_v63   ;;  %v1004_v19 = vpop.xlane.xlu0 %1003  ;;  %v3418_v28 = vsub.f32 %v3098_v48, %v3108_v63 }
 0x21e   : > { %v1010_v26 = vpop.xlane.xlu1 %1009  ;;  %v3126_v29 = vmax.f32 %v3110_v1, %v1004_v19 }
 0x21f   : > { %v3129_v32 = vmax.f32 %v3118_v13, %v1010_v26 }
 0x220   : > { %1609 = vst.msk [vmem:[#allocation2 + $0x60] sm:$0xff] %vm634_vm0, %v3126_v29  ;;  %1112 = vperm.xlu1 %2438, %v3048_v17  }
 0x221   : > { %1612 = vst.msk [vmem:[#allocation2 + $0x78] sm:$0xff] %vm634_vm0, %v3129_v32  ;;  %1132 = vperm.xlu0 %2437, %v3088_v43   ;;  %v1008_v56 = vpop.xlane.xlu0 %1007  ;;  %v3423_v43 = vsub.f32 %v3118_v13, %v3129_v32 }
 0x222   : > { %v1006_v3 = vpop.xlane.xlu1 %1005  ;;  %v3146_v19 = vmax.f32 %v3131_v40, %v1008_v56 }
 0x223   : > { %v3149_v26 = vmax.f32 %v3138_v45, %v1006_v3 }
 0x224   : > { %1611 = vst.msk [vmem:[#allocation2 + $0x70] sm:$0xff] %vm634_vm0, %v3146_v19  ;;  %1117 = vperm.xlu1 %2438, %v3085_v42   ;;  %v3421_v48 = vsub.f32 %v3131_v40, %v3146_v19  ;;  %v1073_v40 = vmul.f32 1.442695, %v3423_v43 }
 0x225   : > { %1610 = vst.msk [vmem:[#allocation2 + $0x68] sm:$0xff] %vm634_vm0, %v3149_v26  ;;  %1142 = vperm.xlu0 %2437, %v3149_v26  }
 0x226   : > { %v1071_v63 = vmul.f32 1.442695, %v3421_v48  ;;  %v1211_v48 = vld [vmem:[#allocation3 + $0x40] sm:$0xff] }
 0x228   : > { %1127 = vperm.xlu1 %2438, %v3105_v58   ;;  %v1065_v58 = vmul.f32 1.442695, %v3420_v44 }
 0x229   : > { %1152 = vperm.xlu0 %2437, %v3129_v32  }
 0x22c   : > { %1137 = vperm.xlu1 %2438, %v3126_v29  }
 0x230   : > { %1147 = vperm.xlu1 %2438, %v3146_v19  }
 0x286   : > { %v1088_v56 = vpop.permute.xlu1 %1087 }
 0x287   : > { %v1157_v3 = vsub.f32 %v2915_v9, %v1088_v56  ;;  %v1078_v52 = vpop.permute.xlu0 %1077 }
 0x288   : > { %v1155_v41 = vsub.f32 %v2918_v11, %v1078_v52 }
 0x289   : > { %v1175_v53 = vmul.f32 1.442695, %v1157_v3 }
 0x28a   : > { %v1171_v16 = vmul.f32 1.442695, %v1155_v41  ;;  %v1093_v7 = vpop.permute.xlu1 %1092 }
 0x28b   : > { %2463 = vpow2.f32 %v1175_v53  ;;  %v1158_v24 = vsub.f32 %v2923_v12, %v1093_v7 }
 0x28c   : > { %2465 = vpow2.f32 %v1171_v16 }
 0x28d   : > { %v1177_v46 = vmul.f32 1.442695, %v1158_v24 }
 0x28e   : > { %v1083_v39 = vpop.permute.xlu1 %1082 }
 0x28f   : > { %2467 = vpow2.f32 %v1177_v46  ;;  %v1156_v33 = vsub.f32 %v2926_v14, %v1083_v39 }
 0x291   : > { %v1173_v5 = vmul.f32 1.442695, %v1156_v33 }
 0x293   : > { %2469 = vpow2.f32 %v1173_v5  ;;  %v1108_v20 = vpop.permute.xlu1 %1107 }
 0x294   : > { %v1161_v9 = vsub.f32 %v2939_v25, %v1108_v20 }
 0x295   : > { %v2464_v56 = vpop.eup %2463 }
 0x296   : > { %v2466_v0 = vpop.eup %2465  ;;  %v1183_v11 = vmul.f32 1.442695, %v1161_v9  ;;  %1239 = vadd.xlane.f32.xlu0 %v2464_v56 }
 0x297   : > { %1235 = vadd.xlane.f32.xlu1 %v2466_v0  ;;  %v1098_v52 = vpop.permute.xlu1 %1097 }
 0x298   : > { %2471 = vpow2.f32 %v1183_v11  ;;  %v1159_v12 = vsub.f32 %v2931_v21, %v1098_v52 }
 0x299   : > { %v2468_v7 = vpop.eup %2467 }
 0x29a   : > { %v1179_v24 = vmul.f32 1.442695, %v1159_v12  ;;  %v1413_v41 = vpack.c.bf16 %v2468_v7, %v2464_v56 }
 0x29b   : > { %1241 = vadd.xlane.f32.xlu1 %v2468_v7  ;;  %v1103_v46 = vpop.permute.xlu1 %1102 }
 0x29c   : > { %2473 = vpow2.f32 %v1179_v24  ;;  %v1160_v14 = vsub.f32 %v2942_v27, %v1103_v46  ;;  %v1123_v5 = vpop.permute.xlu0 %1122 }
 0x29d   : > { %v2470_v33 = vpop.eup %2469  ;;  %v1164_v20 = vsub.f32 %v2958_v38, %v1123_v5 }
 0x29e   : > { %v1181_v39 = vmul.f32 1.442695, %v1160_v14  ;;  %1237 = vadd.xlane.f32.xlu0 %v2470_v33  ;;  %v1412_v25 = vpack.c.bf16 %v2470_v33, %v2466_v0 }
 0x29f   : > { %v1113_v16 = vpop.permute.xlu1 %1112  ;;  %v1189_v11 = vmul.f32 1.442695, %v1164_v20 }
 0x2a0   : > { %2475 = vpow2.f32 %v1181_v39  ;;  %v1162_v53 = vsub.f32 %v2934_v23, %v1113_v16  ;;  %v1133_v21 = vpop.permute.xlu0 %1132  ;;  %2329 = vmatprep.mubr.bf16.mxu1 %v1412_v25 }
 0x2a1   : > { %2330 = vmatmul.mubr.bf16.vlgmr.msra.gmra.mrb[0].mxu1 %v1413_v41  ;;  %v1166_v27 = vsub.f32 %v2950_v36, %v1133_v21 }
 0x2a2   : > { %v2472_v3 = vpop.eup %2471  ;;  %v1185_v9 = vmul.f32 1.442695, %v1162_v53 }
 0x2a3   : > { %1247 = vadd.xlane.f32.xlu0 %v2472_v3  ;;  %v1118_v52 = vpop.permute.xlu1 %1117  ;;  %v1193_v56 = vmul.f32 1.442695, %v1166_v27 }
 0x2a4   : > { %2477 = vpow2.f32 %v1185_v9  ;;  %v1163_v0 = vsub.f32 %v2947_v34, %v1118_v52  ;;  %v1143_v12 = vpop.permute.xlu0 %1142 }
 0x2a5   : > { %2479 = vpow2.f32 %v1189_v11  ;;  %v1168_v23 = vsub.f32 %v2990_v51, %v1143_v12 }
 0x2a6   : > { %v2474_v38 = vpop.eup %2473  ;;  %v1187_v24 = vmul.f32 1.442695, %v1163_v0 }
 0x2a7   : > { %1243 = vadd.xlane.f32.xlu0 %v2474_v38  ;;  %v1128_v7 = vpop.permute.xlu1 %1127  ;;  %v1197_v33 = vmul.f32 1.442695, %v1168_v23  ;;  %v1045_v23 = vmul.f32 1.442695, %v1028_v8 }
 0x2a8   : > { %2481 = vpow2.f32 %v1187_v24  ;;  %v1165_v46 = vsub.f32 %v2954_v37, %v1128_v7  ;;  %v1153_v14 = vpop.permute.xlu0 %1152  ;;  %v1047_v7 = vmul.f32 1.442695, %v1029_v61 }
 0x2a9   : > { %2483 = vpow2.f32 %v1193_v56  ;;  %v1170_v39 = vsub.f32 %v2982_v49, %v1153_v14 }
 0x2aa   : > { %v2476_v5 = vpop.eup %2475  ;;  %v1191_v36 = vmul.f32 1.442695, %v1165_v46  ;;  %v3410_v46 = vsub.f32 %v3001_v55, %v3007_v59  ;;  %v3414_v55 = vsub.f32 %v3058_v22, %v3068_v30  ;;  %v1063_v22 = vmul.f32 1.442695, %v3417_v18 }
 0x2ab   : > { %v1138_v34 = vpop.permute.xlu1 %1137  ;;  %v1414_v25 = vpack.c.bf16 %v2476_v5, %v2474_v38  ;;  %v1201_v41 = vmul.f32 1.442695, %v1170_v39  ;;  %v1061_v30 = vmul.f32 1.442695, %v3418_v28 }
 0x2ac   : > { %2485 = vpow2.f32 %v1191_v36  ;;  %v1167_v20 = vsub.f32 %v2963_v47, %v1138_v34  ;;  %v1043_v14 = vmul.f32 1.442695, %v3410_v46  ;;  %v1053_v59 = vmul.f32 1.442695, %v3414_v55 }
 0x2ad   : > { %2333 = vmatprep.mubr.bf16.mxu1 %v1414_v25  ;;  %2487 = vpow2.f32 %v1197_v33  ;;  %v3412_v33 = vsub.f32 %v3009_v60, %v3025_v2  ;;  %v1059_v60 = vmul.f32 1.442695, %v3415_v4  ;;  %v3416_v2 = vsub.f32 %v3042_v10, %v3048_v17 }
 0x2ae   : > { %v2478_v16 = vpop.eup %2477  ;;  %v1195_v51 = vmul.f32 1.442695, %v1167_v20  ;;  %v3419_v10 = vsub.f32 %v3110_v1, %v3126_v29  ;;  %v3422_v1 = vsub.f32 %v3138_v45, %v3149_v26 }
 0x2af   : > { %1249 = vadd.xlane.f32.xlu1 %v2478_v16  ;;  %v1148_v53 = vpop.permute.xlu1 %1147  ;;  %v1415_v37 = vpack.c.bf16 %v2478_v16, %v2472_v3  ;;  %v2480_v9 = vpop.eup %2479  ;;  %v1049_v62 = vmul.f32 1.442695, %v3412_v33 }
 0x2b0   : > { %2489 = vpow2.f32 %v1195_v51  ;;  %v1169_v21 = vsub.f32 %v2986_v50, %v1148_v53  ;;  %v1067_v17 = vmul.f32 1.442695, %v3419_v10  ;;  %v1069_v29 = vmul.f32 1.442695, %v3422_v1  ;;  %v1205_v51 = vld [vmem:[#allocation3 + $0x10] sm:$0xff] }
 0x2b1   : > { %2334 = vmatmul.mubr.bf16.gmra.mrb[4].mxu1 %v1415_v37  ;;  %2491 = vpow2.f32 %v1201_v41  ;;  %v1203_v41 = vld [vmem:[#allocation3] sm:$0xff] }
 0x2b2   : > { %v2482_v11 = vpop.eup %2481  ;;  %v1199_v49 = vmul.f32 1.442695, %v1169_v21 }
 0x2b3   : > { %1245 = vadd.xlane.f32.xlu1 %v2476_v5  ;;  %v1416_v27 = vpack.c.bf16 %v2480_v9, %v2482_v11  ;;  %v2484_v47 = vpop.eup %2483  ;;  %v3411_v5 = vsub.f32 %v3035_v6, %v3045_v15  ;;  %v1057_v6 = vmul.f32 1.442695, %v3416_v2 }
 0x2b4   : > { %2493 = vpow2.f32 %v1199_v49  ;;  %v1206_v49 = vld [vmem:[#allocation3 + $0x18] sm:$0xff] }
 0x2b5   : > { %2337 = vmatprep.mubr.bf16.mxu1 %v1416_v27  ;;  %2495 = vpow2.f32 %v1045_v23  ;;  %v1051_v36 = vmul.f32 1.442695, %v3411_v5 }
 0x2b6   : > { %v2486_v52 = vpop.eup %2485  ;;  %2497 = vpow2.f32 %v1047_v7 }
 0x2b7   : > { %1257 = vadd.xlane.f32.xlu1 %v2484_v47  ;;  %1255 = vadd.xlane.f32.xlu0 %v2486_v52  ;;  %v1417_v0 = vpack.c.bf16 %v2484_v47, %v2486_v52  ;;  %v2488_v12 = vpop.eup %2487  ;;  %2499 = vpow2.f32 %v1043_v14  ;;  %v1204_v52 = vld [vmem:[#allocation3 + $0x8] sm:$0xff]  ;;  %v1207_v14 = vld [vmem:[#allocation3 + $0x20] sm:$0xff] }
 0x2b8   : > { %2501 = vpow2.f32 %v1051_v36 }
 0x2b9   : > { %2338 = vmatmul.mubr.bf16.gmra.mrb[8].mxu1 %v1417_v0  ;;  %2503 = vpow2.f32 %v1049_v62 }
 0x2ba   : > { %v2490_v3 = vpop.eup %2489  ;;  %2505 = vpow2.f32 %v1055_v57 }
 0x2bb   : > { %1253 = vadd.xlane.f32.xlu1 %v2480_v9  ;;  %1251 = vadd.xlane.f32.xlu0 %v2482_v11  ;;  %v1418_v50 = vpack.c.bf16 %v2488_v12, %v2490_v3  ;;  %v2492_v38 = vpop.eup %2491  ;;  %2507 = vpow2.f32 %v1053_v59  ;;  %v1210_v59 = vld [vmem:[#allocation3 + $0x38] sm:$0xff] }
 0x2bc   : > { %2509 = vpow2.f32 %v1059_v60 }
 0x2bd   : > { %2341 = vmatprep.mubr.bf16.mxu1 %v1418_v50  ;;  %2511 = vpow2.f32 %v1057_v6  ;;  %v1208_v6 = vld [vmem:[#allocation3 + $0x28] sm:$0xff] }
 0x2be   : > { %v2494_v24 = vpop.eup %2493  ;;  %2513 = vpow2.f32 %v1063_v22 }
 0x2bf   : > { %1265 = vadd.xlane.f32.xlu1 %v2492_v38  ;;  %1259 = vadd.xlane.f32.xlu0 %v2490_v3  ;;  %v1419_v56 = vpack.c.bf16 %v2492_v38, %v2494_v24  ;;  %v3202_v61 = vpop.eup %2495  ;;  %2515 = vpow2.f32 %v1061_v30 }
 0x2c0   : > { %v2498_v8 = vpop.eup %2497  ;;  %2517 = vpow2.f32 %v1067_v17  ;;  %v1220_v3 = vmul.f32 %v3202_v61, %v1204_v52 }
 0x2c1   : > { %2342 = vmatmul.mubr.bf16.gmra.mrb[12].mxu1 %v1419_v56  ;;  %v2500_v15 = vpop.eup %2499  ;;  %2519 = vpow2.f32 %v1065_v58  ;;  %v1221_v53 = vmul.f32 %v2498_v8, %v1205_v51  ;;  %v1215_v51 = vld [vmem:[#allocation3 + $0x60] sm:$0xff] }
 0x2c2   : > { %v3217_v31 = vpop.eup %2501  ;;  %2521 = vpow2.f32 %v1071_v63  ;;  %v1219_v21 = vmul.f32 %v2500_v15, %v1203_v41  ;;  %v1212_v63 = vld [vmem:[#allocation3 + $0x48] sm:$0xff]  ;;  %v1218_v41 = vld [vmem:[#allocation3 + $0x78] sm:$0xff] }
 0x2c3   : > { %1261 = vadd.xlane.f32.xlu1 %v2488_v12  ;;  %1263 = vadd.xlane.f32.xlu0 %v2494_v24  ;;  %v2504_v42 = vpop.eup %2503  ;;  %2523 = vpow2.f32 %v1069_v29  ;;  %v1209_v24 = vld [vmem:[#allocation3 + $0x30] sm:$0xff]  ;;  %v1223_v33 = vmul.f32 %v3217_v31, %v1207_v14 }
 0x2c4   : > { %v2506_v39 = vpop.eup %2505  ;;  %2525 = vpow2.f32 %v1073_v40  ;;  %v1222_v47 = vmul.f32 %v2504_v42, %v1206_v49 }
 0x2c5   : > { %v3226_v34 = vpop.eup %2507  ;;  %v1225_v23 = vmul.f32 %v2506_v39, %v1209_v24 }
 0x2c6   : > { %v3235_v25 = vpop.eup %2509  ;;  %v1224_v22 = vmul.f32 %v3226_v34, %v1208_v6 }
 0x2c7   : > { %v3237_v35 = vpop.eup %2511  ;;  %v1227_v43 = vmul.f32 %v3235_v25, %v1211_v48 }
 0x2c8   : > { %v3244_v19 = vpop.eup %2513  ;;  %v1226_v4 = vmul.f32 %v3237_v35, %v1210_v59 }
 0x2c9   : > { %v3246_v20 = vpop.eup %2515 }
 0x2ca   : > { %v3250_v45 = vpop.eup %2517  ;;  %v1228_v40 = vmul.f32 %v3246_v20, %v1212_v63 }
 0x2cb   : > { %v3252_v26 = vpop.eup %2519 }
 0x2cc   : > { %v3256_v13 = vpop.eup %2521 }
 0x2cd   : > { %v3258_v32 = vpop.eup %2523 }
 0x2ce   : > { %v3262_v16 = vpop.eup %2525 }
 0x2d4   : > { %1323 = vperm.xlu1 %2438, %v3202_v61  }
 0x2d8   : > { %1328 = vperm.xlu1 %2438, %v2498_v8  }
 0x2d9   : > { %1318 = vperm.xlu0 %2437, %v2500_v15  }
 0x2dc   : > { %1338 = vperm.xlu1 %2438, %v3217_v31   ;;  %v1213_v31 = vld [vmem:[#allocation3 + $0x50] sm:$0xff] }
 0x2dd   : > { %1333 = vperm.xlu0 %2437, %v2504_v42   ;;  %v1214_v42 = vld [vmem:[#allocation3 + $0x58] sm:$0xff]  ;;  %v1229_v17 = vmul.f32 %v3244_v19, %v1213_v31 }
 0x2de   : > { %v1230_v44 = vmul.f32 %v3252_v26, %v1214_v42 }
 0x2e0   : > { %1348 = vperm.xlu1 %2438, %v2506_v39  }
 0x2e1   : > { %1343 = vperm.xlu0 %2437, %v3226_v34  }
 0x2e4   : > { %1358 = vperm.xlu1 %2438, %v3235_v25   ;;  %v1234_v25 = vmul.f32 %v3262_v16, %v1218_v41 }
 0x2e5   : > { %1353 = vperm.xlu0 %2437, %v3237_v35  }
 0x2e8   : > { %1368 = vperm.xlu1 %2438, %v3244_v19  }
 0x2e9   : > { %1363 = vperm.xlu0 %2437, %v3246_v20  }
 0x2ec   : > { %1378 = vperm.xlu1 %2438, %v3250_v45  }
 0x2ed   : > { %1373 = vperm.xlu0 %2437, %v3252_v26  }
 0x2f0   : > { %1388 = vperm.xlu1 %2438, %v3256_v13  }
 0x2f1   : > { %1383 = vperm.xlu0 %2437, %v3258_v32  }
 0x2f5   : > { %1393 = vperm.xlu0 %2437, %v3262_v16  }
 0x323   : > { %v1240_v37 = vpop.xlane.xlu0 %1239 }
 0x324   : > { %v1269_v9 = vadd.f32 %v1240_v37, %v1221_v53  ;;  %v1236_v11 = vpop.xlane.xlu1 %1235 }
 0x325   : > { %v1267_v27 = vadd.f32 %v1236_v11, %v1219_v21  ;;  %v1231_v11 = vmul.f32 %v3250_v45, %v1215_v51 }
 0x326   : > { %1286 = vst.msk [vmem:[#allocation3 + $0x10] sm:$0xff] %vm634_vm0, %v1269_v9 }
 0x327   : > { %1284 = vst.msk [vmem:[#allocation3] sm:$0xff] %vm634_vm0, %v1267_v27  ;;  %v1217_v27 = vld [vmem:[#allocation3 + $0x70] sm:$0xff] }
 0x328   : > { %v1242_v0 = vpop.xlane.xlu1 %1241 }
 0x329   : > { %v1270_v12 = vadd.f32 %v1242_v0, %v1222_v47  ;;  %v1216_v47 = vld [vmem:[#allocation3 + $0x68] sm:$0xff] }
 0x32b   : > { %1287 = vst.msk [vmem:[#allocation3 + $0x18] sm:$0xff] %vm634_vm0, %v1270_v12  ;;  %v1238_v50 = vpop.xlane.xlu0 %1237 }
 0x32c   : > { %v1268_v38 = vadd.f32 %v1238_v50, %v1220_v3  ;;  %v1233_v50 = vmul.f32 %v3256_v13, %v1217_v27 }
 0x32d   : > { %v1634_v56 = vld [vmem:[#allocation3 + $0x10] sm:$0xff] }
 0x32e   : > { %1285 = vst.msk [vmem:[#allocation3 + $0x8] sm:$0xff] %vm634_vm0, %v1268_v38  ;;  %2527 = vrcp.f32 %v1634_v56  ;;  %v1632_v7 = vld [vmem:[#allocation3] sm:$0xff]  ;;  %v1232_v38 = vmul.f32 %v3258_v32, %v1216_v47 }
 0x32f   : > { %2529 = vrcp.f32 %v1632_v7 }
 0x330   : > { %v1248_v46 = vpop.xlane.xlu0 %1247 }
 0x331   : > { %v1273_v5 = vadd.f32 %v1248_v46, %v1225_v23 }
 0x332   : > { %v1635_v36 = vld [vmem:[#allocation3 + $0x18] sm:$0xff] }
 0x333   : > { %1290 = vst.msk [vmem:[#allocation3 + $0x30] sm:$0xff] %vm634_vm0, %v1273_v5  ;;  %2531 = vrcp.f32 %v1635_v36 }
 0x334   : > { %v1244_v62 = vpop.xlane.xlu0 %1243 }
 0x335   : > { %v1271_v54 = vadd.f32 %v1244_v62, %v1223_v33  ;;  %v1633_v57 = vld [vmem:[#allocation3 + $0x8] sm:$0xff] }
 0x336   : > { %2533 = vrcp.f32 %v1633_v57 }
 0x337   : > { %1288 = vst.msk [vmem:[#allocation3 + $0x20] sm:$0xff] %vm634_vm0, %v1271_v54 }
 0x338   : > { %v2528_v55 = vpop.eup %2527 }
 0x339   : > { %1676 = vperm.xlu1 %2438, %v2528_v55   ;;  %v2530_v60 = vpop.eup %2529 }
 0x33a   : > { %v1638_v61 = vld [vmem:[#allocation3 + $0x30] sm:$0xff] }
 0x33b   : > { %2535 = vrcp.f32 %v1638_v61 }
 0x33c   : > { %v1250_v2 = vpop.xlane.xlu1 %1249 }
 0x33d   : > { %v2532_v8 = vpop.eup %2531  ;;  %v1274_v15 = vadd.f32 %v1250_v2, %v1226_v4  ;;  %1666 = vperm.xlu1 %2438, %v2530_v60  }
 0x33e   : > { %1681 = vperm.xlu0 %2437, %v2532_v8   ;;  %v1636_v18 = vld [vmem:[#allocation3 + $0x20] sm:$0xff] }
 0x33f   : > { %1291 = vst.msk [vmem:[#allocation3 + $0x38] sm:$0xff] %vm634_vm0, %v1274_v15  ;;  %2537 = vrcp.f32 %v1636_v18 }
 0x340   : > { %v2534_v28 = vpop.eup %2533  ;;  %v1246_v30 = vpop.xlane.xlu1 %1245 }
 0x341   : > { %v1272_v10 = vadd.f32 %v1246_v30, %v1224_v22 }
 0x342   : > { %1671 = vperm.xlu0 %2437, %v2534_v28  }
 0x343   : > { %1289 = vst.msk [vmem:[#allocation3 + $0x28] sm:$0xff] %vm634_vm0, %v1272_v10 }
 0x344   : > { %v1256_v58 = vpop.xlane.xlu0 %1255  ;;  %v1258_v39 = vpop.xlane.xlu1 %1257 }
 0x345   : > { %v2536_v1 = vpop.eup %2535  ;;  %v1277_v29 = vadd.f32 %v1256_v58, %v1229_v17  ;;  %v1278_v34 = vadd.f32 %v1258_v39, %v1230_v44 }
 0x346   : > { %1696 = vperm.xlu1 %2438, %v2536_v1   ;;  %v1639_v35 = vld [vmem:[#allocation3 + $0x38] sm:$0xff] }
 0x347   : > { %1294 = vst.msk [vmem:[#allocation3 + $0x50] sm:$0xff] %vm634_vm0, %v1277_v29  ;;  %1295 = vst.msk [vmem:[#allocation3 + $0x58] sm:$0xff] %vm634_vm0, %v1278_v34  ;;  %2539 = vrcp.f32 %v1639_v35 }
 0x348   : > { %v1252_v19 = vpop.xlane.xlu0 %1251  ;;  %v1254_v26 = vpop.xlane.xlu1 %1253 }
 0x349   : > { %v2538_v53 = vpop.eup %2537  ;;  %v1275_v37 = vadd.f32 %v1252_v19, %v1227_v43  ;;  %v1276_v21 = vadd.f32 %v1254_v26, %v1228_v40 }
 0x34a   : > { %1686 = vperm.xlu1 %2438, %v2538_v53   ;;  %v1637_v9 = vld [vmem:[#allocation3 + $0x28] sm:$0xff] }
 0x34b   : > { %1292 = vst.msk [vmem:[#allocation3 + $0x40] sm:$0xff] %vm634_vm0, %v1275_v37  ;;  %1293 = vst.msk [vmem:[#allocation3 + $0x48] sm:$0xff] %vm634_vm0, %v1276_v21  ;;  %2541 = vrcp.f32 %v1637_v9 }
 0x34c   : > { %v1260_v20 = vpop.xlane.xlu0 %1259  ;;  %v1266_v49 = vpop.xlane.xlu1 %1265 }
 0x34d   : > { %v1279_v52 = vadd.f32 %v1260_v20, %v1231_v11  ;;  %v1282_v0 = vadd.f32 %v1266_v49, %v1234_v25 }
 0x34e   : > { %v1642_v12 = vld [vmem:[#allocation3 + $0x50] sm:$0xff]  ;;  %v1643_v3 = vld [vmem:[#allocation3 + $0x58] sm:$0xff] }
 0x34f   : > { %1296 = vst.msk [vmem:[#allocation3 + $0x60] sm:$0xff] %vm634_vm0, %v1279_v52  ;;  %1299 = vst.msk [vmem:[#allocation3 + $0x78] sm:$0xff] %vm634_vm0, %v1282_v0  ;;  %2543 = vrcp.f32 %v1642_v12 }
 0x350   : > { %v1264_v45 = vpop.xlane.xlu0 %1263  ;;  %v1262_v16 = vpop.xlane.xlu1 %1261  ;;  %2545 = vrcp.f32 %v1643_v3 }
 0x351   : > { %v2540_v24 = vpop.eup %2539  ;;  %v1281_v56 = vadd.f32 %v1264_v45, %v1233_v50  ;;  %v1280_v23 = vadd.f32 %v1262_v16, %v1232_v38 }
 0x352   : > { %1701 = vperm.xlu0 %2437, %v2540_v24   ;;  %v1640_v7 = vld [vmem:[#allocation3 + $0x40] sm:$0xff]  ;;  %v1641_v46 = vld [vmem:[#allocation3 + $0x48] sm:$0xff] }
 0x353   : > { %1298 = vst.msk [vmem:[#allocation3 + $0x70] sm:$0xff] %vm634_vm0, %v1281_v56  ;;  %1297 = vst.msk [vmem:[#allocation3 + $0x68] sm:$0xff] %vm634_vm0, %v1280_v23  ;;  %2547 = vrcp.f32 %v1640_v7 }
 0x354   : > { %2549 = vrcp.f32 %v1641_v46  ;;  %v1324_v30 = vpop.permute.xlu1 %1323 }
 0x355   : > { %v2542_v14 = vpop.eup %2541  ;;  %v1397_v52 = vmul.f32 0.0, %v1324_v30 }
 0x356   : > { %1691 = vperm.xlu0 %2437, %v2542_v14   ;;  %v1644_v13 = vld [vmem:[#allocation3 + $0x60] sm:$0xff]  ;;  %v1647_v54 = vld [vmem:[#allocation3 + $0x78] sm:$0xff] }
 0x357   : > { %2551 = vrcp.f32 %v1644_v13 }
 0x358   : > { %v1319_v17 = vpop.permute.xlu0 %1318  ;;  %v1329_v58 = vpop.permute.xlu1 %1328 }
 0x359   : > { %v2544_v32 = vpop.eup %2543  ;;  %v1398_v25 = vmul.f32 0.0, %v1329_v58  ;;  %v1396_v0 = vmul.f32 0.0, %v1319_v17 }
 0x35a   : > { %v2546_v5 = vpop.eup %2545  ;;  %1716 = vperm.xlu1 %2438, %v2544_v32   ;;  %v1646_v36 = vld [vmem:[#allocation3 + $0x70] sm:$0xff]  ;;  %v1645_v33 = vld [vmem:[#allocation3 + $0x68] sm:$0xff] }
 0x35b   : > { %1721 = vperm.xlu0 %2437, %v2546_v5   ;;  %2553 = vrcp.f32 %v1646_v36 }
 0x35c   : > { %2555 = vrcp.f32 %v1645_v33  ;;  %v1334_v48 = vpop.permute.xlu0 %1333  ;;  %v1339_v29 = vpop.permute.xlu1 %1338 }
 0x35d   : > { %v2548_v62 = vpop.eup %2547  ;;  %2557 = vrcp.f32 %v1647_v54  ;;  %v1399_v20 = vmul.f32 0.0, %v1334_v48  ;;  %v1400_v33 = vmul.f32 0.0, %v1339_v29 }
 0x35e   : > { %v2550_v57 = vpop.eup %2549  ;;  %1706 = vperm.xlu1 %2438, %v2548_v62  }
 0x35f   : > { %1711 = vperm.xlu0 %2437, %v2550_v57  }
 0x360   : > { %v1344_v35 = vpop.permute.xlu0 %1343  ;;  %v1349_v43 = vpop.permute.xlu1 %1348 }
 0x361   : > { %v2552_v55 = vpop.eup %2551  ;;  %v1402_v14 = vmul.f32 0.0, %v1349_v43  ;;  %v1401_v62 = vmul.f32 0.0, %v1344_v35 }
 0x362   : > { %1726 = vperm.xlu1 %2438, %v2552_v55  }
 0x364   : > { %v1354_v40 = vpop.permute.xlu0 %1353  ;;  %v1359_v19 = vpop.permute.xlu1 %1358 }
 0x365   : > { %v2554_v59 = vpop.eup %2553  ;;  %v1403_v13 = vmul.f32 0.0, %v1354_v40  ;;  %v1404_v48 = vmul.f32 0.0, %v1359_v19 }
 0x366   : > { %v2556_v61 = vpop.eup %2555  ;;  %1736 = vperm.xlu1 %2438, %v2554_v59  }
 0x367   : > { %1731 = vperm.xlu0 %2437, %v2556_v61   ;;  %v2558_v4 = vpop.eup %2557 }
 0x368   : > { %v1364_v26 = vpop.permute.xlu0 %1363  ;;  %v1369_v51 = vpop.permute.xlu1 %1368 }
 0x36b   : > { %1741 = vperm.xlu0 %2437, %v2558_v4  }
 0x36c   : > { %v1374_v41 = vpop.permute.xlu0 %1373  ;;  %v3309_v53 = vpop.permute.xlu1 %1378 }
 0x36d   : > { %v1407_v30 = vmul.f32 0.0, %v1374_v41  ;;  %v1408_v19 = vmul.f32 0.0, %v3309_v53 }
 0x370   : > { %v3311_v37 = vpop.permute.xlu0 %1383  ;;  %v3313_v21 = vpop.permute.xlu1 %1388 }
 0x374   : > { %v2331_v60 = vpop.f32.mrb[0].mxu1  ;;  %v3315_v9 = vpop.permute.xlu0 %1393 }
 0x375   : > { %v1502_v2 = vpop.f32.mrb[1].mxu1  ;;  %v1567_v49 = vadd.f32 %v2331_v60, %v1398_v25 }
 0x376   : > { %v2332_v6 = vpop.f32.mrb[2].mxu1  ;;  %v1565_v38 = vadd.f32 %v1502_v2, %v1396_v0  ;;  %v1406_v2 = vmul.f32 0.0, %v1369_v51 }
 0x377   : > { %v1505_v8 = vpop.f32.mrb[3].mxu1  ;;  %v1568_v27 = vadd.f32 %v2332_v6, %v1399_v20 }
 0x378   : > { %v1566_v45 = vadd.f32 %v1505_v8, %v1397_v52 }
 0x384   : > { %v2335_v15 = vpop.f32.mrb[4].mxu1 }
 0x385   : > { %v1518_v18 = vpop.f32.mrb[5].mxu1  ;;  %v1571_v32 = vadd.f32 %v2335_v15, %v1402_v14 }
 0x386   : > { %v2336_v22 = vpop.f32.mrb[6].mxu1  ;;  %v1569_v59 = vadd.f32 %v1518_v18, %v1400_v33 }
 0x387   : > { %v1521_v28 = vpop.f32.mrb[7].mxu1  ;;  %v1572_v5 = vadd.f32 %v2336_v22, %v1403_v13 }
 0x388   : > { %v1570_v61 = vadd.f32 %v1521_v28, %v1401_v62  ;;  %v1405_v28 = vmul.f32 0.0, %v1364_v26 }
 0x38c   : > { %v3293_v31 = vpop.f32.mrb[8].mxu1 }
 0x38d   : > { %v3295_v42 = vpop.f32.mrb[9].mxu1  ;;  %v1575_v17 = vadd.f32 %v3293_v31, %v1406_v2 }
 0x38e   : > { %v3297_v10 = vpop.f32.mrb[10].mxu1  ;;  %v1573_v43 = vadd.f32 %v3295_v42, %v1404_v48 }
 0x38f   : > { %v3299_v44 = vpop.f32.mrb[11].mxu1  ;;  %v1576_v22 = vadd.f32 %v3297_v10, %v1407_v30 }
 0x390   : > { %v1574_v40 = vadd.f32 %v3299_v44, %v1405_v28 }
 0x394   : > { %v3301_v39 = vpop.f32.mrb[12].mxu1 }
 0x395   : > { %v3303_v63 = vpop.f32.mrb[13].mxu1 }
 0x396   : > { %v3305_v1 = vpop.f32.mrb[14].mxu1  ;;  %v1577_v26 = vadd.f32 %v3303_v63, %v1408_v19 }
 0x397   : > { %v3307_v34 = vpop.f32.mrb[15].mxu1 }
 0x3b8   : > { %v1677_v11 = vpop.permute.xlu1 %1676 }
 0x3b9   : > { %v1746_v12 = vmul.f32 %v1677_v11, %v1567_v49  ;;  %v1409_v49 = vmul.f32 0.0, %v3311_v37 }
 0x3bb   : > { %v1578_v42 = vadd.f32 %v3307_v34, %v1409_v49 }
 0x3bc   : > { %v1667_v50 = vpop.permute.xlu1 %1666 }
 0x3bd   : > { %v1682_v47 = vpop.permute.xlu0 %1681  ;;  %v1744_v56 = vmul.f32 %v1667_v50, %v1565_v38 }
 0x3be   : > { %v1747_v3 = vmul.f32 %v1682_v47, %v1568_v27  ;;  %v1410_v27 = vmul.f32 0.0, %v3313_v21  ;;  %v1411_v47 = vmul.f32 0.0, %v3315_v9 }
 0x3c0   : > { %v2210_v16 = vpack.c.bf16 %v1747_v3, %v1746_v12  ;;  %v1579_v3 = vadd.f32 %v3301_v39, %v1410_v27  ;;  %v1580_v53 = vadd.f32 %v3305_v1, %v1411_v47 }
 0x3c1   : > { %v1672_v24 = vpop.permute.xlu0 %1671 }
 0x3c2   : > { %2242 = vst [vmem:[%s3318_s15 + $0x8] sm:$0xff] %v2210_v16   ;;  %v1745_v23 = vmul.f32 %v1672_v24, %v1566_v45 }
 0x3c4   : > { %v2205_v7 = vpack.c.bf16 %v1745_v23, %v1744_v56 }
 0x3c5   : > { %v1697_v46 = vpop.permute.xlu1 %1696 }
 0x3c6   : > { %2206 = vst [vmem:[%s3318_s15] sm:$0xff] %v2205_v7   ;;  %v1750_v54 = vmul.f32 %v1697_v46, %v1571_v32 }
 0x3c9   : > { %v1687_v55 = vpop.permute.xlu1 %1686  ;;  %v1873_v34 = vld [vmem:[%s3318_s15 + $0x8] sm:$0xf] (%p2788_p13)  ;;  %v1875_v21 = vld [vmem:[%s3318_s15 + $0xc] sm:$0xf] (%p2788_p13) }
 0x3ca   : > { %v1748_v6 = vmul.f32 %v1687_v55, %v1569_v59  ;;  %1874 = vst [vmem:[%s1853_s6 + $0x10] sm:$0xf] (%p2788_p13), %v1873_v34  ;;  %1876 = vst [vmem:[%s1853_s6 + $0x18] sm:$0xf] (%p2788_p13), %v1875_v21 }
 0x3cd   : > { %v1869_v39 = vld [vmem:[%s3318_s15] sm:$0xf] (%p2788_p13)  ;;  %v1871_v1 = vld [vmem:[%s3318_s15 + $0x4] sm:$0xf] (%p2788_p13) }
 0x3ce   : > { %1870 = vst [vmem:[%s1853_s6] sm:$0xf] (%p2788_p13), %v1869_v39  ;;  %1872 = vst [vmem:[%s1853_s6 + $0x8] sm:$0xf] (%p2788_p13), %v1871_v1 }
 0x3d1   : > { %v1702_v36 = vpop.permute.xlu0 %1701 }
 0x3d2   : > { %v1751_v57 = vmul.f32 %v1702_v36, %v1572_v5 }
 0x3d4   : > { %v2220_v4 = vpack.c.bf16 %v1751_v57, %v1750_v54 }
 0x3d5   : > { %v1692_v60 = vpop.permute.xlu0 %1691 }
 0x3d6   : > { %2244 = vst [vmem:[%s3318_s15 + $0x18] sm:$0xff] %v2220_v4   ;;  %v1749_v8 = vmul.f32 %v1692_v60, %v1570_v61 }
 0x3d8   : > { %v2215_v15 = vpack.c.bf16 %v1749_v8, %v1748_v6 }
 0x3d9   : > { %v1717_v58 = vpop.permute.xlu1 %1716 }
 0x3da   : > { %2243 = vst [vmem:[%s3318_s15 + $0x10] sm:$0xff] %v2215_v15   ;;  %v1722_v29 = vpop.permute.xlu0 %1721  ;;  %v1754_v18 = vmul.f32 %v1717_v58, %v1575_v17 }
 0x3db   : > { %v1755_v35 = vmul.f32 %v1722_v29, %v1576_v22 }
 0x3dd   : > { %v2230_v51 = vpack.c.bf16 %v1755_v35, %v1754_v18  ;;  %v1707_v41 = vpop.permute.xlu1 %1706  ;;  %v1881_v24 = vld [vmem:[%s3318_s15 + $0x18] sm:$0xf] (%p2788_p13)  ;;  %v1883_v56 = vld [vmem:[%s3318_s15 + $0x1c] sm:$0xf] (%p2788_p13) }
 0x3de   : > { %v1712_v11 = vpop.permute.xlu0 %1711  ;;  %v1752_v31 = vmul.f32 %v1707_v41, %v1573_v43  ;;  %1882 = vst [vmem:[%s1853_s6 + $0x30] sm:$0xf] (%p2788_p13), %v1881_v24  ;;  %1884 = vst [vmem:[%s1853_s6 + $0x38] sm:$0xf] (%p2788_p13), %v1883_v56 }
 0x3df   : > { %2246 = vst [vmem:[%s3318_s15 + $0x28] sm:$0xff] %v2230_v51   ;;  %v1753_v25 = vmul.f32 %v1712_v11, %v1574_v40 }
 0x3e1   : > { %v2225_v20 = vpack.c.bf16 %v1753_v25, %v1752_v31  ;;  %v1727_v10 = vpop.permute.xlu1 %1726  ;;  %v1877_v9 = vld [vmem:[%s3318_s15 + $0x10] sm:$0xf] (%p2788_p13)  ;;  %v1879_v16 = vld [vmem:[%s3318_s15 + $0x14] sm:$0xf] (%p2788_p13) }
 0x3e2   : > { %v1756_v52 = vmul.f32 %v1727_v10, %v1577_v26  ;;  %1878 = vst [vmem:[%s1853_s6 + $0x20] sm:$0xf] (%p2788_p13), %v1877_v9  ;;  %1880 = vst [vmem:[%s1853_s6 + $0x28] sm:$0xf] (%p2788_p13), %v1879_v16 }
 0x3e3   : > { %2245 = vst [vmem:[%s3318_s15 + $0x20] sm:$0xff] %v2225_v20  }
 0x3e5   : > { %v1737_v12 = vpop.permute.xlu1 %1736 }
 0x3e6   : > { %v1732_v44 = vpop.permute.xlu0 %1731  ;;  %v1758_v38 = vmul.f32 %v1737_v12, %v1579_v3  ;;  %v1889_v46 = vld [vmem:[%s3318_s15 + $0x28] sm:$0xf] (%p2788_p13)  ;;  %v1891_v14 = vld [vmem:[%s3318_s15 + $0x2c] sm:$0xf] (%p2788_p13) }
 0x3e7   : > { %v1757_v0 = vmul.f32 %v1732_v44, %v1578_v42  ;;  %1890 = vst [vmem:[%s1853_s6 + $0x50] sm:$0xf] (%p2788_p13), %v1889_v46  ;;  %1892 = vst [vmem:[%s1853_s6 + $0x58] sm:$0xf] (%p2788_p13), %v1891_v14 }
 0x3e9   : > { %v2235_v50 = vpack.c.bf16 %v1757_v0, %v1756_v52  ;;  %1846 = sbr.rel (!%p2788_p13) target bundleno = 1016 (0x3f8), region = 171 }
 0x3ea   : > { %v1742_v37 = vpop.permute.xlu0 %1741  ;;  %v1885_v23 = vld [vmem:[%s3318_s15 + $0x20] sm:$0xf] (%p2788_p13)  ;;  %v1887_v7 = vld [vmem:[%s3318_s15 + $0x24] sm:$0xf] (%p2788_p13) }
 0x3eb   : > { %2247 = vst [vmem:[%s3318_s15 + $0x30] sm:$0xff] %v2235_v50   ;;  %v1759_v63 = vmul.f32 %v1742_v37, %v1580_v53  ;;  %1886 = vst [vmem:[%s1853_s6 + $0x40] sm:$0xf] (%p2788_p13), %v1885_v23 }
 0x3ec   : > { %1888 = vst [vmem:[%s1853_s6 + $0x48] sm:$0xf] (%p2788_p13), %v1887_v7 }
 0x3ed   : > { %v2240_v45 = vpack.c.bf16 %v1759_v63, %v1758_v38 }
 0x3ef   : > { %2248 = vst [vmem:[%s3318_s15 + $0x38] sm:$0xff] %v2240_v45  }
 0x3f2   : > { %v1893_v13 = vld [vmem:[%s3318_s15 + $0x30] sm:$0xf]  ;;  %v1895_v32 = vld [vmem:[%s3318_s15 + $0x34] sm:$0xf] }
 0x3f3   : > { %1894 = vst [vmem:[%s1853_s6 + $0x60] sm:$0xf] %v1893_v13  ;;  %1896 = vst [vmem:[%s1853_s6 + $0x68] sm:$0xf] %v1895_v32 }
 0x3f6   : > { %v1897_v5 = vld [vmem:[%s3318_s15 + $0x38] sm:$0xf]  ;;  %v1899_v36 = vld [vmem:[%s3318_s15 + $0x3c] sm:$0xf] }
 0x3f7   : > { %1898 = vst [vmem:[%s1853_s6 + $0x70] sm:$0xf] %v1897_v5  ;;  %1900 = vst [vmem:[%s1853_s6 + $0x78] sm:$0xf] %v1899_v36 }
 0x3f8 PF: > { %s14_s25 = sadd.s32 1, %s2645_s25   ;;  %s3426_s4 = sld [smem:[#allocation10_spill]] }
 0x3f9   : > { %p11_p5 = scmp.ge.s32.totalorder %s14_s25, 6   ;;  %s3427_s15 = smov %s2609_s16 }
 0x3fa   : > { %s3428_s16 = smov %s2793_s29  ;;  %s3429_s17 = smov %s2617_s18 }
 0x3fb   : > { %s3430_s18 = smov %s2771_s5  ;;  %s3431_s19 = smov %s2625_s20 }
 0x3fc   : > { %s3432_s20 = smov %s2768_s26  ;;  %s3433_s21 = smov %s2637_s23 }
 0x3fd   : > { %s3434_s22 = smov %s2641_s24  ;;  %s3435_s23 = smov %s3438_s27 }
 0x3fe   : > { %s3436_s24 = smov %s3426_s4  ;;  %13 = sbr.rel (!%p11_p5) target bundleno = 8 (0x8), region = 262 }

// kernel: verb_model_bert_forward.10
= control target key start
LH: loop header
LB: loop body
LE: loop exit
PB: predicated region body
PF: predicated region fallthrough
CT: control target
= control target key end

     0   :  { %s3587_s1 = inlined_call_operand.vmem [shape: bf16[256,768], index: 1, kind: input, shape index: {}]   ;;  %s3588_s0 = inlined_call_operand.vmem [shape: f32[256,256], index: 0, kind: input, shape index: {}]   ;;  %s3589_s2 = inlined_call_operand.vmem [shape: f32[1,768], index: 2, kind: input, shape index: {}]   ;;  %s3590_s3 = inlined_call_operand.vmem [shape: bf16[256,768], index: 3, kind: output, shape index: {}]  }
   0x1   :  { %v2293_v0 = vld [vmem:[%s3587_s1 + $0x4] ss:$24 sps:$4 sm:$0xff]   ;;  %v2295_v1 = vld [vmem:[%s3587_s1] ss:$24 sps:$4 sm:$0xff]   ;;  %v2296_v2 = vld [vmem:[%s3587_s1 + $0x34] ss:$24 sps:$4 sm:$0xff]  }
   0x2   :  { %718 = vmatprep.subr.bf16.mxu0 %v2293_v0  ;;  %2261 = vmatprep.subr.bf16.mxu1 %v2293_v0  ;;  %v2298_v3 = vld [vmem:[%s3587_s1 + $0x30] ss:$24 sps:$4 sm:$0xff]   ;;  %v2299_v4 = vld [vmem:[%s3587_s1 + $0x64] ss:$24 sps:$4 sm:$0xff]   ;;  %v2301_v5 = vld [vmem:[%s3587_s1 + $0x60] ss:$24 sps:$4 sm:$0xff]  }
   0x3   :  { %719 = vmatpush1.bf16.msra.mxu0 %v2295_v1  ;;  %2277 = vmatpush1.bf16.msra.mxu1 %v2295_v1  ;;  %v2302_v6 = vld [vmem:[%s3587_s1 + $0x94] ss:$24 sps:$4 sm:$0xff]   ;;  %v2304_v7 = vld [vmem:[%s3587_s1 + $0x90] ss:$24 sps:$4 sm:$0xff]   ;;  %v2305_v8 = vld [vmem:[%s3587_s1 + $0xc4] ss:$24 sps:$4 sm:$0xff]  }
   0x4   :  { %720 = vmatprep.subr.bf16.mxu0 %v2296_v2  ;;  %2262 = vmatprep.subr.bf16.mxu1 %v2296_v2  ;;  %v2307_v9 = vld [vmem:[%s3587_s1 + $0xc0] ss:$24 sps:$4 sm:$0xff]   ;;  %v2308_v10 = vld [vmem:[%s3587_s1 + $0xf4] ss:$24 sps:$4 sm:$0xff]   ;;  %v2310_v11 = vld [vmem:[%s3587_s1 + $0xf0] ss:$24 sps:$4 sm:$0xff]  }
   0x5   :  { %v2311_v12 = vld [vmem:[%s3587_s1 + $0x124] ss:$24 sps:$4 sm:$0xff]   ;;  %v15_v13 = vld [vmem:[%s3588_s0 + $0x8] sm:$0xff]  ;;  %v2313_v18 = vld [vmem:[%s3587_s1 + $0x120] ss:$24 sps:$4 sm:$0xff]  }
   0x6   :  { %v17_v14 = vld [vmem:[%s3588_s0 + $0x18] sm:$0xff]  ;;  %v47_v16 = vld [vmem:[%s3588_s0 + $0x108] sm:$0xff]  ;;  %v14_v38 = vld [vmem:[%s3588_s0] sm:$0xff] }
   0x7   :  { %721 = vmatpush1.bf16.msra.mxu0 %v2298_v3  ;;  %2278 = vmatpush1.bf16.msra.mxu1 %v2298_v3  ;;  %v2502_v15 = vpack.c.bf16 %v17_v14, %v15_v13  ;;  %v49_v17 = vld [vmem:[%s3588_s0 + $0x118] sm:$0xff]  ;;  %v2314_v20 = vld [vmem:[%s3587_s1 + $0x154] ss:$24 sps:$4 sm:$0xff]   ;;  %v2316_v21 = vld [vmem:[%s3587_s1 + $0x150] ss:$24 sps:$4 sm:$0xff]  }
   0x8   :  { %722 = vmatprep.subr.bf16.mxu0 %v2299_v4  ;;  %2263 = vmatprep.subr.bf16.mxu1 %v2299_v4  ;;  %v2513_v19 = vpack.c.bf16 %v49_v17, %v47_v16  ;;  %v2317_v22 = vld [vmem:[%s3587_s1 + $0x184] ss:$24 sps:$4 sm:$0xff]   ;;  %v2319_v23 = vld [vmem:[%s3587_s1 + $0x180] ss:$24 sps:$4 sm:$0xff]   ;;  %v2320_v24 = vld [vmem:[%s3587_s1 + $0x1b4] ss:$24 sps:$4 sm:$0xff]  }
   0x9   :  { %750 = vmatprep.mubr.bf16.mxu0 %v2502_v15  ;;  %v2322_v25 = vld [vmem:[%s3587_s1 + $0x1b0] ss:$24 sps:$4 sm:$0xff]   ;;  %v2323_v26 = vld [vmem:[%s3587_s1 + $0x1e4] ss:$24 sps:$4 sm:$0xff]   ;;  %v2325_v27 = vld [vmem:[%s3587_s1 + $0x1e0] ss:$24 sps:$4 sm:$0xff]  }
   0xa   :  { %830 = vmatprep.mubr.bf16.mxu1 %v2513_v19  ;;  %v2326_v28 = vld [vmem:[%s3587_s1 + $0x214] ss:$24 sps:$4 sm:$0xff]   ;;  %v2328_v29 = vld [vmem:[%s3587_s1 + $0x210] ss:$24 sps:$4 sm:$0xff]   ;;  %v2329_v30 = vld [vmem:[%s3587_s1 + $0x244] ss:$24 sps:$4 sm:$0xff]  }
   0xb   :  { %723 = vmatpush1.bf16.msra.mxu0 %v2301_v5  ;;  %2279 = vmatpush1.bf16.msra.mxu1 %v2301_v5  ;;  %v2331_v31 = vld [vmem:[%s3587_s1 + $0x240] ss:$24 sps:$4 sm:$0xff]   ;;  %v2332_v32 = vld [vmem:[%s3587_s1 + $0x274] ss:$24 sps:$4 sm:$0xff]   ;;  %v2334_v33 = vld [vmem:[%s3587_s1 + $0x270] ss:$24 sps:$4 sm:$0xff]  }
   0xc   :  { %724 = vmatprep.subr.bf16.mxu0 %v2302_v6  ;;  %2264 = vmatprep.subr.bf16.mxu1 %v2302_v6  ;;  %v2335_v34 = vld [vmem:[%s3587_s1 + $0x2a4] ss:$24 sps:$4 sm:$0xff]   ;;  %v2337_v35 = vld [vmem:[%s3587_s1 + $0x2a0] ss:$24 sps:$4 sm:$0xff]   ;;  %v2338_v36 = vld [vmem:[%s3587_s1 + $0x2d4] ss:$24 sps:$4 sm:$0xff]  }
   0xd   :  { %v2340_v37 = vld [vmem:[%s3587_s1 + $0x2d0] ss:$24 sps:$4 sm:$0xff]   ;;  %v46_v40 = vld [vmem:[%s3588_s0 + $0x100] sm:$0xff]  ;;  %v2346_v43 = vld [vmem:[%s3587_s1 + $0x14] ss:$24 sps:$4 sm:$0xff]  }
   0xe   :  { %v16_v39 = vld [vmem:[%s3588_s0 + $0x10] sm:$0xff]  ;;  %v2343_v42 = vld [vmem:[%s3587_s1 + $0xc] ss:$24 sps:$4 sm:$0xff]   ;;  %v21_v47 = vld [vmem:[%s3588_s0 + $0x38] sm:$0xff] }
   0xf   :  { %725 = vmatpush1.bf16.msra.mxu0 %v2304_v7  ;;  %2280 = vmatpush1.bf16.msra.mxu1 %v2304_v7  ;;  %v48_v41 = vld [vmem:[%s3588_s0 + $0x110] sm:$0xff]  ;;  %v19_v44 = vld [vmem:[%s3588_s0 + $0x28] sm:$0xff]  ;;  %v2592_v45 = vpack.c.bf16 %v16_v39, %v14_v38  ;;  %v53_v49 = vld [vmem:[%s3588_s0 + $0x138] sm:$0xff] }
  0x10   :  { %726 = vmatprep.subr.bf16.mxu0 %v2305_v8  ;;  %2265 = vmatprep.subr.bf16.mxu1 %v2305_v8  ;;  %v2594_v46 = vpack.c.bf16 %v48_v41, %v46_v40  ;;  %v51_v48 = vld [vmem:[%s3588_s0 + $0x128] sm:$0xff]  ;;  %v2349_v52 = vld [vmem:[%s3587_s1 + $0x3c] ss:$24 sps:$4 sm:$0xff]   ;;  %v2347_v54 = vld [vmem:[%s3587_s1 + $0x38] ss:$24 sps:$4 sm:$0xff]   ;;  %v2623_v56 = vpack.c.bf16 %v21_v47, %v19_v44 }
  0x11   :  { %v2341_v50 = vld [vmem:[%s3587_s1 + $0x8] ss:$24 sps:$4 sm:$0xff]   ;;  %v2352_v53 = vld [vmem:[%s3587_s1 + $0x44] ss:$24 sps:$4 sm:$0xff]   ;;  %v2625_v57 = vpack.c.bf16 %v53_v49, %v51_v48  ;;  %v20_v59 = vld [vmem:[%s3588_s0 + $0x30] sm:$0xff] }
  0x12   :  { %v2344_v51 = vld [vmem:[%s3587_s1 + $0x10] ss:$24 sps:$4 sm:$0xff]   ;;  %v2350_v55 = vld [vmem:[%s3587_s1 + $0x40] ss:$24 sps:$4 sm:$0xff]   ;;  %v2355_v62 = vld [vmem:[%s3587_s1 + $0x6c] ss:$24 sps:$4 sm:$0xff]  }
  0x13   :  { %727 = vmatpush1.bf16.msra.mxu0 %v2307_v9  ;;  %2281 = vmatpush1.bf16.msra.mxu1 %v2307_v9  ;;  %v18_v58 = vld [vmem:[%s3588_s0 + $0x20] sm:$0xff]  ;;  %v52_v61 = vld [vmem:[%s3588_s0 + $0x130] sm:$0xff]  ;;  %v23_v0 = vld [vmem:[%s3588_s0 + $0x48] sm:$0xff] }
  0x14   :  { %728 = vmatprep.subr.bf16.mxu0 %v2308_v10  ;;  %2266 = vmatprep.subr.bf16.mxu1 %v2308_v10  ;;  %v50_v60 = vld [vmem:[%s3588_s0 + $0x120] sm:$0xff]  ;;  %v2358_v63 = vld [vmem:[%s3587_s1 + $0x74] ss:$24 sps:$4 sm:$0xff]   ;;  %v2652_v1 = vpack.c.bf16 %v20_v59, %v18_v58  ;;  %v25_v3 = vld [vmem:[%s3588_s0 + $0x58] sm:$0xff] }
  0x15   :  { %v2654_v2 = vpack.c.bf16 %v52_v61, %v50_v60  ;;  %v55_v4 = vld [vmem:[%s3588_s0 + $0x148] sm:$0xff]  ;;  %v57_v5 = vld [vmem:[%s3588_s0 + $0x158] sm:$0xff]  ;;  %v22_v14 = vld [vmem:[%s3588_s0 + $0x40] sm:$0xff] }
  0x16   :  { %v2353_v6 = vld [vmem:[%s3587_s1 + $0x68] ss:$24 sps:$4 sm:$0xff]   ;;  %v2361_v8 = vld [vmem:[%s3587_s1 + $0x9c] ss:$24 sps:$4 sm:$0xff]   ;;  %v2359_v10 = vld [vmem:[%s3587_s1 + $0x98] ss:$24 sps:$4 sm:$0xff]   ;;  %v2685_v13 = vpack.c.bf16 %v57_v5, %v55_v4 }
  0x17   :  { %729 = vmatpush1.bf16.msra.mxu0 %v2310_v11  ;;  %2282 = vmatpush1.bf16.msra.mxu1 %v2310_v11  ;;  %v2356_v7 = vld [vmem:[%s3587_s1 + $0x70] ss:$24 sps:$4 sm:$0xff]   ;;  %v2364_v9 = vld [vmem:[%s3587_s1 + $0xa4] ss:$24 sps:$4 sm:$0xff]   ;;  %v2362_v11 = vld [vmem:[%s3587_s1 + $0xa0] ss:$24 sps:$4 sm:$0xff]  }
  0x18   :  { %730 = vmatprep.subr.bf16.mxu0 %v2311_v12  ;;  %2267 = vmatprep.subr.bf16.mxu1 %v2311_v12  ;;  %v2683_v12 = vpack.c.bf16 %v25_v3, %v23_v0  ;;  %v24_v16 = vld [vmem:[%s3588_s0 + $0x50] sm:$0xff]  ;;  %v54_v17 = vld [vmem:[%s3588_s0 + $0x140] sm:$0xff]  ;;  %v33_v47 = vld [vmem:[%s3588_s0 + $0x98] sm:$0xff] }
  0x19   :  { %v58_v38 = vld [vmem:[%s3588_s0 + $0x160] sm:$0xff]  ;;  %v60_v39 = vld [vmem:[%s3588_s0 + $0x170] sm:$0xff]  ;;  %v63_v48 = vld [vmem:[%s3588_s0 + $0x188] sm:$0xff] }
  0x1a   :  { %v2379_v40 = vld [vmem:[%s3587_s1 + $0x12c] ss:$24 sps:$4 sm:$0xff]   ;;  %v2774_v44 = vpack.c.bf16 %v60_v39, %v58_v38  ;;  %v65_v49 = vld [vmem:[%s3588_s0 + $0x198] sm:$0xff]  ;;  %v32_v61 = vld [vmem:[%s3588_s0 + $0x90] sm:$0xff] }
  0x1b   :  { %731 = vmatpush1.bf16.msra.mxu0 %v2313_v18  ;;  %2283 = vmatpush1.bf16.msra.mxu1 %v2313_v18  ;;  %v56_v18 = vld [vmem:[%s3588_s0 + $0x150] sm:$0xff]  ;;  %v2386_v59 = vld [vmem:[%s3587_s1 + $0x160] ss:$24 sps:$4 sm:$0xff]   ;;  %v2391_v0 = vld [vmem:[%s3587_s1 + $0x18c] ss:$24 sps:$4 sm:$0xff]  }
  0x1c   :  { %732 = vmatprep.subr.bf16.mxu0 %v2314_v20  ;;  %2268 = vmatprep.subr.bf16.mxu1 %v2314_v20  ;;  %v2367_v20 = vld [vmem:[%s3587_s1 + $0xcc] ss:$24 sps:$4 sm:$0xff]   ;;  %v2383_v58 = vld [vmem:[%s3587_s1 + $0x158] ss:$24 sps:$4 sm:$0xff]   ;;  %v2401_v38 = vld [vmem:[%s3587_s1 + $0x1e8] ss:$24 sps:$4 sm:$0xff]  }
  0x1d   :  { %v2382_v41 = vld [vmem:[%s3587_s1 + $0x134] ss:$24 sps:$4 sm:$0xff]   ;;  %v30_v60 = vld [vmem:[%s3588_s0 + $0x80] sm:$0xff]  ;;  %v2404_v39 = vld [vmem:[%s3587_s1 + $0x1f0] ss:$24 sps:$4 sm:$0xff]  }
  0x1e   :  { %v2394_v3 = vld [vmem:[%s3587_s1 + $0x194] ss:$24 sps:$4 sm:$0xff]   ;;  %v2832_v5 = vpack.c.bf16 %v32_v61, %v30_v60 }
  0x1f   :  { %733 = vmatpush1.bf16.msra.mxu0 %v2316_v21  ;;  %2284 = vmatpush1.bf16.msra.mxu1 %v2316_v21  ;;  %v2370_v21 = vld [vmem:[%s3587_s1 + $0xd4] ss:$24 sps:$4 sm:$0xff]  }
  0x20   :  { %734 = vmatprep.subr.bf16.mxu0 %v2317_v22  ;;  %2269 = vmatprep.subr.bf16.mxu1 %v2317_v22  ;;  %v27_v22 = vld [vmem:[%s3588_s0 + $0x68] sm:$0xff] }
  0x21   :  { %v35_v4 = vld [vmem:[%s3588_s0 + $0xa8] sm:$0xff] }
  0x22   :  { %v43_v60 = vld [vmem:[%s3588_s0 + $0xe8] sm:$0xff] }
  0x23   :  { %735 = vmatpush1.bf16.msra.mxu0 %v2319_v23  ;;  %2285 = vmatpush1.bf16.msra.mxu1 %v2319_v23  ;;  %v2712_v23 = vpack.c.bf16 %v24_v16, %v22_v14  ;;  %v2397_v14 = vld [vmem:[%s3587_s1 + $0x1bc] ss:$24 sps:$4 sm:$0xff]  }
  0x24   :  { %736 = vmatprep.subr.bf16.mxu0 %v2320_v24  ;;  %2270 = vmatprep.subr.bf16.mxu1 %v2320_v24  ;;  %v2714_v24 = vpack.c.bf16 %v56_v18, %v54_v17  ;;  %v2400_v16 = vld [vmem:[%s3587_s1 + $0x1c4] ss:$24 sps:$4 sm:$0xff]  }
  0x27   :  { %737 = vmatpush1.bf16.msra.mxu0 %v2322_v25  ;;  %2286 = vmatpush1.bf16.msra.mxu1 %v2322_v25  ;;  %v29_v25 = vld [vmem:[%s3588_s0 + $0x78] sm:$0xff] }
  0x28   :  { %738 = vmatprep.subr.bf16.mxu0 %v2323_v26  ;;  %2271 = vmatprep.subr.bf16.mxu1 %v2323_v26  ;;  %v59_v26 = vld [vmem:[%s3588_s0 + $0x168] sm:$0xff] }
  0x2b   :  { %739 = vmatpush1.bf16.msra.mxu0 %v2325_v27  ;;  %2287 = vmatpush1.bf16.msra.mxu1 %v2325_v27  ;;  %v61_v27 = vld [vmem:[%s3588_s0 + $0x178] sm:$0xff] }
  0x2c   :  { %740 = vmatprep.subr.bf16.mxu0 %v2326_v28  ;;  %2272 = vmatprep.subr.bf16.mxu1 %v2326_v28  ;;  %v2365_v28 = vld [vmem:[%s3587_s1 + $0xc8] ss:$24 sps:$4 sm:$0xff]  }
  0x2f   :  { %741 = vmatpush1.bf16.msra.mxu0 %v2328_v29  ;;  %2288 = vmatpush1.bf16.msra.mxu1 %v2328_v29  ;;  %v2368_v29 = vld [vmem:[%s3587_s1 + $0xd0] ss:$24 sps:$4 sm:$0xff]  }
  0x30   :  { %742 = vmatprep.subr.bf16.mxu0 %v2329_v30  ;;  %2273 = vmatprep.subr.bf16.mxu1 %v2329_v30  ;;  %v2373_v30 = vld [vmem:[%s3587_s1 + $0xfc] ss:$24 sps:$4 sm:$0xff]  }
  0x33   :  { %743 = vmatpush1.bf16.msra.mxu0 %v2331_v31  ;;  %2289 = vmatpush1.bf16.msra.mxu1 %v2331_v31  ;;  %v2376_v31 = vld [vmem:[%s3587_s1 + $0x104] ss:$24 sps:$4 sm:$0xff]  }
  0x34   :  { %744 = vmatprep.subr.bf16.mxu0 %v2332_v32  ;;  %2274 = vmatprep.subr.bf16.mxu1 %v2332_v32  ;;  %v2371_v32 = vld [vmem:[%s3587_s1 + $0xf8] ss:$24 sps:$4 sm:$0xff]  }
  0x37   :  { %745 = vmatpush1.bf16.msra.mxu0 %v2334_v33  ;;  %2290 = vmatpush1.bf16.msra.mxu1 %v2334_v33  ;;  %v2374_v33 = vld [vmem:[%s3587_s1 + $0x100] ss:$24 sps:$4 sm:$0xff]  }
  0x38   :  { %746 = vmatprep.subr.bf16.mxu0 %v2335_v34  ;;  %2275 = vmatprep.subr.bf16.mxu1 %v2335_v34  ;;  %v2743_v34 = vpack.c.bf16 %v29_v25, %v27_v22  ;;  %v34_v22 = vld [vmem:[%s3588_s0 + $0xa0] sm:$0xff]  ;;  %v36_v25 = vld [vmem:[%s3588_s0 + $0xb0] sm:$0xff] }
  0x3b   :  { %747 = vmatpush1.bf16.msra.mxu0 %v2337_v35  ;;  %2291 = vmatpush1.bf16.msra.mxu1 %v2337_v35  ;;  %v2745_v35 = vpack.c.bf16 %v61_v27, %v59_v26  ;;  %v66_v26 = vld [vmem:[%s3588_s0 + $0x1a0] sm:$0xff]  ;;  %v68_v27 = vld [vmem:[%s3588_s0 + $0x1b0] sm:$0xff] }
  0x3c   :  { %748 = vmatprep.subr.bf16.mxu0 %v2338_v36  ;;  %2276 = vmatprep.subr.bf16.mxu1 %v2338_v36  ;;  %v26_v36 = vld [vmem:[%s3588_s0 + $0x60] sm:$0xff] }
  0x3f   :  { %749 = vmatpush1.bf16.msra.mxu0 %v2340_v37  ;;  %2292 = vmatpush1.bf16.msra.mxu1 %v2340_v37  ;;  %v28_v37 = vld [vmem:[%s3588_s0 + $0x70] sm:$0xff] }
  0x40   :  { %911 = vmatprep.subr.bf16.mxu1 %v2343_v42  ;;  %1104 = vmatprep.subr.bf16.mxu0 %v2346_v43  ;;  %v31_v42 = vld [vmem:[%s3588_s0 + $0x88] sm:$0xff]  ;;  %v2772_v43 = vpack.c.bf16 %v28_v37, %v26_v36  ;;  %v73_v37 = vld [vmem:[%s3588_s0 + $0x1d8] sm:$0xff] }
  0x41   :  { %v71_v36 = vld [vmem:[%s3588_s0 + $0x1c8] sm:$0xff] }
  0x42   :  { %751 = vmatmul.mubr.bf16.vlgmr.msra.gmra.mrb[0].mxu0 %v2592_v45  ;;  %831 = vmatmul.mubr.bf16.vlgmr.msra.gmra.mrb[0].mxu1 %v2594_v46 }
  0x43   :  { %912 = vmatpush1.bf16.msra.mxu1 %v2341_v50  ;;  %1105 = vmatpush1.bf16.msra.mxu0 %v2344_v51  ;;  %v2377_v50 = vld [vmem:[%s3587_s1 + $0x128] ss:$24 sps:$4 sm:$0xff]  }
  0x44   :  { %913 = vmatprep.subr.bf16.mxu1 %v2349_v52  ;;  %1106 = vmatprep.subr.bf16.mxu0 %v2352_v53  ;;  %v2380_v51 = vld [vmem:[%s3587_s1 + $0x130] ss:$24 sps:$4 sm:$0xff]   ;;  %v2385_v52 = vld [vmem:[%s3587_s1 + $0x15c] ss:$24 sps:$4 sm:$0xff]  }
  0x45   :  { %760 = vmatprep.mubr.bf16.mxu0 %v2623_v56  ;;  %840 = vmatprep.mubr.bf16.mxu1 %v2625_v57  ;;  %v2388_v53 = vld [vmem:[%s3587_s1 + $0x164] ss:$24 sps:$4 sm:$0xff]  }
  0x47   :  { %914 = vmatpush1.bf16.msra.mxu1 %v2347_v54  ;;  %1107 = vmatpush1.bf16.msra.mxu0 %v2350_v55  ;;  %v2797_v54 = vpack.c.bf16 %v33_v47, %v31_v42  ;;  %v2799_v55 = vpack.c.bf16 %v65_v49, %v63_v48  ;;  %v2919_v47 = vpack.c.bf16 %v73_v37, %v71_v36  ;;  %v2407_v48 = vld [vmem:[%s3587_s1 + $0x218] ss:$24 sps:$4 sm:$0xff]   ;;  %v2433_v36 = vld [vmem:[%s3587_s1 + $0x2dc] ss:$24 sps:$4 sm:$0xff]  }
  0x48   :  { %915 = vmatprep.subr.bf16.mxu1 %v2355_v62  ;;  %1108 = vmatprep.subr.bf16.mxu0 %v2358_v63  ;;  %v62_v62 = vld [vmem:[%s3588_s0 + $0x180] sm:$0xff]  ;;  %v64_v63 = vld [vmem:[%s3588_s0 + $0x190] sm:$0xff] }
  0x49   :  { %v2410_v49 = vld [vmem:[%s3587_s1 + $0x220] ss:$24 sps:$4 sm:$0xff]   ;;  %v2436_v37 = vld [vmem:[%s3587_s1 + $0x2e4] ss:$24 sps:$4 sm:$0xff]  }
  0x4a   :  { %761 = vmatmul.mubr.bf16.gmra.mrb[4].mxu0 %v2652_v1  ;;  %841 = vmatmul.mubr.bf16.gmra.mrb[4].mxu1 %v2654_v2 }
  0x4b   :  { %916 = vmatpush1.bf16.msra.mxu1 %v2353_v6  ;;  %1109 = vmatpush1.bf16.msra.mxu0 %v2356_v7  ;;  %v2834_v6 = vpack.c.bf16 %v64_v63, %v62_v62  ;;  %v37_v7 = vld [vmem:[%s3588_s0 + $0xb8] sm:$0xff] }
  0x4c   :  { %917 = vmatprep.subr.bf16.mxu1 %v2361_v8  ;;  %1110 = vmatprep.subr.bf16.mxu0 %v2364_v9  ;;  %v67_v8 = vld [vmem:[%s3588_s0 + $0x1a8] sm:$0xff]  ;;  %v69_v9 = vld [vmem:[%s3588_s0 + $0x1b8] sm:$0xff]  ;;  %v2857_v17 = vpack.c.bf16 %v37_v7, %v35_v4 }
  0x4d   :  { %770 = vmatprep.mubr.bf16.mxu0 %v2683_v12  ;;  %850 = vmatprep.mubr.bf16.mxu1 %v2685_v13  ;;  %v2859_v18 = vpack.c.bf16 %v69_v9, %v67_v8  ;;  %v45_v63 = vld [vmem:[%s3588_s0 + $0xf8] sm:$0xff]  ;;  %v2413_v4 = vld [vmem:[%s3587_s1 + $0x248] ss:$24 sps:$4 sm:$0xff]  }
  0x4e   :  { %v2416_v7 = vld [vmem:[%s3587_s1 + $0x250] ss:$24 sps:$4 sm:$0xff]   ;;  %v2421_v8 = vld [vmem:[%s3587_s1 + $0x27c] ss:$24 sps:$4 sm:$0xff]  }
  0x4f   :  { %918 = vmatpush1.bf16.msra.mxu1 %v2359_v10  ;;  %1111 = vmatpush1.bf16.msra.mxu0 %v2362_v11  ;;  %v2389_v10 = vld [vmem:[%s3587_s1 + $0x188] ss:$24 sps:$4 sm:$0xff]   ;;  %v2424_v9 = vld [vmem:[%s3587_s1 + $0x284] ss:$24 sps:$4 sm:$0xff]  }
  0x50   :  { %919 = vmatprep.subr.bf16.mxu1 %v2367_v20  ;;  %1112 = vmatprep.subr.bf16.mxu0 %v2370_v21  ;;  %v2392_v11 = vld [vmem:[%s3587_s1 + $0x190] ss:$24 sps:$4 sm:$0xff]   ;;  %v2398_v21 = vld [vmem:[%s3587_s1 + $0x1c0] ss:$24 sps:$4 sm:$0xff]  }
  0x51   :  { %v2395_v20 = vld [vmem:[%s3587_s1 + $0x1b8] ss:$24 sps:$4 sm:$0xff]  }
  0x52   :  { %771 = vmatmul.mubr.bf16.gmra.mrb[8].mxu0 %v2712_v23  ;;  %851 = vmatmul.mubr.bf16.gmra.mrb[8].mxu1 %v2714_v24 }
  0x53   :  { %920 = vmatpush1.bf16.msra.mxu1 %v2365_v28  ;;  %1113 = vmatpush1.bf16.msra.mxu0 %v2368_v29  ;;  %v2403_v28 = vld [vmem:[%s3587_s1 + $0x1ec] ss:$24 sps:$4 sm:$0xff]  }
  0x54   :  { %921 = vmatprep.subr.bf16.mxu1 %v2373_v30  ;;  %1114 = vmatprep.subr.bf16.mxu0 %v2376_v31  ;;  %v2406_v29 = vld [vmem:[%s3587_s1 + $0x1f4] ss:$24 sps:$4 sm:$0xff]   ;;  %v2892_v31 = vpack.c.bf16 %v36_v25, %v34_v22  ;;  %v74_v22 = vld [vmem:[%s3588_s0 + $0x1e0] sm:$0xff] }
  0x55   :  { %780 = vmatprep.mubr.bf16.mxu0 %v2743_v34  ;;  %860 = vmatprep.mubr.bf16.mxu1 %v2745_v35  ;;  %v39_v30 = vld [vmem:[%s3588_s0 + $0xc8] sm:$0xff]  ;;  %v76_v25 = vld [vmem:[%s3588_s0 + $0x1f0] sm:$0xff] }
  0x57   :  { %922 = vmatpush1.bf16.msra.mxu1 %v2371_v32  ;;  %1115 = vmatpush1.bf16.msra.mxu0 %v2374_v33  ;;  %v2894_v32 = vpack.c.bf16 %v68_v27, %v66_v26  ;;  %v41_v33 = vld [vmem:[%s3588_s0 + $0xd8] sm:$0xff]  ;;  %v2427_v26 = vld [vmem:[%s3587_s1 + $0x2ac] ss:$24 sps:$4 sm:$0xff]  }
  0x58   :  { %923 = vmatprep.subr.bf16.mxu1 %v2379_v40  ;;  %1116 = vmatprep.subr.bf16.mxu0 %v2382_v41  ;;  %v2409_v40 = vld [vmem:[%s3587_s1 + $0x21c] ss:$24 sps:$4 sm:$0xff]   ;;  %v2917_v42 = vpack.c.bf16 %v41_v33, %v39_v30  ;;  %v2425_v30 = vld [vmem:[%s3587_s1 + $0x2a8] ss:$24 sps:$4 sm:$0xff]  }
  0x59   :  { %v2412_v41 = vld [vmem:[%s3587_s1 + $0x224] ss:$24 sps:$4 sm:$0xff]   ;;  %v2430_v27 = vld [vmem:[%s3587_s1 + $0x2b4] ss:$24 sps:$4 sm:$0xff]   ;;  %v2428_v33 = vld [vmem:[%s3587_s1 + $0x2b0] ss:$24 sps:$4 sm:$0xff]  }
  0x5a   :  { %781 = vmatmul.mubr.bf16.gmra.mrb[12].mxu0 %v2772_v43  ;;  %861 = vmatmul.mubr.bf16.gmra.mrb[12].mxu1 %v2774_v44 }
  0x5b   :  { %924 = vmatpush1.bf16.msra.mxu1 %v2377_v50  ;;  %1117 = vmatpush1.bf16.msra.mxu0 %v2380_v51  ;;  %v38_v50 = vld [vmem:[%s3588_s0 + $0xc0] sm:$0xff]  ;;  %v40_v51 = vld [vmem:[%s3588_s0 + $0xd0] sm:$0xff] }
  0x5c   :  { %925 = vmatprep.subr.bf16.mxu1 %v2385_v52  ;;  %1118 = vmatprep.subr.bf16.mxu0 %v2388_v53  ;;  %v70_v52 = vld [vmem:[%s3588_s0 + $0x1c0] sm:$0xff]  ;;  %v72_v53 = vld [vmem:[%s3588_s0 + $0x1d0] sm:$0xff]  ;;  %v2952_v61 = vpack.c.bf16 %v40_v51, %v38_v50 }
  0x5d   :  { %790 = vmatprep.mubr.bf16.mxu0 %v2797_v54  ;;  %870 = vmatprep.mubr.bf16.mxu1 %v2799_v55  ;;  %v2954_v62 = vpack.c.bf16 %v72_v53, %v70_v52 }
  0x5f   :  { %926 = vmatpush1.bf16.msra.mxu1 %v2383_v58  ;;  %1119 = vmatpush1.bf16.msra.mxu0 %v2386_v59  ;;  %v2415_v58 = vld [vmem:[%s3587_s1 + $0x24c] ss:$24 sps:$4 sm:$0xff]  }
  0x60   :  { %927 = vmatprep.subr.bf16.mxu1 %v2391_v0  ;;  %1120 = vmatprep.subr.bf16.mxu0 %v2394_v3  ;;  %v2418_v59 = vld [vmem:[%s3587_s1 + $0x254] ss:$24 sps:$4 sm:$0xff]   ;;  %v77_v3 = vld [vmem:[%s3588_s0 + $0x1f8] sm:$0xff] }
  0x61   :  { %v75_v0 = vld [vmem:[%s3588_s0 + $0x1e8] sm:$0xff] }
  0x62   :  { %791 = vmatmul.mubr.bf16.gmra.mrb[16].mxu0 %v2832_v5  ;;  %871 = vmatmul.mubr.bf16.gmra.mrb[16].mxu1 %v2834_v6 }
  0x63   :  { %928 = vmatpush1.bf16.msra.mxu1 %v2389_v10  ;;  %1121 = vmatpush1.bf16.msra.mxu0 %v2392_v11  ;;  %v2977_v10 = vpack.c.bf16 %v45_v63, %v43_v60  ;;  %v2979_v11 = vpack.c.bf16 %v77_v3, %v75_v0 }
  0x64   :  { %929 = vmatprep.subr.bf16.mxu1 %v2397_v14  ;;  %1122 = vmatprep.subr.bf16.mxu0 %v2400_v16  ;;  %v2419_v14 = vld [vmem:[%s3587_s1 + $0x278] ss:$24 sps:$4 sm:$0xff]  }
  0x65   :  { %800 = vmatprep.mubr.bf16.mxu0 %v2857_v17  ;;  %880 = vmatprep.mubr.bf16.mxu1 %v2859_v18  ;;  %v2422_v16 = vld [vmem:[%s3587_s1 + $0x280] ss:$24 sps:$4 sm:$0xff]  }
  0x67   :  { %930 = vmatpush1.bf16.msra.mxu1 %v2395_v20  ;;  %1123 = vmatpush1.bf16.msra.mxu0 %v2398_v21  ;;  %v42_v20 = vld [vmem:[%s3588_s0 + $0xe0] sm:$0xff]  ;;  %v44_v21 = vld [vmem:[%s3588_s0 + $0xf0] sm:$0xff] }
  0x68   :  { %931 = vmatprep.subr.bf16.mxu1 %v2403_v28  ;;  %1124 = vmatprep.subr.bf16.mxu0 %v2406_v29  ;;  %v92_v28 = vpack.c.bf16 %v44_v21, %v42_v20  ;;  %v3009_v29 = vpack.c.bf16 %v76_v25, %v74_v22 }
  0x6a   :  { %801 = vmatmul.mubr.bf16.gmra.mrb[20].mxu0 %v2892_v31  ;;  %881 = vmatmul.mubr.bf16.gmra.mrb[20].mxu1 %v2894_v32 }
  0x6b   :  { %932 = vmatpush1.bf16.msra.mxu1 %v2401_v38  ;;  %1125 = vmatpush1.bf16.msra.mxu0 %v2404_v39  ;;  %v2431_v38 = vld [vmem:[%s3587_s1 + $0x2d8] ss:$24 sps:$4 sm:$0xff]  }
  0x6c   :  { %933 = vmatprep.subr.bf16.mxu1 %v2409_v40  ;;  %1126 = vmatprep.subr.bf16.mxu0 %v2412_v41  ;;  %v2434_v39 = vld [vmem:[%s3587_s1 + $0x2e0] ss:$24 sps:$4 sm:$0xff]  }
  0x6d   :  { %810 = vmatprep.mubr.bf16.mxu0 %v2917_v42  ;;  %890 = vmatprep.mubr.bf16.mxu1 %v2919_v47 }
  0x6f   :  { %934 = vmatpush1.bf16.msra.mxu1 %v2407_v48  ;;  %1127 = vmatpush1.bf16.msra.mxu0 %v2410_v49 }
  0x70   :  { %935 = vmatprep.subr.bf16.mxu1 %v2415_v58  ;;  %1128 = vmatprep.subr.bf16.mxu0 %v2418_v59 }
  0x72   :  { %811 = vmatmul.mubr.bf16.gmra.mrb[24].mxu0 %v2952_v61  ;;  %891 = vmatmul.mubr.bf16.gmra.mrb[24].mxu1 %v2954_v62 }
  0x73   :  { %936 = vmatpush1.bf16.msra.mxu1 %v2413_v4  ;;  %1129 = vmatpush1.bf16.msra.mxu0 %v2416_v7 }
  0x74   :  { %937 = vmatprep.subr.bf16.mxu1 %v2421_v8  ;;  %1130 = vmatprep.subr.bf16.mxu0 %v2424_v9 }
  0x75   :  { %820 = vmatprep.mubr.bf16.mxu0 %v2977_v10  ;;  %900 = vmatprep.mubr.bf16.mxu1 %v2979_v11 }
  0x77   :  { %938 = vmatpush1.bf16.msra.mxu1 %v2419_v14  ;;  %1131 = vmatpush1.bf16.msra.mxu0 %v2422_v16 }
  0x78   :  { %939 = vmatprep.subr.bf16.mxu1 %v2427_v26  ;;  %1132 = vmatprep.subr.bf16.mxu0 %v2430_v27 }
  0x7a   :  { %821 = vmatmul.mubr.bf16.gmra.mrb[28].mxu0 %v92_v28  ;;  %901 = vmatmul.mubr.bf16.gmra.mrb[28].mxu1 %v3009_v29 }
  0x7b   :  { %940 = vmatpush1.bf16.msra.mxu1 %v2425_v30  ;;  %1133 = vmatpush1.bf16.msra.mxu0 %v2428_v33 }
  0x7c   :  { %941 = vmatprep.subr.bf16.mxu1 %v2433_v36  ;;  %1134 = vmatprep.subr.bf16.mxu0 %v2436_v37 }
  0x7d   :  { %943 = vmatprep.mubr.bf16.mxu1 %v2502_v15  ;;  %1136 = vmatprep.mubr.bf16.mxu0 %v2502_v15  ;;  %v208_v15 = vlaneseq }
  0x7f   :  { %942 = vmatpush1.bf16.msra.mxu1 %v2431_v38  ;;  %1135 = vmatpush1.bf16.msra.mxu0 %v2434_v39 }
  0x82   :  { %944 = vmatmul.mubr.bf16.vlgmr.msra.gmra.mrb[32].mxu1 %v2592_v45  ;;  %1137 = vmatmul.mubr.bf16.vlgmr.msra.gmra.mrb[32].mxu0 %v2592_v45  ;;  %v209_v45 = vshrl.u32 %v208_v15, 7 }
  0x83   :  { %953 = vmatprep.mubr.bf16.mxu1 %v2623_v56  ;;  %1146 = vmatprep.mubr.bf16.mxu0 %v2623_v56  ;;  %v206_v56 = vld [vmem:[%s3589_s2] sm:$0x3f] }
  0x8a   :  { %954 = vmatmul.mubr.bf16.gmra.mrb[36].mxu1 %v2652_v1  ;;  %1147 = vmatmul.mubr.bf16.gmra.mrb[36].mxu0 %v2652_v1  ;;  %v230_v1 = vsub.s32 5, %v209_v45 }
  0x8b   :  { %963 = vmatprep.mubr.bf16.mxu1 %v2683_v12  ;;  %1156 = vmatprep.mubr.bf16.mxu0 %v2683_v12 }
  0x92   :  { %964 = vmatmul.mubr.bf16.gmra.mrb[40].mxu1 %v2712_v23  ;;  %1157 = vmatmul.mubr.bf16.gmra.mrb[40].mxu0 %v2712_v23  ;;  %v3083_v23 = vrot.slane %v206_v56, %v230_v1 }
  0x93   :  { %973 = vmatprep.mubr.bf16.mxu1 %v2743_v34  ;;  %1166 = vmatprep.mubr.bf16.mxu0 %v2743_v34  ;;  %v214_v34 = vsub.s32 1, %v209_v45 }
  0x9a   :  { %974 = vmatmul.mubr.bf16.gmra.mrb[44].mxu1 %v2772_v43  ;;  %1167 = vmatmul.mubr.bf16.gmra.mrb[44].mxu0 %v2772_v43  ;;  %v3105_v43 = vrot.slane %v206_v56, %v214_v34 }
  0x9b   :  { %983 = vmatprep.mubr.bf16.mxu1 %v2797_v54  ;;  %1176 = vmatprep.mubr.bf16.mxu0 %v2797_v54 }
  0xa2   :  { %984 = vmatmul.mubr.bf16.gmra.mrb[48].mxu1 %v2832_v5  ;;  %1177 = vmatmul.mubr.bf16.gmra.mrb[48].mxu0 %v2832_v5 }
  0xa3   :  { %993 = vmatprep.mubr.bf16.mxu1 %v2857_v17  ;;  %1186 = vmatprep.mubr.bf16.mxu0 %v2857_v17 }
  0xaa   :  { %994 = vmatmul.mubr.bf16.gmra.mrb[52].mxu1 %v2892_v31  ;;  %1187 = vmatmul.mubr.bf16.gmra.mrb[52].mxu0 %v2892_v31 }
  0xab   :  { %1003 = vmatprep.mubr.bf16.mxu1 %v2917_v42  ;;  %1196 = vmatprep.mubr.bf16.mxu0 %v2917_v42 }
  0xb2   :  { %1004 = vmatmul.mubr.bf16.gmra.mrb[56].mxu1 %v2952_v61  ;;  %1197 = vmatmul.mubr.bf16.gmra.mrb[56].mxu0 %v2952_v61 }
  0xb3   :  { %1013 = vmatprep.mubr.bf16.mxu1 %v2977_v10  ;;  %1206 = vmatprep.mubr.bf16.mxu0 %v2977_v10 }
  0xba   :  { %1014 = vmatmul.mubr.bf16.gmra.mrb[60].mxu1 %v92_v28  ;;  %1207 = vmatmul.mubr.bf16.gmra.mrb[60].mxu0 %v92_v28 }
  0xbb   :  { %1023 = vmatprep.mubr.bf16.mxu1 %v2513_v19  ;;  %1216 = vmatprep.mubr.bf16.mxu0 %v2513_v19  ;;  %v218_v19 = vsub.s32 2, %v209_v45 }
  0xc2   :  { %1024 = vmatmul.mubr.bf16.gmra.mrb[64].mxu1 %v2594_v46  ;;  %1217 = vmatmul.mubr.bf16.gmra.mrb[64].mxu0 %v2594_v46  ;;  %v226_v46 = vsub.s32 4, %v209_v45 }
  0xc3   :  { %1033 = vmatprep.mubr.bf16.mxu1 %v2625_v57  ;;  %1226 = vmatprep.mubr.bf16.mxu0 %v2625_v57  ;;  %v222_v57 = vsub.s32 3, %v209_v45 }
  0xc4   :  { %v3079_v12 = vrot.slane %v206_v56, %v226_v46 }
  0xca   :  { %1034 = vmatmul.mubr.bf16.gmra.mrb[68].mxu1 %v2654_v2  ;;  %1227 = vmatmul.mubr.bf16.gmra.mrb[68].mxu0 %v2654_v2  ;;  %v3077_v2 = vrot.slane %v206_v56, %v218_v19 }
  0xcb   :  { %1043 = vmatprep.mubr.bf16.mxu1 %v2685_v13  ;;  %1236 = vmatprep.mubr.bf16.mxu0 %v2685_v13  ;;  %v3081_v13 = vrot.slane %v206_v56, %v222_v57 }
  0xd2   :  { %1044 = vmatmul.mubr.bf16.gmra.mrb[72].mxu1 %v2714_v24  ;;  %1237 = vmatmul.mubr.bf16.gmra.mrb[72].mxu0 %v2714_v24  ;;  %v210_v24 = vsub.s32 0, %v209_v45 }
  0xd3   :  { %1053 = vmatprep.mubr.bf16.mxu1 %v2745_v35  ;;  %1246 = vmatprep.mubr.bf16.mxu0 %v2745_v35 }
  0xd4   :  { %v3103_v35 = vrot.slane %v206_v56, %v210_v24 }
  0xda   :  { %1054 = vmatmul.mubr.bf16.gmra.mrb[76].mxu1 %v2774_v44  ;;  %1247 = vmatmul.mubr.bf16.gmra.mrb[76].mxu0 %v2774_v44 }
  0xdb   :  { %1063 = vmatprep.mubr.bf16.mxu1 %v2799_v55  ;;  %1256 = vmatprep.mubr.bf16.mxu0 %v2799_v55 }
  0xe2   :  { %1064 = vmatmul.mubr.bf16.gmra.mrb[80].mxu1 %v2834_v6  ;;  %1257 = vmatmul.mubr.bf16.gmra.mrb[80].mxu0 %v2834_v6 }
  0xe3   :  { %1073 = vmatprep.mubr.bf16.mxu1 %v2859_v18  ;;  %1266 = vmatprep.mubr.bf16.mxu0 %v2859_v18 }
  0xea   :  { %1074 = vmatmul.mubr.bf16.gmra.mrb[84].mxu1 %v2894_v32  ;;  %1267 = vmatmul.mubr.bf16.gmra.mrb[84].mxu0 %v2894_v32 }
  0xeb   :  { %1083 = vmatprep.mubr.bf16.mxu1 %v2919_v47  ;;  %1276 = vmatprep.mubr.bf16.mxu0 %v2919_v47 }
  0xf2   :  { %1084 = vmatmul.mubr.bf16.gmra.mrb[88].mxu1 %v2954_v62  ;;  %1277 = vmatmul.mubr.bf16.gmra.mrb[88].mxu0 %v2954_v62 }
  0xf3   :  { %1093 = vmatprep.mubr.bf16.mxu1 %v2979_v11  ;;  %1286 = vmatprep.mubr.bf16.mxu0 %v2979_v11 }
  0xfa   :  { %1094 = vmatmul.mubr.bf16.gmra.mrb[92].mxu1 %v3009_v29  ;;  %1287 = vmatmul.mubr.bf16.gmra.mrb[92].mxu0 %v3009_v29 }
 0x115   :  { %v752_v44 = vpop.f32.mrb[0].mxu0  ;;  %v832_v54 = vpop.f32.mrb[0].mxu1 }
 0x116   :  { %v753_v55 = vadd.f32 %v752_v44, %v3103_v35  ;;  %v833_v5 = vadd.f32 %v832_v54, %v3103_v35  ;;  %v754_v6 = vpop.f32.mrb[1].mxu0  ;;  %v834_v17 = vpop.f32.mrb[1].mxu1 }
 0x117   :  { %v755_v18 = vadd.f32 %v754_v6, %v3105_v43  ;;  %v835_v31 = vadd.f32 %v834_v17, %v3105_v43  ;;  %v756_v32 = vpop.f32.mrb[2].mxu0  ;;  %v836_v40 = vpop.f32.mrb[2].mxu1 }
 0x118   :  { %v757_v41 = vadd.f32 %v756_v32, %v3103_v35  ;;  %v837_v42 = vadd.f32 %v836_v40, %v3103_v35  ;;  %v758_v47 = vpop.f32.mrb[3].mxu0  ;;  %v838_v48 = vpop.f32.mrb[3].mxu1 }
 0x119   :  { %v2165_v49 = vpack.c.bf16 %v755_v18, %v753_v55  ;;  %v2213_v50 = vpack.c.bf16 %v835_v31, %v833_v5  ;;  %v759_v51 = vadd.f32 %v758_v47, %v3105_v43  ;;  %v839_v52 = vadd.f32 %v838_v48, %v3105_v43 }
 0x11b   :  { %1873 = vst [vmem:[%s3590_s3] sm:$0xff] %v2165_v49  ;;  %1921 = vst [vmem:[%s3590_s3 + $0x180] sm:$0xff] %v2213_v50  ;;  %v2168_v53 = vpack.c.bf16 %v759_v51, %v757_v41  ;;  %v2216_v58 = vpack.c.bf16 %v839_v52, %v837_v42 }
 0x11d   :  { %1876 = vst [vmem:[%s3590_s3 + $0x18] sm:$0xff] %v2168_v53  ;;  %1924 = vst [vmem:[%s3590_s3 + $0x198] sm:$0xff] %v2216_v58  ;;  %v762_v59 = vpop.f32.mrb[4].mxu0  ;;  %v842_v60 = vpop.f32.mrb[4].mxu1 }
 0x11e   :  { %v763_v61 = vadd.f32 %v762_v59, %v3103_v35  ;;  %v843_v62 = vadd.f32 %v842_v60, %v3103_v35  ;;  %v764_v63 = vpop.f32.mrb[5].mxu0  ;;  %v844_v0 = vpop.f32.mrb[5].mxu1 }
 0x11f   :  { %v765_v3 = vadd.f32 %v764_v63, %v3105_v43  ;;  %v845_v4 = vadd.f32 %v844_v0, %v3105_v43  ;;  %v766_v7 = vpop.f32.mrb[6].mxu0  ;;  %v846_v8 = vpop.f32.mrb[6].mxu1 }
 0x120   :  { %v767_v9 = vadd.f32 %v766_v7, %v3103_v35  ;;  %v847_v10 = vadd.f32 %v846_v8, %v3103_v35  ;;  %v768_v11 = vpop.f32.mrb[7].mxu0  ;;  %v848_v14 = vpop.f32.mrb[7].mxu1 }
 0x121   :  { %v2171_v16 = vpack.c.bf16 %v765_v3, %v763_v61  ;;  %v2219_v20 = vpack.c.bf16 %v845_v4, %v843_v62  ;;  %v769_v21 = vadd.f32 %v768_v11, %v3105_v43  ;;  %v849_v22 = vadd.f32 %v848_v14, %v3105_v43 }
 0x123   :  { %1879 = vst [vmem:[%s3590_s3 + $0x30] sm:$0xff] %v2171_v16  ;;  %1927 = vst [vmem:[%s3590_s3 + $0x1b0] sm:$0xff] %v2219_v20  ;;  %v2174_v25 = vpack.c.bf16 %v769_v21, %v767_v9  ;;  %v2222_v26 = vpack.c.bf16 %v849_v22, %v847_v10 }
 0x125   :  { %1882 = vst [vmem:[%s3590_s3 + $0x48] sm:$0xff] %v2174_v25  ;;  %1930 = vst [vmem:[%s3590_s3 + $0x1c8] sm:$0xff] %v2222_v26  ;;  %v772_v27 = vpop.f32.mrb[8].mxu0  ;;  %v852_v28 = vpop.f32.mrb[8].mxu1 }
 0x126   :  { %v773_v29 = vadd.f32 %v772_v27, %v3103_v35  ;;  %v853_v30 = vadd.f32 %v852_v28, %v3103_v35  ;;  %v774_v33 = vpop.f32.mrb[9].mxu0  ;;  %v854_v36 = vpop.f32.mrb[9].mxu1 }
 0x127   :  { %v775_v37 = vadd.f32 %v774_v33, %v3105_v43  ;;  %v855_v38 = vadd.f32 %v854_v36, %v3105_v43  ;;  %v776_v39 = vpop.f32.mrb[10].mxu0  ;;  %v856_v15 = vpop.f32.mrb[10].mxu1 }
 0x128   :  { %v777_v45 = vadd.f32 %v776_v39, %v3103_v35  ;;  %v857_v19 = vadd.f32 %v856_v15, %v3103_v35  ;;  %v778_v46 = vpop.f32.mrb[11].mxu0  ;;  %v858_v56 = vpop.f32.mrb[11].mxu1 }
 0x129   :  { %v2177_v57 = vpack.c.bf16 %v775_v37, %v773_v29  ;;  %v2225_v1 = vpack.c.bf16 %v855_v38, %v853_v30  ;;  %v779_v24 = vadd.f32 %v778_v46, %v3105_v43  ;;  %v859_v34 = vadd.f32 %v858_v56, %v3105_v43 }
 0x12b   :  { %1885 = vst [vmem:[%s3590_s3 + $0x60] sm:$0xff] %v2177_v57  ;;  %1933 = vst [vmem:[%s3590_s3 + $0x1e0] sm:$0xff] %v2225_v1  ;;  %v2180_v44 = vpack.c.bf16 %v779_v24, %v777_v45  ;;  %v2228_v54 = vpack.c.bf16 %v859_v34, %v857_v19 }
 0x12d   :  { %1888 = vst [vmem:[%s3590_s3 + $0x78] sm:$0xff] %v2180_v44  ;;  %1936 = vst [vmem:[%s3590_s3 + $0x1f8] sm:$0xff] %v2228_v54  ;;  %v782_v55 = vpop.f32.mrb[12].mxu0  ;;  %v862_v5 = vpop.f32.mrb[12].mxu1 }
 0x12e   :  { %v783_v6 = vadd.f32 %v782_v55, %v3103_v35  ;;  %v863_v17 = vadd.f32 %v862_v5, %v3103_v35  ;;  %v784_v18 = vpop.f32.mrb[13].mxu0  ;;  %v864_v31 = vpop.f32.mrb[13].mxu1 }
 0x12f   :  { %v785_v32 = vadd.f32 %v784_v18, %v3105_v43  ;;  %v865_v40 = vadd.f32 %v864_v31, %v3105_v43  ;;  %v786_v41 = vpop.f32.mrb[14].mxu0  ;;  %v866_v42 = vpop.f32.mrb[14].mxu1 }
 0x130   :  { %v787_v47 = vadd.f32 %v786_v41, %v3103_v35  ;;  %v867_v48 = vadd.f32 %v866_v42, %v3103_v35  ;;  %v788_v49 = vpop.f32.mrb[15].mxu0  ;;  %v868_v50 = vpop.f32.mrb[15].mxu1 }
 0x131   :  { %v2183_v51 = vpack.c.bf16 %v785_v32, %v783_v6  ;;  %v2231_v52 = vpack.c.bf16 %v865_v40, %v863_v17  ;;  %v789_v53 = vadd.f32 %v788_v49, %v3105_v43  ;;  %v869_v58 = vadd.f32 %v868_v50, %v3105_v43 }
 0x133   :  { %1891 = vst [vmem:[%s3590_s3 + $0x90] sm:$0xff] %v2183_v51  ;;  %1939 = vst [vmem:[%s3590_s3 + $0x210] sm:$0xff] %v2231_v52  ;;  %v2186_v59 = vpack.c.bf16 %v789_v53, %v787_v47  ;;  %v2234_v60 = vpack.c.bf16 %v869_v58, %v867_v48 }
 0x135   :  { %1894 = vst [vmem:[%s3590_s3 + $0xa8] sm:$0xff] %v2186_v59  ;;  %1942 = vst [vmem:[%s3590_s3 + $0x228] sm:$0xff] %v2234_v60  ;;  %v792_v61 = vpop.f32.mrb[16].mxu0  ;;  %v872_v62 = vpop.f32.mrb[16].mxu1 }
 0x136   :  { %v793_v63 = vadd.f32 %v792_v61, %v3103_v35  ;;  %v873_v0 = vadd.f32 %v872_v62, %v3103_v35  ;;  %v794_v3 = vpop.f32.mrb[17].mxu0  ;;  %v874_v4 = vpop.f32.mrb[17].mxu1 }
 0x137   :  { %v795_v7 = vadd.f32 %v794_v3, %v3105_v43  ;;  %v875_v8 = vadd.f32 %v874_v4, %v3105_v43  ;;  %v796_v9 = vpop.f32.mrb[18].mxu0  ;;  %v876_v10 = vpop.f32.mrb[18].mxu1 }
 0x138   :  { %v797_v11 = vadd.f32 %v796_v9, %v3103_v35  ;;  %v877_v14 = vadd.f32 %v876_v10, %v3103_v35  ;;  %v798_v16 = vpop.f32.mrb[19].mxu0  ;;  %v878_v20 = vpop.f32.mrb[19].mxu1 }
 0x139   :  { %v2189_v21 = vpack.c.bf16 %v795_v7, %v793_v63  ;;  %v2237_v22 = vpack.c.bf16 %v875_v8, %v873_v0  ;;  %v799_v25 = vadd.f32 %v798_v16, %v3105_v43  ;;  %v879_v26 = vadd.f32 %v878_v20, %v3105_v43 }
 0x13b   :  { %1897 = vst [vmem:[%s3590_s3 + $0xc0] sm:$0xff] %v2189_v21  ;;  %1945 = vst [vmem:[%s3590_s3 + $0x240] sm:$0xff] %v2237_v22  ;;  %v2192_v27 = vpack.c.bf16 %v799_v25, %v797_v11  ;;  %v2240_v28 = vpack.c.bf16 %v879_v26, %v877_v14 }
 0x13d   :  { %1900 = vst [vmem:[%s3590_s3 + $0xd8] sm:$0xff] %v2192_v27  ;;  %1948 = vst [vmem:[%s3590_s3 + $0x258] sm:$0xff] %v2240_v28  ;;  %v802_v29 = vpop.f32.mrb[20].mxu0  ;;  %v882_v30 = vpop.f32.mrb[20].mxu1 }
 0x13e   :  { %v803_v33 = vadd.f32 %v802_v29, %v3103_v35  ;;  %v883_v36 = vadd.f32 %v882_v30, %v3103_v35  ;;  %v804_v37 = vpop.f32.mrb[21].mxu0  ;;  %v884_v38 = vpop.f32.mrb[21].mxu1 }
 0x13f   :  { %v805_v39 = vadd.f32 %v804_v37, %v3105_v43  ;;  %v885_v15 = vadd.f32 %v884_v38, %v3105_v43  ;;  %v806_v45 = vpop.f32.mrb[22].mxu0  ;;  %v886_v19 = vpop.f32.mrb[22].mxu1 }
 0x140   :  { %v807_v46 = vadd.f32 %v806_v45, %v3103_v35  ;;  %v887_v56 = vadd.f32 %v886_v19, %v3103_v35  ;;  %v808_v57 = vpop.f32.mrb[23].mxu0  ;;  %v888_v1 = vpop.f32.mrb[23].mxu1 }
 0x141   :  { %v2195_v24 = vpack.c.bf16 %v805_v39, %v803_v33  ;;  %v2243_v34 = vpack.c.bf16 %v885_v15, %v883_v36  ;;  %v809_v44 = vadd.f32 %v808_v57, %v3105_v43  ;;  %v889_v54 = vadd.f32 %v888_v1, %v3105_v43 }
 0x143   :  { %1903 = vst [vmem:[%s3590_s3 + $0xf0] sm:$0xff] %v2195_v24  ;;  %1951 = vst [vmem:[%s3590_s3 + $0x270] sm:$0xff] %v2243_v34  ;;  %v2198_v55 = vpack.c.bf16 %v809_v44, %v807_v46  ;;  %v2246_v5 = vpack.c.bf16 %v889_v54, %v887_v56 }
 0x145   :  { %1906 = vst [vmem:[%s3590_s3 + $0x108] sm:$0xff] %v2198_v55  ;;  %1954 = vst [vmem:[%s3590_s3 + $0x288] sm:$0xff] %v2246_v5  ;;  %v812_v6 = vpop.f32.mrb[24].mxu0  ;;  %v892_v17 = vpop.f32.mrb[24].mxu1 }
 0x146   :  { %v813_v18 = vadd.f32 %v812_v6, %v3103_v35  ;;  %v893_v31 = vadd.f32 %v892_v17, %v3103_v35  ;;  %v814_v32 = vpop.f32.mrb[25].mxu0  ;;  %v894_v40 = vpop.f32.mrb[25].mxu1 }
 0x147   :  { %v815_v41 = vadd.f32 %v814_v32, %v3105_v43  ;;  %v895_v42 = vadd.f32 %v894_v40, %v3105_v43  ;;  %v816_v47 = vpop.f32.mrb[26].mxu0  ;;  %v896_v48 = vpop.f32.mrb[26].mxu1 }
 0x148   :  { %v817_v49 = vadd.f32 %v816_v47, %v3103_v35  ;;  %v897_v50 = vadd.f32 %v896_v48, %v3103_v35  ;;  %v818_v51 = vpop.f32.mrb[27].mxu0  ;;  %v898_v52 = vpop.f32.mrb[27].mxu1 }
 0x149   :  { %v2201_v53 = vpack.c.bf16 %v815_v41, %v813_v18  ;;  %v2249_v58 = vpack.c.bf16 %v895_v42, %v893_v31  ;;  %v819_v59 = vadd.f32 %v818_v51, %v3105_v43  ;;  %v899_v60 = vadd.f32 %v898_v52, %v3105_v43 }
 0x14b   :  { %1909 = vst [vmem:[%s3590_s3 + $0x120] sm:$0xff] %v2201_v53  ;;  %1957 = vst [vmem:[%s3590_s3 + $0x2a0] sm:$0xff] %v2249_v58  ;;  %v2204_v61 = vpack.c.bf16 %v819_v59, %v817_v49  ;;  %v2252_v62 = vpack.c.bf16 %v899_v60, %v897_v50 }
 0x14d   :  { %1912 = vst [vmem:[%s3590_s3 + $0x138] sm:$0xff] %v2204_v61  ;;  %1960 = vst [vmem:[%s3590_s3 + $0x2b8] sm:$0xff] %v2252_v62  ;;  %v822_v63 = vpop.f32.mrb[28].mxu0  ;;  %v902_v0 = vpop.f32.mrb[28].mxu1 }
 0x14e   :  { %v823_v3 = vadd.f32 %v822_v63, %v3103_v35  ;;  %v903_v4 = vadd.f32 %v902_v0, %v3103_v35  ;;  %v824_v7 = vpop.f32.mrb[29].mxu0  ;;  %v904_v8 = vpop.f32.mrb[29].mxu1 }
 0x14f   :  { %v825_v9 = vadd.f32 %v824_v7, %v3105_v43  ;;  %v905_v10 = vadd.f32 %v904_v8, %v3105_v43  ;;  %v826_v11 = vpop.f32.mrb[30].mxu0  ;;  %v906_v14 = vpop.f32.mrb[30].mxu1 }
 0x150   :  { %v827_v16 = vadd.f32 %v826_v11, %v3103_v35  ;;  %v907_v20 = vadd.f32 %v906_v14, %v3103_v35  ;;  %v828_v21 = vpop.f32.mrb[31].mxu0  ;;  %v908_v22 = vpop.f32.mrb[31].mxu1 }
 0x151   :  { %v2207_v25 = vpack.c.bf16 %v825_v9, %v823_v3  ;;  %v2255_v26 = vpack.c.bf16 %v905_v10, %v903_v4  ;;  %v829_v27 = vadd.f32 %v828_v21, %v3105_v43  ;;  %v909_v28 = vadd.f32 %v908_v22, %v3105_v43 }
 0x153   :  { %1915 = vst [vmem:[%s3590_s3 + $0x150] sm:$0xff] %v2207_v25  ;;  %1963 = vst [vmem:[%s3590_s3 + $0x2d0] sm:$0xff] %v2255_v26  ;;  %v2210_v29 = vpack.c.bf16 %v829_v27, %v827_v16  ;;  %v2258_v30 = vpack.c.bf16 %v909_v28, %v907_v20 }
 0x155   :  { %1918 = vst [vmem:[%s3590_s3 + $0x168] sm:$0xff] %v2210_v29  ;;  %1966 = vst [vmem:[%s3590_s3 + $0x2e8] sm:$0xff] %v2258_v30  ;;  %v945_v35 = vpop.f32.mrb[32].mxu1  ;;  %v1138_v43 = vpop.f32.mrb[32].mxu0 }
 0x156   :  { %v946_v33 = vadd.f32 %v945_v35, %v3077_v2  ;;  %v1139_v36 = vadd.f32 %v1138_v43, %v3079_v12  ;;  %v947_v37 = vpop.f32.mrb[33].mxu1  ;;  %v1140_v38 = vpop.f32.mrb[33].mxu0 }
 0x157   :  { %v948_v39 = vadd.f32 %v947_v37, %v3081_v13  ;;  %v1141_v15 = vadd.f32 %v1140_v38, %v3083_v23  ;;  %v949_v45 = vpop.f32.mrb[34].mxu1  ;;  %v1142_v19 = vpop.f32.mrb[34].mxu0 }
 0x158   :  { %v950_v46 = vadd.f32 %v949_v45, %v3077_v2  ;;  %v1143_v56 = vadd.f32 %v1142_v19, %v3079_v12  ;;  %v951_v57 = vpop.f32.mrb[35].mxu1  ;;  %v1144_v1 = vpop.f32.mrb[35].mxu0 }
 0x159   :  { %v2166_v24 = vpack.c.bf16 %v948_v39, %v946_v33  ;;  %v2167_v34 = vpack.c.bf16 %v1141_v15, %v1139_v36  ;;  %v952_v44 = vadd.f32 %v951_v57, %v3081_v13  ;;  %v1145_v54 = vadd.f32 %v1144_v1, %v3083_v23 }
 0x15b   :  { %1874 = vst [vmem:[%s3590_s3 + $0x8] sm:$0xff] %v2166_v24  ;;  %1875 = vst [vmem:[%s3590_s3 + $0x10] sm:$0xff] %v2167_v34  ;;  %v2169_v55 = vpack.c.bf16 %v952_v44, %v950_v46  ;;  %v2170_v5 = vpack.c.bf16 %v1145_v54, %v1143_v56 }
 0x15d   :  { %1877 = vst [vmem:[%s3590_s3 + $0x20] sm:$0xff] %v2169_v55  ;;  %1878 = vst [vmem:[%s3590_s3 + $0x28] sm:$0xff] %v2170_v5  ;;  %v955_v6 = vpop.f32.mrb[36].mxu1  ;;  %v1148_v17 = vpop.f32.mrb[36].mxu0 }
 0x15e   :  { %v956_v18 = vadd.f32 %v955_v6, %v3077_v2  ;;  %v1149_v31 = vadd.f32 %v1148_v17, %v3079_v12  ;;  %v957_v32 = vpop.f32.mrb[37].mxu1  ;;  %v1150_v40 = vpop.f32.mrb[37].mxu0 }
 0x15f   :  { %v958_v41 = vadd.f32 %v957_v32, %v3081_v13  ;;  %v1151_v42 = vadd.f32 %v1150_v40, %v3083_v23  ;;  %v959_v47 = vpop.f32.mrb[38].mxu1  ;;  %v1152_v48 = vpop.f32.mrb[38].mxu0 }
 0x160   :  { %v960_v49 = vadd.f32 %v959_v47, %v3077_v2  ;;  %v1153_v50 = vadd.f32 %v1152_v48, %v3079_v12  ;;  %v961_v51 = vpop.f32.mrb[39].mxu1  ;;  %v1154_v52 = vpop.f32.mrb[39].mxu0 }
 0x161   :  { %v2172_v53 = vpack.c.bf16 %v958_v41, %v956_v18  ;;  %v2173_v58 = vpack.c.bf16 %v1151_v42, %v1149_v31  ;;  %v962_v59 = vadd.f32 %v961_v51, %v3081_v13  ;;  %v1155_v60 = vadd.f32 %v1154_v52, %v3083_v23 }
 0x163   :  { %1880 = vst [vmem:[%s3590_s3 + $0x38] sm:$0xff] %v2172_v53  ;;  %1881 = vst [vmem:[%s3590_s3 + $0x40] sm:$0xff] %v2173_v58  ;;  %v2175_v61 = vpack.c.bf16 %v962_v59, %v960_v49  ;;  %v2176_v62 = vpack.c.bf16 %v1155_v60, %v1153_v50 }
 0x165   :  { %1883 = vst [vmem:[%s3590_s3 + $0x50] sm:$0xff] %v2175_v61  ;;  %1884 = vst [vmem:[%s3590_s3 + $0x58] sm:$0xff] %v2176_v62  ;;  %v965_v63 = vpop.f32.mrb[40].mxu1  ;;  %v1158_v0 = vpop.f32.mrb[40].mxu0 }
 0x166   :  { %v966_v3 = vadd.f32 %v965_v63, %v3077_v2  ;;  %v1159_v4 = vadd.f32 %v1158_v0, %v3079_v12  ;;  %v967_v7 = vpop.f32.mrb[41].mxu1  ;;  %v1160_v8 = vpop.f32.mrb[41].mxu0 }
 0x167   :  { %v968_v9 = vadd.f32 %v967_v7, %v3081_v13  ;;  %v1161_v10 = vadd.f32 %v1160_v8, %v3083_v23  ;;  %v969_v11 = vpop.f32.mrb[42].mxu1  ;;  %v1162_v14 = vpop.f32.mrb[42].mxu0 }
 0x168   :  { %v970_v16 = vadd.f32 %v969_v11, %v3077_v2  ;;  %v1163_v20 = vadd.f32 %v1162_v14, %v3079_v12  ;;  %v971_v21 = vpop.f32.mrb[43].mxu1  ;;  %v1164_v22 = vpop.f32.mrb[43].mxu0 }
 0x169   :  { %v2178_v25 = vpack.c.bf16 %v968_v9, %v966_v3  ;;  %v2179_v26 = vpack.c.bf16 %v1161_v10, %v1159_v4  ;;  %v972_v27 = vadd.f32 %v971_v21, %v3081_v13  ;;  %v1165_v28 = vadd.f32 %v1164_v22, %v3083_v23 }
 0x16b   :  { %1886 = vst [vmem:[%s3590_s3 + $0x68] sm:$0xff] %v2178_v25  ;;  %1887 = vst [vmem:[%s3590_s3 + $0x70] sm:$0xff] %v2179_v26  ;;  %v2181_v29 = vpack.c.bf16 %v972_v27, %v970_v16  ;;  %v2182_v30 = vpack.c.bf16 %v1165_v28, %v1163_v20 }
 0x16d   :  { %1889 = vst [vmem:[%s3590_s3 + $0x80] sm:$0xff] %v2181_v29  ;;  %1890 = vst [vmem:[%s3590_s3 + $0x88] sm:$0xff] %v2182_v30  ;;  %v975_v35 = vpop.f32.mrb[44].mxu1  ;;  %v1168_v43 = vpop.f32.mrb[44].mxu0 }
 0x16e   :  { %v976_v33 = vadd.f32 %v975_v35, %v3077_v2  ;;  %v1169_v36 = vadd.f32 %v1168_v43, %v3079_v12  ;;  %v977_v37 = vpop.f32.mrb[45].mxu1  ;;  %v1170_v38 = vpop.f32.mrb[45].mxu0 }
 0x16f   :  { %v978_v39 = vadd.f32 %v977_v37, %v3081_v13  ;;  %v1171_v15 = vadd.f32 %v1170_v38, %v3083_v23  ;;  %v979_v45 = vpop.f32.mrb[46].mxu1  ;;  %v1172_v19 = vpop.f32.mrb[46].mxu0 }
 0x170   :  { %v980_v46 = vadd.f32 %v979_v45, %v3077_v2  ;;  %v1173_v56 = vadd.f32 %v1172_v19, %v3079_v12  ;;  %v981_v57 = vpop.f32.mrb[47].mxu1  ;;  %v1174_v1 = vpop.f32.mrb[47].mxu0 }
 0x171   :  { %v2184_v24 = vpack.c.bf16 %v978_v39, %v976_v33  ;;  %v2185_v34 = vpack.c.bf16 %v1171_v15, %v1169_v36  ;;  %v982_v44 = vadd.f32 %v981_v57, %v3081_v13  ;;  %v1175_v54 = vadd.f32 %v1174_v1, %v3083_v23 }
 0x173   :  { %1892 = vst [vmem:[%s3590_s3 + $0x98] sm:$0xff] %v2184_v24  ;;  %1893 = vst [vmem:[%s3590_s3 + $0xa0] sm:$0xff] %v2185_v34  ;;  %v2187_v55 = vpack.c.bf16 %v982_v44, %v980_v46  ;;  %v2188_v5 = vpack.c.bf16 %v1175_v54, %v1173_v56 }
 0x175   :  { %1895 = vst [vmem:[%s3590_s3 + $0xb0] sm:$0xff] %v2187_v55  ;;  %1896 = vst [vmem:[%s3590_s3 + $0xb8] sm:$0xff] %v2188_v5  ;;  %v985_v6 = vpop.f32.mrb[48].mxu1  ;;  %v1178_v17 = vpop.f32.mrb[48].mxu0 }
 0x176   :  { %v986_v18 = vadd.f32 %v985_v6, %v3077_v2  ;;  %v1179_v31 = vadd.f32 %v1178_v17, %v3079_v12  ;;  %v987_v32 = vpop.f32.mrb[49].mxu1  ;;  %v1180_v40 = vpop.f32.mrb[49].mxu0 }
 0x177   :  { %v988_v41 = vadd.f32 %v987_v32, %v3081_v13  ;;  %v1181_v42 = vadd.f32 %v1180_v40, %v3083_v23  ;;  %v989_v47 = vpop.f32.mrb[50].mxu1  ;;  %v1182_v48 = vpop.f32.mrb[50].mxu0 }
 0x178   :  { %v990_v49 = vadd.f32 %v989_v47, %v3077_v2  ;;  %v1183_v50 = vadd.f32 %v1182_v48, %v3079_v12  ;;  %v991_v51 = vpop.f32.mrb[51].mxu1  ;;  %v1184_v52 = vpop.f32.mrb[51].mxu0 }
 0x179   :  { %v2190_v53 = vpack.c.bf16 %v988_v41, %v986_v18  ;;  %v2191_v58 = vpack.c.bf16 %v1181_v42, %v1179_v31  ;;  %v992_v59 = vadd.f32 %v991_v51, %v3081_v13  ;;  %v1185_v60 = vadd.f32 %v1184_v52, %v3083_v23 }
 0x17b   :  { %1898 = vst [vmem:[%s3590_s3 + $0xc8] sm:$0xff] %v2190_v53  ;;  %1899 = vst [vmem:[%s3590_s3 + $0xd0] sm:$0xff] %v2191_v58  ;;  %v2193_v61 = vpack.c.bf16 %v992_v59, %v990_v49  ;;  %v2194_v62 = vpack.c.bf16 %v1185_v60, %v1183_v50 }
 0x17d   :  { %1901 = vst [vmem:[%s3590_s3 + $0xe0] sm:$0xff] %v2193_v61  ;;  %1902 = vst [vmem:[%s3590_s3 + $0xe8] sm:$0xff] %v2194_v62  ;;  %v995_v63 = vpop.f32.mrb[52].mxu1  ;;  %v1188_v0 = vpop.f32.mrb[52].mxu0 }
 0x17e   :  { %v996_v3 = vadd.f32 %v995_v63, %v3077_v2  ;;  %v1189_v4 = vadd.f32 %v1188_v0, %v3079_v12  ;;  %v997_v7 = vpop.f32.mrb[53].mxu1  ;;  %v1190_v8 = vpop.f32.mrb[53].mxu0 }
 0x17f   :  { %v998_v9 = vadd.f32 %v997_v7, %v3081_v13  ;;  %v1191_v10 = vadd.f32 %v1190_v8, %v3083_v23  ;;  %v999_v11 = vpop.f32.mrb[54].mxu1  ;;  %v1192_v14 = vpop.f32.mrb[54].mxu0 }
 0x180   :  { %v1000_v16 = vadd.f32 %v999_v11, %v3077_v2  ;;  %v1193_v20 = vadd.f32 %v1192_v14, %v3079_v12  ;;  %v1001_v21 = vpop.f32.mrb[55].mxu1  ;;  %v1194_v22 = vpop.f32.mrb[55].mxu0 }
 0x181   :  { %v2196_v25 = vpack.c.bf16 %v998_v9, %v996_v3  ;;  %v2197_v26 = vpack.c.bf16 %v1191_v10, %v1189_v4  ;;  %v1002_v27 = vadd.f32 %v1001_v21, %v3081_v13  ;;  %v1195_v28 = vadd.f32 %v1194_v22, %v3083_v23 }
 0x183   :  { %1904 = vst [vmem:[%s3590_s3 + $0xf8] sm:$0xff] %v2196_v25  ;;  %1905 = vst [vmem:[%s3590_s3 + $0x100] sm:$0xff] %v2197_v26  ;;  %v2199_v29 = vpack.c.bf16 %v1002_v27, %v1000_v16  ;;  %v2200_v30 = vpack.c.bf16 %v1195_v28, %v1193_v20 }
 0x185   :  { %1907 = vst [vmem:[%s3590_s3 + $0x110] sm:$0xff] %v2199_v29  ;;  %1908 = vst [vmem:[%s3590_s3 + $0x118] sm:$0xff] %v2200_v30  ;;  %v1005_v35 = vpop.f32.mrb[56].mxu1  ;;  %v1198_v43 = vpop.f32.mrb[56].mxu0 }
 0x186   :  { %v1006_v33 = vadd.f32 %v1005_v35, %v3077_v2  ;;  %v1199_v36 = vadd.f32 %v1198_v43, %v3079_v12  ;;  %v1007_v37 = vpop.f32.mrb[57].mxu1  ;;  %v1200_v38 = vpop.f32.mrb[57].mxu0 }
 0x187   :  { %v1008_v39 = vadd.f32 %v1007_v37, %v3081_v13  ;;  %v1201_v15 = vadd.f32 %v1200_v38, %v3083_v23  ;;  %v1009_v45 = vpop.f32.mrb[58].mxu1  ;;  %v1202_v19 = vpop.f32.mrb[58].mxu0 }
 0x188   :  { %v1010_v46 = vadd.f32 %v1009_v45, %v3077_v2  ;;  %v1203_v56 = vadd.f32 %v1202_v19, %v3079_v12  ;;  %v1011_v57 = vpop.f32.mrb[59].mxu1  ;;  %v1204_v1 = vpop.f32.mrb[59].mxu0 }
 0x189   :  { %v2202_v24 = vpack.c.bf16 %v1008_v39, %v1006_v33  ;;  %v2203_v34 = vpack.c.bf16 %v1201_v15, %v1199_v36  ;;  %v1012_v44 = vadd.f32 %v1011_v57, %v3081_v13  ;;  %v1205_v54 = vadd.f32 %v1204_v1, %v3083_v23 }
 0x18b   :  { %1910 = vst [vmem:[%s3590_s3 + $0x128] sm:$0xff] %v2202_v24  ;;  %1911 = vst [vmem:[%s3590_s3 + $0x130] sm:$0xff] %v2203_v34  ;;  %v2205_v55 = vpack.c.bf16 %v1012_v44, %v1010_v46  ;;  %v2206_v5 = vpack.c.bf16 %v1205_v54, %v1203_v56 }
 0x18d   :  { %1913 = vst [vmem:[%s3590_s3 + $0x140] sm:$0xff] %v2205_v55  ;;  %1914 = vst [vmem:[%s3590_s3 + $0x148] sm:$0xff] %v2206_v5  ;;  %v1015_v6 = vpop.f32.mrb[60].mxu1  ;;  %v1208_v17 = vpop.f32.mrb[60].mxu0 }
 0x18e   :  { %v1016_v18 = vadd.f32 %v1015_v6, %v3077_v2  ;;  %v1209_v31 = vadd.f32 %v1208_v17, %v3079_v12  ;;  %v1017_v32 = vpop.f32.mrb[61].mxu1  ;;  %v1210_v40 = vpop.f32.mrb[61].mxu0 }
 0x18f   :  { %v1018_v41 = vadd.f32 %v1017_v32, %v3081_v13  ;;  %v1211_v42 = vadd.f32 %v1210_v40, %v3083_v23  ;;  %v1019_v47 = vpop.f32.mrb[62].mxu1  ;;  %v1212_v48 = vpop.f32.mrb[62].mxu0 }
 0x190   :  { %v1020_v49 = vadd.f32 %v1019_v47, %v3077_v2  ;;  %v1213_v50 = vadd.f32 %v1212_v48, %v3079_v12  ;;  %v1021_v51 = vpop.f32.mrb[63].mxu1  ;;  %v1214_v52 = vpop.f32.mrb[63].mxu0 }
 0x191   :  { %v2208_v53 = vpack.c.bf16 %v1018_v41, %v1016_v18  ;;  %v2209_v58 = vpack.c.bf16 %v1211_v42, %v1209_v31  ;;  %v1022_v59 = vadd.f32 %v1021_v51, %v3081_v13  ;;  %v1215_v60 = vadd.f32 %v1214_v52, %v3083_v23 }
 0x193   :  { %1916 = vst [vmem:[%s3590_s3 + $0x158] sm:$0xff] %v2208_v53  ;;  %1917 = vst [vmem:[%s3590_s3 + $0x160] sm:$0xff] %v2209_v58  ;;  %v2211_v61 = vpack.c.bf16 %v1022_v59, %v1020_v49  ;;  %v2212_v62 = vpack.c.bf16 %v1215_v60, %v1213_v50 }
 0x195   :  { %1919 = vst [vmem:[%s3590_s3 + $0x170] sm:$0xff] %v2211_v61  ;;  %1920 = vst [vmem:[%s3590_s3 + $0x178] sm:$0xff] %v2212_v62  ;;  %v1025_v63 = vpop.f32.mrb[64].mxu1  ;;  %v1218_v0 = vpop.f32.mrb[64].mxu0 }
 0x196   :  { %v1026_v3 = vadd.f32 %v1025_v63, %v3077_v2  ;;  %v1219_v4 = vadd.f32 %v1218_v0, %v3079_v12  ;;  %v1027_v7 = vpop.f32.mrb[65].mxu1  ;;  %v1220_v8 = vpop.f32.mrb[65].mxu0 }
 0x197   :  { %v1028_v9 = vadd.f32 %v1027_v7, %v3081_v13  ;;  %v1221_v10 = vadd.f32 %v1220_v8, %v3083_v23  ;;  %v1029_v11 = vpop.f32.mrb[66].mxu1  ;;  %v1222_v14 = vpop.f32.mrb[66].mxu0 }
 0x198   :  { %v1030_v16 = vadd.f32 %v1029_v11, %v3077_v2  ;;  %v1223_v20 = vadd.f32 %v1222_v14, %v3079_v12  ;;  %v1031_v21 = vpop.f32.mrb[67].mxu1  ;;  %v1224_v22 = vpop.f32.mrb[67].mxu0 }
 0x199   :  { %v2214_v25 = vpack.c.bf16 %v1028_v9, %v1026_v3  ;;  %v2215_v26 = vpack.c.bf16 %v1221_v10, %v1219_v4  ;;  %v1032_v27 = vadd.f32 %v1031_v21, %v3081_v13  ;;  %v1225_v28 = vadd.f32 %v1224_v22, %v3083_v23 }
 0x19b   :  { %1922 = vst [vmem:[%s3590_s3 + $0x188] sm:$0xff] %v2214_v25  ;;  %1923 = vst [vmem:[%s3590_s3 + $0x190] sm:$0xff] %v2215_v26  ;;  %v2217_v29 = vpack.c.bf16 %v1032_v27, %v1030_v16  ;;  %v2218_v30 = vpack.c.bf16 %v1225_v28, %v1223_v20 }
 0x19d   :  { %1925 = vst [vmem:[%s3590_s3 + $0x1a0] sm:$0xff] %v2217_v29  ;;  %1926 = vst [vmem:[%s3590_s3 + $0x1a8] sm:$0xff] %v2218_v30  ;;  %v1035_v35 = vpop.f32.mrb[68].mxu1  ;;  %v1228_v43 = vpop.f32.mrb[68].mxu0 }
 0x19e   :  { %v1036_v33 = vadd.f32 %v1035_v35, %v3077_v2  ;;  %v1229_v36 = vadd.f32 %v1228_v43, %v3079_v12  ;;  %v1037_v37 = vpop.f32.mrb[69].mxu1  ;;  %v1230_v38 = vpop.f32.mrb[69].mxu0 }
 0x19f   :  { %v1038_v39 = vadd.f32 %v1037_v37, %v3081_v13  ;;  %v1231_v15 = vadd.f32 %v1230_v38, %v3083_v23  ;;  %v1039_v45 = vpop.f32.mrb[70].mxu1  ;;  %v1232_v19 = vpop.f32.mrb[70].mxu0 }
 0x1a0   :  { %v1040_v46 = vadd.f32 %v1039_v45, %v3077_v2  ;;  %v1233_v56 = vadd.f32 %v1232_v19, %v3079_v12  ;;  %v1041_v57 = vpop.f32.mrb[71].mxu1  ;;  %v1234_v1 = vpop.f32.mrb[71].mxu0 }
 0x1a1   :  { %v2220_v24 = vpack.c.bf16 %v1038_v39, %v1036_v33  ;;  %v2221_v34 = vpack.c.bf16 %v1231_v15, %v1229_v36  ;;  %v1042_v44 = vadd.f32 %v1041_v57, %v3081_v13  ;;  %v1235_v54 = vadd.f32 %v1234_v1, %v3083_v23 }
 0x1a3   :  { %1928 = vst [vmem:[%s3590_s3 + $0x1b8] sm:$0xff] %v2220_v24  ;;  %1929 = vst [vmem:[%s3590_s3 + $0x1c0] sm:$0xff] %v2221_v34  ;;  %v2223_v55 = vpack.c.bf16 %v1042_v44, %v1040_v46  ;;  %v2224_v5 = vpack.c.bf16 %v1235_v54, %v1233_v56 }
 0x1a5   :  { %1931 = vst [vmem:[%s3590_s3 + $0x1d0] sm:$0xff] %v2223_v55  ;;  %1932 = vst [vmem:[%s3590_s3 + $0x1d8] sm:$0xff] %v2224_v5  ;;  %v1045_v6 = vpop.f32.mrb[72].mxu1  ;;  %v1238_v17 = vpop.f32.mrb[72].mxu0 }
 0x1a6   :  { %v1046_v18 = vadd.f32 %v1045_v6, %v3077_v2  ;;  %v1239_v31 = vadd.f32 %v1238_v17, %v3079_v12  ;;  %v1047_v32 = vpop.f32.mrb[73].mxu1  ;;  %v1240_v40 = vpop.f32.mrb[73].mxu0 }
 0x1a7   :  { %v1048_v41 = vadd.f32 %v1047_v32, %v3081_v13  ;;  %v1241_v42 = vadd.f32 %v1240_v40, %v3083_v23  ;;  %v1049_v47 = vpop.f32.mrb[74].mxu1  ;;  %v1242_v48 = vpop.f32.mrb[74].mxu0 }
 0x1a8   :  { %v1050_v49 = vadd.f32 %v1049_v47, %v3077_v2  ;;  %v1243_v50 = vadd.f32 %v1242_v48, %v3079_v12  ;;  %v1051_v51 = vpop.f32.mrb[75].mxu1  ;;  %v1244_v52 = vpop.f32.mrb[75].mxu0 }
 0x1a9   :  { %v2226_v53 = vpack.c.bf16 %v1048_v41, %v1046_v18  ;;  %v2227_v58 = vpack.c.bf16 %v1241_v42, %v1239_v31  ;;  %v1052_v59 = vadd.f32 %v1051_v51, %v3081_v13  ;;  %v1245_v60 = vadd.f32 %v1244_v52, %v3083_v23 }
 0x1ab   :  { %1934 = vst [vmem:[%s3590_s3 + $0x1e8] sm:$0xff] %v2226_v53  ;;  %1935 = vst [vmem:[%s3590_s3 + $0x1f0] sm:$0xff] %v2227_v58  ;;  %v2229_v61 = vpack.c.bf16 %v1052_v59, %v1050_v49  ;;  %v2230_v62 = vpack.c.bf16 %v1245_v60, %v1243_v50 }
 0x1ad   :  { %1937 = vst [vmem:[%s3590_s3 + $0x200] sm:$0xff] %v2229_v61  ;;  %1938 = vst [vmem:[%s3590_s3 + $0x208] sm:$0xff] %v2230_v62  ;;  %v1055_v63 = vpop.f32.mrb[76].mxu1  ;;  %v1248_v0 = vpop.f32.mrb[76].mxu0 }
 0x1ae   :  { %v1056_v3 = vadd.f32 %v1055_v63, %v3077_v2  ;;  %v1249_v4 = vadd.f32 %v1248_v0, %v3079_v12  ;;  %v1057_v7 = vpop.f32.mrb[77].mxu1  ;;  %v1250_v8 = vpop.f32.mrb[77].mxu0 }
 0x1af   :  { %v1058_v9 = vadd.f32 %v1057_v7, %v3081_v13  ;;  %v1251_v10 = vadd.f32 %v1250_v8, %v3083_v23  ;;  %v1059_v11 = vpop.f32.mrb[78].mxu1  ;;  %v1252_v14 = vpop.f32.mrb[78].mxu0 }
 0x1b0   :  { %v1060_v16 = vadd.f32 %v1059_v11, %v3077_v2  ;;  %v1253_v20 = vadd.f32 %v1252_v14, %v3079_v12  ;;  %v1061_v21 = vpop.f32.mrb[79].mxu1  ;;  %v1254_v22 = vpop.f32.mrb[79].mxu0 }
 0x1b1   :  { %v2232_v25 = vpack.c.bf16 %v1058_v9, %v1056_v3  ;;  %v2233_v26 = vpack.c.bf16 %v1251_v10, %v1249_v4  ;;  %v1062_v27 = vadd.f32 %v1061_v21, %v3081_v13  ;;  %v1255_v28 = vadd.f32 %v1254_v22, %v3083_v23 }
 0x1b3   :  { %1940 = vst [vmem:[%s3590_s3 + $0x218] sm:$0xff] %v2232_v25  ;;  %1941 = vst [vmem:[%s3590_s3 + $0x220] sm:$0xff] %v2233_v26  ;;  %v2235_v29 = vpack.c.bf16 %v1062_v27, %v1060_v16  ;;  %v2236_v30 = vpack.c.bf16 %v1255_v28, %v1253_v20 }
 0x1b5   :  { %1943 = vst [vmem:[%s3590_s3 + $0x230] sm:$0xff] %v2235_v29  ;;  %1944 = vst [vmem:[%s3590_s3 + $0x238] sm:$0xff] %v2236_v30  ;;  %v1065_v35 = vpop.f32.mrb[80].mxu1  ;;  %v1258_v43 = vpop.f32.mrb[80].mxu0 }
 0x1b6   :  { %v1066_v33 = vadd.f32 %v1065_v35, %v3077_v2  ;;  %v1259_v36 = vadd.f32 %v1258_v43, %v3079_v12  ;;  %v1067_v37 = vpop.f32.mrb[81].mxu1  ;;  %v1260_v38 = vpop.f32.mrb[81].mxu0 }
 0x1b7   :  { %v1068_v39 = vadd.f32 %v1067_v37, %v3081_v13  ;;  %v1261_v15 = vadd.f32 %v1260_v38, %v3083_v23  ;;  %v1069_v45 = vpop.f32.mrb[82].mxu1  ;;  %v1262_v19 = vpop.f32.mrb[82].mxu0 }
 0x1b8   :  { %v1070_v46 = vadd.f32 %v1069_v45, %v3077_v2  ;;  %v1263_v56 = vadd.f32 %v1262_v19, %v3079_v12  ;;  %v1071_v57 = vpop.f32.mrb[83].mxu1  ;;  %v1264_v1 = vpop.f32.mrb[83].mxu0 }
 0x1b9   :  { %v2238_v24 = vpack.c.bf16 %v1068_v39, %v1066_v33  ;;  %v2239_v34 = vpack.c.bf16 %v1261_v15, %v1259_v36  ;;  %v1072_v44 = vadd.f32 %v1071_v57, %v3081_v13  ;;  %v1265_v54 = vadd.f32 %v1264_v1, %v3083_v23 }
 0x1bb   :  { %1946 = vst [vmem:[%s3590_s3 + $0x248] sm:$0xff] %v2238_v24  ;;  %1947 = vst [vmem:[%s3590_s3 + $0x250] sm:$0xff] %v2239_v34  ;;  %v2241_v55 = vpack.c.bf16 %v1072_v44, %v1070_v46  ;;  %v2242_v5 = vpack.c.bf16 %v1265_v54, %v1263_v56 }
 0x1bd   :  { %1949 = vst [vmem:[%s3590_s3 + $0x260] sm:$0xff] %v2241_v55  ;;  %1950 = vst [vmem:[%s3590_s3 + $0x268] sm:$0xff] %v2242_v5  ;;  %v1075_v6 = vpop.f32.mrb[84].mxu1  ;;  %v1268_v17 = vpop.f32.mrb[84].mxu0 }
 0x1be   :  { %v1076_v18 = vadd.f32 %v1075_v6, %v3077_v2  ;;  %v1269_v31 = vadd.f32 %v1268_v17, %v3079_v12  ;;  %v1077_v32 = vpop.f32.mrb[85].mxu1  ;;  %v1270_v40 = vpop.f32.mrb[85].mxu0 }
 0x1bf   :  { %v1078_v41 = vadd.f32 %v1077_v32, %v3081_v13  ;;  %v1271_v42 = vadd.f32 %v1270_v40, %v3083_v23  ;;  %v1079_v47 = vpop.f32.mrb[86].mxu1  ;;  %v1272_v48 = vpop.f32.mrb[86].mxu0 }
 0x1c0   :  { %v1080_v49 = vadd.f32 %v1079_v47, %v3077_v2  ;;  %v1273_v50 = vadd.f32 %v1272_v48, %v3079_v12  ;;  %v1081_v51 = vpop.f32.mrb[87].mxu1  ;;  %v1274_v52 = vpop.f32.mrb[87].mxu0 }
 0x1c1   :  { %v2244_v53 = vpack.c.bf16 %v1078_v41, %v1076_v18  ;;  %v2245_v58 = vpack.c.bf16 %v1271_v42, %v1269_v31  ;;  %v1082_v59 = vadd.f32 %v1081_v51, %v3081_v13  ;;  %v1275_v60 = vadd.f32 %v1274_v52, %v3083_v23 }
 0x1c3   :  { %1952 = vst [vmem:[%s3590_s3 + $0x278] sm:$0xff] %v2244_v53  ;;  %1953 = vst [vmem:[%s3590_s3 + $0x280] sm:$0xff] %v2245_v58  ;;  %v2247_v61 = vpack.c.bf16 %v1082_v59, %v1080_v49  ;;  %v2248_v62 = vpack.c.bf16 %v1275_v60, %v1273_v50 }
 0x1c5   :  { %1955 = vst [vmem:[%s3590_s3 + $0x290] sm:$0xff] %v2247_v61  ;;  %1956 = vst [vmem:[%s3590_s3 + $0x298] sm:$0xff] %v2248_v62  ;;  %v1085_v63 = vpop.f32.mrb[88].mxu1  ;;  %v1278_v0 = vpop.f32.mrb[88].mxu0 }
 0x1c6   :  { %v1086_v3 = vadd.f32 %v1085_v63, %v3077_v2  ;;  %v1279_v4 = vadd.f32 %v1278_v0, %v3079_v12  ;;  %v1087_v7 = vpop.f32.mrb[89].mxu1  ;;  %v1280_v8 = vpop.f32.mrb[89].mxu0 }
 0x1c7   :  { %v1088_v9 = vadd.f32 %v1087_v7, %v3081_v13  ;;  %v1281_v10 = vadd.f32 %v1280_v8, %v3083_v23  ;;  %v1089_v11 = vpop.f32.mrb[90].mxu1  ;;  %v1282_v14 = vpop.f32.mrb[90].mxu0 }
 0x1c8   :  { %v1090_v16 = vadd.f32 %v1089_v11, %v3077_v2  ;;  %v1283_v20 = vadd.f32 %v1282_v14, %v3079_v12  ;;  %v1091_v21 = vpop.f32.mrb[91].mxu1  ;;  %v1284_v22 = vpop.f32.mrb[91].mxu0 }
 0x1c9   :  { %v2250_v25 = vpack.c.bf16 %v1088_v9, %v1086_v3  ;;  %v2251_v26 = vpack.c.bf16 %v1281_v10, %v1279_v4  ;;  %v1092_v27 = vadd.f32 %v1091_v21, %v3081_v13  ;;  %v1285_v28 = vadd.f32 %v1284_v22, %v3083_v23 }
 0x1cb   :  { %1958 = vst [vmem:[%s3590_s3 + $0x2a8] sm:$0xff] %v2250_v25  ;;  %1959 = vst [vmem:[%s3590_s3 + $0x2b0] sm:$0xff] %v2251_v26  ;;  %v2253_v29 = vpack.c.bf16 %v1092_v27, %v1090_v16  ;;  %v2254_v30 = vpack.c.bf16 %v1285_v28, %v1283_v20 }
 0x1cd   :  { %1961 = vst [vmem:[%s3590_s3 + $0x2c0] sm:$0xff] %v2253_v29  ;;  %1962 = vst [vmem:[%s3590_s3 + $0x2c8] sm:$0xff] %v2254_v30  ;;  %v1095_v35 = vpop.f32.mrb[92].mxu1  ;;  %v1288_v43 = vpop.f32.mrb[92].mxu0 }
 0x1ce   :  { %v1096_v33 = vadd.f32 %v1095_v35, %v3077_v2  ;;  %v1289_v36 = vadd.f32 %v1288_v43, %v3079_v12  ;;  %v1097_v37 = vpop.f32.mrb[93].mxu1  ;;  %v1290_v38 = vpop.f32.mrb[93].mxu0 }
 0x1cf   :  { %v1098_v39 = vadd.f32 %v1097_v37, %v3081_v13  ;;  %v1291_v15 = vadd.f32 %v1290_v38, %v3083_v23  ;;  %v1099_v45 = vpop.f32.mrb[94].mxu1  ;;  %v1292_v19 = vpop.f32.mrb[94].mxu0 }
 0x1d0   :  { %v1100_v46 = vadd.f32 %v1099_v45, %v3077_v2  ;;  %v1293_v56 = vadd.f32 %v1292_v19, %v3079_v12  ;;  %v1101_v57 = vpop.f32.mrb[95].mxu1  ;;  %v1294_v1 = vpop.f32.mrb[95].mxu0 }
 0x1d1   :  { %v2256_v24 = vpack.c.bf16 %v1098_v39, %v1096_v33  ;;  %v2257_v34 = vpack.c.bf16 %v1291_v15, %v1289_v36  ;;  %v1102_v44 = vadd.f32 %v1101_v57, %v3081_v13  ;;  %v1295_v54 = vadd.f32 %v1294_v1, %v3083_v23 }
 0x1d3   :  { %1964 = vst [vmem:[%s3590_s3 + $0x2d8] sm:$0xff] %v2256_v24  ;;  %1965 = vst [vmem:[%s3590_s3 + $0x2e0] sm:$0xff] %v2257_v34  ;;  %v2259_v55 = vpack.c.bf16 %v1102_v44, %v1100_v46  ;;  %v2260_v2 = vpack.c.bf16 %v1295_v54, %v1293_v56 }
 0x1d5   :  { %1967 = vst [vmem:[%s3590_s3 + $0x2f0] sm:$0xff] %v2259_v55  ;;  %1968 = vst [vmem:[%s3590_s3 + $0x2f8] sm:$0xff] %v2260_v2 }

// kernel: verb_model_bert_forward.12
= control target key start
LH: loop header
LB: loop body
LE: loop exit
PB: predicated region body
PF: predicated region fallthrough
CT: control target
= control target key end

     0   :  { %s3142_s1 = inlined_call_operand.vmem [shape: bf16[256,256], index: 1, kind: input, shape index: {}]   ;;  %s3143_s0 = inlined_call_operand.vmem [shape: bf16[256,256], index: 0, kind: input, shape index: {}]   ;;  %s3144_s2 = inlined_call_operand.vmem [shape: f32[1,256], index: 2, kind: input, shape index: {}]   ;;  %s3145_s3 = inlined_call_operand.vmem [shape: f32[256,256], index: 3, kind: input, shape index: {}]   ;;  %s3146_s4 = inlined_call_operand.vmem [shape: f32[1,256], index: 4, kind: input, shape index: {}]   ;;  %s3147_s5 = inlined_call_operand.vmem [shape: f32[1,256], index: 5, kind: input, shape index: {}]   ;;  %s3148_s6 = inlined_call_operand.vmem [shape: f32[256,256], index: 6, kind: output, shape index: {}]  }
   0x1   :  { %v1569_v0 = vld [vmem:[%s3142_s1 + $0x4] ss:$8 sps:$4 sm:$0xff]   ;;  %v1571_v1 = vld [vmem:[%s3142_s1] ss:$8 sps:$4 sm:$0xff]   ;;  %v1572_v2 = vld [vmem:[%s3142_s1 + $0x14] ss:$8 sps:$4 sm:$0xff]  }
   0x2   :  { %419 = vmatprep.subr.bf16.mxu0 %v1569_v0  ;;  %1537 = vmatprep.subr.bf16.mxu1 %v1569_v0  ;;  %v1574_v3 = vld [vmem:[%s3142_s1 + $0x10] ss:$8 sps:$4 sm:$0xff]   ;;  %v1575_v4 = vld [vmem:[%s3142_s1 + $0x24] ss:$8 sps:$4 sm:$0xff]   ;;  %v1577_v5 = vld [vmem:[%s3142_s1 + $0x20] ss:$8 sps:$4 sm:$0xff]   ;;  %v89_v0 = vlaneseq }
   0x3   :  { %420 = vmatpush1.bf16.msra.mxu0 %v1571_v1  ;;  %1553 = vmatpush1.bf16.msra.mxu1 %v1571_v1  ;;  %v1578_v6 = vld [vmem:[%s3142_s1 + $0x34] ss:$8 sps:$4 sm:$0xff]   ;;  %v1580_v7 = vld [vmem:[%s3142_s1 + $0x30] ss:$8 sps:$4 sm:$0xff]   ;;  %v1581_v8 = vld [vmem:[%s3142_s1 + $0x44] ss:$8 sps:$4 sm:$0xff]  }
   0x4   :  { %421 = vmatprep.subr.bf16.mxu0 %v1572_v2  ;;  %1538 = vmatprep.subr.bf16.mxu1 %v1572_v2  ;;  %v1583_v9 = vld [vmem:[%s3142_s1 + $0x40] ss:$8 sps:$4 sm:$0xff]   ;;  %v1584_v10 = vld [vmem:[%s3142_s1 + $0x54] ss:$8 sps:$4 sm:$0xff]   ;;  %v1586_v11 = vld [vmem:[%s3142_s1 + $0x50] ss:$8 sps:$4 sm:$0xff]  }
   0x5   :  { %v1587_v12 = vld [vmem:[%s3142_s1 + $0x64] ss:$8 sps:$4 sm:$0xff]   ;;  %v1589_v14 = vld [vmem:[%s3142_s1 + $0x60] ss:$8 sps:$4 sm:$0xff]   ;;  %v1590_v16 = vld [vmem:[%s3142_s1 + $0x74] ss:$8 sps:$4 sm:$0xff]  }
   0x6   :  { %v1619_v13 = vld [vmem:[%s3143_s0 + $0x4] ss:$8 sps:$4 sm:$0xff]   ;;  %v1592_v17 = vld [vmem:[%s3142_s1 + $0x70] ss:$8 sps:$4 sm:$0xff]   ;;  %v1595_v19 = vld [vmem:[%s3142_s1 + $0x80] ss:$8 sps:$4 sm:$0xff]  }
   0x7   :  { %422 = vmatpush1.bf16.msra.mxu0 %v1574_v3  ;;  %1554 = vmatpush1.bf16.msra.mxu1 %v1574_v3  ;;  %v1622_v15 = vld [vmem:[%s3143_s0 + $0x84] ss:$8 sps:$4 sm:$0xff]   ;;  %v1596_v20 = vld [vmem:[%s3142_s1 + $0x94] ss:$8 sps:$4 sm:$0xff]   ;;  %v1598_v21 = vld [vmem:[%s3142_s1 + $0x90] ss:$8 sps:$4 sm:$0xff]  }
   0x8   :  { %423 = vmatprep.subr.bf16.mxu0 %v1575_v4  ;;  %1539 = vmatprep.subr.bf16.mxu1 %v1575_v4  ;;  %v1593_v18 = vld [vmem:[%s3142_s1 + $0x84] ss:$8 sps:$4 sm:$0xff]   ;;  %v1601_v23 = vld [vmem:[%s3142_s1 + $0xa0] ss:$8 sps:$4 sm:$0xff]   ;;  %v1602_v24 = vld [vmem:[%s3142_s1 + $0xb4] ss:$8 sps:$4 sm:$0xff]  }
   0x9   :  { %451 = vmatprep.mubr.bf16.mxu0 %v1619_v13  ;;  %531 = vmatprep.mubr.bf16.mxu1 %v1622_v15  ;;  %v1599_v22 = vld [vmem:[%s3142_s1 + $0xa4] ss:$8 sps:$4 sm:$0xff]   ;;  %v1604_v25 = vld [vmem:[%s3142_s1 + $0xb0] ss:$8 sps:$4 sm:$0xff]   ;;  %v1607_v27 = vld [vmem:[%s3142_s1 + $0xc0] ss:$8 sps:$4 sm:$0xff]  }
   0xa   :  { %v1605_v26 = vld [vmem:[%s3142_s1 + $0xc4] ss:$8 sps:$4 sm:$0xff]   ;;  %v1608_v28 = vld [vmem:[%s3142_s1 + $0xd4] ss:$8 sps:$4 sm:$0xff]   ;;  %v1610_v29 = vld [vmem:[%s3142_s1 + $0xd0] ss:$8 sps:$4 sm:$0xff]  }
   0xb   :  { %424 = vmatpush1.bf16.msra.mxu0 %v1577_v5  ;;  %1555 = vmatpush1.bf16.msra.mxu1 %v1577_v5  ;;  %v1611_v30 = vld [vmem:[%s3142_s1 + $0xe4] ss:$8 sps:$4 sm:$0xff]   ;;  %v1613_v31 = vld [vmem:[%s3142_s1 + $0xe0] ss:$8 sps:$4 sm:$0xff]   ;;  %v1614_v32 = vld [vmem:[%s3142_s1 + $0xf4] ss:$8 sps:$4 sm:$0xff]  }
   0xc   :  { %425 = vmatprep.subr.bf16.mxu0 %v1578_v6  ;;  %1540 = vmatprep.subr.bf16.mxu1 %v1578_v6  ;;  %v1616_v33 = vld [vmem:[%s3142_s1 + $0xf0] ss:$8 sps:$4 sm:$0xff]   ;;  %v1617_v34 = vld [vmem:[%s3143_s0] ss:$8 sps:$4 sm:$0xff]   ;;  %v1623_v36 = vld [vmem:[%s3143_s0 + $0x14] ss:$8 sps:$4 sm:$0xff]  }
   0xd   :  { %v1620_v35 = vld [vmem:[%s3143_s0 + $0x80] ss:$8 sps:$4 sm:$0xff]   ;;  %v1626_v37 = vld [vmem:[%s3143_s0 + $0x94] ss:$8 sps:$4 sm:$0xff]   ;;  %v1625_v38 = vld [vmem:[%s3143_s0 + $0x10] ss:$8 sps:$4 sm:$0xff]  }
   0xe   :  { %v1628_v39 = vld [vmem:[%s3143_s0 + $0x90] ss:$8 sps:$4 sm:$0xff]   ;;  %v1629_v40 = vld [vmem:[%s3143_s0 + $0x24] ss:$8 sps:$4 sm:$0xff]   ;;  %v1631_v42 = vld [vmem:[%s3143_s0 + $0x20] ss:$8 sps:$4 sm:$0xff]  }
   0xf   :  { %426 = vmatpush1.bf16.msra.mxu0 %v1580_v7  ;;  %1556 = vmatpush1.bf16.msra.mxu1 %v1580_v7  ;;  %v1632_v41 = vld [vmem:[%s3143_s0 + $0xa4] ss:$8 sps:$4 sm:$0xff]   ;;  %v1634_v43 = vld [vmem:[%s3143_s0 + $0xa0] ss:$8 sps:$4 sm:$0xff]   ;;  %v1635_v44 = vld [vmem:[%s3143_s0 + $0x34] ss:$8 sps:$4 sm:$0xff]  }
  0x10   :  { %427 = vmatprep.subr.bf16.mxu0 %v1581_v8  ;;  %1541 = vmatprep.subr.bf16.mxu1 %v1581_v8  ;;  %v1638_v45 = vld [vmem:[%s3143_s0 + $0xb4] ss:$8 sps:$4 sm:$0xff]   ;;  %v1637_v46 = vld [vmem:[%s3143_s0 + $0x30] ss:$8 sps:$4 sm:$0xff]   ;;  %v1641_v48 = vld [vmem:[%s3143_s0 + $0x44] ss:$8 sps:$4 sm:$0xff]  }
  0x11   :  { %v1640_v47 = vld [vmem:[%s3143_s0 + $0xb0] ss:$8 sps:$4 sm:$0xff]   ;;  %v1644_v49 = vld [vmem:[%s3143_s0 + $0xc4] ss:$8 sps:$4 sm:$0xff]   ;;  %v1643_v50 = vld [vmem:[%s3143_s0 + $0x40] ss:$8 sps:$4 sm:$0xff]  }
  0x12   :  { %v1646_v51 = vld [vmem:[%s3143_s0 + $0xc0] ss:$8 sps:$4 sm:$0xff]   ;;  %v1647_v52 = vld [vmem:[%s3143_s0 + $0x54] ss:$8 sps:$4 sm:$0xff]   ;;  %v1649_v54 = vld [vmem:[%s3143_s0 + $0x50] ss:$8 sps:$4 sm:$0xff]  }
  0x13   :  { %428 = vmatpush1.bf16.msra.mxu0 %v1583_v9  ;;  %1557 = vmatpush1.bf16.msra.mxu1 %v1583_v9  ;;  %v1650_v53 = vld [vmem:[%s3143_s0 + $0xd4] ss:$8 sps:$4 sm:$0xff]   ;;  %v1652_v55 = vld [vmem:[%s3143_s0 + $0xd0] ss:$8 sps:$4 sm:$0xff]   ;;  %v1653_v56 = vld [vmem:[%s3143_s0 + $0x64] ss:$8 sps:$4 sm:$0xff]  }
  0x14   :  { %429 = vmatprep.subr.bf16.mxu0 %v1584_v10  ;;  %1542 = vmatprep.subr.bf16.mxu1 %v1584_v10  ;;  %v1656_v57 = vld [vmem:[%s3143_s0 + $0xe4] ss:$8 sps:$4 sm:$0xff]   ;;  %v1655_v58 = vld [vmem:[%s3143_s0 + $0x60] ss:$8 sps:$4 sm:$0xff]   ;;  %v1659_v60 = vld [vmem:[%s3143_s0 + $0x74] ss:$8 sps:$4 sm:$0xff]  }
  0x15   :  { %v1658_v59 = vld [vmem:[%s3143_s0 + $0xe0] ss:$8 sps:$4 sm:$0xff]   ;;  %v1662_v61 = vld [vmem:[%s3143_s0 + $0xf4] ss:$8 sps:$4 sm:$0xff]   ;;  %v1661_v62 = vld [vmem:[%s3143_s0 + $0x70] ss:$8 sps:$4 sm:$0xff]  }
  0x16   :  { %v1664_v63 = vld [vmem:[%s3143_s0 + $0xf0] ss:$8 sps:$4 sm:$0xff]   ;;  %v90_v1 = vshrl.u32 %v89_v0, 7  ;;  %v87_v3 = vld [vmem:[%s3144_s2] sm:$0x3]  ;;  %v645_v15 = vld [vmem:[%s3145_s3 + $0x108] sm:$0xff] }
  0x17   :  { %430 = vmatpush1.bf16.msra.mxu0 %v1586_v11  ;;  %1558 = vmatpush1.bf16.msra.mxu1 %v1586_v11  ;;  %v612_v9 = vld [vmem:[%s3145_s3] sm:$0xff] }
  0x18   :  { %431 = vmatprep.subr.bf16.mxu0 %v1587_v12  ;;  %1543 = vmatprep.subr.bf16.mxu1 %v1587_v12  ;;  %v1956_v2 = vsub.s32 0, %v90_v1  ;;  %v1961_v4 = vsub.s32 1, %v90_v1  ;;  %v644_v12 = vld [vmem:[%s3145_s3 + $0x100] sm:$0xff]  ;;  %v651_v1 = vld [vmem:[%s3145_s3 + $0x138] sm:$0xff] }
  0x1a   :  { %3191 = vst [vmem:[#allocation2_spill] sm:$0xff] %v1956_v2  ;;  %3192 = vst [vmem:[#allocation3_spill] sm:$0xff] %v1961_v4  ;;  %v1964_v5 = vrot.slane %v87_v3, %v1956_v2  ;;  %v1967_v6 = vrot.slane %v87_v3, %v1961_v4 }
  0x1b   :  { %432 = vmatpush1.bf16.msra.mxu0 %v1589_v14  ;;  %1559 = vmatpush1.bf16.msra.mxu1 %v1589_v14 }
  0x1c   :  { %433 = vmatprep.subr.bf16.mxu0 %v1590_v16  ;;  %1544 = vmatprep.subr.bf16.mxu1 %v1590_v16  ;;  %v613_v16 = vld [vmem:[%s3145_s3 + $0x8] sm:$0xff] }
  0x1f   :  { %434 = vmatpush1.bf16.msra.mxu0 %v1592_v17  ;;  %1560 = vmatpush1.bf16.msra.mxu1 %v1592_v17 }
  0x20   :  { %435 = vmatprep.subr.bf16.mxu0 %v1593_v18  ;;  %1545 = vmatprep.subr.bf16.mxu1 %v1593_v18 }
  0x23   :  { %436 = vmatpush1.bf16.msra.mxu0 %v1595_v19  ;;  %1561 = vmatpush1.bf16.msra.mxu1 %v1595_v19 }
  0x24   :  { %437 = vmatprep.subr.bf16.mxu0 %v1596_v20  ;;  %1546 = vmatprep.subr.bf16.mxu1 %v1596_v20 }
  0x27   :  { %438 = vmatpush1.bf16.msra.mxu0 %v1598_v21  ;;  %1562 = vmatpush1.bf16.msra.mxu1 %v1598_v21  ;;  %v646_v21 = vld [vmem:[%s3145_s3 + $0x110] sm:$0xff] }
  0x28   :  { %439 = vmatprep.subr.bf16.mxu0 %v1599_v22  ;;  %1547 = vmatprep.subr.bf16.mxu1 %v1599_v22 }
  0x2b   :  { %440 = vmatpush1.bf16.msra.mxu0 %v1601_v23  ;;  %1563 = vmatpush1.bf16.msra.mxu1 %v1601_v23 }
  0x2c   :  { %441 = vmatprep.subr.bf16.mxu0 %v1602_v24  ;;  %1548 = vmatprep.subr.bf16.mxu1 %v1602_v24 }
  0x2f   :  { %442 = vmatpush1.bf16.msra.mxu0 %v1604_v25  ;;  %1564 = vmatpush1.bf16.msra.mxu1 %v1604_v25 }
  0x30   :  { %443 = vmatprep.subr.bf16.mxu0 %v1605_v26  ;;  %1549 = vmatprep.subr.bf16.mxu1 %v1605_v26  ;;  %v647_v26 = vld [vmem:[%s3145_s3 + $0x118] sm:$0xff] }
  0x33   :  { %444 = vmatpush1.bf16.msra.mxu0 %v1607_v27  ;;  %1565 = vmatpush1.bf16.msra.mxu1 %v1607_v27 }
  0x34   :  { %445 = vmatprep.subr.bf16.mxu0 %v1608_v28  ;;  %1550 = vmatprep.subr.bf16.mxu1 %v1608_v28 }
  0x37   :  { %446 = vmatpush1.bf16.msra.mxu0 %v1610_v29  ;;  %1566 = vmatpush1.bf16.msra.mxu1 %v1610_v29 }
  0x38   :  { %447 = vmatprep.subr.bf16.mxu0 %v1611_v30  ;;  %1551 = vmatprep.subr.bf16.mxu1 %v1611_v30 }
  0x3b   :  { %448 = vmatpush1.bf16.msra.mxu0 %v1613_v31  ;;  %1567 = vmatpush1.bf16.msra.mxu1 %v1613_v31 }
  0x3c   :  { %449 = vmatprep.subr.bf16.mxu0 %v1614_v32  ;;  %1552 = vmatprep.subr.bf16.mxu1 %v1614_v32 }
  0x3f   :  { %450 = vmatpush1.bf16.msra.mxu0 %v1616_v33  ;;  %1568 = vmatpush1.bf16.msra.mxu1 %v1616_v33 }
  0x42   :  { %452 = vmatmul.mubr.bf16.vlgmr.msra.gmra.mrb[0].mxu0 %v1617_v34  ;;  %532 = vmatmul.mubr.bf16.vlgmr.msra.gmra.mrb[0].mxu1 %v1620_v35  ;;  %v614_v34 = vld [vmem:[%s3145_s3 + $0x10] sm:$0xff]  ;;  %v615_v35 = vld [vmem:[%s3145_s3 + $0x18] sm:$0xff] }
  0x43   :  { %461 = vmatprep.mubr.bf16.mxu0 %v1623_v36  ;;  %541 = vmatprep.mubr.bf16.mxu1 %v1626_v37 }
  0x4a   :  { %462 = vmatmul.mubr.bf16.gmra.mrb[4].mxu0 %v1625_v38  ;;  %542 = vmatmul.mubr.bf16.gmra.mrb[4].mxu1 %v1628_v39  ;;  %v616_v39 = vld [vmem:[%s3145_s3 + $0x20] sm:$0xff] }
  0x4b   :  { %471 = vmatprep.mubr.bf16.mxu0 %v1629_v40  ;;  %551 = vmatprep.mubr.bf16.mxu1 %v1632_v41 }
  0x52   :  { %472 = vmatmul.mubr.bf16.gmra.mrb[8].mxu0 %v1631_v42  ;;  %552 = vmatmul.mubr.bf16.gmra.mrb[8].mxu1 %v1634_v43  ;;  %v648_v42 = vld [vmem:[%s3145_s3 + $0x120] sm:$0xff] }
  0x53   :  { %481 = vmatprep.mubr.bf16.mxu0 %v1635_v44  ;;  %561 = vmatprep.mubr.bf16.mxu1 %v1638_v45 }
  0x5a   :  { %482 = vmatmul.mubr.bf16.gmra.mrb[12].mxu0 %v1637_v46  ;;  %562 = vmatmul.mubr.bf16.gmra.mrb[12].mxu1 %v1640_v47 }
  0x5b   :  { %491 = vmatprep.mubr.bf16.mxu0 %v1641_v48  ;;  %571 = vmatprep.mubr.bf16.mxu1 %v1644_v49  ;;  %v617_v48 = vld [vmem:[%s3145_s3 + $0x28] sm:$0xff] }
  0x62   :  { %492 = vmatmul.mubr.bf16.gmra.mrb[16].mxu0 %v1643_v50  ;;  %572 = vmatmul.mubr.bf16.gmra.mrb[16].mxu1 %v1646_v51  ;;  %v649_v51 = vld [vmem:[%s3145_s3 + $0x128] sm:$0xff] }
  0x63   :  { %501 = vmatprep.mubr.bf16.mxu0 %v1647_v52  ;;  %581 = vmatprep.mubr.bf16.mxu1 %v1650_v53 }
  0x6a   :  { %502 = vmatmul.mubr.bf16.gmra.mrb[20].mxu0 %v1649_v54  ;;  %582 = vmatmul.mubr.bf16.gmra.mrb[20].mxu1 %v1652_v55  ;;  %v618_v54 = vld [vmem:[%s3145_s3 + $0x30] sm:$0xff] }
  0x6b   :  { %511 = vmatprep.mubr.bf16.mxu0 %v1653_v56  ;;  %591 = vmatprep.mubr.bf16.mxu1 %v1656_v57 }
  0x72   :  { %512 = vmatmul.mubr.bf16.gmra.mrb[24].mxu0 %v1655_v58  ;;  %592 = vmatmul.mubr.bf16.gmra.mrb[24].mxu1 %v1658_v59 }
  0x73   :  { %521 = vmatprep.mubr.bf16.mxu0 %v1659_v60  ;;  %601 = vmatprep.mubr.bf16.mxu1 %v1662_v61  ;;  %v619_v60 = vld [vmem:[%s3145_s3 + $0x38] sm:$0xff] }
  0x7a   :  { %522 = vmatmul.mubr.bf16.gmra.mrb[28].mxu0 %v1661_v62  ;;  %602 = vmatmul.mubr.bf16.gmra.mrb[28].mxu1 %v1664_v63  ;;  %v650_v63 = vld [vmem:[%s3145_s3 + $0x130] sm:$0xff] }
 0x115   :  { %v453_v7 = vpop.f32.mrb[0].mxu0  ;;  %v533_v8 = vpop.f32.mrb[0].mxu1 }
 0x116   :  { %v454_v10 = vadd.f32 %v453_v7, %v1964_v5  ;;  %v534_v11 = vadd.f32 %v533_v8, %v1964_v5  ;;  %v455_v13 = vpop.f32.mrb[1].mxu0  ;;  %v535_v14 = vpop.f32.mrb[1].mxu1 }
 0x117   :  { %v456_v17 = vadd.f32 %v455_v13, %v1967_v6  ;;  %v536_v18 = vadd.f32 %v535_v14, %v1967_v6  ;;  %v457_v19 = vpop.f32.mrb[2].mxu0  ;;  %v537_v20 = vpop.f32.mrb[2].mxu1 }
 0x118   :  { %v538_v22 = vadd.f32 %v537_v20, %v1964_v5  ;;  %v459_v23 = vpop.f32.mrb[3].mxu0  ;;  %v539_v24 = vpop.f32.mrb[3].mxu1  ;;  %v1989_v25 = vadd.f32 %v612_v9, %v454_v10  ;;  %v1994_v27 = vadd.f32 %v644_v12, %v534_v11  ;;  %v458_v31 = vadd.f32 %v457_v19, %v1964_v5  ;;  %v652_v19 = vld [vmem:[%s3145_s3 + $0x140] sm:$0xff] }
 0x119   :  { %v1996_v28 = vadd.f32 %v645_v15, %v536_v18  ;;  %v540_v29 = vadd.f32 %v539_v24, %v1967_v6  ;;  %v1999_v30 = vadd.f32 %v613_v16, %v456_v17  ;;  %v460_v32 = vadd.f32 %v459_v23, %v1967_v6  ;;  %v620_v17 = vld [vmem:[%s3145_s3 + $0x40] sm:$0xff]  ;;  %v621_v24 = vld [vmem:[%s3145_s3 + $0x48] sm:$0xff] }
 0x11a   :  { %v2003_v33 = vadd.f32 %v646_v21, %v538_v22  ;;  %v2025_v44 = vadd.f32 %v614_v34, %v458_v31  ;;  %v653_v31 = vld [vmem:[%s3145_s3 + $0x148] sm:$0xff] }
 0x11b   :  { %v740_v36 = vadd.f32 %v1999_v30, %v1989_v25  ;;  %v2013_v37 = vadd.f32 %v647_v26, %v540_v29  ;;  %v788_v43 = vadd.f32 %v1996_v28, %v1994_v27  ;;  %v2027_v45 = vadd.f32 %v615_v35, %v460_v32  ;;  %v622_v35 = vld [vmem:[%s3145_s3 + $0x50] sm:$0xff] }
 0x11d   :  { %v463_v38 = vpop.f32.mrb[4].mxu0  ;;  %741 = vadd.xlane.f32.xlu0 %v740_v36  ;;  %v791_v40 = vadd.f32 %v2013_v37, %v2003_v33  ;;  %v543_v41 = vpop.f32.mrb[4].mxu1  ;;  %v743_v11 = vadd.f32 %v2027_v45, %v2025_v44 }
 0x11e   :  { %v464_v46 = vadd.f32 %v463_v38, %v1964_v5  ;;  %v465_v47 = vpop.f32.mrb[5].mxu0  ;;  %v544_v49 = vadd.f32 %v543_v41, %v1964_v5  ;;  %v545_v50 = vpop.f32.mrb[5].mxu1 }
 0x11f   :  { %v466_v52 = vadd.f32 %v465_v47, %v1967_v6  ;;  %792 = vadd.xlane.f32.xlu1 %v791_v40  ;;  %v467_v53 = vpop.f32.mrb[6].mxu0  ;;  %v546_v55 = vadd.f32 %v545_v50, %v1967_v6  ;;  %v547_v56 = vpop.f32.mrb[6].mxu1 }
 0x120   :  { %v2042_v57 = vadd.f32 %v616_v39, %v464_v46  ;;  %v468_v58 = vadd.f32 %v467_v53, %v1964_v5  ;;  %v469_v59 = vpop.f32.mrb[7].mxu0  ;;  %v2048_v61 = vadd.f32 %v648_v42, %v544_v49  ;;  %v548_v62 = vadd.f32 %v547_v56, %v1964_v5  ;;  %v549_v0 = vpop.f32.mrb[7].mxu1  ;;  %v623_v46 = vld [vmem:[%s3145_s3 + $0x58] sm:$0xff] }
 0x121   :  { %v2057_v3 = vadd.f32 %v617_v48, %v466_v52  ;;  %v470_v7 = vadd.f32 %v469_v59, %v1967_v6  ;;  %789 = vadd.xlane.f32.xlu0 %v788_v43  ;;  %v2060_v8 = vadd.f32 %v649_v51, %v546_v55  ;;  %v550_v9 = vadd.f32 %v549_v0, %v1967_v6  ;;  %v654_v48 = vld [vmem:[%s3145_s3 + $0x150] sm:$0xff]  ;;  %v655_v53 = vld [vmem:[%s3145_s3 + $0x158] sm:$0xff] }
 0x122   :  { %v2063_v10 = vadd.f32 %v618_v54, %v468_v58  ;;  %v2069_v13 = vadd.f32 %v650_v63, %v548_v62  ;;  %v624_v63 = vld [vmem:[%s3145_s3 + $0x60] sm:$0xff] }
 0x123   :  { %v2067_v12 = vadd.f32 %v619_v60, %v470_v7  ;;  %v746_v14 = vadd.f32 %v2057_v3, %v2042_v57  ;;  %v2073_v15 = vadd.f32 %v651_v1, %v550_v9  ;;  %v794_v21 = vadd.f32 %v2060_v8, %v2048_v61  ;;  %v656_v1 = vld [vmem:[%s3145_s3 + $0x160] sm:$0xff] }
 0x125   :  { %v473_v16 = vpop.f32.mrb[8].mxu0  ;;  %747 = vadd.xlane.f32.xlu1 %v746_v14  ;;  %744 = vadd.xlane.f32.xlu0 %v743_v11  ;;  %v553_v18 = vpop.f32.mrb[8].mxu1  ;;  %v749_v20 = vadd.f32 %v2067_v12, %v2063_v10  ;;  %v797_v39 = vadd.f32 %v2073_v15, %v2069_v13 }
 0x126   :  { %v474_v22 = vadd.f32 %v473_v16, %v1964_v5  ;;  %v475_v23 = vpop.f32.mrb[9].mxu0  ;;  %v554_v26 = vadd.f32 %v553_v18, %v1964_v5  ;;  %v555_v29 = vpop.f32.mrb[9].mxu1  ;;  %v625_v16 = vld [vmem:[%s3145_s3 + $0x68] sm:$0xff] }
 0x127   :  { %v476_v32 = vadd.f32 %v475_v23, %v1967_v6  ;;  %v477_v34 = vpop.f32.mrb[10].mxu0  ;;  %v556_v36 = vadd.f32 %v555_v29, %v1967_v6  ;;  %v557_v38 = vpop.f32.mrb[10].mxu1 }
 0x128   :  { %v2100_v40 = vadd.f32 %v620_v17, %v474_v22  ;;  %v478_v41 = vadd.f32 %v477_v34, %v1964_v5  ;;  %v2103_v42 = vadd.f32 %v652_v19, %v554_v26  ;;  %v479_v43 = vpop.f32.mrb[11].mxu0  ;;  %v558_v47 = vadd.f32 %v557_v38, %v1964_v5  ;;  %v559_v49 = vpop.f32.mrb[11].mxu1  ;;  %v657_v19 = vld [vmem:[%s3145_s3 + $0x168] sm:$0xff]  ;;  %v626_v22 = vld [vmem:[%s3145_s3 + $0x70] sm:$0xff] }
 0x129   :  { %v2112_v50 = vadd.f32 %v621_v24, %v476_v32  ;;  %750 = vadd.xlane.f32.xlu1 %v749_v20  ;;  %795 = vadd.xlane.f32.xlu0 %v794_v21  ;;  %v480_v51 = vadd.f32 %v479_v43, %v1967_v6  ;;  %v2115_v52 = vadd.f32 %v653_v31, %v556_v36  ;;  %v658_v38 = vld [vmem:[%s3145_s3 + $0x170] sm:$0xff] }
 0x12a   :  { %v2120_v54 = vadd.f32 %v622_v35, %v478_v41  ;;  %v560_v55 = vadd.f32 %v559_v49, %v1967_v6  ;;  %v2125_v58 = vadd.f32 %v654_v48, %v558_v47  ;;  %v627_v35 = vld [vmem:[%s3145_s3 + $0x78] sm:$0xff] }
 0x12b   :  { %v2123_v56 = vadd.f32 %v623_v46, %v480_v51  ;;  %v752_v59 = vadd.f32 %v2112_v50, %v2100_v40  ;;  %v800_v9 = vadd.f32 %v2115_v52, %v2103_v42  ;;  %v659_v47 = vld [vmem:[%s3145_s3 + $0x178] sm:$0xff] }
 0x12c   :  { %v2129_v60 = vadd.f32 %v655_v53, %v560_v55 }
 0x12d   :  { %v483_v62 = vpop.f32.mrb[12].mxu0  ;;  %798 = vadd.xlane.f32.xlu1 %v797_v39  ;;  %753 = vadd.xlane.f32.xlu0 %v752_v59  ;;  %v563_v0 = vpop.f32.mrb[12].mxu1  ;;  %v755_v7 = vadd.f32 %v2123_v56, %v2120_v54 }
 0x12e   :  { %v484_v11 = vadd.f32 %v483_v62, %v1964_v5  ;;  %v485_v14 = vpop.f32.mrb[13].mxu0  ;;  %v564_v17 = vadd.f32 %v563_v0, %v1964_v5  ;;  %v565_v18 = vpop.f32.mrb[13].mxu1  ;;  %v803_v26 = vadd.f32 %v2129_v60, %v2125_v58 }
 0x12f   :  { %v486_v20 = vadd.f32 %v485_v14, %v1967_v6  ;;  %v487_v21 = vpop.f32.mrb[14].mxu0  ;;  %v566_v23 = vadd.f32 %v565_v18, %v1967_v6  ;;  %v567_v24 = vpop.f32.mrb[14].mxu1 }
 0x130   :  { %v2156_v29 = vadd.f32 %v624_v63, %v484_v11  ;;  %v488_v31 = vadd.f32 %v487_v21, %v1964_v5  ;;  %v2159_v32 = vadd.f32 %v656_v1, %v564_v17  ;;  %v489_v34 = vpop.f32.mrb[15].mxu0  ;;  %v568_v36 = vadd.f32 %v567_v24, %v1964_v5  ;;  %v569_v39 = vpop.f32.mrb[15].mxu1  ;;  %v628_v63 = vld [vmem:[%s3145_s3 + $0x80] sm:$0xff] }
 0x131   :  { %v2168_v41 = vadd.f32 %v625_v16, %v486_v20  ;;  %756 = vadd.xlane.f32.xlu1 %v755_v7  ;;  %801 = vadd.xlane.f32.xlu0 %v800_v9  ;;  %v490_v43 = vadd.f32 %v489_v34, %v1967_v6  ;;  %v2171_v46 = vadd.f32 %v657_v19, %v566_v23  ;;  %v660_v1 = vld [vmem:[%s3145_s3 + $0x180] sm:$0xff]  ;;  %v629_v16 = vld [vmem:[%s3145_s3 + $0x88] sm:$0xff] }
 0x132   :  { %v2176_v48 = vadd.f32 %v626_v22, %v488_v31  ;;  %v570_v49 = vadd.f32 %v569_v39, %v1967_v6  ;;  %v2181_v53 = vadd.f32 %v658_v38, %v568_v36  ;;  %v661_v19 = vld [vmem:[%s3145_s3 + $0x188] sm:$0xff]  ;;  %v630_v22 = vld [vmem:[%s3145_s3 + $0x90] sm:$0xff]  ;;  %v631_v38 = vld [vmem:[%s3145_s3 + $0x98] sm:$0xff] }
 0x133   :  { %v2179_v51 = vadd.f32 %v627_v35, %v490_v43  ;;  %v758_v55 = vadd.f32 %v2168_v41, %v2156_v29  ;;  %v806_v9 = vadd.f32 %v2171_v46, %v2159_v32  ;;  %v662_v43 = vld [vmem:[%s3145_s3 + $0x190] sm:$0xff] }
 0x134   :  { %v2185_v59 = vadd.f32 %v659_v47, %v570_v49 }
 0x135   :  { %v493_v62 = vpop.f32.mrb[16].mxu0  ;;  %804 = vadd.xlane.f32.xlu1 %v803_v26  ;;  %759 = vadd.xlane.f32.xlu0 %v758_v55  ;;  %v573_v0 = vpop.f32.mrb[16].mxu1  ;;  %v761_v7 = vadd.f32 %v2179_v51, %v2176_v48 }
 0x136   :  { %v494_v11 = vadd.f32 %v493_v62, %v1964_v5  ;;  %v495_v14 = vpop.f32.mrb[17].mxu0  ;;  %v574_v17 = vadd.f32 %v573_v0, %v1964_v5  ;;  %v575_v18 = vpop.f32.mrb[17].mxu1  ;;  %v809_v26 = vadd.f32 %v2185_v59, %v2181_v53 }
 0x137   :  { %v496_v20 = vadd.f32 %v495_v14, %v1967_v6  ;;  %v497_v21 = vpop.f32.mrb[18].mxu0  ;;  %v576_v23 = vadd.f32 %v575_v18, %v1967_v6  ;;  %v577_v24 = vpop.f32.mrb[18].mxu1 }
 0x138   :  { %v2212_v31 = vadd.f32 %v628_v63, %v494_v11  ;;  %v498_v34 = vadd.f32 %v497_v21, %v1964_v5  ;;  %v2215_v35 = vadd.f32 %v660_v1, %v574_v17  ;;  %v499_v36 = vpop.f32.mrb[19].mxu0  ;;  %v578_v39 = vadd.f32 %v577_v24, %v1964_v5  ;;  %v579_v47 = vpop.f32.mrb[19].mxu1  ;;  %v663_v63 = vld [vmem:[%s3145_s3 + $0x198] sm:$0xff]  ;;  %v632_v17 = vld [vmem:[%s3145_s3 + $0xa0] sm:$0xff]  ;;  %v633_v24 = vld [vmem:[%s3145_s3 + $0xa8] sm:$0xff] }
 0x139   :  { %v2224_v49 = vadd.f32 %v629_v16, %v496_v20  ;;  %762 = vadd.xlane.f32.xlu1 %v761_v7  ;;  %807 = vadd.xlane.f32.xlu0 %v806_v9  ;;  %v500_v55 = vadd.f32 %v499_v36, %v1967_v6  ;;  %v2227_v62 = vadd.f32 %v661_v19, %v576_v23  ;;  %v664_v19 = vld [vmem:[%s3145_s3 + $0x1a0] sm:$0xff]  ;;  %v665_v36 = vld [vmem:[%s3145_s3 + $0x1a8] sm:$0xff] }
 0x13a   :  { %v2232_v0 = vadd.f32 %v630_v22, %v498_v34  ;;  %v580_v1 = vadd.f32 %v579_v47, %v1967_v6  ;;  %v2237_v14 = vadd.f32 %v662_v43, %v578_v39  ;;  %v634_v43 = vld [vmem:[%s3145_s3 + $0xb0] sm:$0xff] }
 0x13b   :  { %v2235_v11 = vadd.f32 %v631_v38, %v500_v55  ;;  %v764_v7 = vadd.f32 %v2224_v49, %v2212_v31  ;;  %v812_v21 = vadd.f32 %v2227_v62, %v2215_v35 }
 0x13c   :  { %3194 = vst [vmem:[#allocation5_spill] sm:$0xff] %v2237_v14  ;;  %v2241_v9 = vadd.f32 %v663_v63, %v580_v1 }
 0x13d   :  { %3193 = vst [vmem:[#allocation4_spill] sm:$0xff] %v2235_v11  ;;  %v503_v16 = vpop.f32.mrb[20].mxu0  ;;  %810 = vadd.xlane.f32.xlu1 %v809_v26  ;;  %765 = vadd.xlane.f32.xlu0 %v764_v7  ;;  %v583_v18 = vpop.f32.mrb[20].mxu1  ;;  %v767_v20 = vadd.f32 %v2235_v11, %v2232_v0 }
 0x13e   :  { %3195 = vst [vmem:[#allocation6_spill] sm:$0xff] %v2241_v9  ;;  %v504_v22 = vadd.f32 %v503_v16, %v1964_v5  ;;  %v505_v23 = vpop.f32.mrb[21].mxu0  ;;  %v584_v26 = vadd.f32 %v583_v18, %v1964_v5  ;;  %v585_v34 = vpop.f32.mrb[21].mxu1  ;;  %v815_v63 = vadd.f32 %v2241_v9, %v2237_v14 }
 0x13f   :  { %v506_v38 = vadd.f32 %v505_v23, %v1967_v6  ;;  %v507_v39 = vpop.f32.mrb[22].mxu0  ;;  %v586_v47 = vadd.f32 %v585_v34, %v1967_v6  ;;  %v587_v55 = vpop.f32.mrb[22].mxu1  ;;  %v635_v23 = vld [vmem:[%s3145_s3 + $0xb8] sm:$0xff]  ;;  %v666_v34 = vld [vmem:[%s3145_s3 + $0x1b0] sm:$0xff] }
 0x140   :  { %v2268_v1 = vadd.f32 %v632_v17, %v504_v22  ;;  %v508_v7 = vadd.f32 %v507_v39, %v1964_v5  ;;  %v2271_v16 = vadd.f32 %v664_v19, %v584_v26  ;;  %v509_v18 = vpop.f32.mrb[23].mxu0  ;;  %v588_v4 = vadd.f32 %v587_v55, %v1964_v5  ;;  %v589_v2 = vpop.f32.mrb[23].mxu1  ;;  %v667_v22 = vld [vmem:[%s3145_s3 + $0x1b8] sm:$0xff] }
 0x141   :  { %v2280_v11 = vadd.f32 %v633_v24, %v506_v38  ;;  %768 = vadd.xlane.f32.xlu1 %v767_v20  ;;  %813 = vadd.xlane.f32.xlu0 %v812_v21  ;;  %v510_v17 = vadd.f32 %v509_v18, %v1967_v6  ;;  %v2283_v19 = vadd.f32 %v665_v36, %v586_v47  ;;  %v636_v36 = vld [vmem:[%s3145_s3 + $0xc0] sm:$0xff]  ;;  %v637_v18 = vld [vmem:[%s3145_s3 + $0xc8] sm:$0xff] }
 0x142   :  { %3196 = vst [vmem:[#allocation7_spill] sm:$0xff] %v2268_v1  ;;  %3197 = vst [vmem:[#allocation8_spill] sm:$0xff] %v2271_v16  ;;  %v2288_v26 = vadd.f32 %v634_v43, %v508_v7  ;;  %v590_v39 = vadd.f32 %v589_v2, %v1967_v6  ;;  %v2293_v9 = vadd.f32 %v666_v34, %v588_v4  ;;  %v668_v2 = vld [vmem:[%s3145_s3 + $0x1c0] sm:$0xff]  ;;  %v669_v34 = vld [vmem:[%s3145_s3 + $0x1c8] sm:$0xff] }
 0x143   :  { %3198 = vst [vmem:[#allocation9_spill] sm:$0xff] %v2280_v11  ;;  %3199 = vst [vmem:[#allocation10_spill] sm:$0xff] %v2283_v19  ;;  %v2291_v55 = vadd.f32 %v635_v23, %v510_v17  ;;  %v770_v20 = vadd.f32 %v2280_v11, %v2268_v1  ;;  %v818_v43 = vadd.f32 %v2283_v19, %v2271_v16 }
 0x144   :  { %3200 = vst [vmem:[#allocation11_spill] sm:$0xff] %v2288_v26  ;;  %3202 = vst [vmem:[#allocation13_spill] sm:$0xff] %v2293_v9  ;;  %v2297_v21 = vadd.f32 %v667_v22, %v590_v39  ;;  %v638_v39 = vld [vmem:[%s3145_s3 + $0xd0] sm:$0xff] }
 0x145   :  { %3201 = vst [vmem:[#allocation12_spill] sm:$0xff] %v2291_v55  ;;  %v513_v24 = vpop.f32.mrb[24].mxu0  ;;  %816 = vadd.xlane.f32.xlu1 %v815_v63  ;;  %771 = vadd.xlane.f32.xlu0 %v770_v20  ;;  %v593_v38 = vpop.f32.mrb[24].mxu1  ;;  %v773_v4 = vadd.f32 %v2291_v55, %v2288_v26 }
 0x146   :  { %3203 = vst [vmem:[#allocation14_spill] sm:$0xff] %v2297_v21  ;;  %v514_v47 = vadd.f32 %v513_v24, %v1964_v5  ;;  %v515_v7 = vpop.f32.mrb[25].mxu0  ;;  %v594_v63 = vadd.f32 %v593_v38, %v1964_v5  ;;  %v595_v23 = vpop.f32.mrb[25].mxu1  ;;  %v821_v19 = vadd.f32 %v2297_v21, %v2293_v9 }
 0x147   :  { %v516_v17 = vadd.f32 %v515_v7, %v1967_v6  ;;  %v517_v22 = vpop.f32.mrb[26].mxu0  ;;  %v596_v20 = vadd.f32 %v595_v23, %v1967_v6  ;;  %v597_v24 = vpop.f32.mrb[26].mxu1  ;;  %v639_v7 = vld [vmem:[%s3145_s3 + $0xd8] sm:$0xff]  ;;  %v670_v23 = vld [vmem:[%s3145_s3 + $0x1d0] sm:$0xff] }
 0x148   :  { %v2324_v16 = vadd.f32 %v636_v36, %v514_v47  ;;  %v518_v38 = vadd.f32 %v517_v22, %v1964_v5  ;;  %v2327_v55 = vadd.f32 %v668_v2, %v594_v63  ;;  %v519_v26 = vpop.f32.mrb[27].mxu0  ;;  %v598_v14 = vadd.f32 %v597_v24, %v1964_v5  ;;  %v599_v11 = vpop.f32.mrb[27].mxu1  ;;  %v671_v47 = vld [vmem:[%s3145_s3 + $0x1d8] sm:$0xff] }
 0x149   :  { %v2336_v1 = vadd.f32 %v637_v18, %v516_v17  ;;  %774 = vadd.xlane.f32.xlu1 %v773_v4  ;;  %819 = vadd.xlane.f32.xlu0 %v818_v43  ;;  %v520_v36 = vadd.f32 %v519_v26, %v1967_v6  ;;  %v2339_v2 = vadd.f32 %v669_v34, %v596_v20  ;;  %v640_v18 = vld [vmem:[%s3145_s3 + $0xe0] sm:$0xff] }
 0x14a   :  { %3204 = vst [vmem:[#allocation15_spill] sm:$0xff] %v2324_v16  ;;  %3205 = vst [vmem:[#allocation16_spill] sm:$0xff] %v2327_v55  ;;  %v2344_v63 = vadd.f32 %v638_v39, %v518_v38  ;;  %v600_v22 = vadd.f32 %v599_v11, %v1967_v6  ;;  %v2349_v21 = vadd.f32 %v670_v23, %v598_v14  ;;  %v672_v11 = vld [vmem:[%s3145_s3 + $0x1e0] sm:$0xff]  ;;  %v641_v38 = vld [vmem:[%s3145_s3 + $0xe8] sm:$0xff] }
 0x14b   :  { %3206 = vst [vmem:[#allocation17_spill] sm:$0xff] %v2336_v1  ;;  %3207 = vst [vmem:[#allocation18_spill] sm:$0xff] %v2339_v2  ;;  %v2347_v24 = vadd.f32 %v639_v7, %v520_v36  ;;  %v776_v4 = vadd.f32 %v2336_v1, %v2324_v16  ;;  %v824_v17 = vadd.f32 %v2339_v2, %v2327_v55  ;;  %v673_v23 = vld [vmem:[%s3145_s3 + $0x1e8] sm:$0xff]  ;;  %v643_v1 = vld [vmem:[%s3145_s3 + $0xf8] sm:$0xff] }
 0x14c   :  { %3208 = vst [vmem:[#allocation19_spill] sm:$0xff] %v2344_v63  ;;  %v2353_v43 = vadd.f32 %v671_v47, %v600_v22  ;;  %v642_v22 = vld [vmem:[%s3145_s3 + $0xf0] sm:$0xff] }
 0x14d   :  { %3209 = vst [vmem:[#allocation20_spill] sm:$0xff] %v2347_v24  ;;  %v523_v26 = vpop.f32.mrb[28].mxu0  ;;  %822 = vadd.xlane.f32.xlu1 %v821_v19  ;;  %777 = vadd.xlane.f32.xlu0 %v776_v4  ;;  %v603_v34 = vpop.f32.mrb[28].mxu1  ;;  %v779_v14 = vadd.f32 %v2347_v24, %v2344_v63  ;;  %v674_v24 = vld [vmem:[%s3145_s3 + $0x1f0] sm:$0xff] }
 0x14e   :  { %3210 = vst [vmem:[#allocation21_spill] sm:$0xff] %v2353_v43  ;;  %v524_v39 = vadd.f32 %v523_v26, %v1964_v5  ;;  %v525_v20 = vpop.f32.mrb[29].mxu0  ;;  %v604_v19 = vadd.f32 %v603_v34, %v1964_v5  ;;  %v605_v7 = vpop.f32.mrb[29].mxu1  ;;  %v827_v34 = vadd.f32 %v2353_v43, %v2349_v21 }
 0x14f   :  { %v526_v36 = vadd.f32 %v525_v20, %v1967_v6  ;;  %v527_v47 = vpop.f32.mrb[30].mxu0  ;;  %v606_v4 = vadd.f32 %v605_v7, %v1967_v6  ;;  %v607_v26 = vpop.f32.mrb[30].mxu1 }
 0x150   :  { %v2383_v63 = vadd.f32 %v640_v18, %v524_v39  ;;  %v528_v2 = vadd.f32 %v527_v47, %v1964_v5  ;;  %v2386_v20 = vadd.f32 %v672_v11, %v604_v19  ;;  %v529_v55 = vpop.f32.mrb[31].mxu0  ;;  %v608_v7 = vadd.f32 %v607_v26, %v1964_v5  ;;  %v609_v16 = vpop.f32.mrb[31].mxu1  ;;  %v675_v11 = vld [vmem:[%s3145_s3 + $0x1f8] sm:$0xff] }
 0x151   :  { %v2392_v9 = vadd.f32 %v641_v38, %v526_v36  ;;  %780 = vadd.xlane.f32.xlu1 %v779_v14  ;;  %825 = vadd.xlane.f32.xlu0 %v824_v17  ;;  %v530_v43 = vadd.f32 %v529_v55, %v1967_v6  ;;  %v2395_v18 = vadd.f32 %v673_v23, %v606_v4 }
 0x152   :  { %v2400_v39 = vadd.f32 %v642_v22, %v528_v2  ;;  %v2402_v19 = vadd.f32 %v674_v24, %v608_v7  ;;  %v610_v47 = vadd.f32 %v609_v16, %v1967_v6 }
 0x153   :  { %v2405_v5 = vadd.f32 %v643_v1, %v530_v43  ;;  %v782_v14 = vadd.f32 %v2392_v9, %v2383_v63  ;;  %v830_v2 = vadd.f32 %v2395_v18, %v2386_v20 }
 0x154   :  { %v2409_v17 = vadd.f32 %v675_v11, %v610_v47 }
 0x155   :  { %828 = vadd.xlane.f32.xlu1 %v827_v34  ;;  %783 = vadd.xlane.f32.xlu0 %v782_v14  ;;  %v785_v55 = vadd.f32 %v2405_v5, %v2400_v39 }
 0x156   :  { %v833_v6 = vadd.f32 %v2409_v17, %v2402_v19 }
 0x159   :  { %786 = vadd.xlane.f32.xlu1 %v785_v55  ;;  %831 = vadd.xlane.f32.xlu0 %v830_v2 }
 0x15d   :  { %834 = vadd.xlane.f32.xlu1 %v833_v6 }
 0x1aa   :  { %v742_v1 = vpop.xlane.xlu0 %741 }
 0x1ab   :  { %v837_v16 = vmul.f32 0.00390625, %v742_v1 }
 0x1ac   :  { %v793_v38 = vpop.xlane.xlu1 %792 }
 0x1ad   :  { %v2418_v24 = vsub.f32 %v1989_v25, %v837_v16  ;;  %v2421_v43 = vsub.f32 %v1999_v30, %v837_v16  ;;  %v854_v4 = vmul.f32 0.00390625, %v793_v38 }
 0x1ae   :  { %v790_v23 = vpop.xlane.xlu0 %789 }
 0x1af   :  { %v853_v36 = vmul.f32 0.00390625, %v790_v23  ;;  %v933_v22 = vmul.f32 %v2418_v24, %v2418_v24  ;;  %v934_v26 = vmul.f32 %v2421_v43, %v2421_v43  ;;  %v2438_v6 = vsub.f32 %v2003_v33, %v854_v4 }
 0x1b1   :  { %v2428_v34 = vsub.f32 %v1994_v27, %v853_v36  ;;  %v2431_v7 = vsub.f32 %v1996_v28, %v853_v36  ;;  %v997_v30 = vadd.f32 %v934_v26, %v933_v22  ;;  %v2441_v27 = vsub.f32 %v2013_v37, %v854_v4 }
 0x1b2   :  { %v748_v25 = vpop.xlane.xlu1 %747  ;;  %v745_v11 = vpop.xlane.xlu0 %744 }
 0x1b3   :  { %v839_v47 = vmul.f32 0.00390625, %v748_v25  ;;  %v838_v14 = vmul.f32 0.00390625, %v745_v11  ;;  %v965_v55 = vmul.f32 %v2428_v34, %v2428_v34  ;;  %v966_v2 = vmul.f32 %v2431_v7, %v2431_v7  ;;  %998 = vadd.xlane.f32.xlu0 %v997_v30 }
 0x1b4   :  { %v968_v30 = vmul.f32 %v2441_v27, %v2441_v27 }
 0x1b5   :  { %v2444_v28 = vsub.f32 %v2042_v57, %v839_v47  ;;  %v2447_v1 = vsub.f32 %v2057_v3, %v839_v47  ;;  %v2450_v16 = vsub.f32 %v2025_v44, %v838_v14  ;;  %v2453_v38 = vsub.f32 %v2027_v45, %v838_v14 }
 0x1b6   :  { %v751_v23 = vpop.xlane.xlu1 %750  ;;  %v796_v36 = vpop.xlane.xlu0 %795  ;;  %v1045_v33 = vadd.f32 %v966_v2, %v965_v55  ;;  %v967_v45 = vmul.f32 %v2438_v6, %v2438_v6 }
 0x1b7   :  { %v840_v22 = vmul.f32 0.00390625, %v751_v23  ;;  %v855_v26 = vmul.f32 0.00390625, %v796_v36  ;;  %v937_v37 = vmul.f32 %v2444_v28, %v2444_v28  ;;  %v938_v57 = vmul.f32 %v2447_v1, %v2447_v1 }
 0x1b8   :  { %1046 = vadd.xlane.f32.xlu0 %v1045_v33  ;;  %v935_v3 = vmul.f32 %v2450_v16, %v2450_v16  ;;  %v936_v44 = vmul.f32 %v2453_v38, %v2453_v38 }
 0x1b9   :  { %v2466_v4 = vsub.f32 %v2063_v10, %v840_v22  ;;  %v2469_v25 = vsub.f32 %v2048_v61, %v855_v26  ;;  %v2472_v11 = vsub.f32 %v2060_v8, %v855_v26  ;;  %v2477_v47 = vsub.f32 %v2067_v12, %v840_v22 }
 0x1ba   :  { %v799_v14 = vpop.xlane.xlu1 %798  ;;  %v754_v55 = vpop.xlane.xlu0 %753  ;;  %v1003_v2 = vadd.f32 %v938_v57, %v937_v37  ;;  %v1000_v23 = vadd.f32 %v936_v44, %v935_v3  ;;  %v1048_v22 = vadd.f32 %v968_v30, %v967_v45 }
 0x1bb   :  { %v856_v36 = vmul.f32 0.00390625, %v799_v14  ;;  %v841_v33 = vmul.f32 0.00390625, %v754_v55  ;;  %v969_v10 = vmul.f32 %v2469_v25, %v2469_v25  ;;  %v970_v61 = vmul.f32 %v2472_v11, %v2472_v11 }
 0x1bc   :  { %1004 = vadd.xlane.f32.xlu0 %v1003_v2  ;;  %1001 = vadd.xlane.f32.xlu1 %v1000_v23  ;;  %v939_v26 = vmul.f32 %v2466_v4, %v2466_v4 }
 0x1bd   :  { %v2484_v8 = vsub.f32 %v2100_v40, %v841_v33  ;;  %v2487_v12 = vsub.f32 %v2112_v50, %v841_v33  ;;  %v2492_v37 = vsub.f32 %v2069_v13, %v856_v36  ;;  %v2495_v57 = vsub.f32 %v2073_v15, %v856_v36 }
 0x1be   :  { %v757_v3 = vpop.xlane.xlu1 %756  ;;  %v802_v44 = vpop.xlane.xlu0 %801  ;;  %v1051_v14 = vadd.f32 %v970_v61, %v969_v10  ;;  %v940_v40 = vmul.f32 %v2477_v47, %v2477_v47 }
 0x1bf   :  { %v842_v55 = vmul.f32 0.00390625, %v757_v3  ;;  %v857_v2 = vmul.f32 0.00390625, %v802_v44  ;;  %v941_v50 = vmul.f32 %v2484_v8, %v2484_v8  ;;  %v942_v45 = vmul.f32 %v2487_v12, %v2487_v12 }
 0x1c0   :  { %1049 = vadd.xlane.f32.xlu1 %v1048_v22  ;;  %1052 = vadd.xlane.f32.xlu0 %v1051_v14  ;;  %v1006_v10 = vadd.f32 %v940_v40, %v939_v26  ;;  %v971_v22 = vmul.f32 %v2492_v37, %v2492_v37 }
 0x1c1   :  { %v2504_v13 = vsub.f32 %v2120_v54, %v842_v55  ;;  %v2507_v15 = vsub.f32 %v2123_v56, %v842_v55  ;;  %v2510_v30 = vsub.f32 %v2103_v42, %v857_v2  ;;  %v2513_v23 = vsub.f32 %v2115_v52, %v857_v2 }
 0x1c2   :  { %v805_v36 = vpop.xlane.xlu1 %804  ;;  %v760_v33 = vpop.xlane.xlu0 %759  ;;  %v1009_v61 = vadd.f32 %v942_v45, %v941_v50  ;;  %v972_v54 = vmul.f32 %v2495_v57, %v2495_v57 }
 0x1c3   :  { %v858_v3 = vmul.f32 0.00390625, %v805_v36  ;;  %v843_v44 = vmul.f32 0.00390625, %v760_v33  ;;  %v973_v56 = vmul.f32 %v2510_v30, %v2510_v30  ;;  %v974_v42 = vmul.f32 %v2513_v23, %v2513_v23 }
 0x1c4   :  { %1007 = vadd.xlane.f32.xlu1 %v1006_v10  ;;  %1010 = vadd.xlane.f32.xlu0 %v1009_v61  ;;  %v943_v52 = vmul.f32 %v2504_v13, %v2504_v13  ;;  %v944_v55 = vmul.f32 %v2507_v15, %v2507_v15  ;;  %v1054_v36 = vadd.f32 %v972_v54, %v971_v22 }
 0x1c5   :  { %v2526_v26 = vsub.f32 %v2125_v58, %v858_v3  ;;  %v2529_v14 = vsub.f32 %v2156_v29, %v843_v44  ;;  %v2532_v40 = vsub.f32 %v2168_v41, %v843_v44  ;;  %v2537_v2 = vsub.f32 %v2129_v60, %v858_v3 }
 0x1c6   :  { %v763_v50 = vpop.xlane.xlu1 %762  ;;  %v808_v45 = vpop.xlane.xlu0 %807  ;;  %v1057_v33 = vadd.f32 %v974_v42, %v973_v56  ;;  %v1012_v3 = vadd.f32 %v944_v55, %v943_v52 }
 0x1c7   :  { %v844_v10 = vmul.f32 0.00390625, %v763_v50  ;;  %v859_v61 = vmul.f32 0.00390625, %v808_v45  ;;  %v945_v58 = vmul.f32 %v2529_v14, %v2529_v14  ;;  %v946_v29 = vmul.f32 %v2532_v40, %v2532_v40 }
 0x1c8   :  { %1055 = vadd.xlane.f32.xlu1 %v1054_v36  ;;  %1058 = vadd.xlane.f32.xlu0 %v1057_v33  ;;  %v975_v22 = vmul.f32 %v2526_v26, %v2526_v26 }
 0x1c9   :  { %v2544_v41 = vsub.f32 %v2159_v32, %v859_v61  ;;  %v2547_v60 = vsub.f32 %v2171_v46, %v859_v61  ;;  %v2552_v54 = vsub.f32 %v2176_v48, %v844_v10  ;;  %v2555_v44 = vsub.f32 %v2179_v51, %v844_v10 }
 0x1ca   :  { %v811_v56 = vpop.xlane.xlu1 %810  ;;  %v766_v42 = vpop.xlane.xlu0 %765  ;;  %v1015_v50 = vadd.f32 %v946_v29, %v945_v58  ;;  %v976_v32 = vmul.f32 %v2537_v2, %v2537_v2 }
 0x1cb   :  { %v860_v45 = vmul.f32 0.00390625, %v811_v56  ;;  %v845_v36 = vmul.f32 0.00390625, %v766_v42  ;;  %v977_v46 = vmul.f32 %v2544_v41, %v2544_v41  ;;  %v978_v52 = vmul.f32 %v2547_v60, %v2547_v60 }
 0x1cc   :  { %1013 = vadd.xlane.f32.xlu1 %v1012_v3  ;;  %1016 = vadd.xlane.f32.xlu0 %v1015_v50  ;;  %v1060_v58 = vadd.f32 %v976_v32, %v975_v22  ;;  %v947_v3 = vmul.f32 %v2552_v54, %v2552_v54 }
 0x1cd   :  { %v2564_v48 = vsub.f32 %v2181_v53, %v860_v45  ;;  %v2567_v51 = vsub.f32 %v2185_v59, %v860_v45  ;;  %v2570_v55 = vsub.f32 %v2212_v31, %v845_v36  ;;  %v2573_v33 = vsub.f32 %v2224_v49, %v845_v36  ;;  %v3216_v36 = vld [vmem:[#allocation4_spill] sm:$0xff] }
 0x1ce   :  { %v769_v10 = vpop.xlane.xlu1 %768  ;;  %v814_v61 = vpop.xlane.xlu0 %813  ;;  %v1063_v29 = vadd.f32 %v978_v52, %v977_v46  ;;  %v948_v53 = vmul.f32 %v2555_v44, %v2555_v44 }
 0x1cf   :  { %3211 = vst [vmem:[#allocation22_spill] sm:$0xff] %v2564_v48  ;;  %3212 = vst [vmem:[#allocation23_spill] sm:$0xff] %v2567_v51  ;;  %v846_v56 = vmul.f32 0.00390625, %v769_v10  ;;  %v861_v42 = vmul.f32 0.00390625, %v814_v61  ;;  %v949_v59 = vmul.f32 %v2570_v55, %v2570_v55  ;;  %v950_v31 = vmul.f32 %v2573_v33, %v2573_v33 }
 0x1d0   :  { %1061 = vadd.xlane.f32.xlu1 %v1060_v58  ;;  %1064 = vadd.xlane.f32.xlu0 %v1063_v29  ;;  %v979_v49 = vmul.f32 %v2564_v48, %v2564_v48  ;;  %v980_v45 = vmul.f32 %v2567_v51, %v2567_v51  ;;  %v1018_v61 = vadd.f32 %v948_v53, %v947_v3  ;;  %v3220_v51 = vld [vmem:[#allocation9_spill] sm:$0xff] }
 0x1d1   :  { %v2586_v22 = vsub.f32 %v2232_v0, %v846_v56  ;;  %v2589_v50 = vsub.f32 %v2215_v35, %v861_v42  ;;  %v2592_v32 = vsub.f32 %v2227_v62, %v861_v42  ;;  %v2597_v46 = vsub.f32 %v3216_v36, %v846_v56  ;;  %v3218_v62 = vld [vmem:[#allocation7_spill] sm:$0xff]  ;;  %v3222_v53 = vld [vmem:[#allocation5_spill] sm:$0xff] }
 0x1d2   :  { %v817_v52 = vpop.xlane.xlu1 %816  ;;  %v772_v10 = vpop.xlane.xlu0 %771  ;;  %v1021_v58 = vadd.f32 %v950_v31, %v949_v59  ;;  %v1066_v36 = vadd.f32 %v980_v45, %v979_v49  ;;  %v3224_v31 = vld [vmem:[#allocation6_spill] sm:$0xff]  ;;  %v3226_v49 = vld [vmem:[#allocation11_spill] sm:$0xff] }
 0x1d3   :  { %3213 = vst [vmem:[#allocation24_spill] sm:$0xff] %v2586_v22  ;;  %3214 = vst [vmem:[#allocation25_spill] sm:$0xff] %v2589_v50  ;;  %v862_v29 = vmul.f32 0.00390625, %v817_v52  ;;  %v847_v48 = vmul.f32 0.00390625, %v772_v10  ;;  %v981_v0 = vmul.f32 %v2589_v50, %v2589_v50  ;;  %v982_v35 = vmul.f32 %v2592_v32, %v2592_v32 }
 0x1d4   :  { %3215 = vst [vmem:[#allocation26_spill] sm:$0xff] %v2592_v32  ;;  %3217 = vst [vmem:[#allocation4_spill] sm:$0xff] %v2597_v46  ;;  %1019 = vadd.xlane.f32.xlu1 %v1018_v61  ;;  %1022 = vadd.xlane.f32.xlu0 %v1021_v58  ;;  %v951_v3 = vmul.f32 %v2586_v22, %v2586_v22  ;;  %v952_v58 = vmul.f32 %v2597_v46, %v2597_v46 }
 0x1d5   :  { %v2604_v42 = vsub.f32 %v3218_v62, %v847_v48  ;;  %v2607_v56 = vsub.f32 %v3220_v51, %v847_v48  ;;  %v2612_v59 = vsub.f32 %v3222_v53, %v862_v29  ;;  %v2615_v52 = vsub.f32 %v3224_v31, %v862_v29  ;;  %v3228_v29 = vld [vmem:[#allocation12_spill] sm:$0xff]  ;;  %v3232_v31 = vld [vmem:[#allocation10_spill] sm:$0xff] }
 0x1d6   :  { %v775_v10 = vpop.xlane.xlu1 %774  ;;  %v820_v32 = vpop.xlane.xlu0 %819  ;;  %v1069_v61 = vadd.f32 %v982_v35, %v981_v0  ;;  %v3230_v0 = vld [vmem:[#allocation8_spill] sm:$0xff] }
 0x1d7   :  { %3219 = vst [vmem:[#allocation7_spill] sm:$0xff] %v2604_v42  ;;  %3221 = vst [vmem:[#allocation9_spill] sm:$0xff] %v2607_v56  ;;  %v848_v62 = vmul.f32 0.00390625, %v775_v10  ;;  %v863_v50 = vmul.f32 0.00390625, %v820_v32  ;;  %v953_v48 = vmul.f32 %v2604_v42, %v2604_v42  ;;  %v954_v51 = vmul.f32 %v2607_v56, %v2607_v56 }
 0x1d8   :  { %3223 = vst [vmem:[#allocation5_spill] sm:$0xff] %v2612_v59  ;;  %3225 = vst [vmem:[#allocation6_spill] sm:$0xff] %v2615_v52  ;;  %1067 = vadd.xlane.f32.xlu1 %v1066_v36  ;;  %1070 = vadd.xlane.f32.xlu0 %v1069_v61  ;;  %v1024_v42 = vadd.f32 %v952_v58, %v951_v3  ;;  %v983_v36 = vmul.f32 %v2612_v59, %v2612_v59  ;;  %v3234_v3 = vld [vmem:[#allocation13_spill] sm:$0xff] }
 0x1d9   :  { %v2624_v45 = vsub.f32 %v3226_v49, %v848_v62  ;;  %v2627_v53 = vsub.f32 %v3228_v29, %v848_v62  ;;  %v2630_v35 = vsub.f32 %v3230_v0, %v863_v50  ;;  %v2633_v10 = vsub.f32 %v3232_v31, %v863_v50  ;;  %v3237_v0 = vld [vmem:[#allocation17_spill] sm:$0xff] }
 0x1da   :  { %v823_v32 = vpop.xlane.xlu1 %822  ;;  %v778_v46 = vpop.xlane.xlu0 %777  ;;  %v1027_v22 = vadd.f32 %v954_v51, %v953_v48  ;;  %v984_v61 = vmul.f32 %v2615_v52, %v2615_v52  ;;  %v3235_v48 = vld [vmem:[#allocation15_spill] sm:$0xff] }
 0x1db   :  { %3227 = vst [vmem:[#allocation11_spill] sm:$0xff] %v2624_v45  ;;  %3229 = vst [vmem:[#allocation12_spill] sm:$0xff] %v2627_v53  ;;  %v864_v49 = vmul.f32 0.00390625, %v823_v32  ;;  %v849_v56 = vmul.f32 0.00390625, %v778_v46  ;;  %v985_v62 = vmul.f32 %v2630_v35, %v2630_v35  ;;  %v986_v29 = vmul.f32 %v2633_v10, %v2633_v10  ;;  %v3239_v32 = vld [vmem:[#allocation14_spill] sm:$0xff] }
 0x1dc   :  { %3231 = vst [vmem:[#allocation8_spill] sm:$0xff] %v2630_v35  ;;  %3233 = vst [vmem:[#allocation10_spill] sm:$0xff] %v2633_v10  ;;  %1025 = vadd.xlane.f32.xlu1 %v1024_v42  ;;  %1028 = vadd.xlane.f32.xlu0 %v1027_v22  ;;  %v955_v50 = vmul.f32 %v2624_v45, %v2624_v45  ;;  %v956_v46 = vmul.f32 %v2627_v53, %v2627_v53  ;;  %v3241_v53 = vld [vmem:[#allocation18_spill] sm:$0xff] }
 0x1dd   :  { %v2646_v58 = vsub.f32 %v3234_v3, %v864_v49  ;;  %v2649_v51 = vsub.f32 %v3235_v48, %v849_v56  ;;  %v2652_v31 = vsub.f32 %v3237_v0, %v849_v56  ;;  %v2657_v35 = vsub.f32 %v3239_v32, %v864_v49  ;;  %v3240_v56 = vld [vmem:[#allocation16_spill] sm:$0xff] }
 0x1de   :  { %v781_v42 = vpop.xlane.xlu1 %780  ;;  %v826_v22 = vpop.xlane.xlu0 %825  ;;  %v1072_v10 = vadd.f32 %v984_v61, %v983_v36  ;;  %v1075_v52 = vadd.f32 %v986_v29, %v985_v62  ;;  %v1030_v32 = vadd.f32 %v956_v46, %v955_v50  ;;  %v3243_v61 = vld [vmem:[#allocation19_spill] sm:$0xff]  ;;  %v3244_v29 = vld [vmem:[#allocation20_spill] sm:$0xff] }
 0x1df   :  { %3236 = vst [vmem:[#allocation13_spill] sm:$0xff] %v2649_v51  ;;  %3238 = vst [vmem:[#allocation15_spill] sm:$0xff] %v2652_v31  ;;  %v850_v45 = vmul.f32 0.00390625, %v781_v42  ;;  %v865_v59 = vmul.f32 0.00390625, %v826_v22  ;;  %v957_v3 = vmul.f32 %v2649_v51, %v2649_v51  ;;  %v958_v48 = vmul.f32 %v2652_v31, %v2652_v31 }
 0x1e0   :  { %1073 = vadd.xlane.f32.xlu1 %v1072_v10  ;;  %1076 = vadd.xlane.f32.xlu0 %v1075_v52  ;;  %v987_v36 = vmul.f32 %v2646_v58, %v2646_v58  ;;  %v988_v52 = vmul.f32 %v2657_v35, %v2657_v35 }
 0x1e1   :  { %v2664_v0 = vsub.f32 %v3240_v56, %v865_v59  ;;  %v2667_v49 = vsub.f32 %v3241_v53, %v865_v59  ;;  %v2672_v62 = vsub.f32 %v3243_v61, %v850_v45  ;;  %v2675_v42 = vsub.f32 %v3244_v29, %v850_v45  ;;  %v3245_v45 = vld [vmem:[#allocation21_spill] sm:$0xff] }
 0x1e2   :  { %v829_v22 = vpop.xlane.xlu1 %828  ;;  %v784_v31 = vpop.xlane.xlu0 %783  ;;  %v1033_v10 = vadd.f32 %v958_v48, %v957_v3  ;;  %v1078_v29 = vadd.f32 %v988_v52, %v987_v36 }
 0x1e3   :  { %3242 = vst [vmem:[#allocation17_spill] sm:$0xff] %v2667_v49  ;;  %v866_v56 = vmul.f32 0.00390625, %v829_v22  ;;  %v851_v51 = vmul.f32 0.00390625, %v784_v31  ;;  %v989_v59 = vmul.f32 %v2664_v0, %v2664_v0  ;;  %v990_v53 = vmul.f32 %v2667_v49, %v2667_v49 }
 0x1e4   :  { %1031 = vadd.xlane.f32.xlu1 %v1030_v32  ;;  %1034 = vadd.xlane.f32.xlu0 %v1033_v10  ;;  %v959_v32 = vmul.f32 %v2672_v62, %v2672_v62 }
 0x1e5   :  { %v2684_v50 = vsub.f32 %v2349_v21, %v866_v56  ;;  %v2687_v46 = vsub.f32 %v3245_v45, %v866_v56  ;;  %v2690_v3 = vsub.f32 %v2383_v63, %v851_v51  ;;  %v2693_v48 = vsub.f32 %v2392_v9, %v851_v51 }
 0x1e6   :  { %v787_v31 = vpop.xlane.xlu1 %786  ;;  %v832_v61 = vpop.xlane.xlu0 %831  ;;  %v1081_v22 = vadd.f32 %v990_v53, %v989_v59  ;;  %v960_v21 = vmul.f32 %v2675_v42, %v2675_v42 }
 0x1e7   :  { %v852_v10 = vmul.f32 0.00390625, %v787_v31  ;;  %v867_v49 = vmul.f32 0.00390625, %v832_v61  ;;  %v961_v56 = vmul.f32 %v2690_v3, %v2690_v3  ;;  %v962_v63 = vmul.f32 %v2693_v48, %v2693_v48 }
 0x1e8   :  { %1079 = vadd.xlane.f32.xlu1 %v1078_v29  ;;  %1082 = vadd.xlane.f32.xlu0 %v1081_v22  ;;  %v991_v36 = vmul.f32 %v2684_v50, %v2684_v50  ;;  %v992_v52 = vmul.f32 %v2687_v46, %v2687_v46  ;;  %v1036_v31 = vadd.f32 %v960_v21, %v959_v32 }
 0x1e9   :  { %v2704_v9 = vsub.f32 %v2386_v20, %v867_v49  ;;  %v2707_v51 = vsub.f32 %v2395_v18, %v867_v49  ;;  %v2714_v59 = vsub.f32 %v2400_v39, %v852_v10  ;;  %v2717_v53 = vsub.f32 %v2405_v5, %v852_v10 }
 0x1ea   :  { %v835_v45 = vpop.xlane.xlu1 %834  ;;  %v1039_v61 = vadd.f32 %v962_v63, %v961_v56  ;;  %v1084_v29 = vadd.f32 %v992_v52, %v991_v36 }
 0x1eb   :  { %3246 = vst [vmem:[#allocation14_spill] sm:$0xff] %v2717_v53  ;;  %v868_v20 = vmul.f32 0.00390625, %v835_v45  ;;  %v993_v18 = vmul.f32 %v2704_v9, %v2704_v9  ;;  %v994_v49 = vmul.f32 %v2707_v51, %v2707_v51  ;;  %v963_v32 = vmul.f32 %v2714_v59, %v2714_v59 }
 0x1ec   :  { %1037 = vadd.xlane.f32.xlu1 %v1036_v31  ;;  %1040 = vadd.xlane.f32.xlu0 %v1039_v61  ;;  %v964_v21 = vmul.f32 %v2717_v53, %v2717_v53 }
 0x1ed   :  { %v1087_v22 = vadd.f32 %v994_v49, %v993_v18  ;;  %v2724_v39 = vsub.f32 %v2402_v19, %v868_v20  ;;  %v2727_v5 = vsub.f32 %v2409_v17, %v868_v20 }
 0x1ee   :  { %v1042_v10 = vadd.f32 %v964_v21, %v963_v32 }
 0x1ef   :  { %3247 = vst [vmem:[#allocation16_spill] sm:$0xff] %v2724_v39  ;;  %3248 = vst [vmem:[#allocation18_spill] sm:$0xff] %v2727_v5  ;;  %v995_v56 = vmul.f32 %v2724_v39, %v2724_v39  ;;  %v996_v63 = vmul.f32 %v2727_v5, %v2727_v5 }
 0x1f0   :  { %1085 = vadd.xlane.f32.xlu1 %v1084_v29  ;;  %1088 = vadd.xlane.f32.xlu0 %v1087_v22  ;;  %v1253_v22 = vld [vmem:[%s3146_s4] sm:$0x3] }
 0x1f1   :  { %v1090_v19 = vadd.f32 %v996_v63, %v995_v56  ;;  %v1329_v63 = vld [vmem:[%s3147_s5] sm:$0x3] }
 0x1f4   :  { %1043 = vadd.xlane.f32.xlu1 %v1042_v10 }
 0x1f8   :  { %1091 = vadd.xlane.f32.xlu1 %v1090_v19 }
 0x240   :  { %v999_v17 = vpop.xlane.xlu0 %998 }
 0x241   :  { %v1093_v36 = vmul.f32 0.00390625, %v999_v17 }
 0x243   :  { %v1125_v52 = vadd.f32 1e-12, %v1093_v36  ;;  %v3249_v36 = vld [vmem:[#allocation2_spill] sm:$0xff] }
 0x245   :  { %v1047_v45 = vpop.xlane.xlu0 %1046  ;;  %1665 = vrsqrt.f32 %v1125_v52  ;;  %v2744_v52 = vrot.slane %v1253_v22, %v3249_v36 }
 0x246   :  { %v1109_v31 = vmul.f32 0.00390625, %v1047_v45  ;;  %v3250_v45 = vld [vmem:[#allocation3_spill] sm:$0xff] }
 0x248   :  { %v1141_v61 = vadd.f32 1e-12, %v1109_v31  ;;  %v2747_v31 = vrot.slane %v1253_v22, %v3250_v45 }
 0x249   :  { %v1002_v20 = vpop.xlane.xlu1 %1001  ;;  %v1005_v18 = vpop.xlane.xlu0 %1004 }
 0x24a   :  { %1667 = vrsqrt.f32 %v1141_v61  ;;  %v1094_v49 = vmul.f32 0.00390625, %v1002_v20  ;;  %v1095_v29 = vmul.f32 0.00390625, %v1005_v18 }
 0x24c   :  { %v1126_v32 = vadd.f32 1e-12, %v1094_v49  ;;  %v1127_v21 = vadd.f32 1e-12, %v1095_v29  ;;  %v2750_v49 = vrot.slane %v1329_v63, %v3249_v36  ;;  %v2753_v29 = vrot.slane %v1329_v63, %v3250_v45 }
 0x24d   :  { %v1050_v10 = vpop.xlane.xlu1 %1049  ;;  %v1053_v56 = vpop.xlane.xlu0 %1052 }
 0x24e   :  { %1669 = vrsqrt.f32 %v1126_v32  ;;  %v1110_v19 = vmul.f32 0.00390625, %v1050_v10  ;;  %v1111_v17 = vmul.f32 0.00390625, %v1053_v56 }
 0x24f   :  { %1671 = vrsqrt.f32 %v1127_v21  ;;  %v1666_v61 = vpop.eup %1665 }
 0x250   :  { %v1142_v20 = vadd.f32 1e-12, %v1110_v19  ;;  %v1143_v18 = vadd.f32 1e-12, %v1111_v17  ;;  %v1189_v32 = vmul.f32 %v1666_v61, %v2418_v24  ;;  %v1190_v10 = vmul.f32 %v1666_v61, %v2421_v43 }
 0x251   :  { %v1008_v56 = vpop.xlane.xlu1 %1007  ;;  %v1011_v5 = vpop.xlane.xlu0 %1010 }
 0x252   :  { %1673 = vrsqrt.f32 %v1142_v20  ;;  %v1096_v39 = vmul.f32 0.00390625, %v1008_v56  ;;  %v1097_v22 = vmul.f32 0.00390625, %v1011_v5  ;;  %v1265_v21 = vmul.f32 %v2744_v52, %v1189_v32 }
 0x253   :  { %v1266_v19 = vmul.f32 %v2747_v31, %v1190_v10  ;;  %1675 = vrsqrt.f32 %v1143_v18 }
 0x254   :  { %v1668_v17 = vpop.eup %1667  ;;  %v1128_v36 = vadd.f32 1e-12, %v1096_v39  ;;  %v1129_v53 = vadd.f32 1e-12, %v1097_v22  ;;  %v1341_v63 = vadd.f32 %v2750_v49, %v1265_v21 }
 0x255   :  { %v1342_v45 = vadd.f32 %v2753_v29, %v1266_v19  ;;  %v1221_v24 = vmul.f32 %v1668_v17, %v2428_v34  ;;  %v1222_v43 = vmul.f32 %v1668_v17, %v2431_v7  ;;  %v1056_v61 = vpop.xlane.xlu1 %1055  ;;  %v1059_v20 = vpop.xlane.xlu0 %1058 }
 0x256   :  { %1677 = vrsqrt.f32 %v1128_v36  ;;  %v1112_v5 = vmul.f32 0.00390625, %v1056_v61  ;;  %v1113_v56 = vmul.f32 0.00390625, %v1059_v20  ;;  %1405 = vst [vmem:[%s3148_s6] sm:$0xff] %v1341_v63 }
 0x257   :  { %1406 = vst [vmem:[%s3148_s6 + $0x8] sm:$0xff] %v1342_v45  ;;  %v1297_v39 = vmul.f32 %v2744_v52, %v1221_v24  ;;  %v1298_v18 = vmul.f32 %v2747_v31, %v1222_v43  ;;  %1679 = vrsqrt.f32 %v1129_v53 }
 0x258   :  { %v1670_v34 = vpop.eup %1669  ;;  %v1144_v7 = vadd.f32 1e-12, %v1112_v5  ;;  %v1145_v32 = vadd.f32 1e-12, %v1113_v56 }
 0x259   :  { %v1672_v10 = vpop.eup %1671  ;;  %v1373_v22 = vadd.f32 %v2750_v49, %v1297_v39  ;;  %v1374_v21 = vadd.f32 %v2753_v29, %v1298_v18  ;;  %v1191_v19 = vmul.f32 %v1670_v34, %v2450_v16  ;;  %v1192_v17 = vmul.f32 %v1670_v34, %v2453_v38  ;;  %v1014_v36 = vpop.xlane.xlu1 %1013 }
 0x25a   :  { %v1017_v63 = vpop.xlane.xlu0 %1016  ;;  %v1193_v45 = vmul.f32 %v1672_v10, %v2444_v28  ;;  %v1194_v24 = vmul.f32 %v1672_v10, %v2447_v1  ;;  %1681 = vrsqrt.f32 %v1144_v7  ;;  %v1098_v53 = vmul.f32 0.00390625, %v1014_v36 }
 0x25b   :  { %1437 = vst [vmem:[%s3148_s6 + $0x100] sm:$0xff] %v1373_v22  ;;  %1438 = vst [vmem:[%s3148_s6 + $0x108] sm:$0xff] %v1374_v21  ;;  %v1267_v16 = vmul.f32 %v2744_v52, %v1191_v19  ;;  %v1268_v38 = vmul.f32 %v2747_v31, %v1192_v17  ;;  %1683 = vrsqrt.f32 %v1145_v32  ;;  %v1099_v43 = vmul.f32 0.00390625, %v1017_v63 }
 0x25c   :  { %v1674_v61 = vpop.eup %1673  ;;  %v1269_v28 = vmul.f32 %v2744_v52, %v1193_v45  ;;  %v1270_v1 = vmul.f32 %v2747_v31, %v1194_v24  ;;  %v1130_v20 = vadd.f32 1e-12, %v1098_v53 }
 0x25d   :  { %v1676_v5 = vpop.eup %1675  ;;  %v1343_v56 = vadd.f32 %v2750_v49, %v1267_v16  ;;  %v1344_v39 = vadd.f32 %v2753_v29, %v1268_v38  ;;  %v1223_v18 = vmul.f32 %v1674_v61, %v2438_v6  ;;  %v1224_v34 = vmul.f32 %v1674_v61, %v2441_v27  ;;  %v1062_v7 = vpop.xlane.xlu1 %1061 }
 0x25e   :  { %v1065_v10 = vpop.xlane.xlu0 %1064  ;;  %v1345_v32 = vadd.f32 %v2750_v49, %v1269_v28  ;;  %v1346_v22 = vadd.f32 %v2753_v29, %v1270_v1  ;;  %v1225_v21 = vmul.f32 %v1676_v5, %v2469_v25  ;;  %v1226_v19 = vmul.f32 %v1676_v5, %v2472_v11 }
 0x25f   :  { %1407 = vst [vmem:[%s3148_s6 + $0x10] sm:$0xff] %v1343_v56  ;;  %1408 = vst [vmem:[%s3148_s6 + $0x18] sm:$0xff] %v1344_v39  ;;  %v1299_v6 = vmul.f32 %v2744_v52, %v1223_v18  ;;  %v1300_v27 = vmul.f32 %v2747_v31, %v1224_v34  ;;  %1685 = vrsqrt.f32 %v1130_v20  ;;  %v1131_v17 = vadd.f32 1e-12, %v1099_v43 }
 0x260   :  { %v1678_v36 = vpop.eup %1677  ;;  %1409 = vst [vmem:[%s3148_s6 + $0x20] sm:$0xff] %v1345_v32  ;;  %1410 = vst [vmem:[%s3148_s6 + $0x28] sm:$0xff] %v1346_v22  ;;  %v1301_v25 = vmul.f32 %v2744_v52, %v1225_v21  ;;  %v1302_v11 = vmul.f32 %v2747_v31, %v1226_v19  ;;  %v1114_v63 = vmul.f32 0.00390625, %v1062_v7  ;;  %v1115_v45 = vmul.f32 0.00390625, %v1065_v10 }
 0x261   :  { %v1680_v24 = vpop.eup %1679  ;;  %v1375_v53 = vadd.f32 %v2750_v49, %v1299_v6  ;;  %v1376_v16 = vadd.f32 %v2753_v29, %v1300_v27  ;;  %v1195_v38 = vmul.f32 %v1678_v36, %v2466_v4  ;;  %v1196_v43 = vmul.f32 %v1678_v36, %v2477_v47  ;;  %v1020_v61 = vpop.xlane.xlu1 %1019 }
 0x262   :  { %v1023_v28 = vpop.xlane.xlu0 %1022  ;;  %v1377_v1 = vadd.f32 %v2750_v49, %v1301_v25  ;;  %v1378_v20 = vadd.f32 %v2753_v29, %v1302_v11  ;;  %v1197_v5 = vmul.f32 %v1680_v24, %v2484_v8  ;;  %v1198_v56 = vmul.f32 %v1680_v24, %v2487_v12 }
 0x263   :  { %1439 = vst [vmem:[%s3148_s6 + $0x110] sm:$0xff] %v1375_v53  ;;  %1440 = vst [vmem:[%s3148_s6 + $0x118] sm:$0xff] %v1376_v16  ;;  %v1271_v4 = vmul.f32 %v2744_v52, %v1195_v38  ;;  %v1272_v47 = vmul.f32 %v2747_v31, %v1196_v43  ;;  %1687 = vrsqrt.f32 %v1131_v17  ;;  %v1146_v39 = vadd.f32 1e-12, %v1114_v63 }
 0x264   :  { %v1682_v18 = vpop.eup %1681  ;;  %1441 = vst [vmem:[%s3148_s6 + $0x120] sm:$0xff] %v1377_v1  ;;  %1442 = vst [vmem:[%s3148_s6 + $0x128] sm:$0xff] %v1378_v20  ;;  %v1273_v8 = vmul.f32 %v2744_v52, %v1197_v5  ;;  %v1274_v12 = vmul.f32 %v2747_v31, %v1198_v56  ;;  %v1147_v34 = vadd.f32 1e-12, %v1115_v45  ;;  %v1100_v7 = vmul.f32 0.00390625, %v1020_v61 }
 0x265   :  { %v1684_v10 = vpop.eup %1683  ;;  %v1347_v32 = vadd.f32 %v2750_v49, %v1271_v4  ;;  %v1348_v22 = vadd.f32 %v2753_v29, %v1272_v47  ;;  %v1227_v21 = vmul.f32 %v1682_v18, %v2492_v37  ;;  %v1228_v19 = vmul.f32 %v1682_v18, %v2495_v57  ;;  %v1068_v6 = vpop.xlane.xlu1 %1067 }
 0x266   :  { %v1071_v27 = vpop.xlane.xlu0 %1070  ;;  %v1349_v17 = vadd.f32 %v2750_v49, %v1273_v8  ;;  %v1350_v36 = vadd.f32 %v2753_v29, %v1274_v12  ;;  %v1229_v25 = vmul.f32 %v1684_v10, %v2510_v30  ;;  %v1230_v11 = vmul.f32 %v1684_v10, %v2513_v23 }
 0x267   :  { %1411 = vst [vmem:[%s3148_s6 + $0x30] sm:$0xff] %v1347_v32  ;;  %1412 = vst [vmem:[%s3148_s6 + $0x38] sm:$0xff] %v1348_v22  ;;  %v1303_v37 = vmul.f32 %v2744_v52, %v1227_v21  ;;  %v1304_v57 = vmul.f32 %v2747_v31, %v1228_v19  ;;  %1689 = vrsqrt.f32 %v1146_v39  ;;  %v1132_v63 = vadd.f32 1e-12, %v1100_v7 }
 0x268   :  { %1413 = vst [vmem:[%s3148_s6 + $0x40] sm:$0xff] %v1349_v17  ;;  %1414 = vst [vmem:[%s3148_s6 + $0x48] sm:$0xff] %v1350_v36  ;;  %v1305_v30 = vmul.f32 %v2744_v52, %v1229_v25  ;;  %v1306_v23 = vmul.f32 %v2747_v31, %v1230_v11  ;;  %1691 = vrsqrt.f32 %v1147_v34  ;;  %v1101_v45 = vmul.f32 0.00390625, %v1023_v28 }
 0x269   :  { %v1686_v24 = vpop.eup %1685  ;;  %v1379_v53 = vadd.f32 %v2750_v49, %v1303_v37  ;;  %v1380_v16 = vadd.f32 %v2753_v29, %v1304_v57  ;;  %1693 = vrsqrt.f32 %v1132_v63  ;;  %v1116_v38 = vmul.f32 0.00390625, %v1068_v6  ;;  %v1026_v43 = vpop.xlane.xlu1 %1025 }
 0x26a   :  { %v1029_v61 = vpop.xlane.xlu0 %1028  ;;  %v1381_v1 = vadd.f32 %v2750_v49, %v1305_v30  ;;  %v1382_v20 = vadd.f32 %v2753_v29, %v1306_v23  ;;  %v1199_v5 = vmul.f32 %v1686_v24, %v2504_v13  ;;  %v1200_v56 = vmul.f32 %v1686_v24, %v2507_v15 }
 0x26b   :  { %1443 = vst [vmem:[%s3148_s6 + $0x130] sm:$0xff] %v1379_v53  ;;  %1444 = vst [vmem:[%s3148_s6 + $0x138] sm:$0xff] %v1380_v16  ;;  %v1133_v28 = vadd.f32 1e-12, %v1101_v45  ;;  %v1148_v4 = vadd.f32 1e-12, %v1116_v38 }
 0x26c   :  { %v1117_v47 = vmul.f32 0.00390625, %v1071_v27  ;;  %v1102_v39 = vmul.f32 0.00390625, %v1026_v43  ;;  %1445 = vst [vmem:[%s3148_s6 + $0x140] sm:$0xff] %v1381_v1  ;;  %1446 = vst [vmem:[%s3148_s6 + $0x148] sm:$0xff] %v1382_v20  ;;  %v1275_v13 = vmul.f32 %v2744_v52, %v1199_v5  ;;  %v1276_v15 = vmul.f32 %v2747_v31, %v1200_v56 }
 0x26d   :  { %v1103_v18 = vmul.f32 0.00390625, %v1029_v61  ;;  %v1688_v8 = vpop.eup %1687  ;;  %1695 = vrsqrt.f32 %v1133_v28  ;;  %v1074_v7 = vpop.xlane.xlu1 %1073 }
 0x26e   :  { %v1149_v12 = vadd.f32 1e-12, %v1117_v47  ;;  %v1134_v34 = vadd.f32 1e-12, %v1102_v39  ;;  %v1077_v10 = vpop.xlane.xlu0 %1076  ;;  %v1351_v32 = vadd.f32 %v2750_v49, %v1275_v13  ;;  %v1352_v22 = vadd.f32 %v2753_v29, %v1276_v15 }
 0x26f   :  { %v1201_v21 = vmul.f32 %v1688_v8, %v2529_v14  ;;  %v1202_v19 = vmul.f32 %v1688_v8, %v2532_v40  ;;  %1697 = vrsqrt.f32 %v1148_v4  ;;  %v1135_v6 = vadd.f32 1e-12, %v1103_v18 }
 0x270   :  { %v1118_v27 = vmul.f32 0.00390625, %v1074_v7  ;;  %v1119_v17 = vmul.f32 0.00390625, %v1077_v10  ;;  %1415 = vst [vmem:[%s3148_s6 + $0x50] sm:$0xff] %v1351_v32  ;;  %1416 = vst [vmem:[%s3148_s6 + $0x58] sm:$0xff] %v1352_v22  ;;  %1699 = vrsqrt.f32 %v1149_v12 }
 0x271   :  { %v1277_v36 = vmul.f32 %v2744_v52, %v1201_v21  ;;  %v1278_v25 = vmul.f32 %v2747_v31, %v1202_v19  ;;  %v1690_v14 = vpop.eup %1689  ;;  %1701 = vrsqrt.f32 %v1134_v34  ;;  %v1032_v37 = vpop.xlane.xlu1 %1031 }
 0x272   :  { %v1150_v40 = vadd.f32 1e-12, %v1118_v27  ;;  %v1151_v11 = vadd.f32 1e-12, %v1119_v17  ;;  %v1035_v57 = vpop.xlane.xlu0 %1034  ;;  %v1692_v63 = vpop.eup %1691  ;;  %v1231_v45 = vmul.f32 %v1690_v14, %v2526_v26  ;;  %v1232_v24 = vmul.f32 %v1690_v14, %v2537_v2  ;;  %v3252_v17 = vld [vmem:[#allocation23_spill] sm:$0xff]  ;;  %v3253_v14 = vld [vmem:[#allocation25_spill] sm:$0xff] }
 0x273   :  { %v1353_v30 = vadd.f32 %v2750_v49, %v1277_v36  ;;  %v1354_v23 = vadd.f32 %v2753_v29, %v1278_v25  ;;  %v1694_v53 = vpop.eup %1693  ;;  %v1233_v16 = vmul.f32 %v1692_v63, %v2544_v41  ;;  %v1234_v38 = vmul.f32 %v1692_v63, %v2547_v60 }
 0x274   :  { %1703 = vrsqrt.f32 %v1135_v6  ;;  %v1104_v43 = vmul.f32 0.00390625, %v1032_v37  ;;  %v1307_v61 = vmul.f32 %v2744_v52, %v1231_v45  ;;  %v1308_v26 = vmul.f32 %v2747_v31, %v1232_v24  ;;  %v3251_v6 = vld [vmem:[#allocation22_spill] sm:$0xff] }
 0x275   :  { %1417 = vst [vmem:[%s3148_s6 + $0x60] sm:$0xff] %v1353_v30  ;;  %1418 = vst [vmem:[%s3148_s6 + $0x68] sm:$0xff] %v1354_v23  ;;  %v1203_v2 = vmul.f32 %v1694_v53, %v2552_v54  ;;  %v1204_v41 = vmul.f32 %v1694_v53, %v2555_v44  ;;  %v1309_v60 = vmul.f32 %v2744_v52, %v1233_v16  ;;  %1705 = vrsqrt.f32 %v1150_v40  ;;  %v1080_v5 = vpop.xlane.xlu1 %1079 }
 0x276   :  { %v1310_v1 = vmul.f32 %v2747_v31, %v1234_v38  ;;  %v1136_v20 = vadd.f32 1e-12, %v1104_v43  ;;  %v1383_v56 = vadd.f32 %v2750_v49, %v1307_v61  ;;  %v1384_v28 = vadd.f32 %v2753_v29, %v1308_v26  ;;  %v1083_v39 = vpop.xlane.xlu0 %1082  ;;  %v3255_v38 = vld [vmem:[#allocation24_spill] sm:$0xff] }
 0x277   :  { %v1279_v4 = vmul.f32 %v2744_v52, %v1203_v2  ;;  %v1280_v47 = vmul.f32 %v2747_v31, %v1204_v41  ;;  %v1696_v13 = vpop.eup %1695  ;;  %v1385_v54 = vadd.f32 %v2750_v49, %v1309_v60  ;;  %1707 = vrsqrt.f32 %v1151_v11  ;;  %v3254_v11 = vld [vmem:[#allocation26_spill] sm:$0xff]  ;;  %v3256_v61 = vld [vmem:[#allocation4_spill] sm:$0xff] }
 0x278   :  { %v1386_v44 = vadd.f32 %v2753_v29, %v1310_v1  ;;  %v1105_v15 = vmul.f32 0.00390625, %v1035_v57  ;;  %1447 = vst [vmem:[%s3148_s6 + $0x150] sm:$0xff] %v1383_v56  ;;  %1448 = vst [vmem:[%s3148_s6 + $0x158] sm:$0xff] %v1384_v28  ;;  %v1205_v12 = vmul.f32 %v1696_v13, %v2570_v55  ;;  %v1206_v34 = vmul.f32 %v1696_v13, %v2573_v33  ;;  %v3257_v1 = vld [vmem:[#allocation7_spill] sm:$0xff] }
 0x279   :  { %v1355_v18 = vadd.f32 %v2750_v49, %v1279_v4  ;;  %v1356_v8 = vadd.f32 %v2753_v29, %v1280_v47  ;;  %v1698_v7 = vpop.eup %1697  ;;  %1449 = vst [vmem:[%s3148_s6 + $0x160] sm:$0xff] %v1385_v54  ;;  %1709 = vrsqrt.f32 %v1136_v20  ;;  %v1120_v32 = vmul.f32 0.00390625, %v1080_v5  ;;  %v1038_v21 = vpop.xlane.xlu1 %1037  ;;  %v3258_v5 = vld [vmem:[#allocation9_spill] sm:$0xff] }
 0x27a   :  { %1450 = vst [vmem:[%s3148_s6 + $0x168] sm:$0xff] %v1386_v44  ;;  %v1137_v10 = vadd.f32 1e-12, %v1105_v15  ;;  %v1121_v22 = vmul.f32 0.00390625, %v1083_v39  ;;  %v1700_v19 = vpop.eup %1699  ;;  %v1281_v55 = vmul.f32 %v2744_v52, %v1205_v12  ;;  %v1282_v33 = vmul.f32 %v2747_v31, %v1206_v34  ;;  %v3259_v15 = vld [vmem:[#allocation5_spill] sm:$0xff]  ;;  %v1041_v34 = vpop.xlane.xlu0 %1040 }
 0x27b   :  { %1419 = vst [vmem:[%s3148_s6 + $0x70] sm:$0xff] %v1355_v18  ;;  %1420 = vst [vmem:[%s3148_s6 + $0x78] sm:$0xff] %v1356_v8  ;;  %v1235_v27 = vmul.f32 %v1698_v7, %v3251_v6  ;;  %v1236_v36 = vmul.f32 %v1698_v7, %v3252_v17  ;;  %v1702_v25 = vpop.eup %1701  ;;  %v1237_v40 = vmul.f32 %v1700_v19, %v3253_v14  ;;  %v1152_v57 = vadd.f32 1e-12, %v1120_v32  ;;  %v3260_v8 = vld [vmem:[#allocation6_spill] sm:$0xff] }
 0x27c   :  { %v1238_v37 = vmul.f32 %v1700_v19, %v3254_v11  ;;  %1711 = vrsqrt.f32 %v1137_v10  ;;  %v1357_v63 = vadd.f32 %v2750_v49, %v1281_v55  ;;  %v1358_v30 = vadd.f32 %v2753_v29, %v1282_v33  ;;  %v3262_v14 = vld [vmem:[#allocation10_spill] sm:$0xff] }
 0x27d   :  { %v1311_v23 = vmul.f32 %v2744_v52, %v1235_v27  ;;  %v1312_v45 = vmul.f32 %v2747_v31, %v1236_v36  ;;  %v1313_v53 = vmul.f32 %v2744_v52, %v1237_v40  ;;  %v1207_v43 = vmul.f32 %v1702_v25, %v3255_v38  ;;  %v2951_v2 = vpop.xlane.xlu1 %1085 }
 0x27e   :  { %v1704_v24 = vpop.eup %1703  ;;  %v1314_v16 = vmul.f32 %v2747_v31, %v1238_v37  ;;  %v1208_v26 = vmul.f32 %v1702_v25, %v3256_v61  ;;  %1421 = vst [vmem:[%s3148_s6 + $0x80] sm:$0xff] %v1357_v63  ;;  %1422 = vst [vmem:[%s3148_s6 + $0x88] sm:$0xff] %v1358_v30  ;;  %1713 = vrsqrt.f32 %v1152_v57  ;;  %v1153_v19 = vadd.f32 1e-12, %v1121_v22  ;;  %v3261_v25 = vld [vmem:[#allocation8_spill] sm:$0xff]  ;;  %v3263_v63 = vld [vmem:[#allocation11_spill] sm:$0xff] }
 0x27f   :  { %v1387_v41 = vadd.f32 %v2750_v49, %v1311_v23  ;;  %v1388_v60 = vadd.f32 %v2753_v29, %v1312_v45  ;;  %v1209_v20 = vmul.f32 %v1704_v24, %v3257_v1  ;;  %v1210_v56 = vmul.f32 %v1704_v24, %v3258_v5  ;;  %v1706_v28 = vpop.eup %1705  ;;  %v3264_v23 = vld [vmem:[#allocation12_spill] sm:$0xff] }
 0x280   :  { %v1389_v4 = vadd.f32 %v2750_v49, %v1313_v53  ;;  %v1390_v47 = vadd.f32 %v2753_v29, %v1314_v16  ;;  %v1283_v39 = vmul.f32 %v2744_v52, %v1207_v43  ;;  %v1284_v13 = vmul.f32 %v2747_v31, %v1208_v26  ;;  %v3265_v26 = vld [vmem:[#allocation13_spill] sm:$0xff] }
 0x281   :  { %1451 = vst [vmem:[%s3148_s6 + $0x170] sm:$0xff] %v1387_v41  ;;  %1452 = vst [vmem:[%s3148_s6 + $0x178] sm:$0xff] %v1388_v60  ;;  %v1285_v54 = vmul.f32 %v2744_v52, %v1209_v20  ;;  %v1286_v44 = vmul.f32 %v2747_v31, %v1210_v56  ;;  %v1239_v18 = vmul.f32 %v1706_v28, %v3259_v15  ;;  %v1708_v7 = vpop.eup %1707  ;;  %v1044_v17 = vpop.xlane.xlu1 %1043  ;;  %1715 = vrsqrt.f32 %v1153_v19  ;;  %v3266_v60 = vld [vmem:[#allocation15_spill] sm:$0xff] }
 0x282   :  { %v1240_v12 = vmul.f32 %v1706_v28, %v3260_v8  ;;  %1453 = vst [vmem:[%s3148_s6 + $0x180] sm:$0xff] %v1389_v4  ;;  %1454 = vst [vmem:[%s3148_s6 + $0x188] sm:$0xff] %v1390_v47  ;;  %v1359_v10 = vadd.f32 %v2750_v49, %v1283_v39  ;;  %v1360_v32 = vadd.f32 %v2753_v29, %v1284_v13  ;;  %v1106_v11 = vmul.f32 0.00390625, %v1038_v21  ;;  %v1089_v20 = vpop.xlane.xlu0 %1088 }
 0x283   :  { %v1361_v55 = vadd.f32 %v2750_v49, %v1285_v54  ;;  %v1362_v33 = vadd.f32 %v2753_v29, %v1286_v44  ;;  %v1315_v6 = vmul.f32 %v2744_v52, %v1239_v18  ;;  %v1710_v36 = vpop.eup %1709  ;;  %v1241_v22 = vmul.f32 %v1708_v7, %v3261_v25 }
 0x284   :  { %v1316_v27 = vmul.f32 %v2747_v31, %v1240_v12  ;;  %1423 = vst [vmem:[%s3148_s6 + $0x90] sm:$0xff] %v1359_v10  ;;  %1424 = vst [vmem:[%s3148_s6 + $0x98] sm:$0xff] %v1360_v32  ;;  %v1242_v40 = vmul.f32 %v1708_v7, %v3262_v14  ;;  %v1211_v30 = vmul.f32 %v1710_v36, %v3263_v63  ;;  %v1138_v16 = vadd.f32 1e-12, %v1106_v11 }
 0x285   :  { %1425 = vst [vmem:[%s3148_s6 + $0xa0] sm:$0xff] %v1361_v55  ;;  %1426 = vst [vmem:[%s3148_s6 + $0xa8] sm:$0xff] %v1362_v33  ;;  %v1391_v37 = vadd.f32 %v2750_v49, %v1315_v6  ;;  %v1212_v45 = vmul.f32 %v1710_v36, %v3264_v23  ;;  %v1317_v53 = vmul.f32 %v2744_v52, %v1241_v22  ;;  %v1107_v38 = vmul.f32 0.00390625, %v1041_v34  ;;  %v1092_v54 = vpop.xlane.xlu1 %1091  ;;  %v3267_v36 = vld [vmem:[#allocation17_spill] sm:$0xff] }
 0x286   :  { %v1392_v57 = vadd.f32 %v2753_v29, %v1316_v27  ;;  %v1712_v24 = vpop.eup %1711  ;;  %v1318_v21 = vmul.f32 %v2747_v31, %v1242_v40  ;;  %v1287_v43 = vmul.f32 %v2744_v52, %v1211_v30  ;;  %1717 = vrsqrt.f32 %v1138_v16 }
 0x287   :  { %1455 = vst [vmem:[%s3148_s6 + $0x190] sm:$0xff] %v1391_v37  ;;  %v1288_v61 = vmul.f32 %v2747_v31, %v1212_v45  ;;  %v1213_v41 = vmul.f32 %v1712_v24, %v3265_v26  ;;  %v1214_v1 = vmul.f32 %v1712_v24, %v3266_v60  ;;  %v1393_v5 = vadd.f32 %v2750_v49, %v1317_v53 }
 0x288   :  { %1456 = vst [vmem:[%s3148_s6 + $0x198] sm:$0xff] %v1392_v57  ;;  %v1394_v56 = vadd.f32 %v2753_v29, %v1318_v21  ;;  %v1139_v28 = vadd.f32 1e-12, %v1107_v38  ;;  %v1363_v4 = vadd.f32 %v2750_v49, %v1287_v43  ;;  %v1122_v44 = vmul.f32 0.00390625, %v2951_v2  ;;  %v1714_v34 = vpop.eup %1713 }
 0x289   :  { %v1364_v47 = vadd.f32 %v2753_v29, %v1288_v61  ;;  %v1289_v39 = vmul.f32 %v2744_v52, %v1213_v41  ;;  %v1290_v13 = vmul.f32 %v2747_v31, %v1214_v1  ;;  %1457 = vst [vmem:[%s3148_s6 + $0x1a0] sm:$0xff] %v1393_v5  ;;  %v1123_v15 = vmul.f32 0.00390625, %v1089_v20 }
 0x28a   :  { %1458 = vst [vmem:[%s3148_s6 + $0x1a8] sm:$0xff] %v1394_v56  ;;  %1719 = vrsqrt.f32 %v1139_v28  ;;  %v1108_v18 = vmul.f32 0.00390625, %v1044_v17  ;;  %1427 = vst [vmem:[%s3148_s6 + $0xb0] sm:$0xff] %v1363_v4  ;;  %v1154_v7 = vadd.f32 1e-12, %v1122_v44  ;;  %v1124_v32 = vmul.f32 0.00390625, %v1092_v54 }
 0x28b   :  { %1428 = vst [vmem:[%s3148_s6 + $0xb8] sm:$0xff] %v1364_v47  ;;  %v1365_v8 = vadd.f32 %v2750_v49, %v1289_v39  ;;  %v1366_v12 = vadd.f32 %v2753_v29, %v1290_v13  ;;  %v1155_v10 = vadd.f32 1e-12, %v1123_v15  ;;  %v1243_v2 = vmul.f32 %v1714_v34, %v2646_v58  ;;  %v1716_v55 = vpop.eup %1715  ;;  %v3268_v39 = vld [vmem:[#allocation14_spill] sm:$0xff]  ;;  %v3269_v54 = vld [vmem:[#allocation16_spill] sm:$0xff] }
 0x28c   :  { %v1244_v19 = vmul.f32 %v1714_v34, %v2657_v35  ;;  %1721 = vrsqrt.f32 %v1154_v7  ;;  %v1140_v33 = vadd.f32 1e-12, %v1108_v18  ;;  %v1245_v17 = vmul.f32 %v1716_v55, %v2664_v0  ;;  %v3270_v15 = vld [vmem:[#allocation18_spill] sm:$0xff] }
 0x28d   :  { %1429 = vst [vmem:[%s3148_s6 + $0xc0] sm:$0xff] %v1365_v8  ;;  %1430 = vst [vmem:[%s3148_s6 + $0xc8] sm:$0xff] %v1366_v12  ;;  %v1319_v6 = vmul.f32 %v2744_v52, %v1243_v2  ;;  %v1246_v25 = vmul.f32 %v1716_v55, %v3267_v36  ;;  %1723 = vrsqrt.f32 %v1155_v10  ;;  %v1156_v22 = vadd.f32 1e-12, %v1124_v32 }
 0x28e   :  { %v1320_v27 = vmul.f32 %v2747_v31, %v1244_v19  ;;  %v1321_v58 = vmul.f32 %v2744_v52, %v1245_v17  ;;  %1725 = vrsqrt.f32 %v1140_v33 }
 0x28f   :  { %v1395_v14 = vadd.f32 %v2750_v49, %v1319_v6  ;;  %v1322_v35 = vmul.f32 %v2747_v31, %v1246_v25  ;;  %1727 = vrsqrt.f32 %v1156_v22 }
 0x290   :  { %v1396_v40 = vadd.f32 %v2753_v29, %v1320_v27  ;;  %v1718_v11 = vpop.eup %1717  ;;  %v1397_v0 = vadd.f32 %v2750_v49, %v1321_v58 }
 0x291   :  { %1459 = vst [vmem:[%s3148_s6 + $0x1b0] sm:$0xff] %v1395_v14  ;;  %v1398_v37 = vadd.f32 %v2753_v29, %v1322_v35  ;;  %v1215_v57 = vmul.f32 %v1718_v11, %v2672_v62  ;;  %v1216_v63 = vmul.f32 %v1718_v11, %v2675_v42 }
 0x292   :  { %1460 = vst [vmem:[%s3148_s6 + $0x1b8] sm:$0xff] %v1396_v40  ;;  %1461 = vst [vmem:[%s3148_s6 + $0x1c0] sm:$0xff] %v1397_v0 }
 0x293   :  { %1462 = vst [vmem:[%s3148_s6 + $0x1c8] sm:$0xff] %v1398_v37  ;;  %v1291_v23 = vmul.f32 %v2744_v52, %v1215_v57  ;;  %v1292_v45 = vmul.f32 %v2747_v31, %v1216_v63 }
 0x294   :  { %v1720_v30 = vpop.eup %1719 }
 0x295   :  { %v1217_v24 = vmul.f32 %v1720_v30, %v2690_v3  ;;  %v1218_v62 = vmul.f32 %v1720_v30, %v2693_v48  ;;  %v1367_v42 = vadd.f32 %v2750_v49, %v1291_v23  ;;  %v1368_v53 = vadd.f32 %v2753_v29, %v1292_v45 }
 0x296   :  { %v1722_v38 = vpop.eup %1721 }
 0x297   :  { %v1293_v21 = vmul.f32 %v2744_v52, %v1217_v24  ;;  %v1294_v16 = vmul.f32 %v2747_v31, %v1218_v62  ;;  %1431 = vst [vmem:[%s3148_s6 + $0xd0] sm:$0xff] %v1367_v42  ;;  %1432 = vst [vmem:[%s3148_s6 + $0xd8] sm:$0xff] %v1368_v53  ;;  %v1247_v43 = vmul.f32 %v1722_v38, %v2684_v50  ;;  %v1724_v26 = vpop.eup %1723 }
 0x298   :  { %v1248_v61 = vmul.f32 %v1722_v38, %v2687_v46  ;;  %v1249_v1 = vmul.f32 %v1724_v26, %v2704_v9  ;;  %v1250_v20 = vmul.f32 %v1724_v26, %v2707_v51  ;;  %v1726_v50 = vpop.eup %1725 }
 0x299   :  { %v1369_v3 = vadd.f32 %v2750_v49, %v1293_v21  ;;  %v1370_v48 = vadd.f32 %v2753_v29, %v1294_v16  ;;  %v1323_v41 = vmul.f32 %v2744_v52, %v1247_v43  ;;  %v1728_v4 = vpop.eup %1727  ;;  %v1219_v47 = vmul.f32 %v1726_v50, %v2714_v59 }
 0x29a   :  { %v1324_v60 = vmul.f32 %v2747_v31, %v1248_v61  ;;  %v1325_v56 = vmul.f32 %v2744_v52, %v1249_v1  ;;  %v1326_v28 = vmul.f32 %v2747_v31, %v1250_v20  ;;  %v1220_v13 = vmul.f32 %v1726_v50, %v3268_v39 }
 0x29b   :  { %1433 = vst [vmem:[%s3148_s6 + $0xe0] sm:$0xff] %v1369_v3  ;;  %1434 = vst [vmem:[%s3148_s6 + $0xe8] sm:$0xff] %v1370_v48  ;;  %v1399_v46 = vadd.f32 %v2750_v49, %v1323_v41  ;;  %v1251_v44 = vmul.f32 %v1728_v4, %v3269_v54  ;;  %v1252_v18 = vmul.f32 %v1728_v4, %v3270_v15 }
 0x29c   :  { %v1400_v5 = vadd.f32 %v2753_v29, %v1324_v60  ;;  %v1401_v9 = vadd.f32 %v2750_v49, %v1325_v56  ;;  %v1402_v51 = vadd.f32 %v2753_v29, %v1326_v28  ;;  %v1295_v59 = vmul.f32 %v2744_v52, %v1219_v47 }
 0x29d   :  { %1463 = vst [vmem:[%s3148_s6 + $0x1d0] sm:$0xff] %v1399_v46  ;;  %v1296_v8 = vmul.f32 %v2747_v31, %v1220_v13  ;;  %v1327_v12 = vmul.f32 %v2744_v52, %v1251_v44  ;;  %v1328_v34 = vmul.f32 %v2747_v31, %v1252_v18 }
 0x29e   :  { %1464 = vst [vmem:[%s3148_s6 + $0x1d8] sm:$0xff] %v1400_v5  ;;  %1465 = vst [vmem:[%s3148_s6 + $0x1e0] sm:$0xff] %v1401_v9  ;;  %v1371_v7 = vadd.f32 %v2750_v49, %v1295_v59 }
 0x29f   :  { %1466 = vst [vmem:[%s3148_s6 + $0x1e8] sm:$0xff] %v1402_v51  ;;  %v1372_v10 = vadd.f32 %v2753_v29, %v1296_v8  ;;  %v1403_v32 = vadd.f32 %v2750_v49, %v1327_v12  ;;  %v1404_v2 = vadd.f32 %v2753_v29, %v1328_v34 }
 0x2a0   :  { %1435 = vst [vmem:[%s3148_s6 + $0xf0] sm:$0xff] %v1371_v7 }
 0x2a1   :  { %1436 = vst [vmem:[%s3148_s6 + $0xf8] sm:$0xff] %v1372_v10  ;;  %1467 = vst [vmem:[%s3148_s6 + $0x1f0] sm:$0xff] %v1403_v32 }
 0x2a2   :  { %1468 = vst [vmem:[%s3148_s6 + $0x1f8] sm:$0xff] %v1404_v2 }

// kernel: verb_model_bert_forward.13
= control target key start
LH: loop header
LB: loop body
LE: loop exit
PB: predicated region body
PF: predicated region fallthrough
CT: control target
= control target key end

     0   :  { %s6898_s1 = inlined_call_operand.vmem [shape: bf16[256,512], index: 1, kind: input, shape index: {}]   ;;  %s6899_s0 = inlined_call_operand.vmem [shape: f32[256,256], index: 0, kind: input, shape index: {}]   ;;  %s6900_s3 = inlined_call_operand.vmem [shape: bf16[512,256], index: 3, kind: input, shape index: {}]   ;;  %s6901_s2 = inlined_call_operand.vmem [shape: f32[1,512], index: 2, kind: input, shape index: {}]   ;;  %s6902_s4 = inlined_call_operand.vmem [shape: f32[1,256], index: 4, kind: input, shape index: {}]   ;;  %s6903_s5 = inlined_call_operand.vmem [shape: f32[1,256], index: 5, kind: input, shape index: {}]   ;;  %s6904_s6 = inlined_call_operand.vmem [shape: f32[1,256], index: 6, kind: input, shape index: {}]   ;;  %s6905_s7 = inlined_call_operand.vmem [shape: f32[256,256], index: 7, kind: output, shape index: {}]  }
   0x1   :  { %v3844_v0 = vld [vmem:[%s6898_s1 + $0x4] ss:$16 sps:$4 sm:$0xff]   ;;  %v3846_v1 = vld [vmem:[%s6898_s1] ss:$16 sps:$4 sm:$0xff]   ;;  %v95_v13 = vld [vmem:[%s6899_s0 + $0x8] sm:$0xff] }
   0x2   :  { %596 = vmatprep.subr.bf16.mxu1 %v3844_v0  ;;  %v3847_v2 = vld [vmem:[%s6898_s1 + $0x24] ss:$16 sps:$4 sm:$0xff]   ;;  %v3849_v3 = vld [vmem:[%s6898_s1 + $0x20] ss:$16 sps:$4 sm:$0xff]   ;;  %v97_v14 = vld [vmem:[%s6899_s0 + $0x18] sm:$0xff] }
   0x3   :  { %597 = vmatpush1.bf16.msra.mxu1 %v3846_v1  ;;  %v3850_v4 = vld [vmem:[%s6898_s1 + $0x44] ss:$16 sps:$4 sm:$0xff]   ;;  %v3852_v5 = vld [vmem:[%s6898_s1 + $0x40] ss:$16 sps:$4 sm:$0xff]   ;;  %v4442_v15 = vpack.c.bf16 %v97_v14, %v95_v13  ;;  %v3894_v37 = vld [vmem:[%s6898_s1 + $0xc] ss:$16 sps:$4 sm:$0xff]  }
   0x4   :  { %598 = vmatprep.subr.bf16.mxu1 %v3847_v2  ;;  %v3853_v6 = vld [vmem:[%s6898_s1 + $0x64] ss:$16 sps:$4 sm:$0xff]   ;;  %v3855_v7 = vld [vmem:[%s6898_s1 + $0x60] ss:$16 sps:$4 sm:$0xff]   ;;  %v99_v38 = vld [vmem:[%s6899_s0 + $0x28] sm:$0xff] }
   0x5   :  { %v3856_v8 = vld [vmem:[%s6898_s1 + $0x84] ss:$16 sps:$4 sm:$0xff]   ;;  %v3858_v9 = vld [vmem:[%s6898_s1 + $0x80] ss:$16 sps:$4 sm:$0xff]   ;;  %628 = vmatprep.mubr.bf16.mxu1 %v4442_v15  ;;  %v101_v39 = vld [vmem:[%s6899_s0 + $0x38] sm:$0xff] }
   0x6   :  { %v3859_v10 = vld [vmem:[%s6898_s1 + $0xa4] ss:$16 sps:$4 sm:$0xff]   ;;  %v3861_v11 = vld [vmem:[%s6898_s1 + $0xa0] ss:$16 sps:$4 sm:$0xff]   ;;  %v3892_v41 = vld [vmem:[%s6898_s1 + $0x8] ss:$16 sps:$4 sm:$0xff]   ;;  %v4522_v42 = vpack.c.bf16 %v101_v39, %v99_v38 }
   0x7   :  { %599 = vmatpush1.bf16.msra.mxu1 %v3849_v3  ;;  %v3862_v12 = vld [vmem:[%s6898_s1 + $0xc4] ss:$16 sps:$4 sm:$0xff]   ;;  %v3864_v16 = vld [vmem:[%s6898_s1 + $0xc0] ss:$16 sps:$4 sm:$0xff]   ;;  %v3897_v43 = vld [vmem:[%s6898_s1 + $0x2c] ss:$16 sps:$4 sm:$0xff]  }
   0x8   :  { %600 = vmatprep.subr.bf16.mxu1 %v3850_v4  ;;  %v3865_v17 = vld [vmem:[%s6898_s1 + $0xe4] ss:$16 sps:$4 sm:$0xff]   ;;  %v3867_v18 = vld [vmem:[%s6898_s1 + $0xe0] ss:$16 sps:$4 sm:$0xff]   ;;  %v3895_v46 = vld [vmem:[%s6898_s1 + $0x28] ss:$16 sps:$4 sm:$0xff]  }
   0x9   :  { %v3868_v19 = vld [vmem:[%s6898_s1 + $0x104] ss:$16 sps:$4 sm:$0xff]   ;;  %v3870_v20 = vld [vmem:[%s6898_s1 + $0x100] ss:$16 sps:$4 sm:$0xff]   ;;  %v103_v47 = vld [vmem:[%s6899_s0 + $0x48] sm:$0xff] }
   0xa   :  { %v3871_v21 = vld [vmem:[%s6898_s1 + $0x124] ss:$16 sps:$4 sm:$0xff]   ;;  %v3873_v22 = vld [vmem:[%s6898_s1 + $0x120] ss:$16 sps:$4 sm:$0xff]   ;;  %v105_v48 = vld [vmem:[%s6899_s0 + $0x58] sm:$0xff] }
   0xb   :  { %601 = vmatpush1.bf16.msra.mxu1 %v3852_v5  ;;  %v3874_v23 = vld [vmem:[%s6898_s1 + $0x144] ss:$16 sps:$4 sm:$0xff]   ;;  %v3876_v24 = vld [vmem:[%s6898_s1 + $0x140] ss:$16 sps:$4 sm:$0xff]   ;;  %v3900_v49 = vld [vmem:[%s6898_s1 + $0x4c] ss:$16 sps:$4 sm:$0xff]   ;;  %v4549_v51 = vpack.c.bf16 %v105_v48, %v103_v47 }
   0xc   :  { %602 = vmatprep.subr.bf16.mxu1 %v3853_v6  ;;  %v3877_v25 = vld [vmem:[%s6898_s1 + $0x164] ss:$16 sps:$4 sm:$0xff]   ;;  %v3879_v26 = vld [vmem:[%s6898_s1 + $0x160] ss:$16 sps:$4 sm:$0xff]   ;;  %v3898_v52 = vld [vmem:[%s6898_s1 + $0x48] ss:$16 sps:$4 sm:$0xff]  }
   0xd   :  { %v3880_v27 = vld [vmem:[%s6898_s1 + $0x184] ss:$16 sps:$4 sm:$0xff]   ;;  %v3882_v28 = vld [vmem:[%s6898_s1 + $0x180] ss:$16 sps:$4 sm:$0xff]   ;;  %v3903_v53 = vld [vmem:[%s6898_s1 + $0x6c] ss:$16 sps:$4 sm:$0xff]  }
   0xe   :  { %v3883_v29 = vld [vmem:[%s6898_s1 + $0x1a4] ss:$16 sps:$4 sm:$0xff]   ;;  %v3885_v30 = vld [vmem:[%s6898_s1 + $0x1a0] ss:$16 sps:$4 sm:$0xff]   ;;  %v3901_v56 = vld [vmem:[%s6898_s1 + $0x68] ss:$16 sps:$4 sm:$0xff]  }
   0xf   :  { %603 = vmatpush1.bf16.msra.mxu1 %v3855_v7  ;;  %v3886_v31 = vld [vmem:[%s6898_s1 + $0x1c4] ss:$16 sps:$4 sm:$0xff]   ;;  %v3888_v32 = vld [vmem:[%s6898_s1 + $0x1c0] ss:$16 sps:$4 sm:$0xff]   ;;  %v107_v57 = vld [vmem:[%s6899_s0 + $0x68] sm:$0xff] }
  0x10   :  { %604 = vmatprep.subr.bf16.mxu1 %v3856_v8  ;;  %v3889_v33 = vld [vmem:[%s6898_s1 + $0x1e4] ss:$16 sps:$4 sm:$0xff]   ;;  %v3891_v34 = vld [vmem:[%s6898_s1 + $0x1e0] ss:$16 sps:$4 sm:$0xff]   ;;  %v109_v58 = vld [vmem:[%s6899_s0 + $0x78] sm:$0xff] }
  0x11   :  { %v94_v35 = vld [vmem:[%s6899_s0] sm:$0xff]  ;;  %v96_v36 = vld [vmem:[%s6899_s0 + $0x10] sm:$0xff]  ;;  %v3906_v59 = vld [vmem:[%s6898_s1 + $0x8c] ss:$16 sps:$4 sm:$0xff]   ;;  %v4579_v61 = vpack.c.bf16 %v109_v58, %v107_v57 }
  0x12   :  { %v4517_v40 = vpack.c.bf16 %v96_v36, %v94_v35  ;;  %v98_v44 = vld [vmem:[%s6899_s0 + $0x20] sm:$0xff]  ;;  %v100_v45 = vld [vmem:[%s6899_s0 + $0x30] sm:$0xff]  ;;  %v3904_v62 = vld [vmem:[%s6898_s1 + $0x88] ss:$16 sps:$4 sm:$0xff]  }
  0x13   :  { %605 = vmatpush1.bf16.msra.mxu1 %v3858_v9  ;;  %v4547_v50 = vpack.c.bf16 %v100_v45, %v98_v44  ;;  %v102_v54 = vld [vmem:[%s6899_s0 + $0x40] sm:$0xff]  ;;  %v104_v55 = vld [vmem:[%s6899_s0 + $0x50] sm:$0xff]  ;;  %v3909_v63 = vld [vmem:[%s6898_s1 + $0xac] ss:$16 sps:$4 sm:$0xff]  }
  0x14   :  { %606 = vmatprep.subr.bf16.mxu1 %v3859_v10  ;;  %v4577_v60 = vpack.c.bf16 %v104_v55, %v102_v54  ;;  %v106_v0 = vld [vmem:[%s6899_s0 + $0x60] sm:$0xff]  ;;  %v108_v1 = vld [vmem:[%s6899_s0 + $0x70] sm:$0xff]  ;;  %v3907_v2 = vld [vmem:[%s6898_s1 + $0xa8] ss:$16 sps:$4 sm:$0xff]  }
  0x15   :  { %v111_v3 = vld [vmem:[%s6899_s0 + $0x88] sm:$0xff]  ;;  %v113_v4 = vld [vmem:[%s6899_s0 + $0x98] sm:$0xff]  ;;  %v4607_v6 = vpack.c.bf16 %v108_v1, %v106_v0  ;;  %v110_v10 = vld [vmem:[%s6899_s0 + $0x80] sm:$0xff] }
  0x16   :  { %v3912_v5 = vld [vmem:[%s6898_s1 + $0xcc] ss:$16 sps:$4 sm:$0xff]   ;;  %v4609_v7 = vpack.c.bf16 %v113_v4, %v111_v3  ;;  %v3910_v8 = vld [vmem:[%s6898_s1 + $0xc8] ss:$16 sps:$4 sm:$0xff]   ;;  %v122_v45 = vld [vmem:[%s6899_s0 + $0xe0] sm:$0xff] }
  0x17   :  { %607 = vmatpush1.bf16.msra.mxu1 %v3861_v11  ;;  %v3915_v9 = vld [vmem:[%s6898_s1 + $0xec] ss:$16 sps:$4 sm:$0xff]   ;;  %v112_v11 = vld [vmem:[%s6899_s0 + $0x90] sm:$0xff]  ;;  %v3925_v35 = vld [vmem:[%s6898_s1 + $0x168] ss:$16 sps:$4 sm:$0xff]  }
  0x18   :  { %608 = vmatprep.subr.bf16.mxu1 %v3862_v12  ;;  %v3913_v12 = vld [vmem:[%s6898_s1 + $0xe8] ss:$16 sps:$4 sm:$0xff]   ;;  %v3930_v36 = vld [vmem:[%s6898_s1 + $0x18c] ss:$16 sps:$4 sm:$0xff]   ;;  %v128_v0 = vld [vmem:[%s6899_s0 + $0x110] sm:$0xff] }
  0x19   :  { %v115_v13 = vld [vmem:[%s6899_s0 + $0xa8] sm:$0xff]  ;;  %v117_v14 = vld [vmem:[%s6899_s0 + $0xb8] sm:$0xff] }
  0x1a   :  { %v3942_v38 = vld [vmem:[%s6900_s3] ss:$8 sps:$4 sm:$0xff]   ;;  %v3943_v48 = vld [vmem:[%s6900_s3 + $0x14] ss:$8 sps:$4 sm:$0xff]   ;;  %v3945_v54 = vld [vmem:[%s6900_s3 + $0x10] ss:$8 sps:$4 sm:$0xff]  }
  0x1b   :  { %609 = vmatpush1.bf16.msra.mxu1 %v3864_v16  ;;  %v3918_v16 = vld [vmem:[%s6898_s1 + $0x10c] ss:$16 sps:$4 sm:$0xff]   ;;  %v3928_v39 = vld [vmem:[%s6898_s1 + $0x188] ss:$16 sps:$4 sm:$0xff]  }
  0x1c   :  { %610 = vmatprep.subr.bf16.mxu1 %v3865_v17  ;;  %v4637_v17 = vpack.c.bf16 %v112_v11, %v110_v10  ;;  %v3931_v47 = vld [vmem:[%s6898_s1 + $0x1a8] ss:$16 sps:$4 sm:$0xff]   ;;  %v3946_v55 = vld [vmem:[%s6900_s3 + $0x24] ss:$8 sps:$4 sm:$0xff]   ;;  %v3949_v1 = vld [vmem:[%s6900_s3 + $0x34] ss:$8 sps:$4 sm:$0xff]  }
  0x1d   :  { %v3934_v57 = vld [vmem:[%s6898_s1 + $0x1c8] ss:$16 sps:$4 sm:$0xff]  }
  0x1e   :  { %v133_v3 = vld [vmem:[%s6899_s0 + $0x138] sm:$0xff] }
  0x1f   :  { %611 = vmatpush1.bf16.msra.mxu1 %v3867_v18  ;;  %v4639_v18 = vpack.c.bf16 %v117_v14, %v115_v13  ;;  %v3937_v4 = vld [vmem:[%s6898_s1 + $0x1e8] ss:$16 sps:$4 sm:$0xff]   ;;  %v132_v13 = vld [vmem:[%s6899_s0 + $0x130] sm:$0xff] }
  0x20   :  { %612 = vmatprep.subr.bf16.mxu1 %v3868_v19  ;;  %v3916_v19 = vld [vmem:[%s6898_s1 + $0x108] ss:$16 sps:$4 sm:$0xff]   ;;  %v3955_v14 = vld [vmem:[%s6900_s3 + $0x54] ss:$8 sps:$4 sm:$0xff]  }
  0x23   :  { %613 = vmatpush1.bf16.msra.mxu1 %v3870_v20  ;;  %v3921_v20 = vld [vmem:[%s6898_s1 + $0x12c] ss:$16 sps:$4 sm:$0xff]  }
  0x24   :  { %614 = vmatprep.subr.bf16.mxu1 %v3871_v21  ;;  %v114_v21 = vld [vmem:[%s6899_s0 + $0xa0] sm:$0xff] }
  0x27   :  { %615 = vmatpush1.bf16.msra.mxu1 %v3873_v22  ;;  %v116_v22 = vld [vmem:[%s6899_s0 + $0xb0] sm:$0xff] }
  0x28   :  { %616 = vmatprep.subr.bf16.mxu1 %v3874_v23  ;;  %v3919_v23 = vld [vmem:[%s6898_s1 + $0x128] ss:$16 sps:$4 sm:$0xff]  }
  0x2b   :  { %617 = vmatpush1.bf16.msra.mxu1 %v3876_v24  ;;  %v119_v24 = vld [vmem:[%s6899_s0 + $0xc8] sm:$0xff] }
  0x2c   :  { %618 = vmatprep.subr.bf16.mxu1 %v3877_v25  ;;  %v121_v25 = vld [vmem:[%s6899_s0 + $0xd8] sm:$0xff] }
  0x2f   :  { %619 = vmatpush1.bf16.msra.mxu1 %v3879_v26  ;;  %v3924_v26 = vld [vmem:[%s6898_s1 + $0x14c] ss:$16 sps:$4 sm:$0xff]  }
  0x30   :  { %620 = vmatprep.subr.bf16.mxu1 %v3880_v27  ;;  %v4667_v27 = vpack.c.bf16 %v116_v22, %v114_v21  ;;  %v3958_v21 = vld [vmem:[%s6900_s3 + $0x64] ss:$8 sps:$4 sm:$0xff]   ;;  %v3960_v22 = vld [vmem:[%s6900_s3 + $0x60] ss:$8 sps:$4 sm:$0xff]  }
  0x33   :  { %621 = vmatpush1.bf16.msra.mxu1 %v3882_v28  ;;  %v4669_v28 = vpack.c.bf16 %v121_v25, %v119_v24  ;;  %v3961_v25 = vld [vmem:[%s6900_s3 + $0x74] ss:$8 sps:$4 sm:$0xff]  }
  0x34   :  { %622 = vmatprep.subr.bf16.mxu1 %v3883_v29  ;;  %v3922_v29 = vld [vmem:[%s6898_s1 + $0x148] ss:$16 sps:$4 sm:$0xff]  }
  0x37   :  { %623 = vmatpush1.bf16.msra.mxu1 %v3885_v30  ;;  %v3927_v30 = vld [vmem:[%s6898_s1 + $0x16c] ss:$16 sps:$4 sm:$0xff]  }
  0x38   :  { %624 = vmatprep.subr.bf16.mxu1 %v3886_v31  ;;  %v118_v31 = vld [vmem:[%s6899_s0 + $0xc0] sm:$0xff] }
  0x3b   :  { %625 = vmatpush1.bf16.msra.mxu1 %v3888_v32  ;;  %v120_v32 = vld [vmem:[%s6899_s0 + $0xd0] sm:$0xff] }
  0x3c   :  { %626 = vmatprep.subr.bf16.mxu1 %v3889_v33  ;;  %v123_v33 = vld [vmem:[%s6899_s0 + $0xe8] sm:$0xff] }
  0x3f   :  { %627 = vmatpush1.bf16.msra.mxu1 %v3891_v34  ;;  %v125_v34 = vld [vmem:[%s6899_s0 + $0xf8] sm:$0xff] }
  0x40   :  { %789 = vmatprep.subr.bf16.mxu1 %v3894_v37  ;;  %v3940_v37 = vld [vmem:[%s6900_s3 + $0x4] ss:$8 sps:$4 sm:$0xff]   ;;  %v4711_v44 = vpack.c.bf16 %v125_v34, %v123_v33  ;;  %v141_v33 = vld [vmem:[%s6899_s0 + $0x178] sm:$0xff]  ;;  %v3966_v34 = vld [vmem:[%s6900_s3 + $0x80] ss:$8 sps:$4 sm:$0xff]  }
  0x41   :  { %2134 = vmatprep.subr.bf16.mxu0 %v3940_v37  ;;  %v3967_v37 = vld [vmem:[%s6900_s3 + $0x94] ss:$8 sps:$4 sm:$0xff]  }
  0x42   :  { %629 = vmatmul.mubr.bf16.vlgmr.msra.gmra.mrb[0].mxu1 %v4517_v40  ;;  %2135 = vmatpush1.bf16.msra.mxu0 %v3942_v38  ;;  %v3969_v38 = vld [vmem:[%s6900_s3 + $0x90] ss:$8 sps:$4 sm:$0xff]  }
  0x43   :  { %790 = vmatpush1.bf16.msra.mxu1 %v3892_v41  ;;  %638 = vmatprep.mubr.bf16.mxu1 %v4522_v42  ;;  %v4706_v41 = vpack.c.bf16 %v120_v32, %v118_v31  ;;  %v136_v31 = vld [vmem:[%s6899_s0 + $0x150] sm:$0xff]  ;;  %v139_v32 = vld [vmem:[%s6899_s0 + $0x168] sm:$0xff] }
  0x44   :  { %791 = vmatprep.subr.bf16.mxu1 %v3897_v43  ;;  %v3933_v43 = vld [vmem:[%s6898_s1 + $0x1ac] ss:$16 sps:$4 sm:$0xff]   ;;  %2136 = vmatprep.subr.bf16.mxu0 %v3943_v48 }
  0x46   :  { %2137 = vmatpush1.bf16.msra.mxu0 %v3945_v54  ;;  %v3975_v54 = vld [vmem:[%s6900_s3 + $0xb0] ss:$8 sps:$4 sm:$0xff]  }
  0x47   :  { %792 = vmatpush1.bf16.msra.mxu1 %v3895_v46  ;;  %v124_v46 = vld [vmem:[%s6899_s0 + $0xf0] sm:$0xff]  ;;  %2138 = vmatprep.subr.bf16.mxu0 %v3946_v55  ;;  %v142_v55 = vld [vmem:[%s6899_s0 + $0x180] sm:$0xff] }
  0x48   :  { %793 = vmatprep.subr.bf16.mxu1 %v3900_v49  ;;  %v127_v49 = vld [vmem:[%s6899_s0 + $0x108] sm:$0xff]  ;;  %v4748_v58 = vpack.c.bf16 %v124_v46, %v122_v45  ;;  %v145_v46 = vld [vmem:[%s6899_s0 + $0x198] sm:$0xff] }
  0x49   :  { %v143_v45 = vld [vmem:[%s6899_s0 + $0x188] sm:$0xff] }
  0x4a   :  { %639 = vmatmul.mubr.bf16.gmra.mrb[4].mxu1 %v4547_v50 }
  0x4b   :  { %648 = vmatprep.mubr.bf16.mxu1 %v4549_v51  ;;  %794 = vmatpush1.bf16.msra.mxu1 %v3898_v52  ;;  %v129_v52 = vld [vmem:[%s6899_s0 + $0x118] sm:$0xff] }
  0x4c   :  { %795 = vmatprep.subr.bf16.mxu1 %v3903_v53  ;;  %v3936_v53 = vld [vmem:[%s6898_s1 + $0x1cc] ss:$16 sps:$4 sm:$0xff]  }
  0x4f   :  { %796 = vmatpush1.bf16.msra.mxu1 %v3901_v56  ;;  %v3948_v56 = vld [vmem:[%s6900_s3 + $0x20] ss:$8 sps:$4 sm:$0xff]  }
  0x50   :  { %797 = vmatprep.subr.bf16.mxu1 %v3906_v59  ;;  %v3939_v59 = vld [vmem:[%s6898_s1 + $0x1ec] ss:$16 sps:$4 sm:$0xff]   ;;  %2139 = vmatpush1.bf16.msra.mxu0 %v3948_v56  ;;  %v144_v56 = vld [vmem:[%s6899_s0 + $0x190] sm:$0xff] }
  0x51   :  { %2140 = vmatprep.subr.bf16.mxu0 %v3949_v1  ;;  %v3978_v1 = vld [vmem:[%s6900_s3 + $0xc0] ss:$8 sps:$4 sm:$0xff]  }
  0x52   :  { %649 = vmatmul.mubr.bf16.gmra.mrb[8].mxu1 %v4577_v60 }
  0x53   :  { %658 = vmatprep.mubr.bf16.mxu1 %v4579_v61  ;;  %798 = vmatpush1.bf16.msra.mxu1 %v3904_v62  ;;  %v4753_v62 = vpack.c.bf16 %v129_v52, %v127_v49  ;;  %v3972_v49 = vld [vmem:[%s6900_s3 + $0xa0] ss:$8 sps:$4 sm:$0xff]   ;;  %v4876_v52 = vpack.c.bf16 %v145_v46, %v143_v45 }
  0x54   :  { %799 = vmatprep.subr.bf16.mxu1 %v3909_v63  ;;  %v126_v63 = vld [vmem:[%s6899_s0 + $0x100] sm:$0xff] }
  0x55   :  { %v4784_v10 = vpack.c.bf16 %v128_v0, %v126_v63  ;;  %v3976_v63 = vld [vmem:[%s6900_s3 + $0xc4] ss:$8 sps:$4 sm:$0xff]   ;;  %v4901_v0 = vpack.c.bf16 %v144_v56, %v142_v55 }
  0x57   :  { %800 = vmatpush1.bf16.msra.mxu1 %v3907_v2  ;;  %v131_v2 = vld [vmem:[%s6899_s0 + $0x128] sm:$0xff] }
  0x58   :  { %801 = vmatprep.subr.bf16.mxu1 %v3912_v5  ;;  %v3951_v5 = vld [vmem:[%s6900_s3 + $0x30] ss:$8 sps:$4 sm:$0xff]   ;;  %v4786_v11 = vpack.c.bf16 %v133_v3, %v131_v2  ;;  %v3979_v3 = vld [vmem:[%s6900_s3 + $0xd4] ss:$8 sps:$4 sm:$0xff]  }
  0x59   :  { %2141 = vmatpush1.bf16.msra.mxu0 %v3951_v5  ;;  %v146_v5 = vld [vmem:[%s6899_s0 + $0x1a0] sm:$0xff] }
  0x5a   :  { %659 = vmatmul.mubr.bf16.gmra.mrb[12].mxu1 %v4607_v6 }
  0x5b   :  { %668 = vmatprep.mubr.bf16.mxu1 %v4609_v7  ;;  %802 = vmatpush1.bf16.msra.mxu1 %v3910_v8  ;;  %v3952_v8 = vld [vmem:[%s6900_s3 + $0x44] ss:$8 sps:$4 sm:$0xff]  }
  0x5c   :  { %803 = vmatprep.subr.bf16.mxu1 %v3915_v9  ;;  %v3954_v9 = vld [vmem:[%s6900_s3 + $0x40] ss:$8 sps:$4 sm:$0xff]   ;;  %2142 = vmatprep.subr.bf16.mxu0 %v3952_v8  ;;  %v148_v8 = vld [vmem:[%s6899_s0 + $0x1b0] sm:$0xff] }
  0x5d   :  { %2143 = vmatpush1.bf16.msra.mxu0 %v3954_v9  ;;  %v151_v9 = vld [vmem:[%s6899_s0 + $0x1c8] sm:$0xff] }
  0x5e   :  { %2144 = vmatprep.subr.bf16.mxu0 %v3955_v14  ;;  %v4931_v14 = vpack.c.bf16 %v148_v8, %v146_v5 }
  0x5f   :  { %804 = vmatpush1.bf16.msra.mxu1 %v3913_v12  ;;  %v130_v12 = vld [vmem:[%s6899_s0 + $0x120] sm:$0xff] }
  0x60   :  { %805 = vmatprep.subr.bf16.mxu1 %v3918_v16  ;;  %v135_v16 = vld [vmem:[%s6899_s0 + $0x148] sm:$0xff] }
  0x62   :  { %669 = vmatmul.mubr.bf16.gmra.mrb[16].mxu1 %v4637_v17 }
  0x63   :  { %678 = vmatprep.mubr.bf16.mxu1 %v4639_v18  ;;  %806 = vmatpush1.bf16.msra.mxu1 %v3916_v19  ;;  %v137_v19 = vld [vmem:[%s6899_s0 + $0x158] sm:$0xff] }
  0x64   :  { %807 = vmatprep.subr.bf16.mxu1 %v3921_v20  ;;  %v3957_v20 = vld [vmem:[%s6900_s3 + $0x50] ss:$8 sps:$4 sm:$0xff]   ;;  %v4816_v24 = vpack.c.bf16 %v137_v19, %v135_v16  ;;  %v3984_v16 = vld [vmem:[%s6900_s3 + $0xe0] ss:$8 sps:$4 sm:$0xff]  }
  0x65   :  { %2145 = vmatpush1.bf16.msra.mxu0 %v3957_v20  ;;  %v3985_v20 = vld [vmem:[%s6900_s3 + $0xf4] ss:$8 sps:$4 sm:$0xff]  }
  0x66   :  { %2146 = vmatprep.subr.bf16.mxu0 %v3958_v21  ;;  %v3987_v21 = vld [vmem:[%s6900_s3 + $0xf0] ss:$8 sps:$4 sm:$0xff]  }
  0x67   :  { %808 = vmatpush1.bf16.msra.mxu1 %v3919_v23  ;;  %v4814_v23 = vpack.c.bf16 %v132_v13, %v130_v12  ;;  %v153_v12 = vld [vmem:[%s6899_s0 + $0x1d8] sm:$0xff]  ;;  %v3982_v13 = vld [vmem:[%s6900_s3 + $0xe4] ss:$8 sps:$4 sm:$0xff]  }
  0x68   :  { %809 = vmatprep.subr.bf16.mxu1 %v3924_v26  ;;  %v3963_v26 = vld [vmem:[%s6900_s3 + $0x70] ss:$8 sps:$4 sm:$0xff]   ;;  %v4936_v19 = vpack.c.bf16 %v153_v12, %v151_v9 }
  0x69   :  { %2147 = vmatpush1.bf16.msra.mxu0 %v3960_v22  ;;  %v150_v22 = vld [vmem:[%s6899_s0 + $0x1c0] sm:$0xff] }
  0x6a   :  { %679 = vmatmul.mubr.bf16.gmra.mrb[20].mxu1 %v4667_v27  ;;  %2148 = vmatprep.subr.bf16.mxu0 %v3961_v25  ;;  %v152_v25 = vld [vmem:[%s6899_s0 + $0x1d0] sm:$0xff] }
  0x6b   :  { %688 = vmatprep.mubr.bf16.mxu1 %v4669_v28  ;;  %810 = vmatpush1.bf16.msra.mxu1 %v3922_v29  ;;  %v3964_v29 = vld [vmem:[%s6900_s3 + $0x84] ss:$8 sps:$4 sm:$0xff]  }
  0x6c   :  { %811 = vmatprep.subr.bf16.mxu1 %v3927_v30  ;;  %v134_v30 = vld [vmem:[%s6899_s0 + $0x140] sm:$0xff] }
  0x6d   :  { %2149 = vmatpush1.bf16.msra.mxu0 %v3963_v26  ;;  %v155_v26 = vld [vmem:[%s6899_s0 + $0x1e8] sm:$0xff] }
  0x6e   :  { %2150 = vmatprep.subr.bf16.mxu0 %v3964_v29  ;;  %v157_v29 = vld [vmem:[%s6899_s0 + $0x1f8] sm:$0xff] }
  0x6f   :  { %812 = vmatpush1.bf16.msra.mxu1 %v3925_v35  ;;  %v4844_v35 = vpack.c.bf16 %v136_v31, %v134_v30  ;;  %v4958_v30 = vpack.c.bf16 %v152_v25, %v150_v22  ;;  %v4960_v31 = vpack.c.bf16 %v157_v29, %v155_v26 }
  0x70   :  { %813 = vmatprep.subr.bf16.mxu1 %v3930_v36  ;;  %v4846_v36 = vpack.c.bf16 %v141_v33, %v139_v32  ;;  %v154_v32 = vld [vmem:[%s6899_s0 + $0x1e0] sm:$0xff]  ;;  %v156_v33 = vld [vmem:[%s6899_s0 + $0x1f0] sm:$0xff] }
  0x71   :  { %2151 = vmatpush1.bf16.msra.mxu0 %v3966_v34  ;;  %v4970_v34 = vpack.c.bf16 %v156_v33, %v154_v32 }
  0x72   :  { %689 = vmatmul.mubr.bf16.gmra.mrb[24].mxu1 %v4706_v41  ;;  %2152 = vmatprep.subr.bf16.mxu0 %v3967_v37  ;;  %v3990_v37 = vld [vmem:[%s6900_s3 + $0x104] ss:$8 sps:$4 sm:$0xff]  }
  0x73   :  { %698 = vmatprep.mubr.bf16.mxu1 %v4711_v44  ;;  %814 = vmatpush1.bf16.msra.mxu1 %v3928_v39  ;;  %v138_v39 = vld [vmem:[%s6899_s0 + $0x160] sm:$0xff] }
  0x74   :  { %815 = vmatprep.subr.bf16.mxu1 %v3933_v43  ;;  %v140_v43 = vld [vmem:[%s6899_s0 + $0x170] sm:$0xff] }
  0x75   :  { %2153 = vmatpush1.bf16.msra.mxu0 %v3969_v38  ;;  %v4871_v48 = vpack.c.bf16 %v140_v43, %v138_v39 }
  0x77   :  { %816 = vmatpush1.bf16.msra.mxu1 %v3931_v47  ;;  %v3970_v47 = vld [vmem:[%s6900_s3 + $0xa4] ss:$8 sps:$4 sm:$0xff]  }
  0x78   :  { %817 = vmatprep.subr.bf16.mxu1 %v3936_v53  ;;  %2154 = vmatprep.subr.bf16.mxu0 %v3970_v47  ;;  %v3973_v53 = vld [vmem:[%s6900_s3 + $0xb4] ss:$8 sps:$4 sm:$0xff]  }
  0x79   :  { %2155 = vmatpush1.bf16.msra.mxu0 %v3972_v49 }
  0x7a   :  { %699 = vmatmul.mubr.bf16.gmra.mrb[28].mxu1 %v4748_v58  ;;  %2156 = vmatprep.subr.bf16.mxu0 %v3973_v53 }
  0x7b   :  { %708 = vmatprep.mubr.bf16.mxu1 %v4753_v62  ;;  %818 = vmatpush1.bf16.msra.mxu1 %v3934_v57  ;;  %v147_v57 = vld [vmem:[%s6899_s0 + $0x1a8] sm:$0xff] }
  0x7c   :  { %819 = vmatprep.subr.bf16.mxu1 %v3939_v59  ;;  %v149_v59 = vld [vmem:[%s6899_s0 + $0x1b8] sm:$0xff] }
  0x7d   :  { %2157 = vmatpush1.bf16.msra.mxu0 %v3975_v54  ;;  %v4906_v2 = vpack.c.bf16 %v149_v59, %v147_v57 }
  0x7e   :  { %2158 = vmatprep.subr.bf16.mxu0 %v3976_v63 }
  0x7f   :  { %820 = vmatpush1.bf16.msra.mxu1 %v3937_v4  ;;  %v3981_v4 = vld [vmem:[%s6900_s3 + $0xd0] ss:$8 sps:$4 sm:$0xff]  }
  0x81   :  { %2159 = vmatpush1.bf16.msra.mxu0 %v3978_v1 }
  0x82   :  { %709 = vmatmul.mubr.bf16.gmra.mrb[32].mxu1 %v4784_v10  ;;  %2160 = vmatprep.subr.bf16.mxu0 %v3979_v3 }
  0x83   :  { %718 = vmatprep.mubr.bf16.mxu1 %v4786_v11 }
  0x85   :  { %2161 = vmatpush1.bf16.msra.mxu0 %v3981_v4 }
  0x86   :  { %2162 = vmatprep.subr.bf16.mxu0 %v3982_v13 }
  0x89   :  { %2163 = vmatpush1.bf16.msra.mxu0 %v3984_v16 }
  0x8a   :  { %719 = vmatmul.mubr.bf16.gmra.mrb[36].mxu1 %v4814_v23  ;;  %2164 = vmatprep.subr.bf16.mxu0 %v3985_v20 }
  0x8b   :  { %728 = vmatprep.mubr.bf16.mxu1 %v4816_v24 }
  0x8d   :  { %2165 = vmatpush1.bf16.msra.mxu0 %v3987_v21 }
  0x8e   :  { %2327 = vmatprep.subr.bf16.mxu0 %v3990_v37 }
  0x92   :  { %729 = vmatmul.mubr.bf16.gmra.mrb[40].mxu1 %v4844_v35 }
  0x93   :  { %738 = vmatprep.mubr.bf16.mxu1 %v4846_v36 }
  0x9a   :  { %739 = vmatmul.mubr.bf16.gmra.mrb[44].mxu1 %v4871_v48 }
  0x9b   :  { %748 = vmatprep.mubr.bf16.mxu1 %v4876_v52 }
  0xa2   :  { %749 = vmatmul.mubr.bf16.gmra.mrb[48].mxu1 %v4901_v0 }
  0xa3   :  { %758 = vmatprep.mubr.bf16.mxu1 %v4906_v2 }
  0xaa   :  { %759 = vmatmul.mubr.bf16.gmra.mrb[52].mxu1 %v4931_v14 }
  0xab   :  { %768 = vmatprep.mubr.bf16.mxu1 %v4936_v19 }
  0xb2   :  { %769 = vmatmul.mubr.bf16.gmra.mrb[56].mxu1 %v4958_v30 }
  0xb3   :  { %778 = vmatprep.mubr.bf16.mxu1 %v4960_v31 }
  0xba   :  { %779 = vmatmul.mubr.bf16.gmra.mrb[60].mxu1 %v4970_v34 }
  0xbb   :  { %821 = vmatprep.mubr.bf16.mxu1 %v4442_v15  ;;  %v256_v15 = vlaneseq }
  0xc2   :  { %822 = vmatmul.mubr.bf16.vlgmr.msra.gmra.mrb[64].mxu1 %v4517_v40  ;;  %v4996_v40 = vshrl.u32 %v256_v15, 7 }
  0xc3   :  { %831 = vmatprep.mubr.bf16.mxu1 %v4522_v42 }
  0xc4   :  { %v5000_v42 = vsub.s32 0, %v4996_v40 }
  0xc6   :  { %6942 = vst [vmem:[#allocation3_spill] sm:$0xff] %v5000_v42 }
  0xca   :  { %832 = vmatmul.mubr.bf16.gmra.mrb[68].mxu1 %v4547_v50  ;;  %v254_v50 = vld [vmem:[%s6901_s2] sm:$0xf] }
  0xcb   :  { %841 = vmatprep.mubr.bf16.mxu1 %v4549_v51  ;;  %v5006_v51 = vsub.s32 1, %v4996_v40 }
  0xcd   :  { %6943 = vst [vmem:[#allocation4_spill] sm:$0xff] %v5006_v51 }
  0xd2   :  { %842 = vmatmul.mubr.bf16.gmra.mrb[72].mxu1 %v4577_v60  ;;  %v5010_v60 = vrot.slane %v254_v50, %v5000_v42 }
  0xd3   :  { %851 = vmatprep.mubr.bf16.mxu1 %v4579_v61  ;;  %v5013_v61 = vrot.slane %v254_v50, %v5006_v51 }
  0xda   :  { %852 = vmatmul.mubr.bf16.gmra.mrb[76].mxu1 %v4607_v6 }
  0xdb   :  { %861 = vmatprep.mubr.bf16.mxu1 %v4609_v7 }
  0xe2   :  { %862 = vmatmul.mubr.bf16.gmra.mrb[80].mxu1 %v4637_v17 }
  0xe3   :  { %871 = vmatprep.mubr.bf16.mxu1 %v4639_v18 }
  0xea   :  { %872 = vmatmul.mubr.bf16.gmra.mrb[84].mxu1 %v4667_v27 }
  0xeb   :  { %881 = vmatprep.mubr.bf16.mxu1 %v4669_v28 }
  0xf2   :  { %882 = vmatmul.mubr.bf16.gmra.mrb[88].mxu1 %v4706_v41 }
  0xf3   :  { %891 = vmatprep.mubr.bf16.mxu1 %v4711_v44 }
  0xfa   :  { %892 = vmatmul.mubr.bf16.gmra.mrb[92].mxu1 %v4748_v58 }
  0xfb   :  { %901 = vmatprep.mubr.bf16.mxu1 %v4753_v62 }
 0x102   :  { %902 = vmatmul.mubr.bf16.gmra.mrb[96].mxu1 %v4784_v10 }
 0x103   :  { %911 = vmatprep.mubr.bf16.mxu1 %v4786_v11 }
 0x10a   :  { %912 = vmatmul.mubr.bf16.gmra.mrb[100].mxu1 %v4814_v23 }
 0x10b   :  { %921 = vmatprep.mubr.bf16.mxu1 %v4816_v24 }
 0x112   :  { %922 = vmatmul.mubr.bf16.gmra.mrb[104].mxu1 %v4844_v35 }
 0x113   :  { %931 = vmatprep.mubr.bf16.mxu1 %v4846_v36 }
 0x115   :  { %v630_v6 = vpop.f32.mrb[0].mxu1 }
 0x116   :  { %v631_v7 = vadd.f32 %v630_v6, %v5010_v60  ;;  %v632_v17 = vpop.f32.mrb[1].mxu1 }
 0x117   :  { %v633_v18 = vadd.f32 %v632_v17, %v5013_v61  ;;  %v634_v27 = vpop.f32.mrb[2].mxu1 }
 0x118   :  { %v1110_v28 = vmul.f32 0.70710677, %v631_v7  ;;  %v635_v41 = vadd.f32 %v634_v27, %v5010_v60  ;;  %v636_v44 = vpop.f32.mrb[3].mxu1  ;;  %v982_v56 = vmul.f32 0.5, %v631_v7  ;;  %v3988_v27 = vld [vmem:[%s6900_s3 + $0x100] ss:$8 sps:$4 sm:$0xff]  }
 0x119   :  { %v1111_v58 = vmul.f32 0.70710677, %v633_v18  ;;  %v637_v62 = vadd.f32 %v636_v44, %v5013_v61  ;;  %v983_v8 = vmul.f32 0.5, %v633_v18 }
 0x11a   :  { %4036 = verf.f32 %v1110_v28  ;;  %v1114_v10 = vmul.f32 0.70710677, %v635_v41  ;;  %932 = vmatmul.mubr.bf16.gmra.mrb[108].mxu1 %v4871_v48  ;;  %v986_v3 = vmul.f32 0.5, %v635_v41 }
 0x11b   :  { %4038 = verf.f32 %v1111_v58  ;;  %v1115_v11 = vmul.f32 0.70710677, %v637_v62  ;;  %941 = vmatprep.mubr.bf16.mxu1 %v4876_v52  ;;  %v987_v21 = vmul.f32 0.5, %v637_v62 }
 0x11c   :  { %4040 = verf.f32 %v1114_v10 }
 0x11d   :  { %4042 = verf.f32 %v1115_v11  ;;  %v640_v23 = vpop.f32.mrb[4].mxu1 }
 0x11e   :  { %v5023_v24 = vadd.f32 %v640_v23, %v5010_v60  ;;  %v642_v35 = vpop.f32.mrb[5].mxu1 }
 0x11f   :  { %v5026_v36 = vadd.f32 %v642_v35, %v5013_v61  ;;  %v644_v38 = vpop.f32.mrb[6].mxu1 }
 0x120   :  { %v1118_v39 = vmul.f32 0.70710677, %v5023_v24  ;;  %v645_v43 = vadd.f32 %v644_v38, %v5010_v60  ;;  %v646_v45 = vpop.f32.mrb[7].mxu1  ;;  %v990_v62 = vmul.f32 0.5, %v5023_v24 }
 0x121   :  { %v1119_v46 = vmul.f32 0.70710677, %v5026_v36  ;;  %v647_v47 = vadd.f32 %v646_v45, %v5013_v61  ;;  %v991_v38 = vmul.f32 0.5, %v5026_v36 }
 0x122   :  { %4044 = verf.f32 %v1118_v39  ;;  %v1122_v48 = vmul.f32 0.70710677, %v645_v43  ;;  %942 = vmatmul.mubr.bf16.gmra.mrb[112].mxu1 %v4901_v0  ;;  %v994_v10 = vmul.f32 0.5, %v645_v43  ;;  %v3991_v43 = vld [vmem:[%s6900_s3 + $0x110] ss:$8 sps:$4 sm:$0xff]  }
 0x123   :  { %4046 = verf.f32 %v1119_v46  ;;  %v1123_v49 = vmul.f32 0.70710677, %v647_v47  ;;  %951 = vmatprep.mubr.bf16.mxu1 %v4906_v2  ;;  %v995_v39 = vmul.f32 0.5, %v647_v47 }
 0x124   :  { %v4037_v52 = vpop.eup %4036  ;;  %4048 = verf.f32 %v1122_v48 }
 0x125   :  { %v4039_v53 = vpop.eup %4038  ;;  %4050 = verf.f32 %v1123_v49  ;;  %v650_v54 = vpop.f32.mrb[8].mxu1  ;;  %v1366_v57 = vadd.f32 1.0, %v4037_v52 }
 0x126   :  { %v4041_v55 = vpop.eup %4040  ;;  %v5035_v59 = vadd.f32 %v650_v54, %v5010_v60  ;;  %v652_v63 = vpop.f32.mrb[9].mxu1  ;;  %v1367_v2 = vadd.f32 1.0, %v4039_v53 }
 0x127   :  { %v4043_v1 = vpop.eup %4042  ;;  %v1370_v4 = vadd.f32 1.0, %v4041_v55  ;;  %v5038_v0 = vadd.f32 %v652_v63, %v5013_v61  ;;  %v654_v5 = vpop.f32.mrb[10].mxu1  ;;  %v1494_v26 = vmul.f32 %v1366_v57, %v982_v56  ;;  %v3996_v55 = vld [vmem:[%s6900_s3 + $0x124] ss:$8 sps:$4 sm:$0xff]  }
 0x128   :  { %v1126_v9 = vmul.f32 0.70710677, %v5035_v59  ;;  %v5042_v12 = vadd.f32 %v654_v5, %v5010_v60  ;;  %v656_v13 = vpop.f32.mrb[11].mxu1  ;;  %v1371_v16 = vadd.f32 1.0, %v4043_v1  ;;  %v1495_v33 = vmul.f32 %v1367_v2, %v983_v8 }
 0x129   :  { %v1498_v20 = vmul.f32 %v1370_v4, %v986_v3  ;;  %v1127_v22 = vmul.f32 0.70710677, %v5038_v0  ;;  %v5046_v25 = vadd.f32 %v656_v13, %v5013_v61 }
 0x12a   :  { %4052 = verf.f32 %v1126_v9  ;;  %v1130_v29 = vmul.f32 0.70710677, %v5042_v12  ;;  %952 = vmatmul.mubr.bf16.gmra.mrb[116].mxu1 %v4931_v14  ;;  %v1499_v37 = vmul.f32 %v1371_v16, %v987_v21  ;;  %v3999_v16 = vld [vmem:[%s6900_s3 + $0x134] ss:$8 sps:$4 sm:$0xff]   ;;  %v998_v21 = vmul.f32 0.5, %v5035_v59 }
 0x12b   :  { %4054 = verf.f32 %v1127_v22  ;;  %v1131_v32 = vmul.f32 0.70710677, %v5046_v25  ;;  %961 = vmatprep.mubr.bf16.mxu1 %v4936_v19  ;;  %v1686_v50 = vpack.c.bf16 %v1498_v20, %v1494_v26  ;;  %v3993_v19 = vld [vmem:[%s6900_s3 + $0x114] ss:$8 sps:$4 sm:$0xff]   ;;  %v1002_v22 = vmul.f32 0.5, %v5042_v12 }
 0x12c   :  { %v4045_v15 = vpop.eup %4044  ;;  %4056 = verf.f32 %v1130_v29  ;;  %v1687_v18 = vpack.c.bf16 %v1499_v37, %v1495_v33  ;;  %v999_v33 = vmul.f32 0.5, %v5038_v0  ;;  %v1003_v37 = vmul.f32 0.5, %v5046_v25 }
 0x12d   :  { %v4047_v6 = vpop.eup %4046  ;;  %v1374_v7 = vadd.f32 1.0, %v4045_v15  ;;  %4058 = verf.f32 %v1131_v32  ;;  %v660_v17 = vpop.f32.mrb[12].mxu1 }
 0x12e   :  { %v4049_v14 = vpop.eup %4048  ;;  %v1375_v28 = vadd.f32 1.0, %v4047_v6  ;;  %v5056_v41 = vadd.f32 %v660_v17, %v5010_v60  ;;  %v662_v44 = vpop.f32.mrb[13].mxu1  ;;  %2166 = vmatprep.mubr.bf16.mxu0 %v1687_v18  ;;  %v3997_v18 = vld [vmem:[%s6900_s3 + $0x130] ss:$8 sps:$4 sm:$0xff]  }
 0x12f   :  { %v4051_v58 = vpop.eup %4050  ;;  %v1378_v11 = vadd.f32 1.0, %v4049_v14  ;;  %v5063_v23 = vadd.f32 %v662_v44, %v5013_v61  ;;  %v664_v35 = vpop.f32.mrb[14].mxu1  ;;  %2167 = vmatmul.mubr.bf16.vlgmr.msra.gmra.mrb[0].mxu0 %v1686_v50  ;;  %v1502_v49 = vmul.f32 %v1374_v7, %v990_v62  ;;  %v4002_v14 = vld [vmem:[%s6900_s3 + $0x144] ss:$8 sps:$4 sm:$0xff]  }
 0x130   :  { %v1379_v45 = vadd.f32 1.0, %v4051_v58  ;;  %v1134_v46 = vmul.f32 0.70710677, %v5056_v41  ;;  %v666_v48 = vpop.f32.mrb[15].mxu1  ;;  %v5069_v24 = vadd.f32 %v664_v35, %v5010_v60  ;;  %2328 = vmatpush1.bf16.msra.mxu0 %v3988_v27  ;;  %v1503_v54 = vmul.f32 %v1375_v28, %v991_v38 }
 0x131   :  { %v1506_v52 = vmul.f32 %v1378_v11, %v994_v10  ;;  %v1135_v53 = vmul.f32 0.70710677, %v5063_v23  ;;  %v5075_v47 = vadd.f32 %v666_v48, %v5013_v61  ;;  %2329 = vmatprep.subr.bf16.mxu0 %v3993_v19  ;;  %v1006_v48 = vmul.f32 0.5, %v5056_v41 }
 0x132   :  { %v1507_v36 = vmul.f32 %v1379_v45, %v995_v39  ;;  %4060 = verf.f32 %v1134_v46  ;;  %962 = vmatmul.mubr.bf16.gmra.mrb[120].mxu1 %v4958_v30  ;;  %v1138_v56 = vmul.f32 0.70710677, %v5069_v24  ;;  %v3994_v30 = vld [vmem:[%s6900_s3 + $0x120] ss:$8 sps:$4 sm:$0xff]   ;;  %v4005_v45 = vld [vmem:[%s6900_s3 + $0x154] ss:$8 sps:$4 sm:$0xff]  }
 0x133   :  { %4062 = verf.f32 %v1135_v53  ;;  %v1690_v57 = vpack.c.bf16 %v1506_v52, %v1502_v49  ;;  %971 = vmatprep.mubr.bf16.mxu1 %v4960_v31  ;;  %v1139_v1 = vmul.f32 0.70710677, %v5075_v47 }
 0x134   :  { %v4053_v63 = vpop.eup %4052  ;;  %v1691_v3 = vpack.c.bf16 %v1507_v36, %v1503_v54  ;;  %4064 = verf.f32 %v1138_v56  ;;  %2330 = vmatpush1.bf16.msra.mxu0 %v3991_v43  ;;  %v1007_v54 = vmul.f32 0.5, %v5063_v23  ;;  %v1010_v36 = vmul.f32 0.5, %v5069_v24  ;;  %v4003_v23 = vld [vmem:[%s6900_s3 + $0x150] ss:$8 sps:$4 sm:$0xff]  }
 0x135   :  { %v4055_v4 = vpop.eup %4054  ;;  %v1382_v5 = vadd.f32 1.0, %v4053_v63  ;;  %v670_v2 = vpop.f32.mrb[16].mxu1  ;;  %4066 = verf.f32 %v1139_v1  ;;  %2331 = vmatprep.subr.bf16.mxu0 %v3996_v55  ;;  %v1011_v63 = vmul.f32 0.5, %v5075_v47  ;;  %v4008_v47 = vld [vmem:[%s6900_s3 + $0x164] ss:$8 sps:$4 sm:$0xff]  }
 0x136   :  { %v4057_v8 = vpop.eup %4056  ;;  %v1383_v9 = vadd.f32 1.0, %v4055_v4  ;;  %v5088_v13 = vadd.f32 %v670_v2, %v5010_v60  ;;  %v672_v31 = vpop.f32.mrb[17].mxu1  ;;  %2176 = vmatprep.mubr.bf16.mxu0 %v1691_v3 }
 0x137   :  { %v4059_v20 = vpop.eup %4058  ;;  %v1386_v26 = vadd.f32 1.0, %v4057_v8  ;;  %v5096_v29 = vadd.f32 %v672_v31, %v5013_v61  ;;  %v674_v32 = vpop.f32.mrb[18].mxu1  ;;  %2177 = vmatmul.mubr.bf16.gmra.mrb[4].mxu0 %v1690_v57  ;;  %v1510_v7 = vmul.f32 %v1382_v5, %v998_v21 }
 0x138   :  { %v1387_v15 = vadd.f32 1.0, %v4059_v20  ;;  %v1142_v50 = vmul.f32 0.70710677, %v5088_v13  ;;  %v676_v6 = vpop.f32.mrb[19].mxu1  ;;  %v5103_v12 = vadd.f32 %v674_v32, %v5010_v60  ;;  %2332 = vmatpush1.bf16.msra.mxu0 %v3994_v30  ;;  %v1511_v0 = vmul.f32 %v1383_v9, %v999_v33 }
 0x139   :  { %v1514_v17 = vmul.f32 %v1386_v26, %v1002_v22  ;;  %v1143_v59 = vmul.f32 0.70710677, %v5096_v29  ;;  %v5109_v25 = vadd.f32 %v676_v6, %v5013_v61  ;;  %2333 = vmatprep.subr.bf16.mxu0 %v3999_v16  ;;  %v4006_v26 = vld [vmem:[%s6900_s3 + $0x160] ss:$8 sps:$4 sm:$0xff]   ;;  %v1014_v6 = vmul.f32 0.5, %v5088_v13 }
 0x13a   :  { %v1515_v27 = vmul.f32 %v1387_v15, %v1003_v37  ;;  %4068 = verf.f32 %v1142_v50  ;;  %972 = vmatmul.mubr.bf16.gmra.mrb[124].mxu1 %v4970_v34  ;;  %v1146_v28 = vmul.f32 0.70710677, %v5103_v12  ;;  %v4000_v34 = vld [vmem:[%s6900_s3 + $0x140] ss:$8 sps:$4 sm:$0xff]   ;;  %v4011_v15 = vld [vmem:[%s6900_s3 + $0x174] ss:$8 sps:$4 sm:$0xff]  }
 0x13b   :  { %4070 = verf.f32 %v1143_v59  ;;  %v1694_v44 = vpack.c.bf16 %v1514_v17, %v1510_v7  ;;  %v1147_v58 = vmul.f32 0.70710677, %v5109_v25 }
 0x13c   :  { %v4061_v19 = vpop.eup %4060  ;;  %v1695_v62 = vpack.c.bf16 %v1515_v27, %v1511_v0  ;;  %4072 = verf.f32 %v1146_v28  ;;  %2334 = vmatpush1.bf16.msra.mxu0 %v3997_v18  ;;  %v1015_v0 = vmul.f32 0.5, %v5096_v29  ;;  %v1018_v27 = vmul.f32 0.5, %v5103_v12  ;;  %v4009_v29 = vld [vmem:[%s6900_s3 + $0x170] ss:$8 sps:$4 sm:$0xff]  }
 0x13d   :  { %v4063_v10 = vpop.eup %4062  ;;  %v680_v11 = vpop.f32.mrb[20].mxu1  ;;  %v1390_v35 = vadd.f32 1.0, %v4061_v19  ;;  %4074 = verf.f32 %v1147_v58  ;;  %2335 = vmatprep.subr.bf16.mxu0 %v4002_v14  ;;  %v1019_v19 = vmul.f32 0.5, %v5109_v25  ;;  %v4014_v25 = vld [vmem:[%s6900_s3 + $0x184] ss:$8 sps:$4 sm:$0xff]  }
 0x13e   :  { %v5121_v38 = vadd.f32 %v680_v11, %v5010_v60  ;;  %v682_v39 = vpop.f32.mrb[21].mxu1  ;;  %2186 = vmatprep.mubr.bf16.mxu0 %v1695_v62  ;;  %v4065_v46 = vpop.eup %4064  ;;  %v1391_v49 = vadd.f32 1.0, %v4063_v10 }
 0x13f   :  { %v5128_v52 = vadd.f32 %v682_v39, %v5013_v61  ;;  %v684_v53 = vpop.f32.mrb[22].mxu1  ;;  %v4067_v43 = vpop.eup %4066  ;;  %v1394_v55 = vadd.f32 1.0, %v4065_v46  ;;  %2187 = vmatmul.mubr.bf16.gmra.mrb[8].mxu0 %v1694_v44  ;;  %v1518_v4 = vmul.f32 %v1390_v35, %v1006_v48 }
 0x140   :  { %v1150_v56 = vmul.f32 0.70710677, %v5121_v38  ;;  %v686_v57 = vpop.f32.mrb[23].mxu1  ;;  %v1395_v1 = vadd.f32 1.0, %v4067_v43  ;;  %v5136_v3 = vadd.f32 %v684_v53, %v5010_v60  ;;  %2336 = vmatpush1.bf16.msra.mxu0 %v4000_v34  ;;  %v1519_v2 = vmul.f32 %v1391_v49, %v1007_v54  ;;  %v4012_v54 = vld [vmem:[%s6900_s3 + $0x180] ss:$8 sps:$4 sm:$0xff]  }
 0x141   :  { %v1151_v41 = vmul.f32 0.70710677, %v5128_v52  ;;  %v1522_v24 = vmul.f32 %v1394_v55, %v1010_v36  ;;  %v5142_v5 = vadd.f32 %v686_v57, %v5013_v61  ;;  %2337 = vmatprep.subr.bf16.mxu0 %v4005_v45  ;;  %v4017_v57 = vld [vmem:[%s6900_s3 + $0x194] ss:$8 sps:$4 sm:$0xff]  }
 0x142   :  { %4076 = verf.f32 %v1150_v56  ;;  %v1523_v30 = vmul.f32 %v1395_v1, %v1011_v63  ;;  %v1154_v8 = vmul.f32 0.70710677, %v5136_v3  ;;  %v1022_v1 = vmul.f32 0.5, %v5121_v38 }
 0x143   :  { %4078 = verf.f32 %v1151_v41  ;;  %v1155_v31 = vmul.f32 0.70710677, %v5142_v5  ;;  %v1698_v16 = vpack.c.bf16 %v1522_v24, %v1518_v4 }
 0x144   :  { %v4069_v9 = vpop.eup %4068  ;;  %4080 = verf.f32 %v1154_v8  ;;  %v1699_v22 = vpack.c.bf16 %v1523_v30, %v1519_v2  ;;  %2338 = vmatpush1.bf16.msra.mxu0 %v4003_v23  ;;  %v1026_v2 = vmul.f32 0.5, %v5136_v3 }
 0x145   :  { %v4071_v20 = vpop.eup %4070  ;;  %v690_v21 = vpop.f32.mrb[24].mxu1  ;;  %v1398_v32 = vadd.f32 1.0, %v4069_v9  ;;  %4082 = verf.f32 %v1155_v31  ;;  %2339 = vmatprep.subr.bf16.mxu0 %v4008_v47  ;;  %v1023_v47 = vmul.f32 0.5, %v5128_v52  ;;  %v1027_v31 = vmul.f32 0.5, %v5142_v5  ;;  %v4015_v52 = vld [vmem:[%s6900_s3 + $0x190] ss:$8 sps:$4 sm:$0xff]  }
 0x146   :  { %v5153_v33 = vadd.f32 %v690_v21, %v5010_v60  ;;  %v692_v37 = vpop.f32.mrb[25].mxu1  ;;  %v4073_v50 = vpop.eup %4072  ;;  %v1399_v7 = vadd.f32 1.0, %v4071_v20  ;;  %2196 = vmatprep.mubr.bf16.mxu0 %v1699_v22  ;;  %v4020_v5 = vld [vmem:[%s6900_s3 + $0x1a4] ss:$8 sps:$4 sm:$0xff]  }
 0x147   :  { %v5160_v17 = vadd.f32 %v692_v37, %v5013_v61  ;;  %v694_v59 = vpop.f32.mrb[26].mxu1  ;;  %v4075_v18 = vpop.eup %4074  ;;  %v1402_v14 = vadd.f32 1.0, %v4073_v50  ;;  %2197 = vmatmul.mubr.bf16.gmra.mrb[12].mxu0 %v1698_v16  ;;  %v1526_v10 = vmul.f32 %v1398_v32, %v1014_v6 }
 0x148   :  { %v1158_v28 = vmul.f32 0.70710677, %v5153_v33  ;;  %v696_v44 = vpop.f32.mrb[27].mxu1  ;;  %v1403_v58 = vadd.f32 1.0, %v4075_v18  ;;  %v5168_v62 = vadd.f32 %v694_v59, %v5010_v60  ;;  %2340 = vmatpush1.bf16.msra.mxu0 %v4006_v26  ;;  %v1527_v34 = vmul.f32 %v1399_v7, %v1015_v0  ;;  %v4018_v0 = vld [vmem:[%s6900_s3 + $0x1a0] ss:$8 sps:$4 sm:$0xff]  }
 0x149   :  { %v1159_v13 = vmul.f32 0.70710677, %v5160_v17  ;;  %v1530_v12 = vmul.f32 %v1402_v14, %v1018_v27  ;;  %v5174_v11 = vadd.f32 %v696_v44, %v5013_v61  ;;  %2341 = vmatprep.subr.bf16.mxu0 %v4011_v15  ;;  %v4023_v44 = vld [vmem:[%s6900_s3 + $0x1b4] ss:$8 sps:$4 sm:$0xff]  }
 0x14a   :  { %4084 = verf.f32 %v1158_v28  ;;  %v1531_v35 = vmul.f32 %v1403_v58, %v1019_v19  ;;  %v1162_v39 = vmul.f32 0.70710677, %v5168_v62  ;;  %v1030_v58 = vmul.f32 0.5, %v5153_v33 }
 0x14b   :  { %4086 = verf.f32 %v1159_v13  ;;  %v1163_v46 = vmul.f32 0.70710677, %v5174_v11  ;;  %v1702_v48 = vpack.c.bf16 %v1530_v12, %v1526_v10 }
 0x14c   :  { %v4077_v45 = vpop.eup %4076  ;;  %4088 = verf.f32 %v1162_v39  ;;  %v1703_v43 = vpack.c.bf16 %v1531_v35, %v1527_v34  ;;  %2342 = vmatpush1.bf16.msra.mxu0 %v4009_v29  ;;  %v1034_v34 = vmul.f32 0.5, %v5168_v62 }
 0x14d   :  { %v4079_v49 = vpop.eup %4078  ;;  %v700_v53 = vpop.f32.mrb[28].mxu1  ;;  %v1406_v36 = vadd.f32 1.0, %v4077_v45  ;;  %4090 = verf.f32 %v1163_v46  ;;  %2343 = vmatprep.subr.bf16.mxu0 %v4014_v25  ;;  %v1031_v25 = vmul.f32 0.5, %v5160_v17  ;;  %v1035_v46 = vmul.f32 0.5, %v5174_v11  ;;  %v4021_v17 = vld [vmem:[%s6900_s3 + $0x1b0] ss:$8 sps:$4 sm:$0xff]  }
 0x14e   :  { %v5185_v55 = vadd.f32 %v700_v53, %v5010_v60  ;;  %v702_v56 = vpop.f32.mrb[29].mxu1  ;;  %v4081_v63 = vpop.eup %4080  ;;  %v1407_v41 = vadd.f32 1.0, %v4079_v49  ;;  %2206 = vmatprep.mubr.bf16.mxu0 %v1703_v43  ;;  %v4026_v11 = vld [vmem:[%s6900_s3 + $0x1c4] ss:$8 sps:$4 sm:$0xff]  }
 0x14f   :  { %v5192_v23 = vadd.f32 %v702_v56, %v5013_v61  ;;  %v704_v4 = vpop.f32.mrb[30].mxu1  ;;  %v4083_v24 = vpop.eup %4082  ;;  %v1410_v30 = vadd.f32 1.0, %v4081_v63  ;;  %2207 = vmatmul.mubr.bf16.gmra.mrb[16].mxu0 %v1702_v48  ;;  %v1534_v21 = vmul.f32 %v1406_v36, %v1022_v1 }
 0x150   :  { %v1166_v8 = vmul.f32 0.70710677, %v5185_v55  ;;  %v706_v9 = vpop.f32.mrb[31].mxu1  ;;  %v1411_v16 = vadd.f32 1.0, %v4083_v24  ;;  %v5200_v20 = vadd.f32 %v704_v4, %v5010_v60  ;;  %2344 = vmatpush1.bf16.msra.mxu0 %v4012_v54  ;;  %v1535_v26 = vmul.f32 %v1407_v41, %v1023_v47  ;;  %v4024_v47 = vld [vmem:[%s6900_s3 + $0x1c0] ss:$8 sps:$4 sm:$0xff]  }
 0x151   :  { %v1167_v38 = vmul.f32 0.70710677, %v5192_v23  ;;  %v1538_v3 = vmul.f32 %v1410_v30, %v1026_v2  ;;  %v5206_v22 = vadd.f32 %v706_v9, %v5013_v61  ;;  %2345 = vmatprep.subr.bf16.mxu0 %v4017_v57  ;;  %v4029_v9 = vld [vmem:[%s6900_s3 + $0x1d4] ss:$8 sps:$4 sm:$0xff]  }
 0x152   :  { %4092 = verf.f32 %v1166_v8  ;;  %v1539_v32 = vmul.f32 %v1411_v16, %v1027_v31  ;;  %v1170_v37 = vmul.f32 0.70710677, %v5200_v20  ;;  %v1038_v16 = vmul.f32 0.5, %v5185_v55 }
 0x153   :  { %4094 = verf.f32 %v1167_v38  ;;  %v1171_v50 = vmul.f32 0.70710677, %v5206_v22  ;;  %v1706_v6 = vpack.c.bf16 %v1538_v3, %v1534_v21 }
 0x154   :  { %v4085_v15 = vpop.eup %4084  ;;  %4096 = verf.f32 %v1170_v37  ;;  %v1707_v18 = vpack.c.bf16 %v1539_v32, %v1535_v26  ;;  %2346 = vmatpush1.bf16.msra.mxu0 %v4015_v52  ;;  %v1042_v26 = vmul.f32 0.5, %v5200_v20 }
 0x155   :  { %v4087_v7 = vpop.eup %4086  ;;  %v710_v59 = vpop.f32.mrb[32].mxu1  ;;  %v1414_v27 = vadd.f32 1.0, %v4085_v15  ;;  %4098 = verf.f32 %v1171_v50  ;;  %2347 = vmatprep.subr.bf16.mxu0 %v4020_v5  ;;  %v1039_v5 = vmul.f32 0.5, %v5192_v23  ;;  %v1043_v50 = vmul.f32 0.5, %v5206_v22  ;;  %v4027_v23 = vld [vmem:[%s6900_s3 + $0x1d0] ss:$8 sps:$4 sm:$0xff]  }
 0x156   :  { %v5217_v14 = vadd.f32 %v710_v59, %v5010_v60  ;;  %v712_v28 = vpop.f32.mrb[33].mxu1  ;;  %v4089_v19 = vpop.eup %4088  ;;  %v1415_v13 = vadd.f32 1.0, %v4087_v7  ;;  %2216 = vmatprep.mubr.bf16.mxu0 %v1707_v18  ;;  %v4032_v22 = vld [vmem:[%s6900_s3 + $0x1e4] ss:$8 sps:$4 sm:$0xff]  }
 0x157   :  { %v5224_v29 = vadd.f32 %v712_v28, %v5013_v61  ;;  %v714_v10 = vpop.f32.mrb[34].mxu1  ;;  %v4091_v12 = vpop.eup %4090  ;;  %v1418_v35 = vadd.f32 1.0, %v4089_v19  ;;  %2217 = vmatmul.mubr.bf16.gmra.mrb[20].mxu0 %v1706_v6  ;;  %v1542_v53 = vmul.f32 %v1414_v27, %v1030_v58 }
 0x158   :  { %v1174_v39 = vmul.f32 0.70710677, %v5217_v14  ;;  %v716_v45 = vpop.f32.mrb[35].mxu1  ;;  %v1419_v48 = vadd.f32 1.0, %v4091_v12  ;;  %v5232_v49 = vadd.f32 %v714_v10, %v5010_v60  ;;  %2348 = vmatpush1.bf16.msra.mxu0 %v4018_v0  ;;  %v1543_v54 = vmul.f32 %v1415_v13, %v1031_v25  ;;  %v4030_v25 = vld [vmem:[%s6900_s3 + $0x1e0] ss:$8 sps:$4 sm:$0xff]  }
 0x159   :  { %v1175_v33 = vmul.f32 0.70710677, %v5224_v29  ;;  %v1546_v62 = vmul.f32 %v1418_v35, %v1034_v34  ;;  %v5238_v43 = vadd.f32 %v716_v45, %v5013_v61  ;;  %2349 = vmatprep.subr.bf16.mxu0 %v4023_v44  ;;  %v4035_v45 = vld [vmem:[%s6900_s3 + $0x1f4] ss:$8 sps:$4 sm:$0xff]  }
 0x15a   :  { %4100 = verf.f32 %v1174_v39  ;;  %v1547_v36 = vmul.f32 %v1419_v48, %v1035_v46  ;;  %v1178_v56 = vmul.f32 0.70710677, %v5232_v49  ;;  %v1046_v48 = vmul.f32 0.5, %v5217_v14 }
 0x15b   :  { %4102 = verf.f32 %v1175_v33  ;;  %v1179_v63 = vmul.f32 0.70710677, %v5238_v43  ;;  %v1710_v1 = vpack.c.bf16 %v1546_v62, %v1542_v53 }
 0x15c   :  { %v4093_v57 = vpop.eup %4092  ;;  %4104 = verf.f32 %v1178_v56  ;;  %v1711_v24 = vpack.c.bf16 %v1547_v36, %v1543_v54  ;;  %2350 = vmatpush1.bf16.msra.mxu0 %v4021_v17  ;;  %v1050_v54 = vmul.f32 0.5, %v5232_v49 }
 0x15d   :  { %v4095_v41 = vpop.eup %4094  ;;  %v720_v4 = vpop.f32.mrb[36].mxu1  ;;  %v1422_v2 = vadd.f32 1.0, %v4093_v57  ;;  %4106 = verf.f32 %v1179_v63  ;;  %2351 = vmatprep.subr.bf16.mxu0 %v4026_v11  ;;  %v1047_v11 = vmul.f32 0.5, %v5224_v29  ;;  %v1051_v63 = vmul.f32 0.5, %v5238_v43  ;;  %v4033_v29 = vld [vmem:[%s6900_s3 + $0x1f0] ss:$8 sps:$4 sm:$0xff]  }
 0x15e   :  { %v5249_v30 = vadd.f32 %v720_v4, %v5010_v60  ;;  %v722_v8 = vpop.f32.mrb[37].mxu1  ;;  %v4097_v31 = vpop.eup %4096  ;;  %v1423_v38 = vadd.f32 1.0, %v4095_v41  ;;  %2226 = vmatprep.mubr.bf16.mxu0 %v1711_v24 }
 0x15f   :  { %v5256_v52 = vadd.f32 %v722_v8, %v5013_v61  ;;  %v724_v21 = vpop.f32.mrb[38].mxu1  ;;  %v4099_v3 = vpop.eup %4098  ;;  %v1426_v32 = vadd.f32 1.0, %v4097_v31  ;;  %2227 = vmatmul.mubr.bf16.gmra.mrb[24].mxu0 %v1710_v1  ;;  %v1550_v59 = vmul.f32 %v1422_v2, %v1038_v16 }
 0x160   :  { %v1182_v37 = vmul.f32 0.70710677, %v5249_v30  ;;  %v726_v15 = vpop.f32.mrb[39].mxu1  ;;  %v1427_v6 = vadd.f32 1.0, %v4099_v3  ;;  %v5264_v7 = vadd.f32 %v724_v21, %v5010_v60  ;;  %2352 = vmatpush1.bf16.msra.mxu0 %v4024_v47  ;;  %v1551_v0 = vmul.f32 %v1423_v38, %v1039_v5 }
 0x161   :  { %v1183_v55 = vmul.f32 0.70710677, %v5256_v52  ;;  %v1554_v20 = vmul.f32 %v1426_v32, %v1042_v26  ;;  %v5270_v18 = vadd.f32 %v726_v15, %v5013_v61  ;;  %2353 = vmatprep.subr.bf16.mxu0 %v4029_v9 }
 0x162   :  { %4108 = verf.f32 %v1182_v37  ;;  %v1555_v27 = vmul.f32 %v1427_v6, %v1043_v50  ;;  %v1186_v28 = vmul.f32 0.70710677, %v5264_v7  ;;  %v1054_v37 = vmul.f32 0.5, %v5249_v30 }
 0x163   :  { %4110 = verf.f32 %v1183_v55  ;;  %v1187_v19 = vmul.f32 0.70710677, %v5270_v18  ;;  %v1714_v58 = vpack.c.bf16 %v1554_v20, %v1550_v59  ;;  %v1058_v59 = vmul.f32 0.5, %v5264_v7 }
 0x164   :  { %v4101_v44 = vpop.eup %4100  ;;  %4112 = verf.f32 %v1186_v28  ;;  %v1715_v12 = vpack.c.bf16 %v1555_v27, %v1551_v0  ;;  %2354 = vmatpush1.bf16.msra.mxu0 %v4027_v23  ;;  %v1055_v23 = vmul.f32 0.5, %v5256_v52  ;;  %v1059_v27 = vmul.f32 0.5, %v5270_v18 }
 0x165   :  { %v4103_v13 = vpop.eup %4102  ;;  %v730_v10 = vpop.f32.mrb[40].mxu1  ;;  %v1430_v34 = vadd.f32 1.0, %v4101_v44  ;;  %4114 = verf.f32 %v1187_v19  ;;  %2355 = vmatprep.subr.bf16.mxu0 %v4032_v22 }
 0x166   :  { %v5281_v35 = vadd.f32 %v730_v10, %v5010_v60  ;;  %v732_v39 = vpop.f32.mrb[41].mxu1  ;;  %v4105_v46 = vpop.eup %4104  ;;  %v1431_v33 = vadd.f32 1.0, %v4103_v13  ;;  %2236 = vmatprep.mubr.bf16.mxu0 %v1715_v12 }
 0x167   :  { %v5288_v17 = vadd.f32 %v732_v39, %v5013_v61  ;;  %v734_v53 = vpop.f32.mrb[42].mxu1  ;;  %v4107_v62 = vpop.eup %4106  ;;  %v1434_v36 = vadd.f32 1.0, %v4105_v46  ;;  %2237 = vmatmul.mubr.bf16.gmra.mrb[28].mxu0 %v1714_v58  ;;  %v1558_v4 = vmul.f32 %v1430_v34, %v1046_v48 }
 0x168   :  { %v1190_v56 = vmul.f32 0.70710677, %v5281_v35  ;;  %v736_v57 = vpop.f32.mrb[43].mxu1  ;;  %v1435_v1 = vadd.f32 1.0, %v4107_v62  ;;  %v5296_v41 = vadd.f32 %v734_v53, %v5010_v60  ;;  %2356 = vmatpush1.bf16.msra.mxu0 %v4030_v25  ;;  %v1559_v47 = vmul.f32 %v1431_v33, %v1047_v11 }
 0x169   :  { %v1191_v14 = vmul.f32 0.70710677, %v5288_v17  ;;  %v1562_v49 = vmul.f32 %v1434_v36, %v1050_v54  ;;  %v5302_v24 = vadd.f32 %v736_v57, %v5013_v61  ;;  %2357 = vmatprep.subr.bf16.mxu0 %v4035_v45  ;;  %v1062_v62 = vmul.f32 0.5, %v5281_v35 }
 0x16a   :  { %4116 = verf.f32 %v1190_v56  ;;  %v1563_v43 = vmul.f32 %v1435_v1, %v1051_v63  ;;  %v1194_v2 = vmul.f32 0.70710677, %v5296_v41  ;;  %v1063_v57 = vmul.f32 0.5, %v5288_v17 }
 0x16b   :  { %4118 = verf.f32 %v1191_v14  ;;  %v1195_v9 = vmul.f32 0.70710677, %v5302_v24  ;;  %v1718_v31 = vpack.c.bf16 %v1562_v49, %v1558_v4  ;;  %v1066_v63 = vmul.f32 0.5, %v5296_v41 }
 0x16c   :  { %v4109_v8 = vpop.eup %4108  ;;  %4120 = verf.f32 %v1194_v2  ;;  %v1719_v21 = vpack.c.bf16 %v1563_v43, %v1559_v47  ;;  %2358 = vmatpush1.bf16.msra.mxu0 %v4033_v29  ;;  %v1067_v4 = vmul.f32 0.5, %v5302_v24 }
 0x16d   :  { %v4111_v16 = vpop.eup %4110  ;;  %v740_v38 = vpop.f32.mrb[44].mxu1  ;;  %v1438_v3 = vadd.f32 1.0, %v4109_v8  ;;  %4122 = verf.f32 %v1195_v9 }
 0x16e   :  { %v5307_v5 = vadd.f32 %v740_v38, %v5010_v60  ;;  %v742_v26 = vpop.f32.mrb[45].mxu1  ;;  %v4113_v32 = vpop.eup %4112  ;;  %v1439_v15 = vadd.f32 1.0, %v4111_v16  ;;  %2246 = vmatprep.mubr.bf16.mxu0 %v1719_v21 }
 0x16f   :  { %v5311_v50 = vadd.f32 %v742_v26, %v5013_v61  ;;  %v744_v6 = vpop.f32.mrb[46].mxu1  ;;  %v4115_v55 = vpop.eup %4114  ;;  %v1442_v20 = vadd.f32 1.0, %v4113_v32  ;;  %2247 = vmatmul.mubr.bf16.gmra.mrb[32].mxu0 %v1718_v31  ;;  %v1566_v19 = vmul.f32 %v1438_v3, %v1054_v37 }
 0x170   :  { %v1198_v22 = vmul.f32 0.70710677, %v5307_v5  ;;  %v746_v0 = vpop.f32.mrb[47].mxu1  ;;  %v1443_v28 = vadd.f32 1.0, %v4115_v55  ;;  %v5319_v44 = vadd.f32 %v744_v6, %v5010_v60  ;;  %v1567_v7 = vmul.f32 %v1439_v15, %v1055_v23 }
 0x171   :  { %v1199_v30 = vmul.f32 0.70710677, %v5311_v50  ;;  %v1570_v58 = vmul.f32 %v1442_v20, %v1058_v59  ;;  %v5322_v52 = vadd.f32 %v746_v0, %v5013_v61  ;;  %v1070_v6 = vmul.f32 0.5, %v5307_v5 }
 0x172   :  { %4124 = verf.f32 %v1198_v22  ;;  %v1571_v13 = vmul.f32 %v1443_v28, %v1059_v27  ;;  %v1202_v10 = vmul.f32 0.70710677, %v5319_v44  ;;  %v1071_v22 = vmul.f32 0.5, %v5311_v50 }
 0x173   :  { %4126 = verf.f32 %v1199_v30  ;;  %v1203_v18 = vmul.f32 0.70710677, %v5322_v52  ;;  %v1722_v25 = vpack.c.bf16 %v1570_v58, %v1566_v19  ;;  %v1074_v0 = vmul.f32 0.5, %v5319_v44 }
 0x174   :  { %v4117_v12 = vpop.eup %4116  ;;  %4128 = verf.f32 %v1202_v10  ;;  %v1723_v45 = vpack.c.bf16 %v1571_v13, %v1567_v7  ;;  %v1075_v19 = vmul.f32 0.5, %v5322_v52 }
 0x175   :  { %v4119_v34 = vpop.eup %4118  ;;  %v750_v39 = vpop.f32.mrb[48].mxu1  ;;  %v1446_v46 = vadd.f32 1.0, %v4117_v12  ;;  %4130 = verf.f32 %v1203_v18 }
 0x176   :  { %v5327_v48 = vadd.f32 %v750_v39, %v5010_v60  ;;  %v752_v33 = vpop.f32.mrb[49].mxu1  ;;  %v4121_v53 = vpop.eup %4120  ;;  %v1447_v11 = vadd.f32 1.0, %v4119_v34  ;;  %2256 = vmatprep.mubr.bf16.mxu0 %v1723_v45 }
 0x177   :  { %v5331_v54 = vadd.f32 %v752_v33, %v5013_v61  ;;  %v754_v36 = vpop.f32.mrb[50].mxu1  ;;  %v4123_v56 = vpop.eup %4122  ;;  %v1450_v1 = vadd.f32 1.0, %v4121_v53  ;;  %2257 = vmatmul.mubr.bf16.gmra.mrb[36].mxu0 %v1722_v25  ;;  %v1574_v43 = vmul.f32 %v1446_v46, %v1062_v62 }
 0x178   :  { %v1206_v14 = vmul.f32 0.70710677, %v5327_v48  ;;  %v756_v29 = vpop.f32.mrb[51].mxu1  ;;  %v1451_v49 = vadd.f32 1.0, %v4123_v56  ;;  %v5339_v47 = vadd.f32 %v754_v36, %v5010_v60  ;;  %v1575_v41 = vmul.f32 %v1447_v11, %v1063_v57 }
 0x179   :  { %v1207_v35 = vmul.f32 0.70710677, %v5331_v54  ;;  %v1578_v2 = vmul.f32 %v1450_v1, %v1066_v63  ;;  %v5342_v17 = vadd.f32 %v756_v29, %v5013_v61  ;;  %v266_v11 = vsub.s32 2, %v4996_v40 }
 0x17a   :  { %4132 = verf.f32 %v1206_v14  ;;  %v1579_v8 = vmul.f32 %v1451_v49, %v1067_v4  ;;  %v1210_v9 = vmul.f32 0.70710677, %v5339_v47  ;;  %v1078_v56 = vmul.f32 0.5, %v5327_v48 }
 0x17b   :  { %4134 = verf.f32 %v1207_v35  ;;  %v1211_v24 = vmul.f32 0.70710677, %v5342_v17  ;;  %v1726_v16 = vpack.c.bf16 %v1578_v2, %v1574_v43  ;;  %v270_v14 = vsub.s32 3, %v4996_v40 }
 0x17c   :  { %v4125_v31 = vpop.eup %4124  ;;  %4136 = verf.f32 %v1210_v9  ;;  %v1727_v3 = vpack.c.bf16 %v1579_v8, %v1575_v41  ;;  %v1079_v4 = vmul.f32 0.5, %v5331_v54  ;;  %v1082_v49 = vmul.f32 0.5, %v5339_v47 }
 0x17d   :  { %v4127_v38 = vpop.eup %4126  ;;  %v760_v21 = vpop.f32.mrb[52].mxu1  ;;  %v1454_v26 = vadd.f32 1.0, %v4125_v31  ;;  %4138 = verf.f32 %v1211_v24  ;;  %v1083_v48 = vmul.f32 0.5, %v5342_v17 }
 0x17e   :  { %v5347_v32 = vadd.f32 %v760_v21, %v5010_v60  ;;  %v762_v37 = vpop.f32.mrb[53].mxu1  ;;  %v4129_v15 = vpop.eup %4128  ;;  %v1455_v55 = vadd.f32 1.0, %v4127_v38  ;;  %2266 = vmatprep.mubr.bf16.mxu0 %v1727_v3 }
 0x17f   :  { %v5351_v23 = vadd.f32 %v762_v37, %v5013_v61  ;;  %v764_v59 = vpop.f32.mrb[54].mxu1  ;;  %v4131_v20 = vpop.eup %4130  ;;  %v1458_v27 = vadd.f32 1.0, %v4129_v15  ;;  %2267 = vmatmul.mubr.bf16.gmra.mrb[40].mxu0 %v1726_v16  ;;  %v1582_v13 = vmul.f32 %v1454_v26, %v1070_v6 }
 0x180   :  { %v1214_v28 = vmul.f32 0.70710677, %v5347_v32  ;;  %v766_v30 = vpop.f32.mrb[55].mxu1  ;;  %v1459_v58 = vadd.f32 1.0, %v4131_v20  ;;  %v5359_v7 = vadd.f32 %v764_v59, %v5010_v60  ;;  %v1583_v44 = vmul.f32 %v1455_v55, %v1071_v22  ;;  %v4356_v59 = vld [vmem:[%s6901_s2] sm:$0xf] }
 0x181   :  { %v1215_v5 = vmul.f32 0.70710677, %v5351_v23  ;;  %v1586_v10 = vmul.f32 %v1458_v27, %v1074_v0  ;;  %v5362_v50 = vadd.f32 %v766_v30, %v5013_v61  ;;  %v5394_v20 = vrot.slane %v4356_v59, %v266_v11 }
 0x182   :  { %4140 = verf.f32 %v1214_v28  ;;  %v1587_v12 = vmul.f32 %v1459_v58, %v1075_v19  ;;  %v1218_v18 = vmul.f32 0.70710677, %v5359_v7  ;;  %v1086_v0 = vmul.f32 0.5, %v5347_v32 }
 0x183   :  { %4142 = verf.f32 %v1215_v5  ;;  %v1219_v52 = vmul.f32 0.70710677, %v5362_v50  ;;  %v1730_v34 = vpack.c.bf16 %v1586_v10, %v1582_v13  ;;  %v5400_v19 = vrot.slane %v4356_v59, %v270_v14 }
 0x184   :  { %v4133_v25 = vpop.eup %4132  ;;  %4144 = verf.f32 %v1218_v18  ;;  %v1731_v46 = vpack.c.bf16 %v1587_v12, %v1583_v44  ;;  %v1087_v5 = vmul.f32 0.5, %v5351_v23  ;;  %v1090_v13 = vmul.f32 0.5, %v5359_v7 }
 0x185   :  { %v4135_v39 = vpop.eup %4134  ;;  %v770_v45 = vpop.f32.mrb[56].mxu1  ;;  %v1462_v33 = vadd.f32 1.0, %v4133_v25  ;;  %4146 = verf.f32 %v1219_v52  ;;  %v1091_v32 = vmul.f32 0.5, %v5362_v50 }
 0x186   :  { %v5367_v53 = vadd.f32 %v770_v45, %v5010_v60  ;;  %v772_v62 = vpop.f32.mrb[57].mxu1  ;;  %v4137_v36 = vpop.eup %4136  ;;  %v1463_v57 = vadd.f32 1.0, %v4135_v39  ;;  %2276 = vmatprep.mubr.bf16.mxu0 %v1731_v46 }
 0x187   :  { %v5372_v63 = vadd.f32 %v772_v62, %v5013_v61  ;;  %v774_v1 = vpop.f32.mrb[58].mxu1  ;;  %v4139_v29 = vpop.eup %4138  ;;  %v1466_v35 = vadd.f32 1.0, %v4137_v36  ;;  %2277 = vmatmul.mubr.bf16.gmra.mrb[44].mxu0 %v1730_v34  ;;  %v1590_v31 = vmul.f32 %v1462_v33, %v1078_v56 }
 0x188   :  { %v1222_v43 = vmul.f32 0.70710677, %v5367_v53  ;;  %v776_v2 = vpop.f32.mrb[59].mxu1  ;;  %v1467_v41 = vadd.f32 1.0, %v4139_v29  ;;  %v5381_v9 = vadd.f32 %v774_v1, %v5010_v60  ;;  %v1591_v47 = vmul.f32 %v1463_v57, %v1079_v4 }
 0x189   :  { %v1223_v8 = vmul.f32 0.70710677, %v5372_v63  ;;  %v1594_v40 = vmul.f32 %v1466_v35, %v1082_v49  ;;  %v5384_v54 = vadd.f32 %v776_v2, %v5013_v61  ;;  %v1094_v14 = vmul.f32 0.5, %v5367_v53 }
 0x18a   :  { %4148 = verf.f32 %v1222_v43  ;;  %v1595_v24 = vmul.f32 %v1467_v41, %v1083_v48  ;;  %v1226_v16 = vmul.f32 0.70710677, %v5381_v9  ;;  %v1095_v43 = vmul.f32 0.5, %v5372_v63 }
 0x18b   :  { %4150 = verf.f32 %v1223_v8  ;;  %v1227_v17 = vmul.f32 0.70710677, %v5384_v54  ;;  %v1734_v21 = vpack.c.bf16 %v1594_v40, %v1590_v31  ;;  %v1098_v2 = vmul.f32 0.5, %v5381_v9 }
 0x18c   :  { %v4141_v38 = vpop.eup %4140  ;;  %4152 = verf.f32 %v1226_v16  ;;  %v1735_v37 = vpack.c.bf16 %v1595_v24, %v1591_v47  ;;  %v1099_v31 = vmul.f32 0.5, %v5384_v54 }
 0x18d   :  { %v4143_v3 = vpop.eup %4142  ;;  %v780_v26 = vpop.f32.mrb[60].mxu1  ;;  %v1470_v15 = vadd.f32 1.0, %v4141_v38  ;;  %4154 = verf.f32 %v1227_v17 }
 0x18e   :  { %v5389_v6 = vadd.f32 %v780_v26, %v5010_v60  ;;  %v782_v55 = vpop.f32.mrb[61].mxu1  ;;  %v4145_v22 = vpop.eup %4144  ;;  %v1471_v27 = vadd.f32 1.0, %v4143_v3  ;;  %2286 = vmatprep.mubr.bf16.mxu0 %v1735_v37 }
 0x18f   :  { %v5398_v28 = vadd.f32 %v782_v55, %v5013_v61  ;;  %v784_v30 = vpop.f32.mrb[62].mxu1  ;;  %v4147_v58 = vpop.eup %4146  ;;  %v1474_v10 = vadd.f32 1.0, %v4145_v22  ;;  %2287 = vmatmul.mubr.bf16.gmra.mrb[48].mxu0 %v1734_v21  ;;  %v1598_v34 = vmul.f32 %v1470_v15, %v1086_v0 }
 0x190   :  { %v1230_v44 = vmul.f32 0.70710677, %v5389_v6  ;;  %v786_v12 = vpop.f32.mrb[63].mxu1  ;;  %v1475_v18 = vadd.f32 1.0, %v4147_v58  ;;  %v5408_v52 = vadd.f32 %v784_v30, %v5010_v60  ;;  %v1599_v7 = vmul.f32 %v1471_v27, %v1087_v5 }
 0x191   :  { %v1231_v25 = vmul.f32 0.70710677, %v5398_v28  ;;  %v1602_v39 = vmul.f32 %v1474_v10, %v1090_v13  ;;  %v5411_v23 = vadd.f32 %v786_v12, %v5013_v61  ;;  %v1102_v27 = vmul.f32 0.5, %v5389_v6 }
 0x192   :  { %4156 = verf.f32 %v1230_v44  ;;  %v1603_v45 = vmul.f32 %v1475_v18, %v1091_v32  ;;  %v1234_v46 = vmul.f32 0.70710677, %v5408_v52  ;;  %v1103_v10 = vmul.f32 0.5, %v5398_v28 }
 0x193   :  { %4158 = verf.f32 %v1231_v25  ;;  %v1235_v50 = vmul.f32 0.70710677, %v5411_v23  ;;  %v1738_v62 = vpack.c.bf16 %v1602_v39, %v1598_v34  ;;  %v1106_v44 = vmul.f32 0.5, %v5408_v52 }
 0x194   :  { %v4149_v33 = vpop.eup %4148  ;;  %4160 = verf.f32 %v1234_v46  ;;  %v1739_v60 = vpack.c.bf16 %v1603_v45, %v1599_v7  ;;  %v1107_v25 = vmul.f32 0.5, %v5411_v23 }
 0x195   :  { %v4151_v11 = vpop.eup %4150  ;;  %v823_v36 = vpop.f32.mrb[64].mxu1  ;;  %v1478_v56 = vadd.f32 1.0, %v4149_v33  ;;  %4162 = verf.f32 %v1235_v50 }
 0x196   :  { %v5416_v57 = vadd.f32 %v823_v36, %v5394_v20  ;;  %v825_v61 = vpop.f32.mrb[65].mxu1  ;;  %v4153_v1 = vpop.eup %4152  ;;  %v1479_v29 = vadd.f32 1.0, %v4151_v11  ;;  %2296 = vmatprep.mubr.bf16.mxu0 %v1739_v60 }
 0x197   :  { %v5420_v4 = vadd.f32 %v825_v61, %v5400_v19  ;;  %v827_v49 = vpop.f32.mrb[66].mxu1  ;;  %v4155_v35 = vpop.eup %4154  ;;  %v1482_v48 = vadd.f32 1.0, %v4153_v1  ;;  %2297 = vmatmul.mubr.bf16.gmra.mrb[52].mxu0 %v1738_v62  ;;  %v1606_v24 = vmul.f32 %v1478_v56, %v1094_v14 }
 0x198   :  { %v1112_v41 = vmul.f32 0.70710677, %v5416_v57  ;;  %v829_v8 = vpop.f32.mrb[67].mxu1  ;;  %v1483_v40 = vadd.f32 1.0, %v4155_v35  ;;  %v5428_v47 = vadd.f32 %v827_v49, %v5394_v20  ;;  %v1607_v9 = vmul.f32 %v1479_v29, %v1095_v43 }
 0x199   :  { %v1113_v53 = vmul.f32 0.70710677, %v5420_v4  ;;  %v1610_v16 = vmul.f32 %v1482_v48, %v1098_v2  ;;  %v5431_v63 = vadd.f32 %v829_v8, %v5400_v19  ;;  %v984_v29 = vmul.f32 0.5, %v5416_v57 }
 0x19a   :  { %4164 = verf.f32 %v1112_v41  ;;  %v1611_v38 = vmul.f32 %v1483_v40, %v1099_v31  ;;  %v1116_v17 = vmul.f32 0.70710677, %v5428_v47  ;;  %v985_v48 = vmul.f32 0.5, %v5420_v4 }
 0x19b   :  { %4166 = verf.f32 %v1113_v53  ;;  %v1117_v54 = vmul.f32 0.70710677, %v5431_v63  ;;  %v1742_v3 = vpack.c.bf16 %v1610_v16, %v1606_v24  ;;  %v988_v41 = vmul.f32 0.5, %v5428_v47 }
 0x19c   :  { %v4157_v21 = vpop.eup %4156  ;;  %4168 = verf.f32 %v1116_v17  ;;  %v1743_v15 = vpack.c.bf16 %v1611_v38, %v1607_v9  ;;  %v989_v53 = vmul.f32 0.5, %v5431_v63 }
 0x19d   :  { %v4159_v26 = vpop.eup %4158  ;;  %v833_v37 = vpop.f32.mrb[68].mxu1  ;;  %v1486_v55 = vadd.f32 1.0, %v4157_v21  ;;  %4170 = verf.f32 %v1117_v54 }
 0x19e   :  { %v5436_v59 = vadd.f32 %v833_v37, %v5394_v20  ;;  %v835_v22 = vpop.f32.mrb[69].mxu1  ;;  %v4161_v0 = vpop.eup %4160  ;;  %v1487_v30 = vadd.f32 1.0, %v4159_v26  ;;  %2306 = vmatprep.mubr.bf16.mxu0 %v1743_v15 }
 0x19f   :  { %v5440_v58 = vadd.f32 %v835_v22, %v5400_v19  ;;  %v837_v5 = vpop.f32.mrb[70].mxu1  ;;  %v4163_v13 = vpop.eup %4162  ;;  %v1490_v12 = vadd.f32 1.0, %v4161_v0  ;;  %2307 = vmatmul.mubr.bf16.gmra.mrb[56].mxu0 %v1742_v3  ;;  %v1614_v7 = vmul.f32 %v1486_v55, %v1102_v27 }
 0x1a0   :  { %v1120_v32 = vmul.f32 0.70710677, %v5436_v59  ;;  %v839_v18 = vpop.f32.mrb[71].mxu1  ;;  %v1491_v34 = vadd.f32 1.0, %v4163_v13  ;;  %v5448_v39 = vadd.f32 %v837_v5, %v5394_v20  ;;  %v1615_v52 = vmul.f32 %v1487_v30, %v1103_v10 }
 0x1a1   :  { %v1121_v6 = vmul.f32 0.70710677, %v5440_v58  ;;  %v1618_v45 = vmul.f32 %v1490_v12, %v1106_v44  ;;  %v5451_v28 = vadd.f32 %v839_v18, %v5400_v19  ;;  %v992_v30 = vmul.f32 0.5, %v5436_v59 }
 0x1a2   :  { %4172 = verf.f32 %v1120_v32  ;;  %v1619_v46 = vmul.f32 %v1491_v34, %v1107_v25  ;;  %v1124_v33 = vmul.f32 0.70710677, %v5448_v39  ;;  %v993_v12 = vmul.f32 0.5, %v5440_v58 }
 0x1a3   :  { %4174 = verf.f32 %v1121_v6  ;;  %v1125_v23 = vmul.f32 0.70710677, %v5451_v28  ;;  %v1746_v62 = vpack.c.bf16 %v1618_v45, %v1614_v7  ;;  %v996_v32 = vmul.f32 0.5, %v5448_v39 }
 0x1a4   :  { %v4165_v50 = vpop.eup %4164  ;;  %4176 = verf.f32 %v1124_v33  ;;  %v1747_v60 = vpack.c.bf16 %v1619_v46, %v1615_v52  ;;  %v997_v6 = vmul.f32 0.5, %v5451_v28 }
 0x1a5   :  { %v4167_v11 = vpop.eup %4166  ;;  %v843_v36 = vpop.f32.mrb[72].mxu1  ;;  %v1368_v56 = vadd.f32 1.0, %v4165_v50  ;;  %4178 = verf.f32 %v1125_v23 }
 0x1a6   :  { %v5456_v61 = vadd.f32 %v843_v36, %v5394_v20  ;;  %v845_v1 = vpop.f32.mrb[73].mxu1  ;;  %v4169_v14 = vpop.eup %4168  ;;  %v1369_v49 = vadd.f32 1.0, %v4167_v11  ;;  %2316 = vmatprep.mubr.bf16.mxu0 %v1747_v60 }
 0x1a7   :  { %v5460_v35 = vadd.f32 %v845_v1, %v5400_v19  ;;  %v847_v43 = vpop.f32.mrb[74].mxu1  ;;  %v4171_v2 = vpop.eup %4170  ;;  %v1372_v8 = vadd.f32 1.0, %v4169_v14  ;;  %2317 = vmatmul.mubr.bf16.gmra.mrb[60].mxu0 %v1746_v62  ;;  %v1496_v9 = vmul.f32 %v1368_v56, %v984_v29 }
 0x1a8   :  { %v1128_v31 = vmul.f32 0.70710677, %v5456_v61  ;;  %v849_v40 = vpop.f32.mrb[75].mxu1  ;;  %v1373_v24 = vadd.f32 1.0, %v4171_v2  ;;  %v5468_v16 = vadd.f32 %v847_v43, %v5394_v20  ;;  %v1497_v47 = vmul.f32 %v1369_v49, %v985_v48 }
 0x1a9   :  { %v1129_v57 = vmul.f32 0.70710677, %v5460_v35  ;;  %v1500_v38 = vmul.f32 %v1372_v8, %v988_v41  ;;  %v5471_v4 = vadd.f32 %v849_v40, %v5400_v19  ;;  %v1000_v49 = vmul.f32 0.5, %v5456_v61 }
 0x1aa   :  { %4180 = verf.f32 %v1128_v31  ;;  %v1501_v17 = vmul.f32 %v1373_v24, %v989_v53  ;;  %v1132_v21 = vmul.f32 0.70710677, %v5468_v16  ;;  %v1001_v8 = vmul.f32 0.5, %v5460_v35 }
 0x1ab   :  { %4182 = verf.f32 %v1129_v57  ;;  %v1688_v3 = vpack.c.bf16 %v1500_v38, %v1496_v9  ;;  %v1133_v63 = vmul.f32 0.70710677, %v5471_v4  ;;  %v1004_v31 = vmul.f32 0.5, %v5468_v16 }
 0x1ac   :  { %v4173_v54 = vpop.eup %4172  ;;  %4184 = verf.f32 %v1132_v21  ;;  %v1689_v15 = vpack.c.bf16 %v1501_v17, %v1497_v47  ;;  %v1005_v57 = vmul.f32 0.5, %v5471_v4 }
 0x1ad   :  { %v4175_v26 = vpop.eup %4174  ;;  %v853_v37 = vpop.f32.mrb[76].mxu1  ;;  %v1376_v55 = vadd.f32 1.0, %v4173_v54  ;;  %4186 = verf.f32 %v1133_v63 }
 0x1ae   :  { %v5476_v22 = vadd.f32 %v853_v37, %v5394_v20  ;;  %v855_v0 = vpop.f32.mrb[77].mxu1  ;;  %v4177_v27 = vpop.eup %4176  ;;  %v1377_v5 = vadd.f32 1.0, %v4175_v26  ;;  %2359 = vmatprep.mubr.bf16.mxu0 %v1689_v15 }
 0x1af   :  { %v5480_v13 = vadd.f32 %v855_v0, %v5400_v19  ;;  %v857_v10 = vpop.f32.mrb[78].mxu1  ;;  %v4179_v44 = vpop.eup %4178  ;;  %v1380_v18 = vadd.f32 1.0, %v4177_v27  ;;  %2360 = vmatmul.mubr.bf16.vlgmr.msra.gmra.mrb[0].mxu0 %v1688_v3  ;;  %v1504_v52 = vmul.f32 %v1376_v55, %v992_v30 }
 0x1b0   :  { %v1136_v25 = vmul.f32 0.70710677, %v5476_v22  ;;  %v859_v34 = vpop.f32.mrb[79].mxu1  ;;  %v1381_v7 = vadd.f32 1.0, %v4179_v44  ;;  %v5488_v45 = vadd.f32 %v857_v10, %v5394_v20  ;;  %v1505_v39 = vmul.f32 %v1377_v5, %v993_v12 }
 0x1b1   :  { %v1137_v59 = vmul.f32 0.70710677, %v5480_v13  ;;  %v1508_v46 = vmul.f32 %v1380_v18, %v996_v32  ;;  %v5491_v58 = vadd.f32 %v859_v34, %v5400_v19  ;;  %v1008_v5 = vmul.f32 0.5, %v5476_v22 }
 0x1b2   :  { %4188 = verf.f32 %v1136_v25  ;;  %v1509_v33 = vmul.f32 %v1381_v7, %v997_v6  ;;  %v1140_v50 = vmul.f32 0.70710677, %v5488_v45  ;;  %v1009_v18 = vmul.f32 0.5, %v5480_v13 }
 0x1b3   :  { %4190 = verf.f32 %v1137_v59  ;;  %v1141_v28 = vmul.f32 0.70710677, %v5491_v58  ;;  %v1692_v62 = vpack.c.bf16 %v1508_v46, %v1504_v52  ;;  %v1012_v25 = vmul.f32 0.5, %v5488_v45 }
 0x1b4   :  { %v4181_v23 = vpop.eup %4180  ;;  %4192 = verf.f32 %v1140_v50  ;;  %v1693_v60 = vpack.c.bf16 %v1509_v33, %v1505_v39  ;;  %v1013_v59 = vmul.f32 0.5, %v5491_v58 }
 0x1b5   :  { %v4183_v11 = vpop.eup %4182  ;;  %v863_v36 = vpop.f32.mrb[80].mxu1  ;;  %v1384_v56 = vadd.f32 1.0, %v4181_v23  ;;  %4194 = verf.f32 %v1141_v28 }
 0x1b6   :  { %v5496_v1 = vadd.f32 %v863_v36, %v5394_v20  ;;  %v865_v14 = vpop.f32.mrb[81].mxu1  ;;  %v4185_v29 = vpop.eup %4184  ;;  %v1385_v43 = vadd.f32 1.0, %v4183_v11  ;;  %2369 = vmatprep.mubr.bf16.mxu0 %v1693_v60 }
 0x1b7   :  { %v5500_v2 = vadd.f32 %v865_v14, %v5400_v19  ;;  %v867_v48 = vpop.f32.mrb[82].mxu1  ;;  %v4187_v41 = vpop.eup %4186  ;;  %v1388_v40 = vadd.f32 1.0, %v4185_v29  ;;  %2370 = vmatmul.mubr.bf16.gmra.mrb[4].mxu0 %v1692_v62  ;;  %v1512_v47 = vmul.f32 %v1384_v56, %v1000_v49 }
 0x1b8   :  { %v1144_v53 = vmul.f32 0.70710677, %v5496_v1  ;;  %v869_v24 = vpop.f32.mrb[83].mxu1  ;;  %v1389_v9 = vadd.f32 1.0, %v4187_v41  ;;  %v5508_v38 = vadd.f32 %v867_v48, %v5394_v20  ;;  %v1513_v16 = vmul.f32 %v1385_v43, %v1001_v8 }
 0x1b9   :  { %v1145_v61 = vmul.f32 0.70710677, %v5500_v2  ;;  %v1516_v17 = vmul.f32 %v1388_v40, %v1004_v31  ;;  %v5511_v35 = vadd.f32 %v869_v24, %v5400_v19  ;;  %v1016_v43 = vmul.f32 0.5, %v5496_v1 }
 0x1ba   :  { %4196 = verf.f32 %v1144_v53  ;;  %v1517_v21 = vmul.f32 %v1389_v9, %v1005_v57  ;;  %v1148_v54 = vmul.f32 0.70710677, %v5508_v38  ;;  %v1017_v40 = vmul.f32 0.5, %v5500_v2 }
 0x1bb   :  { %4198 = verf.f32 %v1145_v61  ;;  %v1149_v4 = vmul.f32 0.70710677, %v5511_v35  ;;  %v1696_v63 = vpack.c.bf16 %v1516_v17, %v1512_v47  ;;  %v1020_v53 = vmul.f32 0.5, %v5508_v38 }
 0x1bc   :  { %v4189_v3 = vpop.eup %4188  ;;  %4200 = verf.f32 %v1148_v54  ;;  %v1697_v15 = vpack.c.bf16 %v1517_v21, %v1513_v16  ;;  %v1021_v61 = vmul.f32 0.5, %v5511_v35 }
 0x1bd   :  { %v4191_v26 = vpop.eup %4190  ;;  %v873_v37 = vpop.f32.mrb[84].mxu1  ;;  %v1392_v55 = vadd.f32 1.0, %v4189_v3  ;;  %4202 = verf.f32 %v1149_v4 }
 0x1be   :  { %v5516_v0 = vadd.f32 %v873_v37, %v5394_v20  ;;  %v875_v27 = vpop.f32.mrb[85].mxu1  ;;  %v4193_v30 = vpop.eup %4192  ;;  %v1393_v10 = vadd.f32 1.0, %v4191_v26  ;;  %2379 = vmatprep.mubr.bf16.mxu0 %v1697_v15 }
 0x1bf   :  { %v5520_v44 = vadd.f32 %v875_v27, %v5400_v19  ;;  %v877_v12 = vpop.f32.mrb[86].mxu1  ;;  %v4195_v32 = vpop.eup %4194  ;;  %v1396_v34 = vadd.f32 1.0, %v4193_v30  ;;  %2380 = vmatmul.mubr.bf16.gmra.mrb[8].mxu0 %v1696_v63  ;;  %v1520_v39 = vmul.f32 %v1392_v55, %v1008_v5 }
 0x1c0   :  { %v1152_v6 = vmul.f32 0.70710677, %v5516_v0  ;;  %v879_v7 = vpop.f32.mrb[87].mxu1  ;;  %v1397_v52 = vadd.f32 1.0, %v4195_v32  ;;  %v5528_v46 = vadd.f32 %v877_v12, %v5394_v20  ;;  %v1521_v45 = vmul.f32 %v1393_v10, %v1009_v18 }
 0x1c1   :  { %v1153_v22 = vmul.f32 0.70710677, %v5520_v44  ;;  %v1524_v33 = vmul.f32 %v1396_v34, %v1012_v25  ;;  %v5531_v13 = vadd.f32 %v879_v7, %v5400_v19  ;;  %v1024_v10 = vmul.f32 0.5, %v5516_v0 }
 0x1c2   :  { %4204 = verf.f32 %v1152_v6  ;;  %v1525_v50 = vmul.f32 %v1397_v52, %v1013_v59  ;;  %v1156_v23 = vmul.f32 0.70710677, %v5528_v46  ;;  %v1025_v34 = vmul.f32 0.5, %v5520_v44 }
 0x1c3   :  { %4206 = verf.f32 %v1153_v22  ;;  %v1157_v58 = vmul.f32 0.70710677, %v5531_v13  ;;  %v1700_v62 = vpack.c.bf16 %v1524_v33, %v1520_v39  ;;  %v1028_v6 = vmul.f32 0.5, %v5528_v46 }
 0x1c4   :  { %v4197_v28 = vpop.eup %4196  ;;  %4208 = verf.f32 %v1156_v23  ;;  %v1701_v60 = vpack.c.bf16 %v1525_v50, %v1521_v45  ;;  %v1029_v22 = vmul.f32 0.5, %v5531_v13 }
 0x1c5   :  { %v4199_v11 = vpop.eup %4198  ;;  %v883_v36 = vpop.f32.mrb[88].mxu1  ;;  %v1400_v56 = vadd.f32 1.0, %v4197_v28  ;;  %4210 = verf.f32 %v1157_v58 }
 0x1c6   :  { %v5536_v14 = vadd.f32 %v883_v36, %v5394_v20  ;;  %v885_v29 = vpop.f32.mrb[89].mxu1  ;;  %v4201_v49 = vpop.eup %4200  ;;  %v1401_v48 = vadd.f32 1.0, %v4199_v11  ;;  %2389 = vmatprep.mubr.bf16.mxu0 %v1701_v60 }
 0x1c7   :  { %v5540_v41 = vadd.f32 %v885_v29, %v5400_v19  ;;  %v887_v8 = vpop.f32.mrb[90].mxu1  ;;  %v4203_v31 = vpop.eup %4202  ;;  %v1404_v24 = vadd.f32 1.0, %v4201_v49  ;;  %2390 = vmatmul.mubr.bf16.gmra.mrb[12].mxu0 %v1700_v62  ;;  %v1528_v16 = vmul.f32 %v1400_v56, %v1016_v43 }
 0x1c8   :  { %v1160_v57 = vmul.f32 0.70710677, %v5536_v14  ;;  %v889_v9 = vpop.f32.mrb[91].mxu1  ;;  %v1405_v47 = vadd.f32 1.0, %v4203_v31  ;;  %v5548_v17 = vadd.f32 %v887_v8, %v5394_v20  ;;  %v1529_v38 = vmul.f32 %v1401_v48, %v1017_v40 }
 0x1c9   :  { %v1161_v1 = vmul.f32 0.70710677, %v5540_v41  ;;  %v1532_v21 = vmul.f32 %v1404_v24, %v1020_v53  ;;  %v5551_v2 = vadd.f32 %v889_v9, %v5400_v19  ;;  %v1032_v48 = vmul.f32 0.5, %v5536_v14 }
 0x1ca   :  { %4212 = verf.f32 %v1160_v57  ;;  %v1533_v54 = vmul.f32 %v1405_v47, %v1021_v61  ;;  %v1164_v3 = vmul.f32 0.70710677, %v5548_v17  ;;  %v1033_v24 = vmul.f32 0.5, %v5540_v41 }
 0x1cb   :  { %4214 = verf.f32 %v1161_v1  ;;  %v1165_v35 = vmul.f32 0.70710677, %v5551_v2  ;;  %v1704_v63 = vpack.c.bf16 %v1532_v21, %v1528_v16  ;;  %v1036_v57 = vmul.f32 0.5, %v5548_v17 }
 0x1cc   :  { %v4205_v4 = vpop.eup %4204  ;;  %4216 = verf.f32 %v1164_v3  ;;  %v1705_v15 = vpack.c.bf16 %v1533_v54, %v1529_v38  ;;  %v1037_v1 = vmul.f32 0.5, %v5551_v2 }
 0x1cd   :  { %v4207_v26 = vpop.eup %4206  ;;  %v893_v37 = vpop.f32.mrb[92].mxu1  ;;  %v1408_v55 = vadd.f32 1.0, %v4205_v4  ;;  %4218 = verf.f32 %v1165_v35 }
 0x1ce   :  { %v5556_v27 = vadd.f32 %v893_v37, %v5394_v20  ;;  %v895_v30 = vpop.f32.mrb[93].mxu1  ;;  %v4209_v5 = vpop.eup %4208  ;;  %v1409_v12 = vadd.f32 1.0, %v4207_v26  ;;  %2399 = vmatprep.mubr.bf16.mxu0 %v1705_v15 }
 0x1cf   :  { %v5560_v32 = vadd.f32 %v895_v30, %v5400_v19  ;;  %v897_v18 = vpop.f32.mrb[94].mxu1  ;;  %v4211_v25 = vpop.eup %4210  ;;  %v1412_v7 = vadd.f32 1.0, %v4209_v5  ;;  %2400 = vmatmul.mubr.bf16.gmra.mrb[16].mxu0 %v1704_v63  ;;  %v1536_v45 = vmul.f32 %v1408_v55, %v1024_v10 }
 0x1d0   :  { %v1168_v59 = vmul.f32 0.70710677, %v5556_v27  ;;  %v899_v52 = vpop.f32.mrb[95].mxu1  ;;  %v1413_v39 = vadd.f32 1.0, %v4211_v25  ;;  %v5568_v33 = vadd.f32 %v897_v18, %v5394_v20  ;;  %v1537_v46 = vmul.f32 %v1409_v12, %v1025_v34 }
 0x1d1   :  { %v1169_v0 = vmul.f32 0.70710677, %v5560_v32  ;;  %v1540_v50 = vmul.f32 %v1412_v7, %v1028_v6  ;;  %v5571_v44 = vadd.f32 %v899_v52, %v5400_v19  ;;  %v1040_v12 = vmul.f32 0.5, %v5556_v27 }
 0x1d2   :  { %4220 = verf.f32 %v1168_v59  ;;  %v1541_v23 = vmul.f32 %v1413_v39, %v1029_v22  ;;  %v1172_v28 = vmul.f32 0.70710677, %v5568_v33  ;;  %v1041_v7 = vmul.f32 0.5, %v5560_v32 }
 0x1d3   :  { %4222 = verf.f32 %v1169_v0  ;;  %v1173_v13 = vmul.f32 0.70710677, %v5571_v44  ;;  %v1708_v62 = vpack.c.bf16 %v1540_v50, %v1536_v45  ;;  %v1044_v59 = vmul.f32 0.5, %v5568_v33 }
 0x1d4   :  { %v4213_v58 = vpop.eup %4212  ;;  %4224 = verf.f32 %v1172_v28  ;;  %v1709_v60 = vpack.c.bf16 %v1541_v23, %v1537_v46  ;;  %v1045_v0 = vmul.f32 0.5, %v5571_v44 }
 0x1d5   :  { %v4215_v11 = vpop.eup %4214  ;;  %v903_v36 = vpop.f32.mrb[96].mxu1  ;;  %v1416_v56 = vadd.f32 1.0, %v4213_v58  ;;  %4226 = verf.f32 %v1173_v13 }
 0x1d6   :  { %v5576_v29 = vadd.f32 %v903_v36, %v5394_v20  ;;  %v905_v49 = vpop.f32.mrb[97].mxu1  ;;  %v4217_v43 = vpop.eup %4216  ;;  %v1417_v8 = vadd.f32 1.0, %v4215_v11  ;;  %2409 = vmatprep.mubr.bf16.mxu0 %v1709_v60 }
 0x1d7   :  { %v5580_v31 = vadd.f32 %v905_v49, %v5400_v19  ;;  %v907_v40 = vpop.f32.mrb[98].mxu1  ;;  %v4219_v53 = vpop.eup %4218  ;;  %v1420_v9 = vadd.f32 1.0, %v4217_v43  ;;  %2410 = vmatmul.mubr.bf16.gmra.mrb[20].mxu0 %v1708_v62  ;;  %v1544_v38 = vmul.f32 %v1416_v56, %v1032_v48 }
 0x1d8   :  { %v1176_v61 = vmul.f32 0.70710677, %v5576_v29  ;;  %v909_v47 = vpop.f32.mrb[99].mxu1  ;;  %v1421_v16 = vadd.f32 1.0, %v4219_v53  ;;  %v5588_v21 = vadd.f32 %v907_v40, %v5394_v20  ;;  %v1545_v17 = vmul.f32 %v1417_v8, %v1033_v24 }
 0x1d9   :  { %v1177_v14 = vmul.f32 0.70710677, %v5580_v31  ;;  %v1548_v54 = vmul.f32 %v1420_v9, %v1036_v57  ;;  %v5591_v41 = vadd.f32 %v909_v47, %v5400_v19  ;;  %v1048_v8 = vmul.f32 0.5, %v5576_v29 }
 0x1da   :  { %4228 = verf.f32 %v1176_v61  ;;  %v1549_v3 = vmul.f32 %v1421_v16, %v1037_v1  ;;  %v1180_v4 = vmul.f32 0.70710677, %v5588_v21  ;;  %v1049_v9 = vmul.f32 0.5, %v5580_v31 }
 0x1db   :  { %4230 = verf.f32 %v1177_v14  ;;  %v1181_v2 = vmul.f32 0.70710677, %v5591_v41  ;;  %v1712_v63 = vpack.c.bf16 %v1548_v54, %v1544_v38  ;;  %v1052_v61 = vmul.f32 0.5, %v5588_v21 }
 0x1dc   :  { %v4221_v35 = vpop.eup %4220  ;;  %4232 = verf.f32 %v1180_v4  ;;  %v1713_v15 = vpack.c.bf16 %v1549_v3, %v1545_v17  ;;  %v1053_v14 = vmul.f32 0.5, %v5591_v41 }
 0x1dd   :  { %v4223_v26 = vpop.eup %4222  ;;  %v913_v37 = vpop.f32.mrb[100].mxu1  ;;  %v1424_v55 = vadd.f32 1.0, %v4221_v35  ;;  %4234 = verf.f32 %v1181_v2 }
 0x1de   :  { %v5596_v30 = vadd.f32 %v913_v37, %v5394_v20  ;;  %v915_v5 = vpop.f32.mrb[101].mxu1  ;;  %v4225_v10 = vpop.eup %4224  ;;  %v1425_v18 = vadd.f32 1.0, %v4223_v26  ;;  %2419 = vmatprep.mubr.bf16.mxu0 %v1713_v15 }
 0x1df   :  { %v5600_v25 = vadd.f32 %v915_v5, %v5400_v19  ;;  %v917_v34 = vpop.f32.mrb[102].mxu1  ;;  %v4227_v6 = vpop.eup %4226  ;;  %v1428_v52 = vadd.f32 1.0, %v4225_v10  ;;  %2420 = vmatmul.mubr.bf16.gmra.mrb[24].mxu0 %v1712_v63  ;;  %v1552_v46 = vmul.f32 %v1424_v55, %v1040_v12 }
 0x1e0   :  { %v1184_v22 = vmul.f32 0.70710677, %v5596_v30  ;;  %v919_v39 = vpop.f32.mrb[103].mxu1  ;;  %v1429_v45 = vadd.f32 1.0, %v4227_v6  ;;  %v5608_v50 = vadd.f32 %v917_v34, %v5394_v20  ;;  %v1553_v33 = vmul.f32 %v1425_v18, %v1041_v7 }
 0x1e1   :  { %v1185_v27 = vmul.f32 0.70710677, %v5600_v25  ;;  %v1556_v23 = vmul.f32 %v1428_v52, %v1044_v59  ;;  %v5611_v32 = vadd.f32 %v919_v39, %v5400_v19  ;;  %v1056_v18 = vmul.f32 0.5, %v5596_v30 }
 0x1e2   :  { %4236 = verf.f32 %v1184_v22  ;;  %v1557_v28 = vmul.f32 %v1429_v45, %v1045_v0  ;;  %v1188_v58 = vmul.f32 0.70710677, %v5608_v50  ;;  %v1057_v52 = vmul.f32 0.5, %v5600_v25 }
 0x1e3   :  { %4238 = verf.f32 %v1185_v27  ;;  %v1189_v44 = vmul.f32 0.70710677, %v5611_v32  ;;  %v1716_v62 = vpack.c.bf16 %v1556_v23, %v1552_v46  ;;  %v1060_v22 = vmul.f32 0.5, %v5608_v50 }
 0x1e4   :  { %v4229_v13 = vpop.eup %4228  ;;  %4240 = verf.f32 %v1188_v58  ;;  %v1717_v60 = vpack.c.bf16 %v1557_v28, %v1553_v33  ;;  %v1061_v27 = vmul.f32 0.5, %v5611_v32 }
 0x1e5   :  { %v4231_v11 = vpop.eup %4230  ;;  %v923_v36 = vpop.f32.mrb[104].mxu1  ;;  %v1432_v56 = vadd.f32 1.0, %v4229_v13  ;;  %4242 = verf.f32 %v1189_v44 }
 0x1e6   :  { %v5616_v49 = vadd.f32 %v923_v36, %v5394_v20  ;;  %v925_v43 = vpop.f32.mrb[105].mxu1  ;;  %v4233_v48 = vpop.eup %4232  ;;  %v1433_v40 = vadd.f32 1.0, %v4231_v11  ;;  %2429 = vmatprep.mubr.bf16.mxu0 %v1717_v60 }
 0x1e7   :  { %v5620_v53 = vadd.f32 %v925_v43, %v5400_v19  ;;  %v927_v24 = vpop.f32.mrb[106].mxu1  ;;  %v4235_v57 = vpop.eup %4234  ;;  %v1436_v47 = vadd.f32 1.0, %v4233_v48  ;;  %2430 = vmatmul.mubr.bf16.gmra.mrb[28].mxu0 %v1716_v62  ;;  %v1560_v17 = vmul.f32 %v1432_v56, %v1048_v8 }
 0x1e8   :  { %v1192_v1 = vmul.f32 0.70710677, %v5616_v49  ;;  %v929_v16 = vpop.f32.mrb[107].mxu1  ;;  %v1437_v38 = vadd.f32 1.0, %v4235_v57  ;;  %v5628_v54 = vadd.f32 %v927_v24, %v5394_v20  ;;  %v1561_v21 = vmul.f32 %v1433_v40, %v1049_v9 }
 0x1e9   :  { %v1193_v29 = vmul.f32 0.70710677, %v5620_v53  ;;  %v1564_v3 = vmul.f32 %v1436_v47, %v1052_v61  ;;  %v5631_v31 = vadd.f32 %v929_v16, %v5400_v19  ;;  %v1064_v40 = vmul.f32 0.5, %v5616_v49 }
 0x1ea   :  { %4244 = verf.f32 %v1192_v1  ;;  %v1565_v4 = vmul.f32 %v1437_v38, %v1053_v14  ;;  %v1196_v35 = vmul.f32 0.70710677, %v5628_v54  ;;  %v1065_v47 = vmul.f32 0.5, %v5620_v53 }
 0x1eb   :  { %4246 = verf.f32 %v1193_v29  ;;  %v1197_v41 = vmul.f32 0.70710677, %v5631_v31  ;;  %v1720_v63 = vpack.c.bf16 %v1564_v3, %v1560_v17  ;;  %v1068_v1 = vmul.f32 0.5, %v5628_v54 }
 0x1ec   :  { %v4237_v2 = vpop.eup %4236  ;;  %4248 = verf.f32 %v1196_v35  ;;  %v1721_v15 = vpack.c.bf16 %v1565_v4, %v1561_v21  ;;  %v1069_v29 = vmul.f32 0.5, %v5631_v31 }
 0x1ed   :  { %v4239_v26 = vpop.eup %4238  ;;  %v933_v37 = vpop.f32.mrb[108].mxu1  ;;  %v1440_v55 = vadd.f32 1.0, %v4237_v2  ;;  %4250 = verf.f32 %v1197_v41 }
 0x1ee   :  { %v5636_v5 = vadd.f32 %v933_v37, %v5394_v20  ;;  %v935_v10 = vpop.f32.mrb[109].mxu1  ;;  %v4241_v12 = vpop.eup %4240  ;;  %v1441_v34 = vadd.f32 1.0, %v4239_v26  ;;  %2439 = vmatprep.mubr.bf16.mxu0 %v1721_v15 }
 0x1ef   :  { %v5640_v6 = vadd.f32 %v935_v10, %v5400_v19  ;;  %v937_v7 = vpop.f32.mrb[110].mxu1  ;;  %v4243_v59 = vpop.eup %4242  ;;  %v1444_v39 = vadd.f32 1.0, %v4241_v12  ;;  %2440 = vmatmul.mubr.bf16.gmra.mrb[32].mxu0 %v1720_v63  ;;  %v1568_v33 = vmul.f32 %v1440_v55, %v1056_v18 }
 0x1f0   :  { %v1200_v0 = vmul.f32 0.70710677, %v5636_v5  ;;  %v939_v45 = vpop.f32.mrb[111].mxu1  ;;  %v1445_v46 = vadd.f32 1.0, %v4243_v59  ;;  %v5648_v23 = vadd.f32 %v937_v7, %v5394_v20  ;;  %v1569_v50 = vmul.f32 %v1441_v34, %v1057_v52 }
 0x1f1   :  { %v1201_v30 = vmul.f32 0.70710677, %v5640_v6  ;;  %v1572_v28 = vmul.f32 %v1444_v39, %v1060_v22  ;;  %v5651_v25 = vadd.f32 %v939_v45, %v5400_v19  ;;  %v1072_v34 = vmul.f32 0.5, %v5636_v5 }
 0x1f2   :  { %4252 = verf.f32 %v1200_v0  ;;  %v1573_v58 = vmul.f32 %v1445_v46, %v1061_v27  ;;  %v1204_v13 = vmul.f32 0.70710677, %v5648_v23  ;;  %v1073_v39 = vmul.f32 0.5, %v5640_v6 }
 0x1f3   :  { %4254 = verf.f32 %v1201_v30  ;;  %v1205_v32 = vmul.f32 0.70710677, %v5651_v25  ;;  %v1724_v62 = vpack.c.bf16 %v1572_v28, %v1568_v33  ;;  %v1076_v0 = vmul.f32 0.5, %v5648_v23 }
 0x1f4   :  { %v4245_v44 = vpop.eup %4244  ;;  %4256 = verf.f32 %v1204_v13  ;;  %v1725_v60 = vpack.c.bf16 %v1573_v58, %v1569_v50  ;;  %v1077_v30 = vmul.f32 0.5, %v5651_v25 }
 0x1f5   :  { %v4247_v11 = vpop.eup %4246  ;;  %v943_v36 = vpop.f32.mrb[112].mxu1  ;;  %v1448_v56 = vadd.f32 1.0, %v4245_v44  ;;  %4258 = verf.f32 %v1205_v32 }
 0x1f6   :  { %v5656_v43 = vadd.f32 %v943_v36, %v5394_v20  ;;  %v945_v48 = vpop.f32.mrb[113].mxu1  ;;  %v4249_v8 = vpop.eup %4248  ;;  %v1449_v24 = vadd.f32 1.0, %v4247_v11  ;;  %2449 = vmatprep.mubr.bf16.mxu0 %v1725_v60 }
 0x1f7   :  { %v5660_v57 = vadd.f32 %v945_v48, %v5400_v19  ;;  %v947_v9 = vpop.f32.mrb[114].mxu1  ;;  %v4251_v61 = vpop.eup %4250  ;;  %v1452_v16 = vadd.f32 1.0, %v4249_v8  ;;  %2450 = vmatmul.mubr.bf16.gmra.mrb[36].mxu0 %v1724_v62  ;;  %v1576_v21 = vmul.f32 %v1448_v56, %v1064_v40 }
 0x1f8   :  { %v1208_v14 = vmul.f32 0.70710677, %v5656_v43  ;;  %v949_v38 = vpop.f32.mrb[115].mxu1  ;;  %v1453_v17 = vadd.f32 1.0, %v4251_v61  ;;  %v5668_v3 = vadd.f32 %v947_v9, %v5394_v20  ;;  %v1577_v54 = vmul.f32 %v1449_v24, %v1065_v47 }
 0x1f9   :  { %v1209_v49 = vmul.f32 0.70710677, %v5660_v57  ;;  %v1580_v4 = vmul.f32 %v1452_v16, %v1068_v1  ;;  %v5671_v53 = vadd.f32 %v949_v38, %v5400_v19  ;;  %v1080_v24 = vmul.f32 0.5, %v5656_v43 }
 0x1fa   :  { %4260 = verf.f32 %v1208_v14  ;;  %v1581_v35 = vmul.f32 %v1453_v17, %v1069_v29  ;;  %v1212_v2 = vmul.f32 0.70710677, %v5668_v3  ;;  %v1081_v16 = vmul.f32 0.5, %v5660_v57 }
 0x1fb   :  { %4262 = verf.f32 %v1209_v49  ;;  %v1213_v31 = vmul.f32 0.70710677, %v5671_v53  ;;  %v1728_v63 = vpack.c.bf16 %v1580_v4, %v1576_v21  ;;  %v1084_v14 = vmul.f32 0.5, %v5668_v3 }
 0x1fc   :  { %v4253_v41 = vpop.eup %4252  ;;  %4264 = verf.f32 %v1212_v2  ;;  %v1729_v15 = vpack.c.bf16 %v1581_v35, %v1577_v54  ;;  %v1085_v49 = vmul.f32 0.5, %v5671_v53 }
 0x1fd   :  { %v4255_v26 = vpop.eup %4254  ;;  %v953_v37 = vpop.f32.mrb[116].mxu1  ;;  %v1456_v55 = vadd.f32 1.0, %v4253_v41  ;;  %4266 = verf.f32 %v1213_v31 }
 0x1fe   :  { %v5676_v10 = vadd.f32 %v953_v37, %v5394_v20  ;;  %v955_v12 = vpop.f32.mrb[117].mxu1  ;;  %v4257_v18 = vpop.eup %4256  ;;  %v1457_v7 = vadd.f32 1.0, %v4255_v26  ;;  %2459 = vmatprep.mubr.bf16.mxu0 %v1729_v15 }
 0x1ff   :  { %v5680_v59 = vadd.f32 %v955_v12, %v5400_v19  ;;  %v957_v52 = vpop.f32.mrb[118].mxu1  ;;  %v4259_v22 = vpop.eup %4258  ;;  %v1460_v45 = vadd.f32 1.0, %v4257_v18  ;;  %2460 = vmatmul.mubr.bf16.gmra.mrb[40].mxu0 %v1728_v63  ;;  %v1584_v50 = vmul.f32 %v1456_v55, %v1072_v34 }
 0x200   :  { %v1216_v27 = vmul.f32 0.70710677, %v5676_v10  ;;  %v959_v46 = vpop.f32.mrb[119].mxu1  ;;  %v1461_v33 = vadd.f32 1.0, %v4259_v22  ;;  %v5688_v28 = vadd.f32 %v957_v52, %v5394_v20  ;;  %v1585_v23 = vmul.f32 %v1457_v7, %v1073_v39 }
 0x201   :  { %v1217_v5 = vmul.f32 0.70710677, %v5680_v59  ;;  %v1588_v58 = vmul.f32 %v1460_v45, %v1076_v0  ;;  %v5691_v6 = vadd.f32 %v959_v46, %v5400_v19  ;;  %v1088_v7 = vmul.f32 0.5, %v5676_v10 }
 0x202   :  { %4268 = verf.f32 %v1216_v27  ;;  %v1589_v13 = vmul.f32 %v1461_v33, %v1077_v30  ;;  %v1220_v44 = vmul.f32 0.70710677, %v5688_v28  ;;  %v1089_v45 = vmul.f32 0.5, %v5680_v59 }
 0x203   :  { %4270 = verf.f32 %v1217_v5  ;;  %v1221_v25 = vmul.f32 0.70710677, %v5691_v6  ;;  %v1732_v62 = vpack.c.bf16 %v1588_v58, %v1584_v50  ;;  %v1092_v27 = vmul.f32 0.5, %v5688_v28 }
 0x204   :  { %v4261_v32 = vpop.eup %4260  ;;  %4272 = verf.f32 %v1220_v44  ;;  %v1733_v60 = vpack.c.bf16 %v1589_v13, %v1585_v23  ;;  %v1093_v5 = vmul.f32 0.5, %v5691_v6 }
 0x205   :  { %v4263_v11 = vpop.eup %4262  ;;  %v963_v36 = vpop.f32.mrb[120].mxu1  ;;  %v1464_v56 = vadd.f32 1.0, %v4261_v32  ;;  %4274 = verf.f32 %v1221_v25 }
 0x206   :  { %v5696_v48 = vadd.f32 %v963_v36, %v5394_v20  ;;  %v965_v8 = vpop.f32.mrb[121].mxu1  ;;  %v4265_v40 = vpop.eup %4264  ;;  %v1465_v9 = vadd.f32 1.0, %v4263_v11  ;;  %2469 = vmatprep.mubr.bf16.mxu0 %v1733_v60 }
 0x207   :  { %v5700_v61 = vadd.f32 %v965_v8, %v5400_v19  ;;  %v967_v47 = vpop.f32.mrb[122].mxu1  ;;  %v4267_v1 = vpop.eup %4266  ;;  %v1468_v38 = vadd.f32 1.0, %v4265_v40  ;;  %2470 = vmatmul.mubr.bf16.gmra.mrb[44].mxu0 %v1732_v62  ;;  %v1592_v54 = vmul.f32 %v1464_v56, %v1080_v24 }
 0x208   :  { %v1224_v29 = vmul.f32 0.70710677, %v5696_v48  ;;  %v969_v17 = vpop.f32.mrb[123].mxu1  ;;  %v1469_v21 = vadd.f32 1.0, %v4267_v1  ;;  %v968_v4 = vadd.f32 %v967_v47, %v5394_v20  ;;  %v1593_v57 = vmul.f32 %v1465_v9, %v1081_v16 }
 0x209   :  { %v1225_v43 = vmul.f32 0.70710677, %v5700_v61  ;;  %v1596_v35 = vmul.f32 %v1468_v38, %v1084_v14  ;;  %v970_v2 = vadd.f32 %v969_v17, %v5400_v19  ;;  %v1096_v40 = vmul.f32 0.5, %v5696_v48 }
 0x20a   :  { %4276 = verf.f32 %v1224_v29  ;;  %v1597_v41 = vmul.f32 %v1469_v21, %v1085_v49  ;;  %v1228_v3 = vmul.f32 0.70710677, %v968_v4  ;;  %v1100_v24 = vmul.f32 0.5, %v968_v4 }
 0x20b   :  { %4278 = verf.f32 %v1225_v43  ;;  %v1229_v63 = vmul.f32 0.70710677, %v970_v2  ;;  %v1736_v26 = vpack.c.bf16 %v1596_v35, %v1592_v54  ;;  %v1097_v9 = vmul.f32 0.5, %v5700_v61 }
 0x20c   :  { %v4269_v31 = vpop.eup %4268  ;;  %4280 = verf.f32 %v1228_v3  ;;  %v1737_v15 = vpack.c.bf16 %v1597_v41, %v1593_v57  ;;  %v1101_v47 = vmul.f32 0.5, %v970_v2 }
 0x20d   :  { %v4271_v37 = vpop.eup %4270  ;;  %v973_v53 = vpop.f32.mrb[124].mxu1  ;;  %v1472_v55 = vadd.f32 1.0, %v4269_v31  ;;  %4282 = verf.f32 %v1229_v63 }
 0x20e   :  { %v974_v12 = vadd.f32 %v973_v53, %v5394_v20  ;;  %v975_v18 = vpop.f32.mrb[125].mxu1  ;;  %v4273_v34 = vpop.eup %4272  ;;  %v1473_v52 = vadd.f32 1.0, %v4271_v37  ;;  %2479 = vmatprep.mubr.bf16.mxu0 %v1737_v15 }
 0x20f   :  { %v976_v22 = vadd.f32 %v975_v18, %v5400_v19  ;;  %v977_v39 = vpop.f32.mrb[126].mxu1  ;;  %v4275_v0 = vpop.eup %4274  ;;  %v1476_v46 = vadd.f32 1.0, %v4273_v34  ;;  %2480 = vmatmul.mubr.bf16.gmra.mrb[48].mxu0 %v1736_v26  ;;  %v1600_v23 = vmul.f32 %v1472_v55, %v1088_v7  ;;  %v2715_v18 = vld [vmem:[%s6902_s4] sm:$0x3] }
 0x210   :  { %v1232_v30 = vmul.f32 0.70710677, %v974_v12  ;;  %v979_v33 = vpop.f32.mrb[127].mxu1  ;;  %v1477_v50 = vadd.f32 1.0, %v4275_v0  ;;  %v978_v10 = vadd.f32 %v977_v39, %v5394_v20  ;;  %v1601_v32 = vmul.f32 %v1473_v52, %v1089_v45  ;;  %v2791_v52 = vld [vmem:[%s6899_s0] sm:$0xff]  ;;  %v2792_v0 = vld [vmem:[%s6899_s0 + $0x8] sm:$0xff] }
 0x211   :  { %v1233_v58 = vmul.f32 0.70710677, %v976_v22  ;;  %v1604_v13 = vmul.f32 %v1476_v46, %v1092_v27  ;;  %v980_v44 = vadd.f32 %v979_v33, %v5400_v19  ;;  %v1104_v4 = vmul.f32 0.5, %v974_v12 }
 0x212   :  { %4284 = verf.f32 %v1232_v30  ;;  %v1605_v25 = vmul.f32 %v1477_v50, %v1093_v5  ;;  %v1236_v59 = vmul.f32 0.70710677, %v978_v10  ;;  %v1108_v41 = vmul.f32 0.5, %v978_v10  ;;  %v2793_v30 = vld [vmem:[%s6899_s0 + $0x10] sm:$0xff]  ;;  %v2794_v5 = vld [vmem:[%s6899_s0 + $0x18] sm:$0xff] }
 0x213   :  { %4286 = verf.f32 %v1233_v58  ;;  %v1237_v62 = vmul.f32 0.70710677, %v980_v44  ;;  %v1740_v11 = vpack.c.bf16 %v1604_v13, %v1600_v23  ;;  %v1105_v61 = vmul.f32 0.5, %v976_v22 }
 0x214   :  { %v4277_v28 = vpop.eup %4276  ;;  %4288 = verf.f32 %v1236_v59  ;;  %v1741_v60 = vpack.c.bf16 %v1605_v25, %v1601_v32  ;;  %v1109_v2 = vmul.f32 0.5, %v980_v44  ;;  %v5723_v12 = vrot.slane %v2715_v18, %v5000_v42  ;;  %v2795_v25 = vld [vmem:[%s6899_s0 + $0x20] sm:$0xff] }
 0x215   :  { %v4279_v36 = vpop.eup %4278  ;;  %v1480_v6 = vadd.f32 1.0, %v4277_v28  ;;  %4290 = verf.f32 %v1237_v62  ;;  %v5726_v34 = vrot.slane %v2715_v18, %v5006_v51  ;;  %v2796_v62 = vld [vmem:[%s6899_s0 + $0x28] sm:$0xff] }
 0x216   :  { %v4281_v56 = vpop.eup %4280  ;;  %v1481_v8 = vadd.f32 1.0, %v4279_v36  ;;  %2489 = vmatprep.mubr.bf16.mxu0 %v1741_v60 }
 0x217   :  { %v4283_v20 = vpop.eup %4282  ;;  %v1484_v19 = vadd.f32 1.0, %v4281_v56  ;;  %2490 = vmatmul.mubr.bf16.gmra.mrb[52].mxu0 %v1740_v11  ;;  %v1608_v16 = vmul.f32 %v1480_v6, %v1096_v40  ;;  %v2797_v56 = vld [vmem:[%s6899_s0 + $0x30] sm:$0xff] }
 0x218   :  { %v1485_v1 = vadd.f32 1.0, %v4283_v20  ;;  %v1609_v38 = vmul.f32 %v1481_v8, %v1097_v9  ;;  %v2798_v20 = vld [vmem:[%s6899_s0 + $0x38] sm:$0xff] }
 0x219   :  { %v1612_v14 = vmul.f32 %v1484_v19, %v1100_v24 }
 0x21a   :  { %v1613_v29 = vmul.f32 %v1485_v1, %v1101_v47 }
 0x21b   :  { %v1744_v49 = vpack.c.bf16 %v1612_v14, %v1608_v16  ;;  %v2799_v14 = vld [vmem:[%s6899_s0 + $0x40] sm:$0xff] }
 0x21c   :  { %v4285_v17 = vpop.eup %4284  ;;  %v1745_v43 = vpack.c.bf16 %v1613_v29, %v1609_v38 }
 0x21d   :  { %v4287_v21 = vpop.eup %4286  ;;  %v1488_v54 = vadd.f32 1.0, %v4285_v17  ;;  %v2800_v17 = vld [vmem:[%s6899_s0 + $0x48] sm:$0xff] }
 0x21e   :  { %v4289_v35 = vpop.eup %4288  ;;  %v1489_v57 = vadd.f32 1.0, %v4287_v21  ;;  %2499 = vmatprep.mubr.bf16.mxu0 %v1745_v43  ;;  %v2801_v43 = vld [vmem:[%s6899_s0 + $0x50] sm:$0xff] }
 0x21f   :  { %v4291_v48 = vpop.eup %4290  ;;  %v1492_v3 = vadd.f32 1.0, %v4289_v35  ;;  %2500 = vmatmul.mubr.bf16.gmra.mrb[56].mxu0 %v1744_v49  ;;  %v1616_v63 = vmul.f32 %v1488_v54, %v1104_v4  ;;  %v2802_v4 = vld [vmem:[%s6899_s0 + $0x58] sm:$0xff] }
 0x220   :  { %v1493_v31 = vadd.f32 1.0, %v4291_v48  ;;  %v1617_v37 = vmul.f32 %v1489_v57, %v1105_v61 }
 0x221   :  { %v1620_v26 = vmul.f32 %v1492_v3, %v1108_v41 }
 0x222   :  { %v1621_v53 = vmul.f32 %v1493_v31, %v1109_v2 }
 0x223   :  { %v1748_v15 = vpack.c.bf16 %v1620_v26, %v1616_v63  ;;  %v2803_v26 = vld [vmem:[%s6899_s0 + $0x60] sm:$0xff] }
 0x224   :  { %v1749_v55 = vpack.c.bf16 %v1621_v53, %v1617_v37 }
 0x226   :  { %2509 = vmatprep.mubr.bf16.mxu0 %v1749_v55  ;;  %v2804_v55 = vld [vmem:[%s6899_s0 + $0x68] sm:$0xff] }
 0x227   :  { %2510 = vmatmul.mubr.bf16.gmra.mrb[60].mxu0 %v1748_v15 }
 0x282   :  { %v2361_v7 = vpop.f32.mrb[0].mxu0 }
 0x283   :  { %v2727_v22 = vadd.f32 %v5723_v12, %v2361_v7  ;;  %v2363_v39 = vpop.f32.mrb[1].mxu0 }
 0x284   :  { %v2728_v45 = vadd.f32 %v5726_v34, %v2363_v39  ;;  %v2365_v27 = vpop.f32.mrb[2].mxu0 }
 0x285   :  { %v2729_v46 = vadd.f32 %v5723_v12, %v2365_v27  ;;  %v2367_v33 = vpop.f32.mrb[3].mxu0  ;;  %v5743_v50 = vadd.f32 %v2791_v52, %v2727_v22  ;;  %v2805_v52 = vld [vmem:[%s6899_s0 + $0x70] sm:$0xff] }
 0x286   :  { %v2730_v58 = vadd.f32 %v5726_v34, %v2367_v33  ;;  %v5746_v10 = vadd.f32 %v2792_v0, %v2728_v45  ;;  %v2806_v45 = vld [vmem:[%s6899_s0 + $0x78] sm:$0xff] }
 0x287   :  { %v5748_v23 = vadd.f32 %v2793_v30, %v2729_v46 }
 0x288   :  { %v5750_v13 = vadd.f32 %v2794_v5, %v2730_v58  ;;  %v2919_v44 = vadd.f32 %v5746_v10, %v5743_v50 }
 0x28a   :  { %2920 = vadd.xlane.f32.xlu0 %v2919_v44  ;;  %v2371_v32 = vpop.f32.mrb[4].mxu0  ;;  %v2922_v60 = vadd.f32 %v5750_v13, %v5748_v23  ;;  %v2807_v44 = vld [vmem:[%s6899_s0 + $0x80] sm:$0xff] }
 0x28b   :  { %v2731_v59 = vadd.f32 %v5723_v12, %v2371_v32  ;;  %v2373_v28 = vpop.f32.mrb[5].mxu0 }
 0x28c   :  { %v2732_v11 = vadd.f32 %v5726_v34, %v2373_v28  ;;  %v2375_v36 = vpop.f32.mrb[6].mxu0  ;;  %v2808_v28 = vld [vmem:[%s6899_s0 + $0x88] sm:$0xff] }
 0x28d   :  { %v2733_v6 = vadd.f32 %v5723_v12, %v2375_v36  ;;  %v2377_v8 = vpop.f32.mrb[7].mxu0  ;;  %v5771_v40 = vadd.f32 %v2795_v25, %v2731_v59  ;;  %v2809_v36 = vld [vmem:[%s6899_s0 + $0x90] sm:$0xff] }
 0x28e   :  { %v2734_v24 = vadd.f32 %v5726_v34, %v2377_v8  ;;  %2923 = vadd.xlane.f32.xlu0 %v2922_v60  ;;  %v5774_v19 = vadd.f32 %v2796_v62, %v2732_v11  ;;  %v2810_v8 = vld [vmem:[%s6899_s0 + $0x98] sm:$0xff] }
 0x28f   :  { %v5776_v9 = vadd.f32 %v2797_v56, %v2733_v6 }
 0x290   :  { %v5778_v47 = vadd.f32 %v2798_v20, %v2734_v24  ;;  %v2925_v1 = vadd.f32 %v5774_v19, %v5771_v40 }
 0x292   :  { %2926 = vadd.xlane.f32.xlu1 %v2925_v1  ;;  %v2381_v16 = vpop.f32.mrb[8].mxu0  ;;  %v2928_v54 = vadd.f32 %v5778_v47, %v5776_v9 }
 0x293   :  { %v2735_v38 = vadd.f32 %v5723_v12, %v2381_v16  ;;  %v2383_v29 = vpop.f32.mrb[9].mxu0 }
 0x294   :  { %v2736_v49 = vadd.f32 %v5726_v34, %v2383_v29  ;;  %v2385_v21 = vpop.f32.mrb[10].mxu0  ;;  %v2811_v29 = vld [vmem:[%s6899_s0 + $0xa0] sm:$0xff] }
 0x295   :  { %v5795_v35 = vadd.f32 %v2799_v14, %v2735_v38  ;;  %v2737_v57 = vadd.f32 %v5723_v12, %v2385_v21  ;;  %v2387_v48 = vpop.f32.mrb[11].mxu0 }
 0x296   :  { %v5801_v41 = vadd.f32 %v2800_v17, %v2736_v49  ;;  %v2738_v3 = vadd.f32 %v5726_v34, %v2387_v48  ;;  %2929 = vadd.xlane.f32.xlu1 %v2928_v54  ;;  %v2813_v48 = vld [vmem:[%s6899_s0 + $0xb0] sm:$0xff] }
 0x297   :  { %v5804_v61 = vadd.f32 %v2801_v43, %v2737_v57  ;;  %v2812_v43 = vld [vmem:[%s6899_s0 + $0xa8] sm:$0xff] }
 0x298   :  { %v5806_v2 = vadd.f32 %v2802_v4, %v2738_v3  ;;  %v2931_v31 = vadd.f32 %v5801_v41, %v5795_v35 }
 0x29a   :  { %2932 = vadd.xlane.f32.xlu0 %v2931_v31  ;;  %v2391_v63 = vpop.f32.mrb[12].mxu0  ;;  %v2934_v37 = vadd.f32 %v5806_v2, %v5804_v61 }
 0x29b   :  { %v2739_v53 = vadd.f32 %v5723_v12, %v2391_v63  ;;  %v2393_v15 = vpop.f32.mrb[13].mxu0  ;;  %v2814_v63 = vld [vmem:[%s6899_s0 + $0xb8] sm:$0xff] }
 0x29c   :  { %v2740_v18 = vadd.f32 %v5726_v34, %v2393_v15  ;;  %2935 = vadd.xlane.f32.xlu1 %v2934_v37  ;;  %v2395_v7 = vpop.f32.mrb[14].mxu0 }
 0x29d   :  { %v5823_v22 = vadd.f32 %v2803_v26, %v2739_v53  ;;  %v2741_v39 = vadd.f32 %v5723_v12, %v2395_v7  ;;  %v2397_v0 = vpop.f32.mrb[15].mxu0  ;;  %v2815_v7 = vld [vmem:[%s6899_s0 + $0xc0] sm:$0xff] }
 0x29e   :  { %v5829_v27 = vadd.f32 %v2804_v55, %v2740_v18  ;;  %v2742_v46 = vadd.f32 %v5726_v34, %v2397_v0 }
 0x29f   :  { %v5832_v30 = vadd.f32 %v2805_v52, %v2741_v39 }
 0x2a0   :  { %v5834_v33 = vadd.f32 %v2806_v45, %v2742_v46  ;;  %v2937_v5 = vadd.f32 %v5829_v27, %v5823_v22  ;;  %v2816_v45 = vld [vmem:[%s6899_s0 + $0xc8] sm:$0xff] }
 0x2a2   :  { %2938 = vadd.xlane.f32.xlu0 %v2937_v5  ;;  %v2401_v58 = vpop.f32.mrb[16].mxu0  ;;  %v2940_v32 = vadd.f32 %v5834_v33, %v5832_v30 }
 0x2a3   :  { %v2743_v25 = vadd.f32 %v5723_v12, %v2401_v58  ;;  %v2403_v59 = vpop.f32.mrb[17].mxu0  ;;  %v2817_v58 = vld [vmem:[%s6899_s0 + $0xd0] sm:$0xff] }
 0x2a4   :  { %v2744_v62 = vadd.f32 %v5726_v34, %v2403_v59  ;;  %2941 = vadd.xlane.f32.xlu1 %v2940_v32  ;;  %v2405_v11 = vpop.f32.mrb[18].mxu0  ;;  %v2818_v59 = vld [vmem:[%s6899_s0 + $0xd8] sm:$0xff] }
 0x2a5   :  { %v5851_v60 = vadd.f32 %v2807_v44, %v2743_v25  ;;  %v2745_v6 = vadd.f32 %v5723_v12, %v2405_v11  ;;  %v2407_v56 = vpop.f32.mrb[19].mxu0 }
 0x2a6   :  { %v5857_v20 = vadd.f32 %v2808_v28, %v2744_v62  ;;  %v2746_v24 = vadd.f32 %v5726_v34, %v2407_v56 }
 0x2a7   :  { %v5860_v1 = vadd.f32 %v2809_v36, %v2745_v6 }
 0x2a8   :  { %v5862_v16 = vadd.f32 %v2810_v8, %v2746_v24  ;;  %v2943_v14 = vadd.f32 %v5857_v20, %v5851_v60  ;;  %v2819_v8 = vld [vmem:[%s6899_s0 + $0xe0] sm:$0xff] }
 0x2aa   :  { %2944 = vadd.xlane.f32.xlu0 %v2943_v14  ;;  %v2411_v38 = vpop.f32.mrb[20].mxu0  ;;  %v2946_v17 = vadd.f32 %v5862_v16, %v5860_v1 }
 0x2ab   :  { %v2747_v49 = vadd.f32 %v5723_v12, %v2411_v38  ;;  %v2413_v21 = vpop.f32.mrb[21].mxu0 }
 0x2ac   :  { %v2748_v54 = vadd.f32 %v5726_v34, %v2413_v21  ;;  %2947 = vadd.xlane.f32.xlu1 %v2946_v17  ;;  %v2415_v57 = vpop.f32.mrb[22].mxu0  ;;  %v2821_v21 = vld [vmem:[%s6899_s0 + $0xf0] sm:$0xff] }
 0x2ad   :  { %v5879_v4 = vadd.f32 %v2811_v29, %v2747_v49  ;;  %v2749_v3 = vadd.f32 %v5723_v12, %v2415_v57  ;;  %v2417_v31 = vpop.f32.mrb[23].mxu0  ;;  %v2820_v29 = vld [vmem:[%s6899_s0 + $0xe8] sm:$0xff] }
 0x2ae   :  { %v5885_v26 = vadd.f32 %v2812_v43, %v2748_v54  ;;  %v2750_v37 = vadd.f32 %v5726_v34, %v2417_v31 }
 0x2af   :  { %v5888_v53 = vadd.f32 %v2813_v48, %v2749_v3  ;;  %v2822_v48 = vld [vmem:[%s6899_s0 + $0xf8] sm:$0xff] }
 0x2b0   :  { %v5890_v15 = vadd.f32 %v2814_v63, %v2750_v37  ;;  %v2949_v55 = vadd.f32 %v5885_v26, %v5879_v4 }
 0x2b2   :  { %2950 = vadd.xlane.f32.xlu0 %v2949_v55  ;;  %v2421_v18 = vpop.f32.mrb[24].mxu0  ;;  %v2952_v52 = vadd.f32 %v5890_v15, %v5888_v53 }
 0x2b3   :  { %v2751_v39 = vadd.f32 %v5723_v12, %v2421_v18  ;;  %v2423_v0 = vpop.f32.mrb[25].mxu0 }
 0x2b4   :  { %v2752_v46 = vadd.f32 %v5726_v34, %v2423_v0  ;;  %2953 = vadd.xlane.f32.xlu1 %v2952_v52  ;;  %v2425_v5 = vpop.f32.mrb[26].mxu0 }
 0x2b5   :  { %v5907_v44 = vadd.f32 %v2815_v7, %v2751_v39  ;;  %v2753_v32 = vadd.f32 %v5723_v12, %v2425_v5  ;;  %v2427_v25 = vpop.f32.mrb[27].mxu0  ;;  %v2823_v7 = vld [vmem:[%s6899_s0 + $0x100] sm:$0xff] }
 0x2b6   :  { %v5913_v28 = vadd.f32 %v2816_v45, %v2752_v46  ;;  %v2754_v62 = vadd.f32 %v5726_v34, %v2427_v25  ;;  %v2824_v45 = vld [vmem:[%s6899_s0 + $0x108] sm:$0xff] }
 0x2b7   :  { %v5916_v11 = vadd.f32 %v2817_v58, %v2753_v32  ;;  %v2825_v58 = vld [vmem:[%s6899_s0 + $0x110] sm:$0xff] }
 0x2b8   :  { %v5918_v36 = vadd.f32 %v2818_v59, %v2754_v62  ;;  %v2955_v6 = vadd.f32 %v5913_v28, %v5907_v44  ;;  %v2826_v62 = vld [vmem:[%s6899_s0 + $0x118] sm:$0xff] }
 0x2ba   :  { %2956 = vadd.xlane.f32.xlu0 %v2955_v6  ;;  %v2431_v56 = vpop.f32.mrb[28].mxu0  ;;  %v2958_v24 = vadd.f32 %v5918_v36, %v5916_v11 }
 0x2bb   :  { %v2755_v14 = vadd.f32 %v5723_v12, %v2431_v56  ;;  %v2433_v38 = vpop.f32.mrb[29].mxu0 }
 0x2bc   :  { %v2756_v17 = vadd.f32 %v5726_v34, %v2433_v38  ;;  %2959 = vadd.xlane.f32.xlu1 %v2958_v24  ;;  %v2435_v49 = vpop.f32.mrb[30].mxu0 }
 0x2bd   :  { %v5935_v43 = vadd.f32 %v2819_v8, %v2755_v14  ;;  %v2757_v54 = vadd.f32 %v5723_v12, %v2435_v49  ;;  %v2437_v57 = vpop.f32.mrb[31].mxu0 }
 0x2be   :  { %v5941_v3 = vadd.f32 %v2820_v29, %v2756_v17  ;;  %v2758_v31 = vadd.f32 %v5726_v34, %v2437_v57  ;;  %v2827_v29 = vld [vmem:[%s6899_s0 + $0x120] sm:$0xff] }
 0x2bf   :  { %v5944_v63 = vadd.f32 %v2821_v21, %v2757_v54  ;;  %v2828_v54 = vld [vmem:[%s6899_s0 + $0x128] sm:$0xff] }
 0x2c0   :  { %v5946_v37 = vadd.f32 %v2822_v48, %v2758_v31  ;;  %v2961_v55 = vadd.f32 %v5941_v3, %v5935_v43  ;;  %v2829_v31 = vld [vmem:[%s6899_s0 + $0x130] sm:$0xff] }
 0x2c2   :  { %2962 = vadd.xlane.f32.xlu0 %v2961_v55  ;;  %v2441_v18 = vpop.f32.mrb[32].mxu0  ;;  %v2964_v52 = vadd.f32 %v5946_v37, %v5944_v63 }
 0x2c3   :  { %v2759_v39 = vadd.f32 %v5723_v12, %v2441_v18  ;;  %v2443_v0 = vpop.f32.mrb[33].mxu0 }
 0x2c4   :  { %v2760_v46 = vadd.f32 %v5726_v34, %v2443_v0  ;;  %2965 = vadd.xlane.f32.xlu1 %v2964_v52  ;;  %v2445_v5 = vpop.f32.mrb[34].mxu0  ;;  %v2830_v52 = vld [vmem:[%s6899_s0 + $0x138] sm:$0xff] }
 0x2c5   :  { %v5963_v32 = vadd.f32 %v2823_v7, %v2759_v39  ;;  %v2761_v25 = vadd.f32 %v5723_v12, %v2445_v5  ;;  %v2447_v59 = vpop.f32.mrb[35].mxu0 }
 0x2c6   :  { %v5969_v6 = vadd.f32 %v2824_v45, %v2760_v46  ;;  %v2762_v56 = vadd.f32 %v5726_v34, %v2447_v59 }
 0x2c7   :  { %v5972_v8 = vadd.f32 %v2825_v58, %v2761_v25  ;;  %v2831_v25 = vld [vmem:[%s6899_s0 + $0x140] sm:$0xff] }
 0x2c8   :  { %v5974_v24 = vadd.f32 %v2826_v62, %v2762_v56  ;;  %v2967_v14 = vadd.f32 %v5969_v6, %v5963_v32 }
 0x2ca   :  { %2968 = vadd.xlane.f32.xlu0 %v2967_v14  ;;  %v2451_v38 = vpop.f32.mrb[36].mxu0  ;;  %v2970_v17 = vadd.f32 %v5974_v24, %v5972_v8  ;;  %v2832_v14 = vld [vmem:[%s6899_s0 + $0x148] sm:$0xff] }
 0x2cb   :  { %v2763_v49 = vadd.f32 %v5723_v12, %v2451_v38  ;;  %v2453_v21 = vpop.f32.mrb[37].mxu0 }
 0x2cc   :  { %v2764_v57 = vadd.f32 %v5726_v34, %v2453_v21  ;;  %2971 = vadd.xlane.f32.xlu1 %v2970_v17  ;;  %v2455_v48 = vpop.f32.mrb[38].mxu0  ;;  %v2833_v17 = vld [vmem:[%s6899_s0 + $0x150] sm:$0xff] }
 0x2cd   :  { %v5991_v55 = vadd.f32 %v2827_v29, %v2763_v49  ;;  %v2765_v18 = vadd.f32 %v5723_v12, %v2455_v48  ;;  %v2457_v7 = vpop.f32.mrb[39].mxu0 }
 0x2ce   :  { %v5997_v39 = vadd.f32 %v2828_v54, %v2764_v57  ;;  %v2766_v0 = vadd.f32 %v5726_v34, %v2457_v7  ;;  %v2834_v57 = vld [vmem:[%s6899_s0 + $0x158] sm:$0xff] }
 0x2cf   :  { %v6000_v45 = vadd.f32 %v2829_v31, %v2765_v18 }
 0x2d0   :  { %v6002_v46 = vadd.f32 %v2830_v52, %v2766_v0  ;;  %v2973_v5 = vadd.f32 %v5997_v39, %v5991_v55 }
 0x2d2   :  { %2974 = vadd.xlane.f32.xlu0 %v2973_v5  ;;  %v2461_v58 = vpop.f32.mrb[40].mxu0  ;;  %v2976_v59 = vadd.f32 %v6002_v46, %v6000_v45  ;;  %v2835_v5 = vld [vmem:[%s6899_s0 + $0x160] sm:$0xff] }
 0x2d3   :  { %v2767_v62 = vadd.f32 %v5723_v12, %v2461_v58  ;;  %v2463_v56 = vpop.f32.mrb[41].mxu0 }
 0x2d4   :  { %v2768_v38 = vadd.f32 %v5726_v34, %v2463_v56  ;;  %2977 = vadd.xlane.f32.xlu1 %v2976_v59  ;;  %v2465_v29 = vpop.f32.mrb[42].mxu0 }
 0x2d5   :  { %v6019_v49 = vadd.f32 %v2831_v25, %v2767_v62  ;;  %v2769_v21 = vadd.f32 %v5723_v12, %v2465_v29  ;;  %v2467_v54 = vpop.f32.mrb[43].mxu0  ;;  %v2836_v62 = vld [vmem:[%s6899_s0 + $0x168] sm:$0xff] }
 0x2d6   :  { %v6025_v48 = vadd.f32 %v2832_v14, %v2768_v38  ;;  %v2770_v31 = vadd.f32 %v5726_v34, %v2467_v54  ;;  %v2837_v38 = vld [vmem:[%s6899_s0 + $0x170] sm:$0xff]  ;;  %v2838_v54 = vld [vmem:[%s6899_s0 + $0x178] sm:$0xff] }
 0x2d7   :  { %v6028_v18 = vadd.f32 %v2833_v17, %v2769_v21 }
 0x2d8   :  { %v6030_v7 = vadd.f32 %v2834_v57, %v2770_v31  ;;  %v2979_v52 = vadd.f32 %v6025_v48, %v6019_v49 }
 0x2da   :  { %2980 = vadd.xlane.f32.xlu0 %v2979_v52  ;;  %v2471_v0 = vpop.f32.mrb[44].mxu0  ;;  %v2982_v58 = vadd.f32 %v6030_v7, %v6028_v18 }
 0x2db   :  { %v2771_v25 = vadd.f32 %v5723_v12, %v2471_v0  ;;  %v2473_v59 = vpop.f32.mrb[45].mxu0 }
 0x2dc   :  { %v2772_v56 = vadd.f32 %v5726_v34, %v2473_v59  ;;  %2983 = vadd.xlane.f32.xlu1 %v2982_v58  ;;  %v2475_v14 = vpop.f32.mrb[46].mxu0 }
 0x2dd   :  { %v6047_v29 = vadd.f32 %v2835_v5, %v2771_v25  ;;  %v2773_v17 = vadd.f32 %v5723_v12, %v2475_v14  ;;  %v2477_v21 = vpop.f32.mrb[47].mxu0  ;;  %v2839_v25 = vld [vmem:[%s6899_s0 + $0x180] sm:$0xff]  ;;  %v2840_v14 = vld [vmem:[%s6899_s0 + $0x188] sm:$0xff] }
 0x2de   :  { %v6053_v57 = vadd.f32 %v2836_v62, %v2772_v56  ;;  %v2774_v31 = vadd.f32 %v5726_v34, %v2477_v21  ;;  %v2841_v21 = vld [vmem:[%s6899_s0 + $0x190] sm:$0xff] }
 0x2df   :  { %v6056_v52 = vadd.f32 %v2837_v38, %v2773_v17 }
 0x2e0   :  { %v6058_v0 = vadd.f32 %v2838_v54, %v2774_v31  ;;  %v2985_v58 = vadd.f32 %v6053_v57, %v6047_v29 }
 0x2e2   :  { %6944 = vst [vmem:[#allocation5_spill] sm:$0xff] %v6058_v0  ;;  %2986 = vadd.xlane.f32.xlu0 %v2985_v58  ;;  %v2481_v5 = vpop.f32.mrb[48].mxu0  ;;  %v2988_v59 = vadd.f32 %v6058_v0, %v6056_v52 }
 0x2e3   :  { %v2775_v62 = vadd.f32 %v5723_v12, %v2481_v5  ;;  %v2483_v56 = vpop.f32.mrb[49].mxu0  ;;  %v2842_v5 = vld [vmem:[%s6899_s0 + $0x198] sm:$0xff] }
 0x2e4   :  { %v2776_v38 = vadd.f32 %v5726_v34, %v2483_v56  ;;  %2989 = vadd.xlane.f32.xlu1 %v2988_v59  ;;  %v2485_v17 = vpop.f32.mrb[50].mxu0 }
 0x2e5   :  { %v6075_v54 = vadd.f32 %v2839_v25, %v2775_v62  ;;  %v2777_v31 = vadd.f32 %v5723_v12, %v2485_v17  ;;  %v2487_v58 = vpop.f32.mrb[51].mxu0  ;;  %v2843_v62 = vld [vmem:[%s6899_s0 + $0x1a0] sm:$0xff] }
 0x2e6   :  { %v6081_v51 = vadd.f32 %v2840_v14, %v2776_v38  ;;  %v2778_v42 = vadd.f32 %v5726_v34, %v2487_v58 }
 0x2e7   :  { %6945 = vst [vmem:[#allocation6_spill] sm:$0xff] %v6075_v54  ;;  %v6084_v56 = vadd.f32 %v2841_v21, %v2777_v31 }
 0x2e8   :  { %6946 = vst [vmem:[#allocation7_spill] sm:$0xff] %v6081_v51  ;;  %v6086_v59 = vadd.f32 %v2842_v5, %v2778_v42  ;;  %v2991_v0 = vadd.f32 %v6081_v51, %v6075_v54  ;;  %v2844_v42 = vld [vmem:[%s6899_s0 + $0x1a8] sm:$0xff] }
 0x2e9   :  { %6947 = vst [vmem:[#allocation8_spill] sm:$0xff] %v6084_v56 }
 0x2ea   :  { %6948 = vst [vmem:[#allocation9_spill] sm:$0xff] %v6086_v59  ;;  %2992 = vadd.xlane.f32.xlu0 %v2991_v0  ;;  %v2491_v25 = vpop.f32.mrb[52].mxu0  ;;  %v2994_v17 = vadd.f32 %v6086_v59, %v6084_v56  ;;  %v2845_v0 = vld [vmem:[%s6899_s0 + $0x1b0] sm:$0xff] }
 0x2eb   :  { %v2779_v14 = vadd.f32 %v5723_v12, %v2491_v25  ;;  %v2493_v38 = vpop.f32.mrb[53].mxu0  ;;  %v2846_v25 = vld [vmem:[%s6899_s0 + $0x1b8] sm:$0xff] }
 0x2ec   :  { %v2780_v21 = vadd.f32 %v5726_v34, %v2493_v38  ;;  %2995 = vadd.xlane.f32.xlu1 %v2994_v17  ;;  %v2495_v31 = vpop.f32.mrb[54].mxu0 }
 0x2ed   :  { %v6103_v58 = vadd.f32 %v2843_v62, %v2779_v14  ;;  %v2781_v5 = vadd.f32 %v5723_v12, %v2495_v31  ;;  %v2497_v59 = vpop.f32.mrb[55].mxu0  ;;  %v2847_v14 = vld [vmem:[%s6899_s0 + $0x1c0] sm:$0xff] }
 0x2ee   :  { %v6109_v56 = vadd.f32 %v2844_v42, %v2780_v21  ;;  %v2782_v51 = vadd.f32 %v5726_v34, %v2497_v59 }
 0x2ef   :  { %6949 = vst [vmem:[#allocation10_spill] sm:$0xff] %v6103_v58  ;;  %v6112_v38 = vadd.f32 %v2845_v0, %v2781_v5 }
 0x2f0   :  { %6950 = vst [vmem:[#allocation11_spill] sm:$0xff] %v6109_v56  ;;  %v6114_v17 = vadd.f32 %v2846_v25, %v2782_v51  ;;  %v2997_v54 = vadd.f32 %v6109_v56, %v6103_v58  ;;  %v2848_v51 = vld [vmem:[%s6899_s0 + $0x1c8] sm:$0xff] }
 0x2f1   :  { %6951 = vst [vmem:[#allocation12_spill] sm:$0xff] %v6112_v38 }
 0x2f2   :  { %6952 = vst [vmem:[#allocation13_spill] sm:$0xff] %v6114_v17  ;;  %2998 = vadd.xlane.f32.xlu0 %v2997_v54  ;;  %v2501_v62 = vpop.f32.mrb[56].mxu0  ;;  %v3000_v31 = vadd.f32 %v6114_v17, %v6112_v38  ;;  %v2849_v54 = vld [vmem:[%s6899_s0 + $0x1d0] sm:$0xff] }
 0x2f3   :  { %v2783_v42 = vadd.f32 %v5723_v12, %v2501_v62  ;;  %v2503_v21 = vpop.f32.mrb[57].mxu0  ;;  %v2850_v62 = vld [vmem:[%s6899_s0 + $0x1d8] sm:$0xff] }
 0x2f4   :  { %v2784_v59 = vadd.f32 %v5726_v34, %v2503_v21  ;;  %3001 = vadd.xlane.f32.xlu1 %v3000_v31  ;;  %v2505_v0 = vpop.f32.mrb[58].mxu0 }
 0x2f5   :  { %v6131_v5 = vadd.f32 %v2847_v14, %v2783_v42  ;;  %v2785_v25 = vadd.f32 %v5723_v12, %v2505_v0  ;;  %v2507_v17 = vpop.f32.mrb[59].mxu0  ;;  %v2851_v42 = vld [vmem:[%s6899_s0 + $0x1e0] sm:$0xff] }
 0x2f6   :  { %v6137_v38 = vadd.f32 %v2848_v51, %v2784_v59  ;;  %v2786_v56 = vadd.f32 %v5726_v34, %v2507_v17 }
 0x2f7   :  { %6953 = vst [vmem:[#allocation14_spill] sm:$0xff] %v6131_v5  ;;  %v6140_v21 = vadd.f32 %v2849_v54, %v2785_v25 }
 0x2f8   :  { %6954 = vst [vmem:[#allocation15_spill] sm:$0xff] %v6137_v38  ;;  %v6142_v31 = vadd.f32 %v2850_v62, %v2786_v56  ;;  %v3003_v58 = vadd.f32 %v6137_v38, %v6131_v5  ;;  %v2852_v56 = vld [vmem:[%s6899_s0 + $0x1e8] sm:$0xff] }
 0x2f9   :  { %6955 = vst [vmem:[#allocation16_spill] sm:$0xff] %v6140_v21 }
 0x2fa   :  { %6956 = vst [vmem:[#allocation17_spill] sm:$0xff] %v6142_v31  ;;  %3004 = vadd.xlane.f32.xlu0 %v3003_v58  ;;  %v2511_v14 = vpop.f32.mrb[60].mxu0  ;;  %v3006_v0 = vadd.f32 %v6142_v31, %v6140_v21  ;;  %v2853_v58 = vld [vmem:[%s6899_s0 + $0x1f0] sm:$0xff] }
 0x2fb   :  { %v2787_v51 = vadd.f32 %v5723_v12, %v2511_v14  ;;  %v2513_v59 = vpop.f32.mrb[61].mxu0  ;;  %v2854_v14 = vld [vmem:[%s6899_s0 + $0x1f8] sm:$0xff] }
 0x2fc   :  { %v2788_v17 = vadd.f32 %v5726_v34, %v2513_v59  ;;  %3007 = vadd.xlane.f32.xlu1 %v3006_v0  ;;  %v2515_v54 = vpop.f32.mrb[62].mxu0 }
 0x2fd   :  { %v6159_v25 = vadd.f32 %v2851_v42, %v2787_v51  ;;  %v2789_v62 = vadd.f32 %v5723_v12, %v2515_v54  ;;  %v2517_v31 = vpop.f32.mrb[63].mxu0 }
 0x2fe   :  { %v6165_v21 = vadd.f32 %v2852_v56, %v2788_v17  ;;  %v2790_v38 = vadd.f32 %v5726_v34, %v2517_v31 }
 0x2ff   :  { %v6168_v59 = vadd.f32 %v2853_v58, %v2789_v62 }
 0x300   :  { %v6170_v0 = vadd.f32 %v2854_v14, %v2790_v38  ;;  %v3009_v5 = vadd.f32 %v6165_v21, %v6159_v25 }
 0x302   :  { %3010 = vadd.xlane.f32.xlu0 %v3009_v5  ;;  %v3012_v12 = vadd.f32 %v6170_v0, %v6168_v59 }
 0x304   :  { %3013 = vadd.xlane.f32.xlu1 %v3012_v12 }
 0x317   :  { %v2921_v42 = vpop.xlane.xlu0 %2920 }
 0x318   :  { %v3016_v51 = vmul.f32 0.00390625, %v2921_v42 }
 0x31a   :  { %v6177_v54 = vsub.f32 %v5743_v50, %v3016_v51  ;;  %v6180_v56 = vsub.f32 %v5746_v10, %v3016_v51 }
 0x31b   :  { %v2924_v34 = vpop.xlane.xlu0 %2923 }
 0x31c   :  { %v3017_v31 = vmul.f32 0.00390625, %v2924_v34  ;;  %v3112_v38 = vmul.f32 %v6177_v54, %v6177_v54  ;;  %v3113_v5 = vmul.f32 %v6180_v56, %v6180_v56 }
 0x31e   :  { %v6187_v17 = vsub.f32 %v5748_v23, %v3017_v31  ;;  %v6190_v58 = vsub.f32 %v5750_v13, %v3017_v31  ;;  %v3176_v62 = vadd.f32 %v3113_v5, %v3112_v38 }
 0x31f   :  { %v2927_v50 = vpop.xlane.xlu1 %2926 }
 0x320   :  { %v3018_v14 = vmul.f32 0.00390625, %v2927_v50  ;;  %3177 = vadd.xlane.f32.xlu0 %v3176_v62  ;;  %v3114_v10 = vmul.f32 %v6187_v17, %v6187_v17  ;;  %v3115_v12 = vmul.f32 %v6190_v58, %v6190_v58 }
 0x322   :  { %v6197_v42 = vsub.f32 %v5771_v40, %v3018_v14  ;;  %v6200_v51 = vsub.f32 %v5774_v19, %v3018_v14  ;;  %v3179_v23 = vadd.f32 %v3115_v12, %v3114_v10 }
 0x323   :  { %v2930_v34 = vpop.xlane.xlu1 %2929 }
 0x324   :  { %v3019_v13 = vmul.f32 0.00390625, %v2930_v34  ;;  %3180 = vadd.xlane.f32.xlu1 %v3179_v23  ;;  %v3116_v31 = vmul.f32 %v6197_v42, %v6197_v42  ;;  %v3117_v38 = vmul.f32 %v6200_v51, %v6200_v51 }
 0x326   :  { %v6207_v5 = vsub.f32 %v5776_v9, %v3019_v13  ;;  %v6210_v62 = vsub.f32 %v5778_v47, %v3019_v13  ;;  %v3182_v40 = vadd.f32 %v3117_v38, %v3116_v31 }
 0x327   :  { %v2933_v50 = vpop.xlane.xlu0 %2932 }
 0x328   :  { %v3020_v19 = vmul.f32 0.00390625, %v2933_v50  ;;  %3183 = vadd.xlane.f32.xlu0 %v3182_v40  ;;  %v3118_v14 = vmul.f32 %v6207_v5, %v6207_v5  ;;  %v3119_v10 = vmul.f32 %v6210_v62, %v6210_v62 }
 0x329   :  { %v2936_v12 = vpop.xlane.xlu1 %2935 }
 0x32a   :  { %v6217_v23 = vsub.f32 %v5795_v35, %v3020_v19  ;;  %v6220_v9 = vsub.f32 %v5801_v41, %v3020_v19  ;;  %v3021_v34 = vmul.f32 0.00390625, %v2936_v12  ;;  %v3185_v47 = vadd.f32 %v3119_v10, %v3118_v14 }
 0x32c   :  { %v6223_v13 = vsub.f32 %v5804_v61, %v3021_v34  ;;  %v6226_v31 = vsub.f32 %v5806_v2, %v3021_v34  ;;  %3186 = vadd.xlane.f32.xlu1 %v3185_v47  ;;  %v3120_v38 = vmul.f32 %v6217_v23, %v6217_v23  ;;  %v3121_v40 = vmul.f32 %v6220_v9, %v6220_v9 }
 0x32e   :  { %v3188_v35 = vadd.f32 %v3121_v40, %v3120_v38  ;;  %v3122_v41 = vmul.f32 %v6223_v13, %v6223_v13  ;;  %v3123_v50 = vmul.f32 %v6226_v31, %v6226_v31 }
 0x32f   :  { %v2939_v19 = vpop.xlane.xlu0 %2938 }
 0x330   :  { %v3022_v61 = vmul.f32 0.00390625, %v2939_v19  ;;  %3189 = vadd.xlane.f32.xlu0 %v3188_v35  ;;  %v3191_v14 = vadd.f32 %v3123_v50, %v3122_v41 }
 0x331   :  { %v2942_v2 = vpop.xlane.xlu1 %2941 }
 0x332   :  { %v6237_v10 = vsub.f32 %v5823_v22, %v3022_v61  ;;  %v6240_v12 = vsub.f32 %v5829_v27, %v3022_v61  ;;  %v3023_v34 = vmul.f32 0.00390625, %v2942_v2  ;;  %3192 = vadd.xlane.f32.xlu1 %v3191_v14 }
 0x334   :  { %v6243_v47 = vsub.f32 %v5832_v30, %v3023_v34  ;;  %v6246_v38 = vsub.f32 %v5834_v33, %v3023_v34  ;;  %v3124_v40 = vmul.f32 %v6237_v10, %v6237_v10  ;;  %v3125_v35 = vmul.f32 %v6240_v12, %v6240_v12 }
 0x336   :  { %v3194_v41 = vadd.f32 %v3125_v35, %v3124_v40  ;;  %v3126_v22 = vmul.f32 %v6243_v47, %v6243_v47  ;;  %v3127_v27 = vmul.f32 %v6246_v38, %v6246_v38 }
 0x337   :  { %v2945_v50 = vpop.xlane.xlu0 %2944 }
 0x338   :  { %v3024_v19 = vmul.f32 0.00390625, %v2945_v50  ;;  %3195 = vadd.xlane.f32.xlu0 %v3194_v41  ;;  %v3197_v30 = vadd.f32 %v3127_v27, %v3126_v22 }
 0x339   :  { %v2948_v61 = vpop.xlane.xlu1 %2947 }
 0x33a   :  { %v6257_v33 = vsub.f32 %v5851_v60, %v3024_v19  ;;  %v6260_v14 = vsub.f32 %v5857_v20, %v3024_v19  ;;  %v3025_v2 = vmul.f32 0.00390625, %v2948_v61  ;;  %3198 = vadd.xlane.f32.xlu1 %v3197_v30 }
 0x33c   :  { %v6263_v34 = vsub.f32 %v5860_v1, %v3025_v2  ;;  %v6266_v40 = vsub.f32 %v5862_v16, %v3025_v2  ;;  %v3128_v35 = vmul.f32 %v6257_v33, %v6257_v33  ;;  %v3129_v41 = vmul.f32 %v6260_v14, %v6260_v14 }
 0x33e   :  { %v3200_v22 = vadd.f32 %v3129_v41, %v3128_v35  ;;  %v3130_v60 = vmul.f32 %v6263_v34, %v6263_v34  ;;  %v3131_v20 = vmul.f32 %v6266_v40, %v6266_v40 }
 0x33f   :  { %v2951_v27 = vpop.xlane.xlu0 %2950 }
 0x340   :  { %v3026_v50 = vmul.f32 0.00390625, %v2951_v27  ;;  %3201 = vadd.xlane.f32.xlu0 %v3200_v22  ;;  %v3203_v1 = vadd.f32 %v3131_v20, %v3130_v60 }
 0x341   :  { %v2954_v19 = vpop.xlane.xlu1 %2953 }
 0x342   :  { %v6277_v16 = vsub.f32 %v5879_v4, %v3026_v50  ;;  %v6280_v30 = vsub.f32 %v5885_v26, %v3026_v50  ;;  %v3027_v61 = vmul.f32 0.00390625, %v2954_v19  ;;  %3204 = vadd.xlane.f32.xlu1 %v3203_v1 }
 0x344   :  { %v6283_v2 = vsub.f32 %v5888_v53, %v3027_v61  ;;  %v6286_v35 = vsub.f32 %v5890_v15, %v3027_v61  ;;  %v3132_v41 = vmul.f32 %v6277_v16, %v6277_v16  ;;  %v3133_v22 = vmul.f32 %v6280_v30, %v6280_v30 }
 0x346   :  { %v3206_v60 = vadd.f32 %v3133_v22, %v3132_v41  ;;  %v3134_v4 = vmul.f32 %v6283_v2, %v6283_v2  ;;  %v3135_v26 = vmul.f32 %v6286_v35, %v6286_v35 }
 0x347   :  { %v2957_v20 = vpop.xlane.xlu0 %2956 }
 0x348   :  { %v3028_v27 = vmul.f32 0.00390625, %v2957_v20  ;;  %3207 = vadd.xlane.f32.xlu0 %v3206_v60  ;;  %v3209_v53 = vadd.f32 %v3135_v26, %v3134_v4 }
 0x349   :  { %v2960_v50 = vpop.xlane.xlu1 %2959 }
 0x34a   :  { %v6297_v15 = vsub.f32 %v5907_v44, %v3028_v27  ;;  %v6300_v1 = vsub.f32 %v5913_v28, %v3028_v27  ;;  %v3029_v19 = vmul.f32 0.00390625, %v2960_v50  ;;  %3210 = vadd.xlane.f32.xlu1 %v3209_v53 }
 0x34c   :  { %v6303_v61 = vsub.f32 %v5916_v11, %v3029_v19  ;;  %v6306_v41 = vsub.f32 %v5918_v36, %v3029_v19  ;;  %v3136_v22 = vmul.f32 %v6297_v15, %v6297_v15  ;;  %v3137_v60 = vmul.f32 %v6300_v1, %v6300_v1 }
 0x34e   :  { %v3212_v4 = vadd.f32 %v3137_v60, %v3136_v22  ;;  %v3138_v44 = vmul.f32 %v6303_v61, %v6303_v61  ;;  %v3139_v28 = vmul.f32 %v6306_v41, %v6306_v41 }
 0x34f   :  { %v2963_v26 = vpop.xlane.xlu0 %2962 }
 0x350   :  { %v3030_v20 = vmul.f32 0.00390625, %v2963_v26  ;;  %3213 = vadd.xlane.f32.xlu0 %v3212_v4  ;;  %v3215_v11 = vadd.f32 %v3139_v28, %v3138_v44 }
 0x351   :  { %v2966_v27 = vpop.xlane.xlu1 %2965 }
 0x352   :  { %v6317_v36 = vsub.f32 %v5935_v43, %v3030_v20  ;;  %v6320_v53 = vsub.f32 %v5941_v3, %v3030_v20  ;;  %v3031_v50 = vmul.f32 0.00390625, %v2966_v27  ;;  %3216 = vadd.xlane.f32.xlu1 %v3215_v11 }
 0x354   :  { %v6323_v19 = vsub.f32 %v5944_v63, %v3031_v50  ;;  %v6326_v22 = vsub.f32 %v5946_v37, %v3031_v50  ;;  %v3140_v60 = vmul.f32 %v6317_v36, %v6317_v36  ;;  %v3141_v4 = vmul.f32 %v6320_v53, %v6320_v53 }
 0x356   :  { %v3218_v44 = vadd.f32 %v3141_v4, %v3140_v60  ;;  %v3142_v43 = vmul.f32 %v6323_v19, %v6323_v19  ;;  %v3143_v3 = vmul.f32 %v6326_v22, %v6326_v22 }
 0x357   :  { %v2969_v28 = vpop.xlane.xlu0 %2968 }
 0x358   :  { %v3032_v26 = vmul.f32 0.00390625, %v2969_v28  ;;  %3219 = vadd.xlane.f32.xlu0 %v3218_v44  ;;  %v3221_v63 = vadd.f32 %v3143_v3, %v3142_v43 }
 0x359   :  { %v2972_v20 = vpop.xlane.xlu1 %2971 }
 0x35a   :  { %v6337_v37 = vsub.f32 %v5963_v32, %v3032_v26  ;;  %v6340_v11 = vsub.f32 %v5969_v6, %v3032_v26  ;;  %v3033_v27 = vmul.f32 0.00390625, %v2972_v20  ;;  %3222 = vadd.xlane.f32.xlu1 %v3221_v63 }
 0x35c   :  { %v6343_v50 = vsub.f32 %v5972_v8, %v3033_v27  ;;  %v6346_v60 = vsub.f32 %v5974_v24, %v3033_v27  ;;  %v3144_v4 = vmul.f32 %v6337_v37, %v6337_v37  ;;  %v3145_v44 = vmul.f32 %v6340_v11, %v6340_v11 }
 0x35e   :  { %v3224_v43 = vadd.f32 %v3145_v44, %v3144_v4  ;;  %v3146_v32 = vmul.f32 %v6343_v50, %v6343_v50  ;;  %v3147_v6 = vmul.f32 %v6346_v60, %v6346_v60 }
 0x35f   :  { %v2975_v3 = vpop.xlane.xlu0 %2974 }
 0x360   :  { %v3034_v28 = vmul.f32 0.00390625, %v2975_v3  ;;  %3225 = vadd.xlane.f32.xlu0 %v3224_v43  ;;  %v3227_v8 = vadd.f32 %v3147_v6, %v3146_v32 }
 0x361   :  { %v2978_v26 = vpop.xlane.xlu1 %2977 }
 0x362   :  { %v6357_v24 = vsub.f32 %v5991_v55, %v3034_v28  ;;  %v6360_v63 = vsub.f32 %v5997_v39, %v3034_v28  ;;  %v3035_v20 = vmul.f32 0.00390625, %v2978_v26  ;;  %3228 = vadd.xlane.f32.xlu1 %v3227_v8 }
 0x364   :  { %v6363_v27 = vsub.f32 %v6000_v45, %v3035_v20  ;;  %v6366_v4 = vsub.f32 %v6002_v46, %v3035_v20  ;;  %v3148_v44 = vmul.f32 %v6357_v24, %v6357_v24  ;;  %v3149_v43 = vmul.f32 %v6360_v63, %v6360_v63 }
 0x366   :  { %v3230_v32 = vadd.f32 %v3149_v43, %v3148_v44  ;;  %v3150_v55 = vmul.f32 %v6363_v27, %v6363_v27  ;;  %v3151_v39 = vmul.f32 %v6366_v4, %v6366_v4 }
 0x367   :  { %v2981_v6 = vpop.xlane.xlu0 %2980 }
 0x368   :  { %v3036_v3 = vmul.f32 0.00390625, %v2981_v6  ;;  %3231 = vadd.xlane.f32.xlu0 %v3230_v32  ;;  %v3233_v45 = vadd.f32 %v3151_v39, %v3150_v55 }
 0x369   :  { %v2984_v28 = vpop.xlane.xlu1 %2983 }
 0x36a   :  { %v6377_v46 = vsub.f32 %v6019_v49, %v3036_v3  ;;  %v6380_v8 = vsub.f32 %v6025_v48, %v3036_v3  ;;  %v3037_v26 = vmul.f32 0.00390625, %v2984_v28  ;;  %3234 = vadd.xlane.f32.xlu1 %v3233_v45 }
 0x36c   :  { %v6383_v20 = vsub.f32 %v6028_v18, %v3037_v26  ;;  %v6386_v44 = vsub.f32 %v6030_v7, %v3037_v26  ;;  %v3152_v43 = vmul.f32 %v6377_v46, %v6377_v46  ;;  %v3153_v32 = vmul.f32 %v6380_v8, %v6380_v8 }
 0x36e   :  { %6957 = vst [vmem:[#allocation18_spill] sm:$0xff] %v6386_v44  ;;  %v3236_v55 = vadd.f32 %v3153_v32, %v3152_v43  ;;  %v3154_v49 = vmul.f32 %v6383_v20, %v6383_v20  ;;  %v3155_v48 = vmul.f32 %v6386_v44, %v6386_v44  ;;  %v6961_v43 = vld [vmem:[#allocation5_spill] sm:$0xff] }
 0x36f   :  { %v2987_v39 = vpop.xlane.xlu0 %2986 }
 0x370   :  { %v3038_v6 = vmul.f32 0.00390625, %v2987_v39  ;;  %3237 = vadd.xlane.f32.xlu0 %v3236_v55  ;;  %v3239_v18 = vadd.f32 %v3155_v48, %v3154_v49 }
 0x371   :  { %v2990_v3 = vpop.xlane.xlu1 %2989 }
 0x372   :  { %v6397_v7 = vsub.f32 %v6047_v29, %v3038_v6  ;;  %v6400_v45 = vsub.f32 %v6053_v57, %v3038_v6  ;;  %v3039_v28 = vmul.f32 0.00390625, %v2990_v3  ;;  %3240 = vadd.xlane.f32.xlu1 %v3239_v18  ;;  %v6963_v3 = vld [vmem:[#allocation6_spill] sm:$0xff] }
 0x374   :  { %6958 = vst [vmem:[#allocation19_spill] sm:$0xff] %v6397_v7  ;;  %6959 = vst [vmem:[#allocation20_spill] sm:$0xff] %v6400_v45  ;;  %v6403_v26 = vsub.f32 %v6056_v52, %v3039_v28  ;;  %v6406_v32 = vsub.f32 %v6961_v43, %v3039_v28  ;;  %v3156_v39 = vmul.f32 %v6397_v7, %v6397_v7  ;;  %v6965_v43 = vld [vmem:[#allocation7_spill] sm:$0xff] }
 0x375   :  { %v3157_v55 = vmul.f32 %v6400_v45, %v6400_v45 }
 0x376   :  { %6960 = vst [vmem:[#allocation21_spill] sm:$0xff] %v6403_v26  ;;  %6962 = vst [vmem:[#allocation5_spill] sm:$0xff] %v6406_v32  ;;  %v3158_v29 = vmul.f32 %v6403_v26, %v6403_v26  ;;  %v3159_v57 = vmul.f32 %v6406_v32, %v6406_v32  ;;  %v6969_v26 = vld [vmem:[#allocation9_spill] sm:$0xff] }
 0x377   :  { %v3242_v49 = vadd.f32 %v3157_v55, %v3156_v39  ;;  %v2993_v48 = vpop.xlane.xlu0 %2992  ;;  %v6967_v39 = vld [vmem:[#allocation8_spill] sm:$0xff] }
 0x378   :  { %v3040_v6 = vmul.f32 0.00390625, %v2993_v48  ;;  %v3245_v52 = vadd.f32 %v3159_v57, %v3158_v29 }
 0x379   :  { %3243 = vadd.xlane.f32.xlu0 %v3242_v49  ;;  %v2996_v18 = vpop.xlane.xlu1 %2995 }
 0x37a   :  { %v6417_v28 = vsub.f32 %v6963_v3, %v3040_v6  ;;  %v6420_v7 = vsub.f32 %v6965_v43, %v3040_v6  ;;  %v3041_v44 = vmul.f32 0.00390625, %v2996_v18  ;;  %3246 = vadd.xlane.f32.xlu1 %v3245_v52 }
 0x37c   :  { %6964 = vst [vmem:[#allocation6_spill] sm:$0xff] %v6417_v28  ;;  %6966 = vst [vmem:[#allocation7_spill] sm:$0xff] %v6420_v7  ;;  %v6423_v55 = vsub.f32 %v6967_v39, %v3041_v44  ;;  %v6426_v45 = vsub.f32 %v6969_v26, %v3041_v44  ;;  %v3160_v48 = vmul.f32 %v6417_v28, %v6417_v28  ;;  %v6971_v44 = vld [vmem:[#allocation10_spill] sm:$0xff]  ;;  %v6973_v39 = vld [vmem:[#allocation11_spill] sm:$0xff] }
 0x37d   :  { %v3161_v49 = vmul.f32 %v6420_v7, %v6420_v7 }
 0x37e   :  { %6968 = vst [vmem:[#allocation8_spill] sm:$0xff] %v6423_v55  ;;  %6970 = vst [vmem:[#allocation9_spill] sm:$0xff] %v6426_v45  ;;  %v3162_v57 = vmul.f32 %v6423_v55, %v6423_v55  ;;  %v3163_v6 = vmul.f32 %v6426_v45, %v6426_v45  ;;  %v6977_v55 = vld [vmem:[#allocation13_spill] sm:$0xff] }
 0x37f   :  { %v3248_v29 = vadd.f32 %v3161_v49, %v3160_v48  ;;  %v2999_v52 = vpop.xlane.xlu0 %2998  ;;  %v6975_v48 = vld [vmem:[#allocation12_spill] sm:$0xff] }
 0x380   :  { %v3042_v18 = vmul.f32 0.00390625, %v2999_v52  ;;  %v3251_v3 = vadd.f32 %v3163_v6, %v3162_v57 }
 0x381   :  { %3249 = vadd.xlane.f32.xlu0 %v3248_v29  ;;  %v3002_v43 = vpop.xlane.xlu1 %3001 }
 0x382   :  { %v6437_v26 = vsub.f32 %v6971_v44, %v3042_v18  ;;  %v6440_v28 = vsub.f32 %v6973_v39, %v3042_v18  ;;  %v3043_v32 = vmul.f32 0.00390625, %v3002_v43  ;;  %3252 = vadd.xlane.f32.xlu1 %v3251_v3 }
 0x384   :  { %6972 = vst [vmem:[#allocation10_spill] sm:$0xff] %v6437_v26  ;;  %6974 = vst [vmem:[#allocation11_spill] sm:$0xff] %v6440_v28  ;;  %v6443_v49 = vsub.f32 %v6975_v48, %v3043_v32  ;;  %v6446_v7 = vsub.f32 %v6977_v55, %v3043_v32  ;;  %v3164_v52 = vmul.f32 %v6437_v26, %v6437_v26  ;;  %v6978_v32 = vld [vmem:[#allocation14_spill] sm:$0xff]  ;;  %v6979_v48 = vld [vmem:[#allocation15_spill] sm:$0xff] }
 0x385   :  { %v3165_v29 = vmul.f32 %v6440_v28, %v6440_v28 }
 0x386   :  { %6976 = vst [vmem:[#allocation12_spill] sm:$0xff] %v6443_v49  ;;  %v3166_v6 = vmul.f32 %v6443_v49, %v6443_v49  ;;  %v3167_v18 = vmul.f32 %v6446_v7, %v6446_v7  ;;  %v6983_v49 = vld [vmem:[#allocation17_spill] sm:$0xff] }
 0x387   :  { %v3254_v57 = vadd.f32 %v3165_v29, %v3164_v52  ;;  %v3005_v3 = vpop.xlane.xlu0 %3004  ;;  %v6981_v52 = vld [vmem:[#allocation16_spill] sm:$0xff] }
 0x388   :  { %v3044_v43 = vmul.f32 0.00390625, %v3005_v3  ;;  %v3257_v44 = vadd.f32 %v3167_v18, %v3166_v6 }
 0x389   :  { %3255 = vadd.xlane.f32.xlu0 %v3254_v57  ;;  %v3008_v39 = vpop.xlane.xlu1 %3007 }
 0x38a   :  { %v6457_v55 = vsub.f32 %v6978_v32, %v3044_v43  ;;  %v6460_v26 = vsub.f32 %v6979_v48, %v3044_v43  ;;  %v3045_v45 = vmul.f32 0.00390625, %v3008_v39  ;;  %3258 = vadd.xlane.f32.xlu1 %v3257_v44 }
 0x38c   :  { %6980 = vst [vmem:[#allocation13_spill] sm:$0xff] %v6460_v26  ;;  %v6463_v29 = vsub.f32 %v6981_v52, %v3045_v45  ;;  %v6466_v28 = vsub.f32 %v6983_v49, %v3045_v45  ;;  %v3168_v3 = vmul.f32 %v6457_v55, %v6457_v55  ;;  %v3169_v57 = vmul.f32 %v6460_v26, %v6460_v26 }
 0x38e   :  { %6982 = vst [vmem:[#allocation14_spill] sm:$0xff] %v6463_v29  ;;  %6984 = vst [vmem:[#allocation15_spill] sm:$0xff] %v6466_v28  ;;  %v3260_v6 = vadd.f32 %v3169_v57, %v3168_v3  ;;  %v3170_v18 = vmul.f32 %v6463_v29, %v6463_v29  ;;  %v3171_v43 = vmul.f32 %v6466_v28, %v6466_v28 }
 0x38f   :  { %v3011_v44 = vpop.xlane.xlu0 %3010 }
 0x390   :  { %v3046_v39 = vmul.f32 0.00390625, %v3011_v44  ;;  %3261 = vadd.xlane.f32.xlu0 %v3260_v6  ;;  %v3263_v32 = vadd.f32 %v3171_v43, %v3170_v18 }
 0x391   :  { %v3014_v48 = vpop.xlane.xlu1 %3013 }
 0x392   :  { %v6477_v45 = vsub.f32 %v6159_v25, %v3046_v39  ;;  %v6480_v49 = vsub.f32 %v6165_v21, %v3046_v39  ;;  %v3047_v52 = vmul.f32 0.00390625, %v3014_v48  ;;  %3264 = vadd.xlane.f32.xlu1 %v3263_v32 }
 0x394   :  { %6985 = vst [vmem:[#allocation16_spill] sm:$0xff] %v6477_v45  ;;  %6986 = vst [vmem:[#allocation17_spill] sm:$0xff] %v6480_v49  ;;  %v6483_v3 = vsub.f32 %v6168_v59, %v3047_v52  ;;  %v6486_v57 = vsub.f32 %v6170_v0, %v3047_v52  ;;  %v3172_v44 = vmul.f32 %v6477_v45, %v6477_v45 }
 0x395   :  { %v3173_v6 = vmul.f32 %v6480_v49, %v6480_v49 }
 0x396   :  { %6987 = vst [vmem:[#allocation22_spill] sm:$0xff] %v6483_v3  ;;  %6988 = vst [vmem:[#allocation23_spill] sm:$0xff] %v6486_v57  ;;  %v3174_v25 = vmul.f32 %v6483_v3, %v6483_v3  ;;  %v3175_v21 = vmul.f32 %v6486_v57, %v6486_v57 }
 0x397   :  { %v3266_v18 = vadd.f32 %v3173_v6, %v3172_v44  ;;  %v3432_v44 = vld [vmem:[%s6903_s5] sm:$0x3] }
 0x398   :  { %v3269_v43 = vadd.f32 %v3175_v21, %v3174_v25  ;;  %v6989_v21 = vld [vmem:[#allocation3_spill] sm:$0xff] }
 0x399   :  { %3267 = vadd.xlane.f32.xlu0 %v3266_v18  ;;  %v3508_v18 = vld [vmem:[%s6904_s6] sm:$0x3] }
 0x39a   :  { %3270 = vadd.xlane.f32.xlu1 %v3269_v43  ;;  %v6503_v43 = vrot.slane %v3432_v44, %v6989_v21 }
 0x3ad   :  { %v3178_v59 = vpop.xlane.xlu0 %3177 }
 0x3ae   :  { %v3272_v39 = vmul.f32 0.00390625, %v3178_v59  ;;  %v6990_v59 = vld [vmem:[#allocation4_spill] sm:$0xff] }
 0x3b0   :  { %v3304_v0 = vadd.f32 1e-12, %v3272_v39  ;;  %v6506_v39 = vrot.slane %v3432_v44, %v6990_v59 }
 0x3b1   :  { %v3181_v32 = vpop.xlane.xlu1 %3180 }
 0x3b2   :  { %4292 = vrsqrt.f32 %v3304_v0  ;;  %v3273_v48 = vmul.f32 0.00390625, %v3181_v32  ;;  %v6509_v32 = vrot.slane %v3508_v18, %v6989_v21 }
 0x3b4   :  { %v3305_v52 = vadd.f32 1e-12, %v3273_v48 }
 0x3b5   :  { %v3184_v45 = vpop.xlane.xlu0 %3183 }
 0x3b6   :  { %4294 = vrsqrt.f32 %v3305_v52  ;;  %v3274_v49 = vmul.f32 0.00390625, %v3184_v45 }
 0x3b8   :  { %v3306_v6 = vadd.f32 1e-12, %v3274_v49  ;;  %v6512_v49 = vrot.slane %v3508_v18, %v6990_v59 }
 0x3b9   :  { %v3187_v3 = vpop.xlane.xlu1 %3186 }
 0x3ba   :  { %4296 = vrsqrt.f32 %v3306_v6  ;;  %v3275_v25 = vmul.f32 0.00390625, %v3187_v3 }
 0x3bc   :  { %v4293_v0 = vpop.eup %4292  ;;  %v3307_v45 = vadd.f32 1e-12, %v3275_v25 }
 0x3bd   :  { %v3368_v48 = vmul.f32 %v4293_v0, %v6177_v54  ;;  %v3369_v52 = vmul.f32 %v4293_v0, %v6180_v56  ;;  %v3190_v6 = vpop.xlane.xlu0 %3189 }
 0x3be   :  { %4298 = vrsqrt.f32 %v3307_v45  ;;  %v3276_v3 = vmul.f32 0.00390625, %v3190_v6 }
 0x3bf   :  { %v3444_v57 = vmul.f32 %v6503_v43, %v3368_v48  ;;  %v3445_v44 = vmul.f32 %v6506_v39, %v3369_v52  ;;  %v3193_v28 = vpop.xlane.xlu1 %3192 }
 0x3c0   :  { %v4295_v29 = vpop.eup %4294  ;;  %v3308_v25 = vadd.f32 1e-12, %v3276_v3  ;;  %v3277_v26 = vmul.f32 0.00390625, %v3193_v28 }
 0x3c1   :  { %v3520_v21 = vadd.f32 %v6509_v32, %v3444_v57  ;;  %v3521_v18 = vadd.f32 %v6512_v49, %v3445_v44  ;;  %v3370_v59 = vmul.f32 %v4295_v29, %v6187_v17  ;;  %v3371_v54 = vmul.f32 %v4295_v29, %v6190_v58 }
 0x3c2   :  { %4300 = vrsqrt.f32 %v3308_v25  ;;  %v3309_v56 = vadd.f32 1e-12, %v3277_v26 }
 0x3c3   :  { %3584 = vst [vmem:[%s6905_s7] sm:$0xff] %v3520_v21  ;;  %3585 = vst [vmem:[%s6905_s7 + $0x8] sm:$0xff] %v3521_v18  ;;  %v3446_v28 = vmul.f32 %v6503_v43, %v3370_v59  ;;  %v3447_v57 = vmul.f32 %v6506_v39, %v3371_v54 }
 0x3c4   :  { %v4297_v0 = vpop.eup %4296  ;;  %4302 = vrsqrt.f32 %v3309_v56 }
 0x3c5   :  { %v3522_v17 = vadd.f32 %v6509_v32, %v3446_v28  ;;  %v3523_v58 = vadd.f32 %v6512_v49, %v3447_v57  ;;  %v3372_v26 = vmul.f32 %v4297_v0, %v6197_v42  ;;  %v3373_v29 = vmul.f32 %v4297_v0, %v6200_v51  ;;  %v3196_v45 = vpop.xlane.xlu0 %3195 }
 0x3c6   :  { %v3278_v48 = vmul.f32 0.00390625, %v3196_v45 }
 0x3c7   :  { %3586 = vst [vmem:[%s6905_s7 + $0x10] sm:$0xff] %v3522_v17  ;;  %3587 = vst [vmem:[%s6905_s7 + $0x18] sm:$0xff] %v3523_v58  ;;  %v3448_v52 = vmul.f32 %v6503_v43, %v3372_v26  ;;  %v3449_v6 = vmul.f32 %v6506_v39, %v3373_v29  ;;  %v3199_v3 = vpop.xlane.xlu1 %3198 }
 0x3c8   :  { %v4299_v44 = vpop.eup %4298  ;;  %v3310_v25 = vadd.f32 1e-12, %v3278_v48  ;;  %v3279_v42 = vmul.f32 0.00390625, %v3199_v3 }
 0x3c9   :  { %v3524_v51 = vadd.f32 %v6509_v32, %v3448_v52  ;;  %v3525_v21 = vadd.f32 %v6512_v49, %v3449_v6  ;;  %v3374_v18 = vmul.f32 %v4299_v44, %v6207_v5  ;;  %v3375_v59 = vmul.f32 %v4299_v44, %v6210_v62 }
 0x3ca   :  { %4304 = vrsqrt.f32 %v3310_v25  ;;  %v3311_v54 = vadd.f32 1e-12, %v3279_v42 }
 0x3cb   :  { %3588 = vst [vmem:[%s6905_s7 + $0x20] sm:$0xff] %v3524_v51  ;;  %3589 = vst [vmem:[%s6905_s7 + $0x28] sm:$0xff] %v3525_v21  ;;  %v3450_v56 = vmul.f32 %v6503_v43, %v3374_v18  ;;  %v3451_v28 = vmul.f32 %v6506_v39, %v3375_v59 }
 0x3cc   :  { %v4301_v57 = vpop.eup %4300  ;;  %4306 = vrsqrt.f32 %v3311_v54 }
 0x3cd   :  { %v3526_v5 = vadd.f32 %v6509_v32, %v3450_v56  ;;  %v3527_v62 = vadd.f32 %v6512_v49, %v3451_v28  ;;  %v3376_v0 = vmul.f32 %v4301_v57, %v6217_v23  ;;  %v3377_v17 = vmul.f32 %v4301_v57, %v6220_v9  ;;  %v3202_v58 = vpop.xlane.xlu0 %3201 }
 0x3ce   :  { %v4303_v26 = vpop.eup %4302  ;;  %v3280_v29 = vmul.f32 0.00390625, %v3202_v58 }
 0x3cf   :  { %3590 = vst [vmem:[%s6905_s7 + $0x30] sm:$0xff] %v3526_v5  ;;  %3591 = vst [vmem:[%s6905_s7 + $0x38] sm:$0xff] %v3527_v62  ;;  %v3452_v45 = vmul.f32 %v6503_v43, %v3376_v0  ;;  %v3453_v48 = vmul.f32 %v6506_v39, %v3377_v17  ;;  %v3378_v52 = vmul.f32 %v4303_v26, %v6223_v13  ;;  %v3205_v9 = vpop.xlane.xlu1 %3204 }
 0x3d0   :  { %v3379_v23 = vmul.f32 %v4303_v26, %v6226_v31  ;;  %v3312_v6 = vadd.f32 1e-12, %v3280_v29  ;;  %v3281_v3 = vmul.f32 0.00390625, %v3205_v9 }
 0x3d1   :  { %v3528_v44 = vadd.f32 %v6509_v32, %v3452_v45  ;;  %v3529_v25 = vadd.f32 %v6512_v49, %v3453_v48  ;;  %v3454_v42 = vmul.f32 %v6503_v43, %v3378_v52 }
 0x3d2   :  { %v3455_v51 = vmul.f32 %v6506_v39, %v3379_v23  ;;  %4308 = vrsqrt.f32 %v3312_v6  ;;  %v3313_v21 = vadd.f32 1e-12, %v3281_v3 }
 0x3d3   :  { %3592 = vst [vmem:[%s6905_s7 + $0x40] sm:$0xff] %v3528_v44  ;;  %3593 = vst [vmem:[%s6905_s7 + $0x48] sm:$0xff] %v3529_v25  ;;  %v3530_v13 = vadd.f32 %v6509_v32, %v3454_v42 }
 0x3d4   :  { %v3531_v31 = vadd.f32 %v6512_v49, %v3455_v51  ;;  %v4305_v18 = vpop.eup %4304  ;;  %4310 = vrsqrt.f32 %v3313_v21 }
 0x3d5   :  { %3594 = vst [vmem:[%s6905_s7 + $0x50] sm:$0xff] %v3530_v13  ;;  %v3380_v59 = vmul.f32 %v4305_v18, %v6237_v10  ;;  %v3381_v54 = vmul.f32 %v4305_v18, %v6240_v12  ;;  %v3208_v56 = vpop.xlane.xlu0 %3207 }
 0x3d6   :  { %3595 = vst [vmem:[%s6905_s7 + $0x58] sm:$0xff] %v3531_v31  ;;  %v4307_v28 = vpop.eup %4306  ;;  %v3282_v57 = vmul.f32 0.00390625, %v3208_v56 }
 0x3d7   :  { %v3456_v5 = vmul.f32 %v6503_v43, %v3380_v59  ;;  %v3457_v62 = vmul.f32 %v6506_v39, %v3381_v54  ;;  %v3382_v0 = vmul.f32 %v4307_v28, %v6243_v47  ;;  %v3383_v17 = vmul.f32 %v4307_v28, %v6246_v38  ;;  %v3211_v58 = vpop.xlane.xlu1 %3210 }
 0x3d8   :  { %v3314_v26 = vadd.f32 1e-12, %v3282_v57  ;;  %v3283_v29 = vmul.f32 0.00390625, %v3211_v58 }
 0x3d9   :  { %v3532_v45 = vadd.f32 %v6509_v32, %v3456_v5  ;;  %v3533_v10 = vadd.f32 %v6512_v49, %v3457_v62  ;;  %v3458_v12 = vmul.f32 %v6503_v43, %v3382_v0  ;;  %v3459_v48 = vmul.f32 %v6506_v39, %v3383_v17 }
 0x3da   :  { %4312 = vrsqrt.f32 %v3314_v26  ;;  %v3315_v52 = vadd.f32 1e-12, %v3283_v29 }
 0x3db   :  { %3596 = vst [vmem:[%s6905_s7 + $0x60] sm:$0xff] %v3532_v45  ;;  %3597 = vst [vmem:[%s6905_s7 + $0x68] sm:$0xff] %v3533_v10  ;;  %v3534_v47 = vadd.f32 %v6509_v32, %v3458_v12  ;;  %v3535_v38 = vadd.f32 %v6512_v49, %v3459_v48 }
 0x3dc   :  { %v4309_v23 = vpop.eup %4308  ;;  %4314 = vrsqrt.f32 %v3315_v52 }
 0x3dd   :  { %3598 = vst [vmem:[%s6905_s7 + $0x70] sm:$0xff] %v3534_v47  ;;  %3599 = vst [vmem:[%s6905_s7 + $0x78] sm:$0xff] %v3535_v38  ;;  %v3384_v9 = vmul.f32 %v4309_v23, %v6257_v33  ;;  %v3385_v6 = vmul.f32 %v4309_v23, %v6260_v14  ;;  %v3214_v3 = vpop.xlane.xlu0 %3213 }
 0x3de   :  { %v4311_v44 = vpop.eup %4310  ;;  %v3284_v25 = vmul.f32 0.00390625, %v3214_v3 }
 0x3df   :  { %v3460_v42 = vmul.f32 %v6503_v43, %v3384_v9  ;;  %v3461_v51 = vmul.f32 %v6506_v39, %v3385_v6  ;;  %v3386_v21 = vmul.f32 %v4311_v44, %v6263_v34  ;;  %v3387_v13 = vmul.f32 %v4311_v44, %v6266_v40  ;;  %v3217_v31 = vpop.xlane.xlu1 %3216 }
 0x3e0   :  { %v3316_v18 = vadd.f32 1e-12, %v3284_v25  ;;  %v3285_v59 = vmul.f32 0.00390625, %v3217_v31 }
 0x3e1   :  { %v3536_v54 = vadd.f32 %v6509_v32, %v3460_v42  ;;  %v3537_v33 = vadd.f32 %v6512_v49, %v3461_v51  ;;  %v3462_v14 = vmul.f32 %v6503_v43, %v3386_v21  ;;  %v3463_v56 = vmul.f32 %v6506_v39, %v3387_v13 }
 0x3e2   :  { %4316 = vrsqrt.f32 %v3316_v18  ;;  %v3317_v28 = vadd.f32 1e-12, %v3285_v59 }
 0x3e3   :  { %3600 = vst [vmem:[%s6905_s7 + $0x80] sm:$0xff] %v3536_v54  ;;  %3601 = vst [vmem:[%s6905_s7 + $0x88] sm:$0xff] %v3537_v33  ;;  %v3538_v34 = vadd.f32 %v6509_v32, %v3462_v14  ;;  %v3539_v40 = vadd.f32 %v6512_v49, %v3463_v56 }
 0x3e4   :  { %v4313_v57 = vpop.eup %4312  ;;  %4318 = vrsqrt.f32 %v3317_v28 }
 0x3e5   :  { %3602 = vst [vmem:[%s6905_s7 + $0x90] sm:$0xff] %v3538_v34  ;;  %3603 = vst [vmem:[%s6905_s7 + $0x98] sm:$0xff] %v3539_v40  ;;  %v3388_v5 = vmul.f32 %v4313_v57, %v6277_v16  ;;  %v3389_v62 = vmul.f32 %v4313_v57, %v6280_v30  ;;  %v3220_v0 = vpop.xlane.xlu0 %3219 }
 0x3e6   :  { %v4315_v17 = vpop.eup %4314  ;;  %v3286_v58 = vmul.f32 0.00390625, %v3220_v0 }
 0x3e7   :  { %v3464_v26 = vmul.f32 %v6503_v43, %v3388_v5  ;;  %v3465_v29 = vmul.f32 %v6506_v39, %v3389_v62  ;;  %v3390_v45 = vmul.f32 %v4315_v17, %v6283_v2  ;;  %v3391_v10 = vmul.f32 %v4315_v17, %v6286_v35  ;;  %v3223_v12 = vpop.xlane.xlu1 %3222 }
 0x3e8   :  { %v3318_v48 = vadd.f32 1e-12, %v3286_v58  ;;  %v3287_v52 = vmul.f32 0.00390625, %v3223_v12 }
 0x3e9   :  { %v3540_v47 = vadd.f32 %v6509_v32, %v3464_v26  ;;  %v3541_v16 = vadd.f32 %v6512_v49, %v3465_v29  ;;  %v3466_v30 = vmul.f32 %v6503_v43, %v3390_v45  ;;  %v3467_v38 = vmul.f32 %v6506_v39, %v3391_v10 }
 0x3ea   :  { %4320 = vrsqrt.f32 %v3318_v48  ;;  %v3319_v23 = vadd.f32 1e-12, %v3287_v52 }
 0x3eb   :  { %3604 = vst [vmem:[%s6905_s7 + $0xa0] sm:$0xff] %v3540_v47  ;;  %3605 = vst [vmem:[%s6905_s7 + $0xa8] sm:$0xff] %v3541_v16  ;;  %v3542_v2 = vadd.f32 %v6509_v32, %v3466_v30  ;;  %v3543_v35 = vadd.f32 %v6512_v49, %v3467_v38 }
 0x3ec   :  { %v4317_v9 = vpop.eup %4316  ;;  %4322 = vrsqrt.f32 %v3319_v23 }
 0x3ed   :  { %3606 = vst [vmem:[%s6905_s7 + $0xb0] sm:$0xff] %v3542_v2  ;;  %3607 = vst [vmem:[%s6905_s7 + $0xb8] sm:$0xff] %v3543_v35  ;;  %v3392_v6 = vmul.f32 %v4317_v9, %v6297_v15  ;;  %v3393_v3 = vmul.f32 %v4317_v9, %v6300_v1  ;;  %v3226_v44 = vpop.xlane.xlu0 %3225 }
 0x3ee   :  { %v4319_v25 = vpop.eup %4318  ;;  %v3288_v42 = vmul.f32 0.00390625, %v3226_v44 }
 0x3ef   :  { %v3468_v51 = vmul.f32 %v6503_v43, %v3392_v6  ;;  %v3469_v21 = vmul.f32 %v6506_v39, %v3393_v3  ;;  %v3394_v13 = vmul.f32 %v4319_v25, %v6303_v61  ;;  %v3395_v31 = vmul.f32 %v4319_v25, %v6306_v41  ;;  %v3229_v18 = vpop.xlane.xlu1 %3228 }
 0x3f0   :  { %v3320_v59 = vadd.f32 1e-12, %v3288_v42  ;;  %v3289_v54 = vmul.f32 0.00390625, %v3229_v18 }
 0x3f1   :  { %v3544_v33 = vadd.f32 %v6509_v32, %v3468_v51  ;;  %v3545_v15 = vadd.f32 %v6512_v49, %v3469_v21  ;;  %v3470_v1 = vmul.f32 %v6503_v43, %v3394_v13  ;;  %v3471_v14 = vmul.f32 %v6506_v39, %v3395_v31 }
 0x3f2   :  { %4324 = vrsqrt.f32 %v3320_v59  ;;  %v3321_v56 = vadd.f32 1e-12, %v3289_v54 }
 0x3f3   :  { %3608 = vst [vmem:[%s6905_s7 + $0xc0] sm:$0xff] %v3544_v33  ;;  %3609 = vst [vmem:[%s6905_s7 + $0xc8] sm:$0xff] %v3545_v15  ;;  %v3546_v61 = vadd.f32 %v6509_v32, %v3470_v1  ;;  %v3547_v41 = vadd.f32 %v6512_v49, %v3471_v14 }
 0x3f4   :  { %v4321_v28 = vpop.eup %4320  ;;  %4326 = vrsqrt.f32 %v3321_v56 }
 0x3f5   :  { %3610 = vst [vmem:[%s6905_s7 + $0xd0] sm:$0xff] %v3546_v61  ;;  %3611 = vst [vmem:[%s6905_s7 + $0xd8] sm:$0xff] %v3547_v41  ;;  %v3396_v34 = vmul.f32 %v4321_v28, %v6317_v36  ;;  %v3397_v40 = vmul.f32 %v4321_v28, %v6320_v53  ;;  %v3232_v57 = vpop.xlane.xlu0 %3231 }
 0x3f6   :  { %v4323_v5 = vpop.eup %4322  ;;  %v3290_v62 = vmul.f32 0.00390625, %v3232_v57 }
 0x3f7   :  { %v3472_v0 = vmul.f32 %v6503_v43, %v3396_v34  ;;  %v3473_v17 = vmul.f32 %v6506_v39, %v3397_v40  ;;  %v3398_v58 = vmul.f32 %v4323_v5, %v6323_v19  ;;  %v3399_v26 = vmul.f32 %v4323_v5, %v6326_v22  ;;  %v3235_v29 = vpop.xlane.xlu1 %3234 }
 0x3f8   :  { %v3322_v45 = vadd.f32 1e-12, %v3290_v62  ;;  %v3291_v10 = vmul.f32 0.00390625, %v3235_v29 }
 0x3f9   :  { %v3548_v12 = vadd.f32 %v6509_v32, %v3472_v0  ;;  %v3549_v36 = vadd.f32 %v6512_v49, %v3473_v17  ;;  %v3474_v53 = vmul.f32 %v6503_v43, %v3398_v58  ;;  %v3475_v48 = vmul.f32 %v6506_v39, %v3399_v26 }
 0x3fa   :  { %4328 = vrsqrt.f32 %v3322_v45  ;;  %v3323_v52 = vadd.f32 1e-12, %v3291_v10 }
 0x3fb   :  { %3612 = vst [vmem:[%s6905_s7 + $0xe0] sm:$0xff] %v3548_v12  ;;  %3613 = vst [vmem:[%s6905_s7 + $0xe8] sm:$0xff] %v3549_v36  ;;  %v3550_v19 = vadd.f32 %v6509_v32, %v3474_v53  ;;  %v3551_v22 = vadd.f32 %v6512_v49, %v3475_v48  ;;  %v6991_v36 = vld [vmem:[#allocation18_spill] sm:$0xff] }
 0x3fc   :  { %v4325_v47 = vpop.eup %4324  ;;  %4330 = vrsqrt.f32 %v3323_v52 }
 0x3fd   :  { %3614 = vst [vmem:[%s6905_s7 + $0xf0] sm:$0xff] %v3550_v19  ;;  %3615 = vst [vmem:[%s6905_s7 + $0xf8] sm:$0xff] %v3551_v22  ;;  %v3400_v16 = vmul.f32 %v4325_v47, %v6337_v37  ;;  %v3401_v30 = vmul.f32 %v4325_v47, %v6340_v11  ;;  %v3238_v38 = vpop.xlane.xlu0 %3237 }
 0x3fe   :  { %v4327_v23 = vpop.eup %4326  ;;  %v3292_v2 = vmul.f32 0.00390625, %v3238_v38 }
 0x3ff   :  { %v3476_v35 = vmul.f32 %v6503_v43, %v3400_v16  ;;  %v3477_v9 = vmul.f32 %v6506_v39, %v3401_v30  ;;  %v3402_v6 = vmul.f32 %v4327_v23, %v6343_v50  ;;  %v3403_v3 = vmul.f32 %v4327_v23, %v6346_v60  ;;  %v3241_v44 = vpop.xlane.xlu1 %3240  ;;  %v6992_v23 = vld [vmem:[#allocation19_spill] sm:$0xff] }
 0x400   :  { %v3324_v25 = vadd.f32 1e-12, %v3292_v2  ;;  %v3293_v42 = vmul.f32 0.00390625, %v3241_v44 }
 0x401   :  { %v3552_v51 = vadd.f32 %v6509_v32, %v3476_v35  ;;  %v3553_v37 = vadd.f32 %v6512_v49, %v3477_v9  ;;  %v3478_v11 = vmul.f32 %v6503_v43, %v3402_v6  ;;  %v3479_v21 = vmul.f32 %v6506_v39, %v3403_v3  ;;  %v6993_v35 = vld [vmem:[#allocation20_spill] sm:$0xff] }
 0x402   :  { %4332 = vrsqrt.f32 %v3324_v25  ;;  %v3325_v13 = vadd.f32 1e-12, %v3293_v42 }
 0x403   :  { %3616 = vst [vmem:[%s6905_s7 + $0x100] sm:$0xff] %v3552_v51  ;;  %3617 = vst [vmem:[%s6905_s7 + $0x108] sm:$0xff] %v3553_v37  ;;  %v3554_v50 = vadd.f32 %v6509_v32, %v3478_v11  ;;  %v3555_v60 = vadd.f32 %v6512_v49, %v3479_v21  ;;  %v6994_v51 = vld [vmem:[#allocation21_spill] sm:$0xff] }
 0x404   :  { %v4329_v31 = vpop.eup %4328  ;;  %4334 = vrsqrt.f32 %v3325_v13  ;;  %v6995_v11 = vld [vmem:[#allocation5_spill] sm:$0xff] }
 0x405   :  { %3618 = vst [vmem:[%s6905_s7 + $0x110] sm:$0xff] %v3554_v50  ;;  %3619 = vst [vmem:[%s6905_s7 + $0x118] sm:$0xff] %v3555_v60  ;;  %v3404_v18 = vmul.f32 %v4329_v31, %v6357_v24  ;;  %v3405_v59 = vmul.f32 %v4329_v31, %v6360_v63 }
 0x406   :  { %v3244_v54 = vpop.xlane.xlu0 %3243  ;;  %v4331_v33 = vpop.eup %4330 }
 0x407   :  { %v3294_v15 = vmul.f32 0.00390625, %v3244_v54  ;;  %v3480_v1 = vmul.f32 %v6503_v43, %v3404_v18  ;;  %v3481_v14 = vmul.f32 %v6506_v39, %v3405_v59  ;;  %v3406_v56 = vmul.f32 %v4331_v33, %v6363_v27  ;;  %v3247_v41 = vpop.xlane.xlu1 %3246 }
 0x408   :  { %v3407_v61 = vmul.f32 %v4331_v33, %v6366_v4  ;;  %v3295_v34 = vmul.f32 0.00390625, %v3247_v41  ;;  %v6997_v41 = vld [vmem:[#allocation7_spill] sm:$0xff] }
 0x409   :  { %v3326_v28 = vadd.f32 1e-12, %v3294_v15  ;;  %v3556_v40 = vadd.f32 %v6509_v32, %v3480_v1  ;;  %v3557_v24 = vadd.f32 %v6512_v49, %v3481_v14  ;;  %v3482_v63 = vmul.f32 %v6503_v43, %v3406_v56  ;;  %v6996_v56 = vld [vmem:[#allocation6_spill] sm:$0xff] }
 0x40a   :  { %v3483_v57 = vmul.f32 %v6506_v39, %v3407_v61  ;;  %v3327_v5 = vadd.f32 1e-12, %v3295_v34 }
 0x40b   :  { %4336 = vrsqrt.f32 %v3326_v28  ;;  %3620 = vst [vmem:[%s6905_s7 + $0x120] sm:$0xff] %v3556_v40  ;;  %3621 = vst [vmem:[%s6905_s7 + $0x128] sm:$0xff] %v3557_v24  ;;  %v3558_v27 = vadd.f32 %v6509_v32, %v3482_v63 }
 0x40c   :  { %v3559_v4 = vadd.f32 %v6512_v49, %v3483_v57  ;;  %v4333_v62 = vpop.eup %4332  ;;  %4338 = vrsqrt.f32 %v3327_v5  ;;  %v6998_v5 = vld [vmem:[#allocation8_spill] sm:$0xff] }
 0x40d   :  { %3622 = vst [vmem:[%s6905_s7 + $0x130] sm:$0xff] %v3558_v27  ;;  %v3408_v0 = vmul.f32 %v4333_v62, %v6377_v46  ;;  %v3409_v17 = vmul.f32 %v4333_v62, %v6380_v8 }
 0x40e   :  { %3623 = vst [vmem:[%s6905_s7 + $0x138] sm:$0xff] %v3559_v4  ;;  %v3250_v58 = vpop.xlane.xlu0 %3249  ;;  %v4335_v26 = vpop.eup %4334  ;;  %v6999_v4 = vld [vmem:[#allocation9_spill] sm:$0xff] }
 0x40f   :  { %v3296_v29 = vmul.f32 0.00390625, %v3250_v58  ;;  %v3484_v45 = vmul.f32 %v6503_v43, %v3408_v0  ;;  %v3485_v10 = vmul.f32 %v6506_v39, %v3409_v17  ;;  %v3410_v12 = vmul.f32 %v4335_v26, %v6383_v20  ;;  %v3253_v48 = vpop.xlane.xlu1 %3252 }
 0x410   :  { %v3411_v53 = vmul.f32 %v4335_v26, %v6991_v36  ;;  %v3297_v19 = vmul.f32 0.00390625, %v3253_v48 }
 0x411   :  { %v3328_v52 = vadd.f32 1e-12, %v3296_v29  ;;  %v3560_v22 = vadd.f32 %v6509_v32, %v3484_v45  ;;  %v3561_v46 = vadd.f32 %v6512_v49, %v3485_v10  ;;  %v3486_v8 = vmul.f32 %v6503_v43, %v3410_v12 }
 0x412   :  { %v3487_v47 = vmul.f32 %v6506_v39, %v3411_v53  ;;  %v3329_v16 = vadd.f32 1e-12, %v3297_v19 }
 0x413   :  { %4340 = vrsqrt.f32 %v3328_v52  ;;  %3624 = vst [vmem:[%s6905_s7 + $0x140] sm:$0xff] %v3560_v22  ;;  %3625 = vst [vmem:[%s6905_s7 + $0x148] sm:$0xff] %v3561_v46  ;;  %v3562_v20 = vadd.f32 %v6509_v32, %v3486_v8  ;;  %v7000_v52 = vld [vmem:[#allocation10_spill] sm:$0xff]  ;;  %v7001_v22 = vld [vmem:[#allocation11_spill] sm:$0xff] }
 0x414   :  { %v3563_v30 = vadd.f32 %v6512_v49, %v3487_v47  ;;  %4342 = vrsqrt.f32 %v3329_v16 }
 0x415   :  { %v4337_v38 = vpop.eup %4336  ;;  %3626 = vst [vmem:[%s6905_s7 + $0x150] sm:$0xff] %v3562_v20 }
 0x416   :  { %3627 = vst [vmem:[%s6905_s7 + $0x158] sm:$0xff] %v3563_v30  ;;  %v3412_v2 = vmul.f32 %v4337_v38, %v6992_v23  ;;  %v3413_v9 = vmul.f32 %v4337_v38, %v6993_v35  ;;  %v3256_v6 = vpop.xlane.xlu0 %3255  ;;  %v4339_v3 = vpop.eup %4338  ;;  %v7002_v38 = vld [vmem:[#allocation12_spill] sm:$0xff] }
 0x417   :  { %v3298_v44 = vmul.f32 0.00390625, %v3256_v6  ;;  %v3414_v37 = vmul.f32 %v4339_v3, %v6994_v51  ;;  %v3415_v21 = vmul.f32 %v4339_v3, %v6995_v11  ;;  %v3259_v13 = vpop.xlane.xlu1 %3258 }
 0x418   :  { %v3488_v25 = vmul.f32 %v6503_v43, %v3412_v2  ;;  %v3489_v42 = vmul.f32 %v6506_v39, %v3413_v9  ;;  %v3299_v60 = vmul.f32 0.00390625, %v3259_v13  ;;  %v7003_v13 = vld [vmem:[#allocation13_spill] sm:$0xff] }
 0x419   :  { %v3330_v50 = vadd.f32 1e-12, %v3298_v44  ;;  %v3490_v59 = vmul.f32 %v6503_v43, %v3414_v37  ;;  %v3491_v54 = vmul.f32 %v6506_v39, %v3415_v21 }
 0x41a   :  { %v3564_v31 = vadd.f32 %v6509_v32, %v3488_v25  ;;  %v3565_v18 = vadd.f32 %v6512_v49, %v3489_v42  ;;  %v3331_v33 = vadd.f32 1e-12, %v3299_v60 }
 0x41b   :  { %4344 = vrsqrt.f32 %v3330_v50  ;;  %v3566_v15 = vadd.f32 %v6509_v32, %v3490_v59  ;;  %v3567_v1 = vadd.f32 %v6512_v49, %v3491_v54  ;;  %v7004_v59 = vld [vmem:[#allocation14_spill] sm:$0xff] }
 0x41c   :  { %3628 = vst [vmem:[%s6905_s7 + $0x160] sm:$0xff] %v3564_v31  ;;  %3629 = vst [vmem:[%s6905_s7 + $0x168] sm:$0xff] %v3565_v18  ;;  %4346 = vrsqrt.f32 %v3331_v33  ;;  %v7005_v33 = vld [vmem:[#allocation15_spill] sm:$0xff] }
 0x41d   :  { %v4341_v14 = vpop.eup %4340  ;;  %3630 = vst [vmem:[%s6905_s7 + $0x170] sm:$0xff] %v3566_v15  ;;  %3631 = vst [vmem:[%s6905_s7 + $0x178] sm:$0xff] %v3567_v1  ;;  %v3262_v34 = vpop.xlane.xlu0 %3261 }
 0x41e   :  { %v3416_v61 = vmul.f32 %v4341_v14, %v6996_v56  ;;  %v3417_v28 = vmul.f32 %v4341_v14, %v6997_v41  ;;  %v4343_v40 = vpop.eup %4342  ;;  %v3300_v24 = vmul.f32 0.00390625, %v3262_v34  ;;  %v7006_v34 = vld [vmem:[#allocation16_spill] sm:$0xff] }
 0x41f   :  { %v3418_v27 = vmul.f32 %v4343_v40, %v6998_v5  ;;  %v3419_v62 = vmul.f32 %v4343_v40, %v6999_v4  ;;  %v3265_v0 = vpop.xlane.xlu1 %3264  ;;  %v7008_v4 = vld [vmem:[#allocation22_spill] sm:$0xff] }
 0x420   :  { %v3492_v63 = vmul.f32 %v6503_v43, %v3416_v61  ;;  %v3493_v57 = vmul.f32 %v6506_v39, %v3417_v28  ;;  %v3332_v17 = vadd.f32 1e-12, %v3300_v24  ;;  %v3301_v58 = vmul.f32 0.00390625, %v3265_v0  ;;  %v7007_v24 = vld [vmem:[#allocation17_spill] sm:$0xff]  ;;  %v7009_v0 = vld [vmem:[#allocation23_spill] sm:$0xff] }
 0x421   :  { %v3494_v45 = vmul.f32 %v6503_v43, %v3418_v27  ;;  %v3495_v10 = vmul.f32 %v6506_v39, %v3419_v62 }
 0x422   :  { %v3568_v26 = vadd.f32 %v6509_v32, %v3492_v63  ;;  %v3569_v29 = vadd.f32 %v6512_v49, %v3493_v57  ;;  %4348 = vrsqrt.f32 %v3332_v17  ;;  %v3333_v12 = vadd.f32 1e-12, %v3301_v58 }
 0x423   :  { %v3570_v36 = vadd.f32 %v6509_v32, %v3494_v45  ;;  %v3571_v53 = vadd.f32 %v6512_v49, %v3495_v10 }
 0x424   :  { %3632 = vst [vmem:[%s6905_s7 + $0x180] sm:$0xff] %v3568_v26  ;;  %3633 = vst [vmem:[%s6905_s7 + $0x188] sm:$0xff] %v3569_v29  ;;  %4350 = vrsqrt.f32 %v3333_v12 }
 0x425   :  { %v4345_v48 = vpop.eup %4344  ;;  %3634 = vst [vmem:[%s6905_s7 + $0x190] sm:$0xff] %v3570_v36  ;;  %3635 = vst [vmem:[%s6905_s7 + $0x198] sm:$0xff] %v3571_v53 }
 0x426   :  { %v3420_v19 = vmul.f32 %v4345_v48, %v7000_v52  ;;  %v3421_v46 = vmul.f32 %v4345_v48, %v7001_v22  ;;  %v3268_v8 = vpop.xlane.xlu0 %3267  ;;  %v4347_v47 = vpop.eup %4346 }
 0x427   :  { %v3302_v16 = vmul.f32 0.00390625, %v3268_v8  ;;  %v3422_v23 = vmul.f32 %v4347_v47, %v7002_v38  ;;  %v3423_v2 = vmul.f32 %v4347_v47, %v6446_v7  ;;  %v3271_v35 = vpop.xlane.xlu1 %3270 }
 0x428   :  { %v3496_v20 = vmul.f32 %v6503_v43, %v3420_v19  ;;  %v3497_v30 = vmul.f32 %v6506_v39, %v3421_v46  ;;  %v3303_v6 = vmul.f32 0.00390625, %v3271_v35 }
 0x429   :  { %v3334_v9 = vadd.f32 1e-12, %v3302_v16  ;;  %v3498_v25 = vmul.f32 %v6503_v43, %v3422_v23  ;;  %v3499_v42 = vmul.f32 %v6506_v39, %v3423_v2 }
 0x42a   :  { %v3572_v3 = vadd.f32 %v6509_v32, %v3496_v20  ;;  %v3573_v44 = vadd.f32 %v6512_v49, %v3497_v30  ;;  %v3335_v51 = vadd.f32 1e-12, %v3303_v6 }
 0x42b   :  { %4352 = vrsqrt.f32 %v3334_v9  ;;  %v3574_v7 = vadd.f32 %v6509_v32, %v3498_v25  ;;  %v3575_v37 = vadd.f32 %v6512_v49, %v3499_v42 }
 0x42c   :  { %3636 = vst [vmem:[%s6905_s7 + $0x1a0] sm:$0xff] %v3572_v3  ;;  %3637 = vst [vmem:[%s6905_s7 + $0x1a8] sm:$0xff] %v3573_v44  ;;  %v4349_v11 = vpop.eup %4348  ;;  %4354 = vrsqrt.f32 %v3335_v51 }
 0x42d   :  { %3638 = vst [vmem:[%s6905_s7 + $0x1b0] sm:$0xff] %v3574_v7  ;;  %3639 = vst [vmem:[%s6905_s7 + $0x1b8] sm:$0xff] %v3575_v37  ;;  %v3424_v21 = vmul.f32 %v4349_v11, %v6457_v55  ;;  %v3425_v50 = vmul.f32 %v4349_v11, %v7003_v13 }
 0x42e   :  { %v4351_v60 = vpop.eup %4350 }
 0x42f   :  { %v3500_v31 = vmul.f32 %v6503_v43, %v3424_v21  ;;  %v3501_v18 = vmul.f32 %v6506_v39, %v3425_v50  ;;  %v3426_v54 = vmul.f32 %v4351_v60, %v7004_v59  ;;  %v3427_v15 = vmul.f32 %v4351_v60, %v7005_v33 }
 0x431   :  { %v3576_v1 = vadd.f32 %v6509_v32, %v3500_v31  ;;  %v3577_v14 = vadd.f32 %v6512_v49, %v3501_v18  ;;  %v3502_v56 = vmul.f32 %v6503_v43, %v3426_v54  ;;  %v3503_v61 = vmul.f32 %v6506_v39, %v3427_v15 }
 0x433   :  { %3640 = vst [vmem:[%s6905_s7 + $0x1c0] sm:$0xff] %v3576_v1  ;;  %3641 = vst [vmem:[%s6905_s7 + $0x1c8] sm:$0xff] %v3577_v14  ;;  %v3578_v55 = vadd.f32 %v6509_v32, %v3502_v56  ;;  %v3579_v41 = vadd.f32 %v6512_v49, %v3503_v61 }
 0x435   :  { %v4353_v28 = vpop.eup %4352  ;;  %3642 = vst [vmem:[%s6905_s7 + $0x1d0] sm:$0xff] %v3578_v55  ;;  %3643 = vst [vmem:[%s6905_s7 + $0x1d8] sm:$0xff] %v3579_v41 }
 0x436   :  { %v3428_v40 = vmul.f32 %v4353_v28, %v7006_v34  ;;  %v3429_v63 = vmul.f32 %v4353_v28, %v7007_v24  ;;  %v4355_v57 = vpop.eup %4354 }
 0x437   :  { %v3430_v62 = vmul.f32 %v4355_v57, %v7008_v4  ;;  %v3431_v17 = vmul.f32 %v4355_v57, %v7009_v0 }
 0x438   :  { %v3504_v5 = vmul.f32 %v6503_v43, %v3428_v40  ;;  %v3505_v27 = vmul.f32 %v6506_v39, %v3429_v63 }
 0x439   :  { %v3506_v29 = vmul.f32 %v6503_v43, %v3430_v62  ;;  %v3507_v45 = vmul.f32 %v6506_v39, %v3431_v17 }
 0x43a   :  { %v3580_v58 = vadd.f32 %v6509_v32, %v3504_v5  ;;  %v3581_v26 = vadd.f32 %v6512_v49, %v3505_v27 }
 0x43b   :  { %v3582_v10 = vadd.f32 %v6509_v32, %v3506_v29  ;;  %v3583_v12 = vadd.f32 %v6512_v49, %v3507_v45 }
 0x43c   :  { %3644 = vst [vmem:[%s6905_s7 + $0x1e0] sm:$0xff] %v3580_v58  ;;  %3645 = vst [vmem:[%s6905_s7 + $0x1e8] sm:$0xff] %v3581_v26 }
 0x43d   :  { %3646 = vst [vmem:[%s6905_s7 + $0x1f0] sm:$0xff] %v3582_v10  ;;  %3647 = vst [vmem:[%s6905_s7 + $0x1f8] sm:$0xff] %v3583_v12 }

</bundles_post_ra>
